<compile_context>
chip_gen: v6e
topology: v6e:2x2x1
jax: 0.10.0
libtpu: 0.0.40
codegen_flags: <defaults>
</compile_context>

<pallas_src>
import functools

import jax
import jax.numpy as jnp
from jax.experimental import pallas as pl
from jax.experimental.pallas import tpu as pltpu

EPS = 1e-5  # nn.LayerNorm default eps
HI = jax.lax.Precision.HIGHEST  # reference only (never used inside the kernel)


def attention_kernel(x_ref, bias_ref, ln_g_ref, ln_b_ref,
                     wq_ref, wk_ref, wv_ref, wo_ref, out_ref,
                     *, block_b, seq_len, heads, dim_head):
    N = seq_len
    dh = dim_head

    # ---- LayerNorm over the merged (block_b * N, dim) rows, in f32 ----
    x = x_ref[...]
    mu = jnp.mean(x, axis=-1, keepdims=True)
    var = jnp.mean((x - mu) ** 2, axis=-1, keepdims=True)
    xn = (x - mu) * jax.lax.rsqrt(var + EPS) * ln_g_ref[...] + ln_b_ref[...]
    xn_b = xn.astype(jnp.bfloat16)

    # ---- q / k / v projections: wide bf16 matmuls, f32 accumulation ----
    # (1/sqrt(dim_head) is pre-folded into wq on the host.)
    q = jnp.dot(xn_b, wq_ref[...], preferred_element_type=jnp.float32)
    k = jnp.dot(xn_b, wk_ref[...], preferred_element_type=jnp.float32)
    v = jnp.dot(xn_b, wv_ref[...], preferred_element_type=jnp.float32)

    # ---- per-(image, head) softmax attention ----
    out_rows = []
    for b in range(block_b):
        r0 = b * N
        # absolute image index for the additive key-padding bias (kept
        # untiled in VMEM; tiny).
        img = pl.program_id(0) * block_b + b
        bias_b = bias_ref[pl.ds(img, 1), :]                       # (1, N)
        head_outs = []
        for h in range(heads):
            c0 = h * dh
            qh = q[r0:r0 + N, c0:c0 + dh].astype(jnp.bfloat16)
            kh = k[r0:r0 + N, c0:c0 + dh].astype(jnp.bfloat16)
            vh = v[r0:r0 + N, c0:c0 + dh].astype(jnp.bfloat16)
            dots = jax.lax.dot_general(
                qh, kh, (((1,), (1,)), ((), ())),
                preferred_element_type=jnp.float32)               # (N, N) f32
            dots = dots + bias_b
            dots = dots - jnp.max(dots, axis=-1, keepdims=True)
            e = jnp.exp(dots)
            inv = pl.reciprocal(jnp.sum(e, axis=-1, keepdims=True), approx=True)
            attn = (e * inv).astype(jnp.bfloat16)
            head_outs.append(
                jnp.dot(attn, vh, preferred_element_type=jnp.float32))
        out_rows.append(jnp.concatenate(head_outs, axis=-1))      # (N, inner)

    o = jnp.concatenate(out_rows, axis=0).astype(jnp.bfloat16)    # (rows, inner)

    # ---- single merged output projection ----
    out_ref[...] = jnp.dot(o, wo_ref[...], preferred_element_type=jnp.float32)


def attention_forward(x, params, *, heads, dim_head,
                      key_padding_mask=None, block_b=None):
    B, N, dim = x.shape
    inner = heads * dim_head
    scale = dim_head ** -0.5

    # Choose how many sequences share a grid step (fill ~256 MXU rows) while
    # keeping the row-block a multiple of 8 (or the full array).
    if block_b is None:
        block_b = B
        for cand in range(min(B, max(1, 256 // N)), 0, -1):
            if B % cand == 0 and (cand * N) % 8 == 0:
                block_b = cand
                break
    grid_b = B // block_b
    rows = block_b * N

    # Host-side glue: split / scale / cast weights (bf16 MXU operands).
    w_qkv = params["w_qkv"]                                   # (dim, 3*inner)
    wq = (w_qkv[:, :inner] * scale).astype(jnp.bfloat16)
    wk = w_qkv[:, inner:2 * inner].astype(jnp.bfloat16)
    wv = w_qkv[:, 2 * inner:].astype(jnp.bfloat16)
    wo = params["w_out"].astype(jnp.bfloat16)                 # (inner, dim)
    ln_g = params["ln_g"].reshape(1, dim).astype(jnp.float32)
    ln_b = params["ln_b"].reshape(1, dim).astype(jnp.float32)

    if key_padding_mask is None:
        bias = jnp.zeros((B, N), jnp.float32)
    else:
        bias = jnp.where(key_padding_mask, -1e30, 0.0).astype(jnp.float32)

    x2 = x.reshape(B * N, dim).astype(jnp.float32)

    kernel = functools.partial(attention_kernel, block_b=block_b, seq_len=N,
                               heads=heads, dim_head=dim_head)

    flops = (2 * B * N * dim * 3 * inner              # q, k, v projections
             + 4 * B * heads * N * N * dim_head       # qk^T and attn @ v
             + 2 * B * N * inner * dim)               # output projection
    transcendentals = B * heads * N * (N + 1) + 2 * B * N
    bytes_accessed = int(2 * B * N * dim * 4                       # x + out
                         + (wq.size + wk.size + wv.size + wo.size) * 2
                         + (ln_g.size + ln_b.size + bias.size) * 4)

    def rep(arr):
        nd = arr.ndim
        return pl.BlockSpec(arr.shape, lambda i, _nd=nd: (0,) * _nd)

    out = pl.pallas_call(
        kernel,
        out_shape=jax.ShapeDtypeStruct((B * N, dim), jnp.float32),
        grid=(grid_b,),
        in_specs=[
            pl.BlockSpec((rows, dim), lambda i: (i, 0)),   # x rows per block
            rep(bias),                                     # untiled, tiny
            rep(ln_g), rep(ln_b),
            rep(wq), rep(wk), rep(wv), rep(wo),
        ],
        out_specs=pl.BlockSpec((rows, dim), lambda i: (i, 0)),
        compiler_params=pltpu.CompilerParams(
            dimension_semantics=("parallel",),
            vmem_limit_bytes=64 * 1024 * 1024),
        cost_estimate=pl.CostEstimate(flops=flops,
                                      transcendentals=transcendentals,
                                      bytes_accessed=bytes_accessed),
    )(x2, bias, ln_g, ln_b, wq, wk, wv, wo)
    return out.reshape(B, N, dim)


def make_params(key, *, dim, heads, dim_head):
    inner = heads * dim_head
    k1, k2 = jax.random.split(key)
    return dict(
        ln_g=jnp.ones((dim,), jnp.float32),
        ln_b=jnp.zeros((dim,), jnp.float32),
        w_qkv=(0.02 * jax.random.normal(k1, (dim, 3 * inner))).astype(jnp.float32),
        w_out=(0.02 * jax.random.normal(k2, (inner, dim))).astype(jnp.float32),
    )


def ref_forward(x, params, *, heads, dim_head, key_padding_mask=None):
    """Pure-JAX f32 (HIGHEST precision) reference mirroring the PyTorch module."""
    B, N, dim = x.shape
    inner = heads * dim_head
    scale = dim_head ** -0.5

    mu = x.mean(-1, keepdims=True)
    var = ((x - mu) ** 2).mean(-1, keepdims=True)
    xn = (x - mu) * jax.lax.rsqrt(var + EPS) * params["ln_g"] + params["ln_b"]

    qkv = jnp.matmul(xn, params["w_qkv"], precision=HI)
    q, k, v = jnp.split(qkv, 3, axis=-1)

    def split_heads(t):
        return t.reshape(B, N, heads, dim_head).transpose(0, 2, 1, 3)

    q, k, v = map(split_heads, (q, k, v))
    dots = jnp.einsum("bhnd,bhmd->bhnm", q, k, precision=HI) * scale
    if key_padding_mask is not None:
        dots = jnp.where(key_padding_mask[:, None, None, :], -1e30, dots)
    attn = jax.nn.softmax(dots, axis=-1)
    o = jnp.einsum("bhnm,bhmd->bhnd", attn, v, precision=HI)
    o = o.transpose(0, 2, 1, 3).reshape(B, N, inner)
    return jnp.matmul(o, params["w_out"], precision=HI)


if __name__ == "__main__":
    # Attention defaults: heads=8, dim_head=64; pick dim=128, seq=64, batch=2.
    B, N, dim = 2, 64, 128
    heads, dim_head = 8, 64

    key = jax.random.PRNGKey(0)
    kx, kp = jax.random.split(key)
    x = jax.random.normal(kx, (B, N, dim), jnp.float32)
    params = make_params(kp, dim=dim, heads=heads, dim_head=dim_head)

    # --- unmasked path (key_padding_mask=None) ---
    out = attention_forward(x, params, heads=heads, dim_head=dim_head)
    out = jax.block_until_ready(out)
    ref = ref_forward(x, params, heads=heads, dim_head=dim_head)
    assert out.shape == (B, N, dim), out.shape
    assert jnp.allclose(out, ref, rtol=2e-2, atol=2e-3), \
        float(jnp.max(jnp.abs(out - ref)))

    # --- masked path: mask out the last 16 keys of the second sequence ---
    mask = jnp.zeros((B, N), bool).at[1, N - 16:].set(True)
    out_m = jax.block_until_ready(
        attention_forward(x, params, heads=heads, dim_head=dim_head,
                          key_padding_mask=mask))
    ref_m = ref_forward(x, params, heads=heads, dim_head=dim_head,
                        key_padding_mask=mask)
    assert jnp.allclose(out_m, ref_m, rtol=2e-2, atol=2e-3), \
        float(jnp.max(jnp.abs(out_m - ref_m)))

    print("KERNEL_OK")
</pallas_src>

<mosaic_0001>
module attributes {stable_mosaic.version = 11 : i64} {
  func.func @attention_kernel(%arg0: i32, %arg1: memref<128x128xf32, #tpu.memory_space<vmem>>, %arg2: memref<2x64xf32, #tpu.memory_space<vmem>>, %arg3: memref<1x128xf32, #tpu.memory_space<vmem>>, %arg4: memref<1x128xf32, #tpu.memory_space<vmem>>, %arg5: memref<128x512xbf16, #tpu.memory_space<vmem>>, %arg6: memref<128x512xbf16, #tpu.memory_space<vmem>>, %arg7: memref<128x512xbf16, #tpu.memory_space<vmem>>, %arg8: memref<512x128xbf16, #tpu.memory_space<vmem>>, %arg9: memref<128x128xf32, #tpu.memory_space<vmem>>) attributes {dimension_semantics = [#tpu.dimension_semantics<parallel>], iteration_bounds = array<i64: 1>, scalar_prefetch = 0 : i64, scratch_operands = 0 : i64, tpu.core_type = #tpu.core_type<tc>, window_params = [{transform_indices = @transform_0, window_bounds = array<i64: 128, 128>}, {pipeline_mode = #tpu.pipeline_mode<synchronous>, transform_indices = @transform_1, window_bounds = array<i64: 2, 64>}, {pipeline_mode = #tpu.pipeline_mode<synchronous>, transform_indices = @transform_2, window_bounds = array<i64: 1, 128>}, {pipeline_mode = #tpu.pipeline_mode<synchronous>, transform_indices = @transform_3, window_bounds = array<i64: 1, 128>}, {pipeline_mode = #tpu.pipeline_mode<synchronous>, transform_indices = @transform_4, window_bounds = array<i64: 128, 512>}, {pipeline_mode = #tpu.pipeline_mode<synchronous>, transform_indices = @transform_5, window_bounds = array<i64: 128, 512>}, {pipeline_mode = #tpu.pipeline_mode<synchronous>, transform_indices = @transform_6, window_bounds = array<i64: 128, 512>}, {pipeline_mode = #tpu.pipeline_mode<synchronous>, transform_indices = @transform_7, window_bounds = array<i64: 512, 128>}, {transform_indices = @transform_8, window_bounds = array<i64: 128, 128>}]} {
    %c0 = arith.constant 0 : index
    %c0_0 = arith.constant 0 : index
    %0 = vector.load %arg1[%c0, %c0_0] : memref<128x128xf32, #tpu.memory_space<vmem>>, vector<128x128xf32>
    %cst = arith.constant dense<0.000000e+00> : vector<128xf32>
    %1 = vector.multi_reduction <add>, %0, %cst [1] : vector<128x128xf32> to vector<128xf32>
    %2 = vector.shape_cast %1 : vector<128xf32> to vector<128x1xf32>
    %cst_1 = arith.constant 1.280000e+02 : f32
    %3 = vector.broadcast %cst_1 : f32 to vector<128x1xf32>
    %4 = arith.divf %2, %3 : vector<128x1xf32>
    %5 = vector.broadcast %4 : vector<128x1xf32> to vector<128x128xf32>
    %6 = arith.subf %0, %5 : vector<128x128xf32>
    %7 = arith.mulf %6, %6 : vector<128x128xf32>
    %cst_2 = arith.constant dense<0.000000e+00> : vector<128xf32>
    %8 = vector.multi_reduction <add>, %7, %cst_2 [1] : vector<128x128xf32> to vector<128xf32>
    %9 = vector.shape_cast %8 : vector<128xf32> to vector<128x1xf32>
    %cst_3 = arith.constant 1.280000e+02 : f32
    %10 = vector.broadcast %cst_3 : f32 to vector<128x1xf32>
    %11 = arith.divf %9, %10 : vector<128x1xf32>
    %12 = vector.broadcast %4 : vector<128x1xf32> to vector<128x128xf32>
    %13 = arith.subf %0, %12 : vector<128x128xf32>
    %cst_4 = arith.constant 9.99999974E-6 : f32
    %14 = vector.broadcast %cst_4 : f32 to vector<128x1xf32>
    %15 = arith.addf %11, %14 : vector<128x1xf32>
    %16 = math.rsqrt %15 : vector<128x1xf32>
    %17 = vector.broadcast %16 : vector<128x1xf32> to vector<128x128xf32>
    %18 = arith.mulf %13, %17 : vector<128x128xf32>
    %c0_5 = arith.constant 0 : index
    %c0_6 = arith.constant 0 : index
    %19 = vector.load %arg3[%c0_5, %c0_6] : memref<1x128xf32, #tpu.memory_space<vmem>>, vector<1x128xf32>
    %20 = vector.broadcast %19 : vector<1x128xf32> to vector<128x128xf32>
    %21 = arith.mulf %18, %20 : vector<128x128xf32>
    %c0_7 = arith.constant 0 : index
    %c0_8 = arith.constant 0 : index
    %22 = vector.load %arg4[%c0_7, %c0_8] : memref<1x128xf32, #tpu.memory_space<vmem>>, vector<1x128xf32>
    %23 = vector.broadcast %22 : vector<1x128xf32> to vector<128x128xf32>
    %24 = arith.addf %21, %23 : vector<128x128xf32>
    %25 = arith.truncf %24 : vector<128x128xf32> to vector<128x128xbf16>
    %c0_9 = arith.constant 0 : index
    %c0_10 = arith.constant 0 : index
    %26 = vector.load %arg5[%c0_9, %c0_10] : memref<128x512xbf16, #tpu.memory_space<vmem>>, vector<128x512xbf16>
    %cst_11 = arith.constant dense<0.000000e+00> : vector<128x512xf32>
    %27 = tpu.matmul %25, %26, %cst_11 {dimension_numbers = #tpu.dot_dimension_numbers<[1], [0], [0], [1], [0, 0, 1, 1], [], []>} : vector<128x128xbf16>, vector<128x512xbf16>, vector<128x512xf32> -> vector<128x512xf32>
    %c0_12 = arith.constant 0 : index
    %c0_13 = arith.constant 0 : index
    %28 = vector.load %arg6[%c0_12, %c0_13] : memref<128x512xbf16, #tpu.memory_space<vmem>>, vector<128x512xbf16>
    %cst_14 = arith.constant dense<0.000000e+00> : vector<128x512xf32>
    %29 = tpu.matmul %25, %28, %cst_14 {dimension_numbers = #tpu.dot_dimension_numbers<[1], [0], [0], [1], [0, 0, 1, 1], [], []>} : vector<128x128xbf16>, vector<128x512xbf16>, vector<128x512xf32> -> vector<128x512xf32>
    %c0_15 = arith.constant 0 : index
    %c0_16 = arith.constant 0 : index
    %30 = vector.load %arg7[%c0_15, %c0_16] : memref<128x512xbf16, #tpu.memory_space<vmem>>, vector<128x512xbf16>
    %cst_17 = arith.constant dense<0.000000e+00> : vector<128x512xf32>
    %31 = tpu.matmul %25, %30, %cst_17 {dimension_numbers = #tpu.dot_dimension_numbers<[1], [0], [0], [1], [0, 0, 1, 1], [], []>} : vector<128x128xbf16>, vector<128x512xbf16>, vector<128x512xf32> -> vector<128x512xf32>
    %c2_i32 = arith.constant 2 : i32
    %32 = arith.muli %arg0, %c2_i32 : i32
    %c0_i32 = arith.constant 0 : i32
    %33 = arith.addi %32, %c0_i32 : i32
    %34 = arith.index_cast %33 : i32 to index
    %c0_18 = arith.constant 0 : index
    %35 = vector.load %arg2[%34, %c0_18] : memref<2x64xf32, #tpu.memory_space<vmem>>, vector<1x64xf32>
    %36 = vector.extract_strided_slice %27 {offsets = [0, 0], sizes = [64, 64], strides = [1, 1]} : vector<128x512xf32> to vector<64x64xf32>
    %37 = arith.truncf %36 : vector<64x64xf32> to vector<64x64xbf16>
    %38 = vector.extract_strided_slice %29 {offsets = [0, 0], sizes = [64, 64], strides = [1, 1]} : vector<128x512xf32> to vector<64x64xf32>
    %39 = arith.truncf %38 : vector<64x64xf32> to vector<64x64xbf16>
    %40 = vector.extract_strided_slice %31 {offsets = [0, 0], sizes = [64, 64], strides = [1, 1]} : vector<128x512xf32> to vector<64x64xf32>
    %41 = arith.truncf %40 : vector<64x64xf32> to vector<64x64xbf16>
    %cst_19 = arith.constant dense<0.000000e+00> : vector<64x64xf32>
    %42 = tpu.matmul %37, %39, %cst_19 {dimension_numbers = #tpu.dot_dimension_numbers<[1], [1], [0], [0], [0, 0, 1, 0], [], []>} : vector<64x64xbf16>, vector<64x64xbf16>, vector<64x64xf32> -> vector<64x64xf32>
    %43 = vector.broadcast %35 : vector<1x64xf32> to vector<64x64xf32>
    %44 = arith.addf %42, %43 : vector<64x64xf32>
    %cst_20 = arith.constant dense<0xFF800000> : vector<64xf32>
    %45 = vector.multi_reduction <maximumf>, %44, %cst_20 [1] : vector<64x64xf32> to vector<64xf32>
    %46 = vector.shape_cast %45 : vector<64xf32> to vector<64x1xf32>
    %47 = vector.broadcast %46 : vector<64x1xf32> to vector<64x64xf32>
    %48 = arith.subf %44, %47 : vector<64x64xf32>
    %49 = math.exp %48 : vector<64x64xf32>
    %cst_21 = arith.constant dense<0.000000e+00> : vector<64xf32>
    %50 = vector.multi_reduction <add>, %49, %cst_21 [1] : vector<64x64xf32> to vector<64xf32>
    %51 = vector.shape_cast %50 : vector<64xf32> to vector<64x1xf32>
    %52 = tpu.reciprocal %51 {approx = true} : vector<64x1xf32> -> vector<64x1xf32>
    %53 = vector.broadcast %52 : vector<64x1xf32> to vector<64x64xf32>
    %54 = arith.mulf %49, %53 : vector<64x64xf32>
    %55 = arith.truncf %54 : vector<64x64xf32> to vector<64x64xbf16>
    %cst_22 = arith.constant dense<0.000000e+00> : vector<64x64xf32>
    %56 = tpu.matmul %55, %41, %cst_22 {dimension_numbers = #tpu.dot_dimension_numbers<[1], [0], [0], [1], [0, 0, 1, 1], [], []>} : vector<64x64xbf16>, vector<64x64xbf16>, vector<64x64xf32> -> vector<64x64xf32>
    %57 = vector.extract_strided_slice %27 {offsets = [0, 64], sizes = [64, 64], strides = [1, 1]} : vector<128x512xf32> to vector<64x64xf32>
    %58 = arith.truncf %57 : vector<64x64xf32> to vector<64x64xbf16>
    %59 = vector.extract_strided_slice %29 {offsets = [0, 64], sizes = [64, 64], strides = [1, 1]} : vector<128x512xf32> to vector<64x64xf32>
    %60 = arith.truncf %59 : vector<64x64xf32> to vector<64x64xbf16>
    %61 = vector.extract_strided_slice %31 {offsets = [0, 64], sizes = [64, 64], strides = [1, 1]} : vector<128x512xf32> to vector<64x64xf32>
    %62 = arith.truncf %61 : vector<64x64xf32> to vector<64x64xbf16>
    %cst_23 = arith.constant dense<0.000000e+00> : vector<64x64xf32>
    %63 = tpu.matmul %58, %60, %cst_23 {dimension_numbers = #tpu.dot_dimension_numbers<[1], [1], [0], [0], [0, 0, 1, 0], [], []>} : vector<64x64xbf16>, vector<64x64xbf16>, vector<64x64xf32> -> vector<64x64xf32>
    %64 = vector.broadcast %35 : vector<1x64xf32> to vector<64x64xf32>
    %65 = arith.addf %63, %64 : vector<64x64xf32>
    %cst_24 = arith.constant dense<0xFF800000> : vector<64xf32>
    %66 = vector.multi_reduction <maximumf>, %65, %cst_24 [1] : vector<64x64xf32> to vector<64xf32>
    %67 = vector.shape_cast %66 : vector<64xf32> to vector<64x1xf32>
    %68 = vector.broadcast %67 : vector<64x1xf32> to vector<64x64xf32>
    %69 = arith.subf %65, %68 : vector<64x64xf32>
    %70 = math.exp %69 : vector<64x64xf32>
    %cst_25 = arith.constant dense<0.000000e+00> : vector<64xf32>
    %71 = vector.multi_reduction <add>, %70, %cst_25 [1] : vector<64x64xf32> to vector<64xf32>
    %72 = vector.shape_cast %71 : vector<64xf32> to vector<64x1xf32>
    %73 = tpu.reciprocal %72 {approx = true} : vector<64x1xf32> -> vector<64x1xf32>
    %74 = vector.broadcast %73 : vector<64x1xf32> to vector<64x64xf32>
    %75 = arith.mulf %70, %74 : vector<64x64xf32>
    %76 = arith.truncf %75 : vector<64x64xf32> to vector<64x64xbf16>
    %cst_26 = arith.constant dense<0.000000e+00> : vector<64x64xf32>
    %77 = tpu.matmul %76, %62, %cst_26 {dimension_numbers = #tpu.dot_dimension_numbers<[1], [0], [0], [1], [0, 0, 1, 1], [], []>} : vector<64x64xbf16>, vector<64x64xbf16>, vector<64x64xf32> -> vector<64x64xf32>
    %78 = vector.extract_strided_slice %27 {offsets = [0, 128], sizes = [64, 64], strides = [1, 1]} : vector<128x512xf32> to vector<64x64xf32>
    %79 = arith.truncf %78 : vector<64x64xf32> to vector<64x64xbf16>
    %80 = vector.extract_strided_slice %29 {offsets = [0, 128], sizes = [64, 64], strides = [1, 1]} : vector<128x512xf32> to vector<64x64xf32>
    %81 = arith.truncf %80 : vector<64x64xf32> to vector<64x64xbf16>
    %82 = vector.extract_strided_slice %31 {offsets = [0, 128], sizes = [64, 64], strides = [1, 1]} : vector<128x512xf32> to vector<64x64xf32>
    %83 = arith.truncf %82 : vector<64x64xf32> to vector<64x64xbf16>
    %cst_27 = arith.constant dense<0.000000e+00> : vector<64x64xf32>
    %84 = tpu.matmul %79, %81, %cst_27 {dimension_numbers = #tpu.dot_dimension_numbers<[1], [1], [0], [0], [0, 0, 1, 0], [], []>} : vector<64x64xbf16>, vector<64x64xbf16>, vector<64x64xf32> -> vector<64x64xf32>
    %85 = vector.broadcast %35 : vector<1x64xf32> to vector<64x64xf32>
    %86 = arith.addf %84, %85 : vector<64x64xf32>
    %cst_28 = arith.constant dense<0xFF800000> : vector<64xf32>
    %87 = vector.multi_reduction <maximumf>, %86, %cst_28 [1] : vector<64x64xf32> to vector<64xf32>
    %88 = vector.shape_cast %87 : vector<64xf32> to vector<64x1xf32>
    %89 = vector.broadcast %88 : vector<64x1xf32> to vector<64x64xf32>
    %90 = arith.subf %86, %89 : vector<64x64xf32>
    %91 = math.exp %90 : vector<64x64xf32>
    %cst_29 = arith.constant dense<0.000000e+00> : vector<64xf32>
    %92 = vector.multi_reduction <add>, %91, %cst_29 [1] : vector<64x64xf32> to vector<64xf32>
    %93 = vector.shape_cast %92 : vector<64xf32> to vector<64x1xf32>
    %94 = tpu.reciprocal %93 {approx = true} : vector<64x1xf32> -> vector<64x1xf32>
    %95 = vector.broadcast %94 : vector<64x1xf32> to vector<64x64xf32>
    %96 = arith.mulf %91, %95 : vector<64x64xf32>
    %97 = arith.truncf %96 : vector<64x64xf32> to vector<64x64xbf16>
    %cst_30 = arith.constant dense<0.000000e+00> : vector<64x64xf32>
    %98 = tpu.matmul %97, %83, %cst_30 {dimension_numbers = #tpu.dot_dimension_numbers<[1], [0], [0], [1], [0, 0, 1, 1], [], []>} : vector<64x64xbf16>, vector<64x64xbf16>, vector<64x64xf32> -> vector<64x64xf32>
    %99 = vector.extract_strided_slice %27 {offsets = [0, 192], sizes = [64, 64], strides = [1, 1]} : vector<128x512xf32> to vector<64x64xf32>
    %100 = arith.truncf %99 : vector<64x64xf32> to vector<64x64xbf16>
    %101 = vector.extract_strided_slice %29 {offsets = [0, 192], sizes = [64, 64], strides = [1, 1]} : vector<128x512xf32> to vector<64x64xf32>
    %102 = arith.truncf %101 : vector<64x64xf32> to vector<64x64xbf16>
    %103 = vector.extract_strided_slice %31 {offsets = [0, 192], sizes = [64, 64], strides = [1, 1]} : vector<128x512xf32> to vector<64x64xf32>
    %104 = arith.truncf %103 : vector<64x64xf32> to vector<64x64xbf16>
    %cst_31 = arith.constant dense<0.000000e+00> : vector<64x64xf32>
    %105 = tpu.matmul %100, %102, %cst_31 {dimension_numbers = #tpu.dot_dimension_numbers<[1], [1], [0], [0], [0, 0, 1, 0], [], []>} : vector<64x64xbf16>, vector<64x64xbf16>, vector<64x64xf32> -> vector<64x64xf32>
    %106 = vector.broadcast %35 : vector<1x64xf32> to vector<64x64xf32>
    %107 = arith.addf %105, %106 : vector<64x64xf32>
    %cst_32 = arith.constant dense<0xFF800000> : vector<64xf32>
    %108 = vector.multi_reduction <maximumf>, %107, %cst_32 [1] : vector<64x64xf32> to vector<64xf32>
    %109 = vector.shape_cast %108 : vector<64xf32> to vector<64x1xf32>
    %110 = vector.broadcast %109 : vector<64x1xf32> to vector<64x64xf32>
    %111 = arith.subf %107, %110 : vector<64x64xf32>
    %112 = math.exp %111 : vector<64x64xf32>
    %cst_33 = arith.constant dense<0.000000e+00> : vector<64xf32>
    %113 = vector.multi_reduction <add>, %112, %cst_33 [1] : vector<64x64xf32> to vector<64xf32>
    %114 = vector.shape_cast %113 : vector<64xf32> to vector<64x1xf32>
    %115 = tpu.reciprocal %114 {approx = true} : vector<64x1xf32> -> vector<64x1xf32>
    %116 = vector.broadcast %115 : vector<64x1xf32> to vector<64x64xf32>
    %117 = arith.mulf %112, %116 : vector<64x64xf32>
    %118 = arith.truncf %117 : vector<64x64xf32> to vector<64x64xbf16>
    %cst_34 = arith.constant dense<0.000000e+00> : vector<64x64xf32>
    %119 = tpu.matmul %118, %104, %cst_34 {dimension_numbers = #tpu.dot_dimension_numbers<[1], [0], [0], [1], [0, 0, 1, 1], [], []>} : vector<64x64xbf16>, vector<64x64xbf16>, vector<64x64xf32> -> vector<64x64xf32>
    %120 = vector.extract_strided_slice %27 {offsets = [0, 256], sizes = [64, 64], strides = [1, 1]} : vector<128x512xf32> to vector<64x64xf32>
    %121 = arith.truncf %120 : vector<64x64xf32> to vector<64x64xbf16>
    %122 = vector.extract_strided_slice %29 {offsets = [0, 256], sizes = [64, 64], strides = [1, 1]} : vector<128x512xf32> to vector<64x64xf32>
    %123 = arith.truncf %122 : vector<64x64xf32> to vector<64x64xbf16>
    %124 = vector.extract_strided_slice %31 {offsets = [0, 256], sizes = [64, 64], strides = [1, 1]} : vector<128x512xf32> to vector<64x64xf32>
    %125 = arith.truncf %124 : vector<64x64xf32> to vector<64x64xbf16>
    %cst_35 = arith.constant dense<0.000000e+00> : vector<64x64xf32>
    %126 = tpu.matmul %121, %123, %cst_35 {dimension_numbers = #tpu.dot_dimension_numbers<[1], [1], [0], [0], [0, 0, 1, 0], [], []>} : vector<64x64xbf16>, vector<64x64xbf16>, vector<64x64xf32> -> vector<64x64xf32>
    %127 = vector.broadcast %35 : vector<1x64xf32> to vector<64x64xf32>
    %128 = arith.addf %126, %127 : vector<64x64xf32>
    %cst_36 = arith.constant dense<0xFF800000> : vector<64xf32>
    %129 = vector.multi_reduction <maximumf>, %128, %cst_36 [1] : vector<64x64xf32> to vector<64xf32>
    %130 = vector.shape_cast %129 : vector<64xf32> to vector<64x1xf32>
    %131 = vector.broadcast %130 : vector<64x1xf32> to vector<64x64xf32>
    %132 = arith.subf %128, %131 : vector<64x64xf32>
    %133 = math.exp %132 : vector<64x64xf32>
    %cst_37 = arith.constant dense<0.000000e+00> : vector<64xf32>
    %134 = vector.multi_reduction <add>, %133, %cst_37 [1] : vector<64x64xf32> to vector<64xf32>
    %135 = vector.shape_cast %134 : vector<64xf32> to vector<64x1xf32>
    %136 = tpu.reciprocal %135 {approx = true} : vector<64x1xf32> -> vector<64x1xf32>
    %137 = vector.broadcast %136 : vector<64x1xf32> to vector<64x64xf32>
    %138 = arith.mulf %133, %137 : vector<64x64xf32>
    %139 = arith.truncf %138 : vector<64x64xf32> to vector<64x64xbf16>
    %cst_38 = arith.constant dense<0.000000e+00> : vector<64x64xf32>
    %140 = tpu.matmul %139, %125, %cst_38 {dimension_numbers = #tpu.dot_dimension_numbers<[1], [0], [0], [1], [0, 0, 1, 1], [], []>} : vector<64x64xbf16>, vector<64x64xbf16>, vector<64x64xf32> -> vector<64x64xf32>
    %141 = vector.extract_strided_slice %27 {offsets = [0, 320], sizes = [64, 64], strides = [1, 1]} : vector<128x512xf32> to vector<64x64xf32>
    %142 = arith.truncf %141 : vector<64x64xf32> to vector<64x64xbf16>
    %143 = vector.extract_strided_slice %29 {offsets = [0, 320], sizes = [64, 64], strides = [1, 1]} : vector<128x512xf32> to vector<64x64xf32>
    %144 = arith.truncf %143 : vector<64x64xf32> to vector<64x64xbf16>
    %145 = vector.extract_strided_slice %31 {offsets = [0, 320], sizes = [64, 64], strides = [1, 1]} : vector<128x512xf32> to vector<64x64xf32>
    %146 = arith.truncf %145 : vector<64x64xf32> to vector<64x64xbf16>
    %cst_39 = arith.constant dense<0.000000e+00> : vector<64x64xf32>
    %147 = tpu.matmul %142, %144, %cst_39 {dimension_numbers = #tpu.dot_dimension_numbers<[1], [1], [0], [0], [0, 0, 1, 0], [], []>} : vector<64x64xbf16>, vector<64x64xbf16>, vector<64x64xf32> -> vector<64x64xf32>
    %148 = vector.broadcast %35 : vector<1x64xf32> to vector<64x64xf32>
    %149 = arith.addf %147, %148 : vector<64x64xf32>
    %cst_40 = arith.constant dense<0xFF800000> : vector<64xf32>
    %150 = vector.multi_reduction <maximumf>, %149, %cst_40 [1] : vector<64x64xf32> to vector<64xf32>
    %151 = vector.shape_cast %150 : vector<64xf32> to vector<64x1xf32>
    %152 = vector.broadcast %151 : vector<64x1xf32> to vector<64x64xf32>
    %153 = arith.subf %149, %152 : vector<64x64xf32>
    %154 = math.exp %153 : vector<64x64xf32>
    %cst_41 = arith.constant dense<0.000000e+00> : vector<64xf32>
    %155 = vector.multi_reduction <add>, %154, %cst_41 [1] : vector<64x64xf32> to vector<64xf32>
    %156 = vector.shape_cast %155 : vector<64xf32> to vector<64x1xf32>
    %157 = tpu.reciprocal %156 {approx = true} : vector<64x1xf32> -> vector<64x1xf32>
    %158 = vector.broadcast %157 : vector<64x1xf32> to vector<64x64xf32>
    %159 = arith.mulf %154, %158 : vector<64x64xf32>
    %160 = arith.truncf %159 : vector<64x64xf32> to vector<64x64xbf16>
    %cst_42 = arith.constant dense<0.000000e+00> : vector<64x64xf32>
    %161 = tpu.matmul %160, %146, %cst_42 {dimension_numbers = #tpu.dot_dimension_numbers<[1], [0], [0], [1], [0, 0, 1, 1], [], []>} : vector<64x64xbf16>, vector<64x64xbf16>, vector<64x64xf32> -> vector<64x64xf32>
    %162 = vector.extract_strided_slice %27 {offsets = [0, 384], sizes = [64, 64], strides = [1, 1]} : vector<128x512xf32> to vector<64x64xf32>
    %163 = arith.truncf %162 : vector<64x64xf32> to vector<64x64xbf16>
    %164 = vector.extract_strided_slice %29 {offsets = [0, 384], sizes = [64, 64], strides = [1, 1]} : vector<128x512xf32> to vector<64x64xf32>
    %165 = arith.truncf %164 : vector<64x64xf32> to vector<64x64xbf16>
    %166 = vector.extract_strided_slice %31 {offsets = [0, 384], sizes = [64, 64], strides = [1, 1]} : vector<128x512xf32> to vector<64x64xf32>
    %167 = arith.truncf %166 : vector<64x64xf32> to vector<64x64xbf16>
    %cst_43 = arith.constant dense<0.000000e+00> : vector<64x64xf32>
    %168 = tpu.matmul %163, %165, %cst_43 {dimension_numbers = #tpu.dot_dimension_numbers<[1], [1], [0], [0], [0, 0, 1, 0], [], []>} : vector<64x64xbf16>, vector<64x64xbf16>, vector<64x64xf32> -> vector<64x64xf32>
    %169 = vector.broadcast %35 : vector<1x64xf32> to vector<64x64xf32>
    %170 = arith.addf %168, %169 : vector<64x64xf32>
    %cst_44 = arith.constant dense<0xFF800000> : vector<64xf32>
    %171 = vector.multi_reduction <maximumf>, %170, %cst_44 [1] : vector<64x64xf32> to vector<64xf32>
    %172 = vector.shape_cast %171 : vector<64xf32> to vector<64x1xf32>
    %173 = vector.broadcast %172 : vector<64x1xf32> to vector<64x64xf32>
    %174 = arith.subf %170, %173 : vector<64x64xf32>
    %175 = math.exp %174 : vector<64x64xf32>
    %cst_45 = arith.constant dense<0.000000e+00> : vector<64xf32>
    %176 = vector.multi_reduction <add>, %175, %cst_45 [1] : vector<64x64xf32> to vector<64xf32>
    %177 = vector.shape_cast %176 : vector<64xf32> to vector<64x1xf32>
    %178 = tpu.reciprocal %177 {approx = true} : vector<64x1xf32> -> vector<64x1xf32>
    %179 = vector.broadcast %178 : vector<64x1xf32> to vector<64x64xf32>
    %180 = arith.mulf %175, %179 : vector<64x64xf32>
    %181 = arith.truncf %180 : vector<64x64xf32> to vector<64x64xbf16>
    %cst_46 = arith.constant dense<0.000000e+00> : vector<64x64xf32>
    %182 = tpu.matmul %181, %167, %cst_46 {dimension_numbers = #tpu.dot_dimension_numbers<[1], [0], [0], [1], [0, 0, 1, 1], [], []>} : vector<64x64xbf16>, vector<64x64xbf16>, vector<64x64xf32> -> vector<64x64xf32>
    %183 = vector.extract_strided_slice %27 {offsets = [0, 448], sizes = [64, 64], strides = [1, 1]} : vector<128x512xf32> to vector<64x64xf32>
    %184 = arith.truncf %183 : vector<64x64xf32> to vector<64x64xbf16>
    %185 = vector.extract_strided_slice %29 {offsets = [0, 448], sizes = [64, 64], strides = [1, 1]} : vector<128x512xf32> to vector<64x64xf32>
    %186 = arith.truncf %185 : vector<64x64xf32> to vector<64x64xbf16>
    %187 = vector.extract_strided_slice %31 {offsets = [0, 448], sizes = [64, 64], strides = [1, 1]} : vector<128x512xf32> to vector<64x64xf32>
    %188 = arith.truncf %187 : vector<64x64xf32> to vector<64x64xbf16>
    %cst_47 = arith.constant dense<0.000000e+00> : vector<64x64xf32>
    %189 = tpu.matmul %184, %186, %cst_47 {dimension_numbers = #tpu.dot_dimension_numbers<[1], [1], [0], [0], [0, 0, 1, 0], [], []>} : vector<64x64xbf16>, vector<64x64xbf16>, vector<64x64xf32> -> vector<64x64xf32>
    %190 = vector.broadcast %35 : vector<1x64xf32> to vector<64x64xf32>
    %191 = arith.addf %189, %190 : vector<64x64xf32>
    %cst_48 = arith.constant dense<0xFF800000> : vector<64xf32>
    %192 = vector.multi_reduction <maximumf>, %191, %cst_48 [1] : vector<64x64xf32> to vector<64xf32>
    %193 = vector.shape_cast %192 : vector<64xf32> to vector<64x1xf32>
    %194 = vector.broadcast %193 : vector<64x1xf32> to vector<64x64xf32>
    %195 = arith.subf %191, %194 : vector<64x64xf32>
    %196 = math.exp %195 : vector<64x64xf32>
    %cst_49 = arith.constant dense<0.000000e+00> : vector<64xf32>
    %197 = vector.multi_reduction <add>, %196, %cst_49 [1] : vector<64x64xf32> to vector<64xf32>
    %198 = vector.shape_cast %197 : vector<64xf32> to vector<64x1xf32>
    %199 = tpu.reciprocal %198 {approx = true} : vector<64x1xf32> -> vector<64x1xf32>
    %200 = vector.broadcast %199 : vector<64x1xf32> to vector<64x64xf32>
    %201 = arith.mulf %196, %200 : vector<64x64xf32>
    %202 = arith.truncf %201 : vector<64x64xf32> to vector<64x64xbf16>
    %cst_50 = arith.constant dense<0.000000e+00> : vector<64x64xf32>
    %203 = tpu.matmul %202, %188, %cst_50 {dimension_numbers = #tpu.dot_dimension_numbers<[1], [0], [0], [1], [0, 0, 1, 1], [], []>} : vector<64x64xbf16>, vector<64x64xbf16>, vector<64x64xf32> -> vector<64x64xf32>
    %204 = tpu.concatenate %56, %77, %98, %119, %140, %161, %182, %203 in 1 : vector<64x64xf32>, vector<64x64xf32>, vector<64x64xf32>, vector<64x64xf32>, vector<64x64xf32>, vector<64x64xf32>, vector<64x64xf32>, vector<64x64xf32> -> vector<64x512xf32>
    %c2_i32_51 = arith.constant 2 : i32
    %205 = arith.muli %arg0, %c2_i32_51 : i32
    %c1_i32 = arith.constant 1 : i32
    %206 = arith.addi %205, %c1_i32 : i32
    %207 = arith.index_cast %206 : i32 to index
    %c0_52 = arith.constant 0 : index
    %208 = vector.load %arg2[%207, %c0_52] : memref<2x64xf32, #tpu.memory_space<vmem>>, vector<1x64xf32>
    %209 = vector.extract_strided_slice %27 {offsets = [64, 0], sizes = [64, 64], strides = [1, 1]} : vector<128x512xf32> to vector<64x64xf32>
    %210 = arith.truncf %209 : vector<64x64xf32> to vector<64x64xbf16>
    %211 = vector.extract_strided_slice %29 {offsets = [64, 0], sizes = [64, 64], strides = [1, 1]} : vector<128x512xf32> to vector<64x64xf32>
    %212 = arith.truncf %211 : vector<64x64xf32> to vector<64x64xbf16>
    %213 = vector.extract_strided_slice %31 {offsets = [64, 0], sizes = [64, 64], strides = [1, 1]} : vector<128x512xf32> to vector<64x64xf32>
    %214 = arith.truncf %213 : vector<64x64xf32> to vector<64x64xbf16>
    %cst_53 = arith.constant dense<0.000000e+00> : vector<64x64xf32>
    %215 = tpu.matmul %210, %212, %cst_53 {dimension_numbers = #tpu.dot_dimension_numbers<[1], [1], [0], [0], [0, 0, 1, 0], [], []>} : vector<64x64xbf16>, vector<64x64xbf16>, vector<64x64xf32> -> vector<64x64xf32>
    %216 = vector.broadcast %208 : vector<1x64xf32> to vector<64x64xf32>
    %217 = arith.addf %215, %216 : vector<64x64xf32>
    %cst_54 = arith.constant dense<0xFF800000> : vector<64xf32>
    %218 = vector.multi_reduction <maximumf>, %217, %cst_54 [1] : vector<64x64xf32> to vector<64xf32>
    %219 = vector.shape_cast %218 : vector<64xf32> to vector<64x1xf32>
    %220 = vector.broadcast %219 : vector<64x1xf32> to vector<64x64xf32>
    %221 = arith.subf %217, %220 : vector<64x64xf32>
    %222 = math.exp %221 : vector<64x64xf32>
    %cst_55 = arith.constant dense<0.000000e+00> : vector<64xf32>
    %223 = vector.multi_reduction <add>, %222, %cst_55 [1] : vector<64x64xf32> to vector<64xf32>
    %224 = vector.shape_cast %223 : vector<64xf32> to vector<64x1xf32>
    %225 = tpu.reciprocal %224 {approx = true} : vector<64x1xf32> -> vector<64x1xf32>
    %226 = vector.broadcast %225 : vector<64x1xf32> to vector<64x64xf32>
    %227 = arith.mulf %222, %226 : vector<64x64xf32>
    %228 = arith.truncf %227 : vector<64x64xf32> to vector<64x64xbf16>
    %cst_56 = arith.constant dense<0.000000e+00> : vector<64x64xf32>
    %229 = tpu.matmul %228, %214, %cst_56 {dimension_numbers = #tpu.dot_dimension_numbers<[1], [0], [0], [1], [0, 0, 1, 1], [], []>} : vector<64x64xbf16>, vector<64x64xbf16>, vector<64x64xf32> -> vector<64x64xf32>
    %230 = vector.extract_strided_slice %27 {offsets = [64, 64], sizes = [64, 64], strides = [1, 1]} : vector<128x512xf32> to vector<64x64xf32>
    %231 = arith.truncf %230 : vector<64x64xf32> to vector<64x64xbf16>
    %232 = vector.extract_strided_slice %29 {offsets = [64, 64], sizes = [64, 64], strides = [1, 1]} : vector<128x512xf32> to vector<64x64xf32>
    %233 = arith.truncf %232 : vector<64x64xf32> to vector<64x64xbf16>
    %234 = vector.extract_strided_slice %31 {offsets = [64, 64], sizes = [64, 64], strides = [1, 1]} : vector<128x512xf32> to vector<64x64xf32>
    %235 = arith.truncf %234 : vector<64x64xf32> to vector<64x64xbf16>
    %cst_57 = arith.constant dense<0.000000e+00> : vector<64x64xf32>
    %236 = tpu.matmul %231, %233, %cst_57 {dimension_numbers = #tpu.dot_dimension_numbers<[1], [1], [0], [0], [0, 0, 1, 0], [], []>} : vector<64x64xbf16>, vector<64x64xbf16>, vector<64x64xf32> -> vector<64x64xf32>
    %237 = vector.broadcast %208 : vector<1x64xf32> to vector<64x64xf32>
    %238 = arith.addf %236, %237 : vector<64x64xf32>
    %cst_58 = arith.constant dense<0xFF800000> : vector<64xf32>
    %239 = vector.multi_reduction <maximumf>, %238, %cst_58 [1] : vector<64x64xf32> to vector<64xf32>
    %240 = vector.shape_cast %239 : vector<64xf32> to vector<64x1xf32>
    %241 = vector.broadcast %240 : vector<64x1xf32> to vector<64x64xf32>
    %242 = arith.subf %238, %241 : vector<64x64xf32>
    %243 = math.exp %242 : vector<64x64xf32>
    %cst_59 = arith.constant dense<0.000000e+00> : vector<64xf32>
    %244 = vector.multi_reduction <add>, %243, %cst_59 [1] : vector<64x64xf32> to vector<64xf32>
    %245 = vector.shape_cast %244 : vector<64xf32> to vector<64x1xf32>
    %246 = tpu.reciprocal %245 {approx = true} : vector<64x1xf32> -> vector<64x1xf32>
    %247 = vector.broadcast %246 : vector<64x1xf32> to vector<64x64xf32>
    %248 = arith.mulf %243, %247 : vector<64x64xf32>
    %249 = arith.truncf %248 : vector<64x64xf32> to vector<64x64xbf16>
    %cst_60 = arith.constant dense<0.000000e+00> : vector<64x64xf32>
    %250 = tpu.matmul %249, %235, %cst_60 {dimension_numbers = #tpu.dot_dimension_numbers<[1], [0], [0], [1], [0, 0, 1, 1], [], []>} : vector<64x64xbf16>, vector<64x64xbf16>, vector<64x64xf32> -> vector<64x64xf32>
    %251 = vector.extract_strided_slice %27 {offsets = [64, 128], sizes = [64, 64], strides = [1, 1]} : vector<128x512xf32> to vector<64x64xf32>
    %252 = arith.truncf %251 : vector<64x64xf32> to vector<64x64xbf16>
    %253 = vector.extract_strided_slice %29 {offsets = [64, 128], sizes = [64, 64], strides = [1, 1]} : vector<128x512xf32> to vector<64x64xf32>
    %254 = arith.truncf %253 : vector<64x64xf32> to vector<64x64xbf16>
    %255 = vector.extract_strided_slice %31 {offsets = [64, 128], sizes = [64, 64], strides = [1, 1]} : vector<128x512xf32> to vector<64x64xf32>
    %256 = arith.truncf %255 : vector<64x64xf32> to vector<64x64xbf16>
    %cst_61 = arith.constant dense<0.000000e+00> : vector<64x64xf32>
    %257 = tpu.matmul %252, %254, %cst_61 {dimension_numbers = #tpu.dot_dimension_numbers<[1], [1], [0], [0], [0, 0, 1, 0], [], []>} : vector<64x64xbf16>, vector<64x64xbf16>, vector<64x64xf32> -> vector<64x64xf32>
    %258 = vector.broadcast %208 : vector<1x64xf32> to vector<64x64xf32>
    %259 = arith.addf %257, %258 : vector<64x64xf32>
    %cst_62 = arith.constant dense<0xFF800000> : vector<64xf32>
    %260 = vector.multi_reduction <maximumf>, %259, %cst_62 [1] : vector<64x64xf32> to vector<64xf32>
    %261 = vector.shape_cast %260 : vector<64xf32> to vector<64x1xf32>
    %262 = vector.broadcast %261 : vector<64x1xf32> to vector<64x64xf32>
    %263 = arith.subf %259, %262 : vector<64x64xf32>
    %264 = math.exp %263 : vector<64x64xf32>
    %cst_63 = arith.constant dense<0.000000e+00> : vector<64xf32>
    %265 = vector.multi_reduction <add>, %264, %cst_63 [1] : vector<64x64xf32> to vector<64xf32>
    %266 = vector.shape_cast %265 : vector<64xf32> to vector<64x1xf32>
    %267 = tpu.reciprocal %266 {approx = true} : vector<64x1xf32> -> vector<64x1xf32>
    %268 = vector.broadcast %267 : vector<64x1xf32> to vector<64x64xf32>
    %269 = arith.mulf %264, %268 : vector<64x64xf32>
    %270 = arith.truncf %269 : vector<64x64xf32> to vector<64x64xbf16>
    %cst_64 = arith.constant dense<0.000000e+00> : vector<64x64xf32>
    %271 = tpu.matmul %270, %256, %cst_64 {dimension_numbers = #tpu.dot_dimension_numbers<[1], [0], [0], [1], [0, 0, 1, 1], [], []>} : vector<64x64xbf16>, vector<64x64xbf16>, vector<64x64xf32> -> vector<64x64xf32>
    %272 = vector.extract_strided_slice %27 {offsets = [64, 192], sizes = [64, 64], strides = [1, 1]} : vector<128x512xf32> to vector<64x64xf32>
    %273 = arith.truncf %272 : vector<64x64xf32> to vector<64x64xbf16>
    %274 = vector.extract_strided_slice %29 {offsets = [64, 192], sizes = [64, 64], strides = [1, 1]} : vector<128x512xf32> to vector<64x64xf32>
    %275 = arith.truncf %274 : vector<64x64xf32> to vector<64x64xbf16>
    %276 = vector.extract_strided_slice %31 {offsets = [64, 192], sizes = [64, 64], strides = [1, 1]} : vector<128x512xf32> to vector<64x64xf32>
    %277 = arith.truncf %276 : vector<64x64xf32> to vector<64x64xbf16>
    %cst_65 = arith.constant dense<0.000000e+00> : vector<64x64xf32>
    %278 = tpu.matmul %273, %275, %cst_65 {dimension_numbers = #tpu.dot_dimension_numbers<[1], [1], [0], [0], [0, 0, 1, 0], [], []>} : vector<64x64xbf16>, vector<64x64xbf16>, vector<64x64xf32> -> vector<64x64xf32>
    %279 = vector.broadcast %208 : vector<1x64xf32> to vector<64x64xf32>
    %280 = arith.addf %278, %279 : vector<64x64xf32>
    %cst_66 = arith.constant dense<0xFF800000> : vector<64xf32>
    %281 = vector.multi_reduction <maximumf>, %280, %cst_66 [1] : vector<64x64xf32> to vector<64xf32>
    %282 = vector.shape_cast %281 : vector<64xf32> to vector<64x1xf32>
    %283 = vector.broadcast %282 : vector<64x1xf32> to vector<64x64xf32>
    %284 = arith.subf %280, %283 : vector<64x64xf32>
    %285 = math.exp %284 : vector<64x64xf32>
    %cst_67 = arith.constant dense<0.000000e+00> : vector<64xf32>
    %286 = vector.multi_reduction <add>, %285, %cst_67 [1] : vector<64x64xf32> to vector<64xf32>
    %287 = vector.shape_cast %286 : vector<64xf32> to vector<64x1xf32>
    %288 = tpu.reciprocal %287 {approx = true} : vector<64x1xf32> -> vector<64x1xf32>
    %289 = vector.broadcast %288 : vector<64x1xf32> to vector<64x64xf32>
    %290 = arith.mulf %285, %289 : vector<64x64xf32>
    %291 = arith.truncf %290 : vector<64x64xf32> to vector<64x64xbf16>
    %cst_68 = arith.constant dense<0.000000e+00> : vector<64x64xf32>
    %292 = tpu.matmul %291, %277, %cst_68 {dimension_numbers = #tpu.dot_dimension_numbers<[1], [0], [0], [1], [0, 0, 1, 1], [], []>} : vector<64x64xbf16>, vector<64x64xbf16>, vector<64x64xf32> -> vector<64x64xf32>
    %293 = vector.extract_strided_slice %27 {offsets = [64, 256], sizes = [64, 64], strides = [1, 1]} : vector<128x512xf32> to vector<64x64xf32>
    %294 = arith.truncf %293 : vector<64x64xf32> to vector<64x64xbf16>
    %295 = vector.extract_strided_slice %29 {offsets = [64, 256], sizes = [64, 64], strides = [1, 1]} : vector<128x512xf32> to vector<64x64xf32>
    %296 = arith.truncf %295 : vector<64x64xf32> to vector<64x64xbf16>
    %297 = vector.extract_strided_slice %31 {offsets = [64, 256], sizes = [64, 64], strides = [1, 1]} : vector<128x512xf32> to vector<64x64xf32>
    %298 = arith.truncf %297 : vector<64x64xf32> to vector<64x64xbf16>
    %cst_69 = arith.constant dense<0.000000e+00> : vector<64x64xf32>
    %299 = tpu.matmul %294, %296, %cst_69 {dimension_numbers = #tpu.dot_dimension_numbers<[1], [1], [0], [0], [0, 0, 1, 0], [], []>} : vector<64x64xbf16>, vector<64x64xbf16>, vector<64x64xf32> -> vector<64x64xf32>
    %300 = vector.broadcast %208 : vector<1x64xf32> to vector<64x64xf32>
    %301 = arith.addf %299, %300 : vector<64x64xf32>
    %cst_70 = arith.constant dense<0xFF800000> : vector<64xf32>
    %302 = vector.multi_reduction <maximumf>, %301, %cst_70 [1] : vector<64x64xf32> to vector<64xf32>
    %303 = vector.shape_cast %302 : vector<64xf32> to vector<64x1xf32>
    %304 = vector.broadcast %303 : vector<64x1xf32> to vector<64x64xf32>
    %305 = arith.subf %301, %304 : vector<64x64xf32>
    %306 = math.exp %305 : vector<64x64xf32>
    %cst_71 = arith.constant dense<0.000000e+00> : vector<64xf32>
    %307 = vector.multi_reduction <add>, %306, %cst_71 [1] : vector<64x64xf32> to vector<64xf32>
    %308 = vector.shape_cast %307 : vector<64xf32> to vector<64x1xf32>
    %309 = tpu.reciprocal %308 {approx = true} : vector<64x1xf32> -> vector<64x1xf32>
    %310 = vector.broadcast %309 : vector<64x1xf32> to vector<64x64xf32>
    %311 = arith.mulf %306, %310 : vector<64x64xf32>
    %312 = arith.truncf %311 : vector<64x64xf32> to vector<64x64xbf16>
    %cst_72 = arith.constant dense<0.000000e+00> : vector<64x64xf32>
    %313 = tpu.matmul %312, %298, %cst_72 {dimension_numbers = #tpu.dot_dimension_numbers<[1], [0], [0], [1], [0, 0, 1, 1], [], []>} : vector<64x64xbf16>, vector<64x64xbf16>, vector<64x64xf32> -> vector<64x64xf32>
    %314 = vector.extract_strided_slice %27 {offsets = [64, 320], sizes = [64, 64], strides = [1, 1]} : vector<128x512xf32> to vector<64x64xf32>
    %315 = arith.truncf %314 : vector<64x64xf32> to vector<64x64xbf16>
    %316 = vector.extract_strided_slice %29 {offsets = [64, 320], sizes = [64, 64], strides = [1, 1]} : vector<128x512xf32> to vector<64x64xf32>
    %317 = arith.truncf %316 : vector<64x64xf32> to vector<64x64xbf16>
    %318 = vector.extract_strided_slice %31 {offsets = [64, 320], sizes = [64, 64], strides = [1, 1]} : vector<128x512xf32> to vector<64x64xf32>
    %319 = arith.truncf %318 : vector<64x64xf32> to vector<64x64xbf16>
    %cst_73 = arith.constant dense<0.000000e+00> : vector<64x64xf32>
    %320 = tpu.matmul %315, %317, %cst_73 {dimension_numbers = #tpu.dot_dimension_numbers<[1], [1], [0], [0], [0, 0, 1, 0], [], []>} : vector<64x64xbf16>, vector<64x64xbf16>, vector<64x64xf32> -> vector<64x64xf32>
    %321 = vector.broadcast %208 : vector<1x64xf32> to vector<64x64xf32>
    %322 = arith.addf %320, %321 : vector<64x64xf32>
    %cst_74 = arith.constant dense<0xFF800000> : vector<64xf32>
    %323 = vector.multi_reduction <maximumf>, %322, %cst_74 [1] : vector<64x64xf32> to vector<64xf32>
    %324 = vector.shape_cast %323 : vector<64xf32> to vector<64x1xf32>
    %325 = vector.broadcast %324 : vector<64x1xf32> to vector<64x64xf32>
    %326 = arith.subf %322, %325 : vector<64x64xf32>
    %327 = math.exp %326 : vector<64x64xf32>
    %cst_75 = arith.constant dense<0.000000e+00> : vector<64xf32>
    %328 = vector.multi_reduction <add>, %327, %cst_75 [1] : vector<64x64xf32> to vector<64xf32>
    %329 = vector.shape_cast %328 : vector<64xf32> to vector<64x1xf32>
    %330 = tpu.reciprocal %329 {approx = true} : vector<64x1xf32> -> vector<64x1xf32>
    %331 = vector.broadcast %330 : vector<64x1xf32> to vector<64x64xf32>
    %332 = arith.mulf %327, %331 : vector<64x64xf32>
    %333 = arith.truncf %332 : vector<64x64xf32> to vector<64x64xbf16>
    %cst_76 = arith.constant dense<0.000000e+00> : vector<64x64xf32>
    %334 = tpu.matmul %333, %319, %cst_76 {dimension_numbers = #tpu.dot_dimension_numbers<[1], [0], [0], [1], [0, 0, 1, 1], [], []>} : vector<64x64xbf16>, vector<64x64xbf16>, vector<64x64xf32> -> vector<64x64xf32>
    %335 = vector.extract_strided_slice %27 {offsets = [64, 384], sizes = [64, 64], strides = [1, 1]} : vector<128x512xf32> to vector<64x64xf32>
    %336 = arith.truncf %335 : vector<64x64xf32> to vector<64x64xbf16>
    %337 = vector.extract_strided_slice %29 {offsets = [64, 384], sizes = [64, 64], strides = [1, 1]} : vector<128x512xf32> to vector<64x64xf32>
    %338 = arith.truncf %337 : vector<64x64xf32> to vector<64x64xbf16>
    %339 = vector.extract_strided_slice %31 {offsets = [64, 384], sizes = [64, 64], strides = [1, 1]} : vector<128x512xf32> to vector<64x64xf32>
    %340 = arith.truncf %339 : vector<64x64xf32> to vector<64x64xbf16>
    %cst_77 = arith.constant dense<0.000000e+00> : vector<64x64xf32>
    %341 = tpu.matmul %336, %338, %cst_77 {dimension_numbers = #tpu.dot_dimension_numbers<[1], [1], [0], [0], [0, 0, 1, 0], [], []>} : vector<64x64xbf16>, vector<64x64xbf16>, vector<64x64xf32> -> vector<64x64xf32>
    %342 = vector.broadcast %208 : vector<1x64xf32> to vector<64x64xf32>
    %343 = arith.addf %341, %342 : vector<64x64xf32>
    %cst_78 = arith.constant dense<0xFF800000> : vector<64xf32>
    %344 = vector.multi_reduction <maximumf>, %343, %cst_78 [1] : vector<64x64xf32> to vector<64xf32>
    %345 = vector.shape_cast %344 : vector<64xf32> to vector<64x1xf32>
    %346 = vector.broadcast %345 : vector<64x1xf32> to vector<64x64xf32>
    %347 = arith.subf %343, %346 : vector<64x64xf32>
    %348 = math.exp %347 : vector<64x64xf32>
    %cst_79 = arith.constant dense<0.000000e+00> : vector<64xf32>
    %349 = vector.multi_reduction <add>, %348, %cst_79 [1] : vector<64x64xf32> to vector<64xf32>
    %350 = vector.shape_cast %349 : vector<64xf32> to vector<64x1xf32>
    %351 = tpu.reciprocal %350 {approx = true} : vector<64x1xf32> -> vector<64x1xf32>
    %352 = vector.broadcast %351 : vector<64x1xf32> to vector<64x64xf32>
    %353 = arith.mulf %348, %352 : vector<64x64xf32>
    %354 = arith.truncf %353 : vector<64x64xf32> to vector<64x64xbf16>
    %cst_80 = arith.constant dense<0.000000e+00> : vector<64x64xf32>
    %355 = tpu.matmul %354, %340, %cst_80 {dimension_numbers = #tpu.dot_dimension_numbers<[1], [0], [0], [1], [0, 0, 1, 1], [], []>} : vector<64x64xbf16>, vector<64x64xbf16>, vector<64x64xf32> -> vector<64x64xf32>
    %356 = vector.extract_strided_slice %27 {offsets = [64, 448], sizes = [64, 64], strides = [1, 1]} : vector<128x512xf32> to vector<64x64xf32>
    %357 = arith.truncf %356 : vector<64x64xf32> to vector<64x64xbf16>
    %358 = vector.extract_strided_slice %29 {offsets = [64, 448], sizes = [64, 64], strides = [1, 1]} : vector<128x512xf32> to vector<64x64xf32>
    %359 = arith.truncf %358 : vector<64x64xf32> to vector<64x64xbf16>
    %360 = vector.extract_strided_slice %31 {offsets = [64, 448], sizes = [64, 64], strides = [1, 1]} : vector<128x512xf32> to vector<64x64xf32>
    %361 = arith.truncf %360 : vector<64x64xf32> to vector<64x64xbf16>
    %cst_81 = arith.constant dense<0.000000e+00> : vector<64x64xf32>
    %362 = tpu.matmul %357, %359, %cst_81 {dimension_numbers = #tpu.dot_dimension_numbers<[1], [1], [0], [0], [0, 0, 1, 0], [], []>} : vector<64x64xbf16>, vector<64x64xbf16>, vector<64x64xf32> -> vector<64x64xf32>
    %363 = vector.broadcast %208 : vector<1x64xf32> to vector<64x64xf32>
    %364 = arith.addf %362, %363 : vector<64x64xf32>
    %cst_82 = arith.constant dense<0xFF800000> : vector<64xf32>
    %365 = vector.multi_reduction <maximumf>, %364, %cst_82 [1] : vector<64x64xf32> to vector<64xf32>
    %366 = vector.shape_cast %365 : vector<64xf32> to vector<64x1xf32>
    %367 = vector.broadcast %366 : vector<64x1xf32> to vector<64x64xf32>
    %368 = arith.subf %364, %367 : vector<64x64xf32>
    %369 = math.exp %368 : vector<64x64xf32>
    %cst_83 = arith.constant dense<0.000000e+00> : vector<64xf32>
    %370 = vector.multi_reduction <add>, %369, %cst_83 [1] : vector<64x64xf32> to vector<64xf32>
    %371 = vector.shape_cast %370 : vector<64xf32> to vector<64x1xf32>
    %372 = tpu.reciprocal %371 {approx = true} : vector<64x1xf32> -> vector<64x1xf32>
    %373 = vector.broadcast %372 : vector<64x1xf32> to vector<64x64xf32>
    %374 = arith.mulf %369, %373 : vector<64x64xf32>
    %375 = arith.truncf %374 : vector<64x64xf32> to vector<64x64xbf16>
    %cst_84 = arith.constant dense<0.000000e+00> : vector<64x64xf32>
    %376 = tpu.matmul %375, %361, %cst_84 {dimension_numbers = #tpu.dot_dimension_numbers<[1], [0], [0], [1], [0, 0, 1, 1], [], []>} : vector<64x64xbf16>, vector<64x64xbf16>, vector<64x64xf32> -> vector<64x64xf32>
    %377 = tpu.concatenate %229, %250, %271, %292, %313, %334, %355, %376 in 1 : vector<64x64xf32>, vector<64x64xf32>, vector<64x64xf32>, vector<64x64xf32>, vector<64x64xf32>, vector<64x64xf32>, vector<64x64xf32>, vector<64x64xf32> -> vector<64x512xf32>
    %378 = tpu.concatenate %204, %377 in 0 : vector<64x512xf32>, vector<64x512xf32> -> vector<128x512xf32>
    %379 = arith.truncf %378 : vector<128x512xf32> to vector<128x512xbf16>
    %c0_85 = arith.constant 0 : index
    %c0_86 = arith.constant 0 : index
    %380 = vector.load %arg8[%c0_85, %c0_86] : memref<512x128xbf16, #tpu.memory_space<vmem>>, vector<512x128xbf16>
    %cst_87 = arith.constant dense<0.000000e+00> : vector<128x128xf32>
    %381 = tpu.matmul %379, %380, %cst_87 {dimension_numbers = #tpu.dot_dimension_numbers<[1], [0], [0], [1], [0, 0, 1, 1], [], []>} : vector<128x512xbf16>, vector<512x128xbf16>, vector<128x128xf32> -> vector<128x128xf32>
    %c0_88 = arith.constant 0 : index
    %c0_89 = arith.constant 0 : index
    %382 = vector.load %arg9[%c0_88, %c0_89] : memref<128x128xf32, #tpu.memory_space<vmem>>, vector<128x128xf32>
    tpu.vector_store %arg9[%c0_88, %c0_89], %381 {strides = array<i32>} : memref<128x128xf32, #tpu.memory_space<vmem>>, vector<128x128xf32>,
    return
  }
  func.func @transform_0(%arg0: i32) -> (i32, i32) {
    %c0_i32 = arith.constant 0 : i32
    %c0_i32_0 = arith.constant 0 : i32
    return %arg0, %c0_i32 : i32, i32
  }
  func.func @transform_1(%arg0: i32) -> (i32, i32) {
    %c0_i32 = arith.constant 0 : i32
    %c0_i32_0 = arith.constant 0 : i32
    %c0_i32_1 = arith.constant 0 : i32
    return %c0_i32, %c0_i32_0 : i32, i32
  }
  func.func @transform_2(%arg0: i32) -> (i32, i32) {
    %c0_i32 = arith.constant 0 : i32
    %c0_i32_0 = arith.constant 0 : i32
    %c0_i32_1 = arith.constant 0 : i32
    return %c0_i32, %c0_i32_0 : i32, i32
  }
  func.func @transform_3(%arg0: i32) -> (i32, i32) {
    %c0_i32 = arith.constant 0 : i32
    %c0_i32_0 = arith.constant 0 : i32
    %c0_i32_1 = arith.constant 0 : i32
    return %c0_i32, %c0_i32_0 : i32, i32
  }
  func.func @transform_4(%arg0: i32) -> (i32, i32) {
    %c0_i32 = arith.constant 0 : i32
    %c0_i32_0 = arith.constant 0 : i32
    %c0_i32_1 = arith.constant 0 : i32
    return %c0_i32, %c0_i32_0 : i32, i32
  }
  func.func @transform_5(%arg0: i32) -> (i32, i32) {
    %c0_i32 = arith.constant 0 : i32
    %c0_i32_0 = arith.constant 0 : i32
    %c0_i32_1 = arith.constant 0 : i32
    return %c0_i32, %c0_i32_0 : i32, i32
  }
  func.func @transform_6(%arg0: i32) -> (i32, i32) {
    %c0_i32 = arith.constant 0 : i32
    %c0_i32_0 = arith.constant 0 : i32
    %c0_i32_1 = arith.constant 0 : i32
    return %c0_i32, %c0_i32_0 : i32, i32
  }
  func.func @transform_7(%arg0: i32) -> (i32, i32) {
    %c0_i32 = arith.constant 0 : i32
    %c0_i32_0 = arith.constant 0 : i32
    %c0_i32_1 = arith.constant 0 : i32
    return %c0_i32, %c0_i32_0 : i32, i32
  }
  func.func @transform_8(%arg0: i32) -> (i32, i32) {
    %c0_i32 = arith.constant 0 : i32
    %c0_i32_0 = arith.constant 0 : i32
    return %arg0, %c0_i32 : i32, i32
  }
}

</mosaic_0001>

<bundles_post_ra>
// kernel: tpu_custom_call.1
= control target key start
LH: loop header
LB: loop body
LE: loop exit
PB: predicated region body
PF: predicated region fallthrough
CT: control target
= control target key end

     0   :  { %13 = vsyncpa [#allocation3], 0  ;;  %s12107_s0 = inlined_call_operand.hbm [shape: f32[128,128], index: 0, kind: input, shape index: {}]   ;;  %s12108_s1 = inlined_call_operand.hbm [shape: f32[2,64], index: 1, kind: input, shape index: {}]   ;;  %s12109_s2 = inlined_call_operand.vmem [shape: f32[1,128], index: 2, kind: input, shape index: {}]   ;;  %s12110_s3 = inlined_call_operand.vmem [shape: f32[1,128], index: 3, kind: input, shape index: {}]   ;;  %s12111_s4 = inlined_call_operand.hbm [shape: bf16[128,512], index: 4, kind: input, shape index: {}]   ;;  %s12112_s5 = inlined_call_operand.hbm [shape: bf16[128,512], index: 5, kind: input, shape index: {}]   ;;  %s12113_s6 = inlined_call_operand.hbm [shape: bf16[128,512], index: 6, kind: input, shape index: {}]   ;;  %s12114_s7 = inlined_call_operand.hbm [shape: bf16[512,128], index: 7, kind: input, shape index: {}]   ;;  %s12115_s8 = inlined_call_operand.hbm [shape: f32[128,128], index: 8, kind: output, shape index: {}]  }
   0x1   :  { %14 = vsyncpa [#allocation6], 0 }
   0x2   :  { %15 = vsyncpa [#allocation9], 0 }
   0x3   :  { %16 = vsyncpa [#allocation12], 0 }
   0x4   :  { %17 = vsyncpa [#allocation4], 0  ;;  %s9294_s27 = smov [#allocation5]  }
   0x5   :  { %s36_s28 = sshll.u32 %s9294_s27, 4  ;;  %s37_s28 = int_to_ptr.vmem [resolvable:$true] %s36_s28 }
   0x6   :  { %s9152_s29 = scalar_lea.vmem %s37_s28, 32  ;;  %p9157_p1 = scmp.lt.s32.totalorder %s37_s28, %s37_s28 }
   0x7   :  { %p9153_p0 = scmp.ne.s32.totalorder %s37_s28, %s9152_s29  ;;  %p9158_p2 = scmp.lt.s32.totalorder %s9152_s29, %s9152_s29 }
   0x9   :  { %p9159_p3 = por %p9158_p2, %p9157_p1 }
   0xb   :  { %p9160_p4 = pnand %p9159_p3, %p9153_p0 }
   0xd   :  { %9163 = shalt.err (!%p9160_p4)
}
   0xe   :  { %39 = dma.hbm_to_vmem [thread:$0]  %s12108_s1, 32, %s37_s28, [#allocation6]  }
   0xf   :  { %s9295_s10 = smov [#allocation8]   ;;  %s9296_s12 = smov [#allocation2]  }
  0x10   :  { %s61_s11 = sshll.u32 %s9295_s10, 4  ;;  %s23_s13 = sshll.u32 %s9296_s12, 4  ;;  %s62_s11 = int_to_ptr.vmem [resolvable:$true] %s61_s11  ;;  %s24_s13 = int_to_ptr.vmem [resolvable:$true] %s23_s13 }
  0x11   :  { %s9172_s14 = scalar_lea.vmem %s62_s11, 4096  ;;  %p9177_p6 = scmp.lt.s32.totalorder %s62_s11, %s62_s11 }
  0x12   :  { %p9173_p5 = scmp.ne.s32.totalorder %s62_s11, %s9172_s14  ;;  %p9178_p7 = scmp.lt.s32.totalorder %s9172_s14, %s9172_s14 }
  0x14   :  { %p9179_p8 = por %p9178_p7, %p9177_p6 }
  0x16   :  { %p9180_p9 = pnand %p9179_p8, %p9173_p5 }
  0x18   :  { %9183 = shalt.err (!%p9180_p9)
}
  0x19   :  { %s9297_s15 = smov 256   ;;  %s9298_s16 = smov 16  }
  0x1a   :  { %67 = dma.hbm_to_vmem [thread:$0]  %s12112_s5, 4096, %s62_s11, [#allocation9], %s9297_s15, %s9297_s15, %s9298_s16  }
  0x1b   :  { %s9192_s1 = scalar_lea.vmem %s24_s13, 2048  ;;  %p9197_p11 = scmp.lt.s32.totalorder %s24_s13, %s24_s13 }
  0x1c   :  { %p9193_p10 = scmp.ne.s32.totalorder %s24_s13, %s9192_s1  ;;  %p9198_p12 = scmp.lt.s32.totalorder %s9192_s1, %s9192_s1 }
  0x1e   :  { %p9199_p13 = por %p9198_p12, %p9197_p11 }
  0x20   :  { %p9200_p0 = pnand %p9199_p13, %p9193_p10 }
  0x22   :  { %9203 = shalt.err (!%p9200_p0)
}
  0x23   :  { %s9299_s19 = smov 128   ;;  %s9300_s20 = smov 8  }
  0x24   :  { %29 = dma.hbm_to_vmem [thread:$0]  %s12107_s0, 2048, %s24_s13, [#allocation3], %s9299_s19, %s9299_s19, %s9300_s20  }
  0x25   :  { %s9301_s23 = smov [#allocation7]   ;;  %s9302_s5 = smov [#allocation10]  }
  0x26   :  { %s49_s24 = sshll.u32 %s9301_s23, 4  ;;  %s73_s25 = sshll.u32 %s9302_s5, 4  ;;  %s50_s24 = int_to_ptr.vmem [resolvable:$true] %s49_s24  ;;  %s74_s25 = int_to_ptr.vmem [resolvable:$true] %s73_s25 }
  0x27   :  { %s9212_s26 = scalar_lea.vmem %s50_s24, 4096  ;;  %p9217_p2 = scmp.lt.s32.totalorder %s50_s24, %s50_s24 }
  0x28   :  { %p9213_p1 = scmp.ne.s32.totalorder %s50_s24, %s9212_s26  ;;  %p9218_p3 = scmp.lt.s32.totalorder %s9212_s26, %s9212_s26 }
  0x2a   :  { %p9219_p4 = por %p9218_p3, %p9217_p2 }
  0x2c   :  { %p9220_p5 = pnand %p9219_p4, %p9213_p1 }
  0x2e   :  { %9223 = shalt.err (!%p9220_p5)
}
  0x2f   :  { %55 = dma.hbm_to_vmem [thread:$0]  %s12111_s4, 4096, %s50_s24, [#allocation6], %s9297_s15, %s9297_s15, %s9298_s16  }
  0x30   :  { %s9232_s0 = scalar_lea.vmem %s74_s25, 4096  ;;  %p9237_p7 = scmp.lt.s32.totalorder %s74_s25, %s74_s25 }
  0x31   :  { %p9233_p6 = scmp.ne.s32.totalorder %s74_s25, %s9232_s0  ;;  %p9238_p8 = scmp.lt.s32.totalorder %s9232_s0, %s9232_s0 }
  0x33   :  { %p9239_p9 = por %p9238_p8, %p9237_p7 }
  0x35   :  { %p9240_p10 = pnand %p9239_p9, %p9233_p6 }
  0x37   :  { %9243 = shalt.err (!%p9240_p10)
}
  0x38   :  { %79 = dma.hbm_to_vmem [thread:$0]  %s12113_s6, 4096, %s74_s25, [#allocation9], %s9297_s15, %s9297_s15, %s9298_s16  }
  0x39   :  { %s9303_s9 = smov [#allocation11]  }
  0x3a   :  { %s85_s10 = sshll.u32 %s9303_s9, 4  ;;  %s86_s10 = int_to_ptr.vmem [resolvable:$true] %s85_s10 }
  0x3b   :  { %s9252_s11 = scalar_lea.vmem %s86_s10, 4096  ;;  %p9257_p12 = scmp.lt.s32.totalorder %s86_s10, %s86_s10 }
  0x3c   :  { %p9253_p11 = scmp.ne.s32.totalorder %s86_s10, %s9252_s11  ;;  %p9258_p13 = scmp.lt.s32.totalorder %s9252_s11, %s9252_s11 }
  0x3e   :  { %p9259_p0 = por %p9258_p13, %p9257_p12 }
  0x40   :  { %p9260_p1 = pnand %p9259_p0, %p9253_p11 }
  0x42   :  { %9263 = shalt.err (!%p9260_p1)
}
  0x43   :  { %s9304_s4 = smov 64   ;;  %s9305_s12 = smov 4  }
  0x44   :  { %91 = dma.hbm_to_vmem [thread:$0]  %s12114_s7, 4096, %s86_s10, [#allocation12], %s9304_s4, %s9304_s4, %s9305_s12  }
  0x45   :  { %9284 = dma.done.wait [#allocation3], 2048  }
  0x46   :  { %9285 = vsyncadd [#allocation3], 4294965248 }
  0x47   :  { %9286 = dma.done.wait [#allocation6], 4128  }
  0x48   :  { %9287 = vsyncadd [#allocation6], 4294963168 }
  0x49   :  { %9288 = dma.done.wait [#allocation9], 8192  }
  0x4a   :  { %9289 = vsyncadd [#allocation9], 4294959104 }
  0x4b   :  { %9290 = dma.done.wait [#allocation12], 4096  }
  0x4c   :  { %9291 = vsyncadd [#allocation12], 4294963200  ;;  %v111_v0 = vld [vmem:[#allocation2] sm:$0xff]  ;;  %v113_v1 = vld [vmem:[#allocation2 + $0x10] sm:$0xff]  ;;  %vm1631_vm0 = vcmask 523264  }
  0x4d   :  { %127 = vadd.xlane.f32.xlu0 %v111_v0  ;;  %131 = vadd.xlane.f32.xlu1 %v113_v1  ;;  %v112_v2 = vld [vmem:[#allocation2 + $0x8] sm:$0xff]  ;;  %v114_v3 = vld [vmem:[#allocation2 + $0x18] sm:$0xff]  ;;  %v115_v4 = vld [vmem:[#allocation2 + $0x20] sm:$0xff] }
  0x4e   :  { %v116_v5 = vld [vmem:[#allocation2 + $0x28] sm:$0xff]  ;;  %v9385_v6 = vld [vmem:[#allocation2 + $0x30] sm:$0xff]  ;;  %v9387_v7 = vld [vmem:[#allocation2 + $0x38] sm:$0xff] }
  0x4f   :  { %v9389_v8 = vld [vmem:[#allocation2 + $0x40] sm:$0xff]  ;;  %v9391_v9 = vld [vmem:[#allocation2 + $0x48] sm:$0xff]  ;;  %v9395_v10 = vld [vmem:[#allocation2 + $0x50] sm:$0xff] }
  0x50   :  { %v9397_v11 = vld [vmem:[#allocation2 + $0x58] sm:$0xff]  ;;  %v9401_v12 = vld [vmem:[#allocation2 + $0x60] sm:$0xff]  ;;  %v9403_v13 = vld [vmem:[#allocation2 + $0x68] sm:$0xff] }
  0x51   :  { %129 = vadd.xlane.f32.xlu0 %v112_v2  ;;  %133 = vadd.xlane.f32.xlu1 %v114_v3  ;;  %v9407_v14 = vld [vmem:[#allocation2 + $0x70] sm:$0xff]  ;;  %v9409_v15 = vld [vmem:[#allocation2 + $0x78] sm:$0xff] }
  0x52   :  { %v8420_v16 = vld [vmem:[#allocation7 + $0xe4] ss:$16 sps:$4 sm:$0xff]   ;;  %v8422_v17 = vld [vmem:[#allocation7 + $0xec] ss:$16 sps:$4 sm:$0xff]   ;;  %v8424_v18 = vld [vmem:[#allocation7 + $0xe0] ss:$16 sps:$4 sm:$0xff]  }
  0x53   :  { %v8425_v19 = vld [vmem:[#allocation7 + $0xe8] ss:$16 sps:$4 sm:$0xff]   ;;  %550 = vmatprep.subr.bf16.mxu0 %v8420_v16  ;;  %663 = vmatprep.subr.bf16.mxu1 %v8422_v17  ;;  %v8426_v55 = vld [vmem:[#allocation7 + $0xc4] ss:$16 sps:$4 sm:$0xff]   ;;  %v8428_v56 = vld [vmem:[#allocation7 + $0xcc] ss:$16 sps:$4 sm:$0xff]  }
  0x54   :  { %551 = vmatpush1.bf16.msra.mxu0 %v8424_v18  ;;  %664 = vmatpush1.bf16.msra.mxu1 %v8425_v19  ;;  %v8430_v57 = vld [vmem:[#allocation7 + $0xc0] ss:$16 sps:$4 sm:$0xff]   ;;  %v8431_v58 = vld [vmem:[#allocation7 + $0xc8] ss:$16 sps:$4 sm:$0xff]  }
  0x55   :  { %135 = vadd.xlane.f32.xlu0 %v115_v4  ;;  %137 = vadd.xlane.f32.xlu1 %v116_v5 }
  0x56   :  { %552 = vmatprep.subr.bf16.mxu0 %v8426_v55  ;;  %665 = vmatprep.subr.bf16.mxu1 %v8428_v56  ;;  %v8467_v55 = vld [vmem:[#allocation7 + $0x8] ss:$16 sps:$4 sm:$0xff]   ;;  %v9306_v56 = vmov 0  }
  0x57   :  { %582 = vmatprep.mubr.bf16.mxu0 %v9306_v56  ;;  %695 = vmatprep.mubr.bf16.mxu1 %v9306_v56 }
  0x58   :  { %553 = vmatpush1.bf16.msra.mxu0 %v8430_v57  ;;  %666 = vmatpush1.bf16.msra.mxu1 %v8431_v58  ;;  %v8470_v57 = vld [vmem:[#allocation8 + $0xe4] ss:$16 sps:$4 sm:$0xff]   ;;  %v8485_v58 = vld [vmem:[#allocation8 + $0xec] ss:$16 sps:$4 sm:$0xff]  }
  0x59   :  { %139 = vadd.xlane.f32.xlu0 %v9385_v6  ;;  %141 = vadd.xlane.f32.xlu1 %v9387_v7 }
  0x5d   :  { %143 = vadd.xlane.f32.xlu0 %v9389_v8  ;;  %145 = vadd.xlane.f32.xlu1 %v9391_v9 }
  0x61   :  { %147 = vadd.xlane.f32.xlu0 %v9395_v10  ;;  %149 = vadd.xlane.f32.xlu1 %v9397_v11 }
  0x65   :  { %151 = vadd.xlane.f32.xlu0 %v9401_v12  ;;  %153 = vadd.xlane.f32.xlu1 %v9403_v13 }
  0x69   :  { %155 = vadd.xlane.f32.xlu0 %v9407_v14  ;;  %157 = vadd.xlane.f32.xlu1 %v9409_v15 }
  0xd6   :  { %v128_v20 = vpop.xlane.xlu0 %127  ;;  %v132_v21 = vpop.xlane.xlu1 %131 }
  0xd7   :  { %v160_v22 = vmul.f32 0.0078125, %v128_v20  ;;  %v162_v23 = vmul.f32 0.0078125, %v132_v21  ;;  %v8438_v21 = vld [vmem:[#allocation7 + $0x84] ss:$16 sps:$4 sm:$0xff]  }
  0xd9   :  { %v9415_v24 = vsub.f32 %v111_v0, %v160_v22  ;;  %v9417_v25 = vsub.f32 %v113_v1, %v162_v23  ;;  %v8440_v22 = vld [vmem:[#allocation7 + $0x8c] ss:$16 sps:$4 sm:$0xff]  }
  0xda   :  { %v130_v26 = vpop.xlane.xlu0 %129  ;;  %v134_v27 = vpop.xlane.xlu1 %133 }
  0xdb   :  { %v161_v28 = vmul.f32 0.0078125, %v130_v26  ;;  %v192_v29 = vmul.f32 %v9415_v24, %v9415_v24  ;;  %v163_v30 = vmul.f32 0.0078125, %v134_v27  ;;  %v194_v31 = vmul.f32 %v9417_v25, %v9417_v25  ;;  %v8442_v26 = vld [vmem:[#allocation7 + $0x80] ss:$16 sps:$4 sm:$0xff]   ;;  %v8443_v27 = vld [vmem:[#allocation7 + $0x88] ss:$16 sps:$4 sm:$0xff]  }
  0xdd   :  { %208 = vadd.xlane.f32.xlu0 %v192_v29  ;;  %v9423_v32 = vsub.f32 %v112_v2, %v161_v28  ;;  %v9425_v33 = vsub.f32 %v114_v3, %v163_v30  ;;  %v8432_v3 = vld [vmem:[#allocation7 + $0xa4] ss:$16 sps:$4 sm:$0xff]  }
  0xde   :  { %v136_v34 = vpop.xlane.xlu0 %135  ;;  %v138_v35 = vpop.xlane.xlu1 %137  ;;  %554 = vmatprep.subr.bf16.mxu0 %v8432_v3 }
  0xdf   :  { %v164_v36 = vmul.f32 0.0078125, %v136_v34  ;;  %v193_v37 = vmul.f32 %v9423_v32, %v9423_v32  ;;  %v165_v38 = vmul.f32 0.0078125, %v138_v35  ;;  %v195_v39 = vmul.f32 %v9425_v33, %v9425_v33  ;;  %v8444_v35 = vld [vmem:[#allocation7 + $0x64] ss:$16 sps:$4 sm:$0xff]  }
  0xe1   :  { %212 = vadd.xlane.f32.xlu0 %v194_v31  ;;  %210 = vadd.xlane.f32.xlu1 %v193_v37  ;;  %v9431_v40 = vsub.f32 %v115_v4, %v164_v36  ;;  %v9433_v41 = vsub.f32 %v116_v5, %v165_v38  ;;  %v8434_v4 = vld [vmem:[#allocation7 + $0xac] ss:$16 sps:$4 sm:$0xff]   ;;  %v8448_v38 = vld [vmem:[#allocation7 + $0x60] ss:$16 sps:$4 sm:$0xff]  }
  0xe2   :  { %v140_v42 = vpop.xlane.xlu0 %139  ;;  %v142_v43 = vpop.xlane.xlu1 %141  ;;  %667 = vmatprep.subr.bf16.mxu1 %v8434_v4  ;;  %v8446_v36 = vld [vmem:[#allocation7 + $0x6c] ss:$16 sps:$4 sm:$0xff]  }
  0xe3   :  { %v166_v44 = vmul.f32 0.0078125, %v140_v42  ;;  %v196_v45 = vmul.f32 %v9431_v40, %v9431_v40  ;;  %v167_v46 = vmul.f32 0.0078125, %v142_v43  ;;  %v197_v47 = vmul.f32 %v9433_v41, %v9433_v41  ;;  %v8450_v43 = vld [vmem:[#allocation7 + $0x44] ss:$16 sps:$4 sm:$0xff]  }
  0xe5   :  { %214 = vadd.xlane.f32.xlu1 %v195_v39  ;;  %216 = vadd.xlane.f32.xlu0 %v196_v45  ;;  %v9440_v48 = vsub.f32 %v9385_v6, %v166_v44  ;;  %v9443_v49 = vsub.f32 %v9387_v7, %v167_v46  ;;  %v8449_v39 = vld [vmem:[#allocation7 + $0x68] ss:$16 sps:$4 sm:$0xff]   ;;  %v8452_v44 = vld [vmem:[#allocation7 + $0x4c] ss:$16 sps:$4 sm:$0xff]   ;;  %v8454_v45 = vld [vmem:[#allocation7 + $0x40] ss:$16 sps:$4 sm:$0xff]  }
  0xe6   :  { %v144_v50 = vpop.xlane.xlu0 %143  ;;  %v146_v51 = vpop.xlane.xlu1 %145  ;;  %v8455_v46 = vld [vmem:[#allocation7 + $0x48] ss:$16 sps:$4 sm:$0xff]  }
  0xe7   :  { %v168_v52 = vmul.f32 0.0078125, %v144_v50  ;;  %v198_v53 = vmul.f32 %v9440_v48, %v9440_v48  ;;  %v169_v54 = vmul.f32 0.0078125, %v146_v51  ;;  %v199_v59 = vmul.f32 %v9443_v49, %v9443_v49  ;;  %v8460_v50 = vld [vmem:[#allocation7 + $0x20] ss:$16 sps:$4 sm:$0xff]   ;;  %v8461_v51 = vld [vmem:[#allocation7 + $0x28] ss:$16 sps:$4 sm:$0xff]  }
  0xe9   :  { %218 = vadd.xlane.f32.xlu1 %v197_v47  ;;  %220 = vadd.xlane.f32.xlu0 %v198_v53  ;;  %v9450_v60 = vsub.f32 %v9389_v8, %v168_v52  ;;  %v9453_v61 = vsub.f32 %v9391_v9, %v169_v54  ;;  %v8436_v8 = vld [vmem:[#allocation7 + $0xa0] ss:$16 sps:$4 sm:$0xff]   ;;  %v8437_v9 = vld [vmem:[#allocation7 + $0xa8] ss:$16 sps:$4 sm:$0xff]   ;;  %v8458_v47 = vld [vmem:[#allocation7 + $0x2c] ss:$16 sps:$4 sm:$0xff]  }
  0xea   :  { %v148_v62 = vpop.xlane.xlu0 %147  ;;  %v150_v63 = vpop.xlane.xlu1 %149  ;;  %555 = vmatpush1.bf16.msra.mxu0 %v8436_v8  ;;  %668 = vmatpush1.bf16.msra.mxu1 %v8437_v9  ;;  %v8462_v52 = vld [vmem:[#allocation7 + $0x4] ss:$16 sps:$4 sm:$0xff]   ;;  %v8464_v53 = vld [vmem:[#allocation7 + $0xc] ss:$16 sps:$4 sm:$0xff]   ;;  %v8466_v54 = vld [vmem:[#allocation7] ss:$16 sps:$4 sm:$0xff]  }
  0xeb   :  { %v170_v0 = vmul.f32 0.0078125, %v148_v62  ;;  %v200_v1 = vmul.f32 %v9450_v60, %v9450_v60  ;;  %v171_v2 = vmul.f32 0.0078125, %v150_v63  ;;  %v201_v5 = vmul.f32 %v9453_v61, %v9453_v61  ;;  %556 = vmatprep.subr.bf16.mxu0 %v8438_v21  ;;  %669 = vmatprep.subr.bf16.mxu1 %v8440_v22 }
  0xed   :  { %222 = vadd.xlane.f32.xlu1 %v199_v59  ;;  %224 = vadd.xlane.f32.xlu0 %v200_v1  ;;  %v9460_v6 = vsub.f32 %v9395_v10, %v170_v0  ;;  %v9463_v7 = vsub.f32 %v9397_v11, %v171_v2 }
  0xee   :  { %v152_v16 = vpop.xlane.xlu0 %151  ;;  %v154_v17 = vpop.xlane.xlu1 %153  ;;  %557 = vmatpush1.bf16.msra.mxu0 %v8442_v26  ;;  %670 = vmatpush1.bf16.msra.mxu1 %v8443_v27 }
  0xef   :  { %v172_v18 = vmul.f32 0.0078125, %v152_v16  ;;  %v202_v19 = vmul.f32 %v9460_v6, %v9460_v6  ;;  %v173_v20 = vmul.f32 0.0078125, %v154_v17  ;;  %v203_v10 = vmul.f32 %v9463_v7, %v9463_v7  ;;  %558 = vmatprep.subr.bf16.mxu0 %v8444_v35  ;;  %671 = vmatprep.subr.bf16.mxu1 %v8446_v36 }
  0xf1   :  { %226 = vadd.xlane.f32.xlu1 %v201_v5  ;;  %228 = vadd.xlane.f32.xlu0 %v202_v19  ;;  %v9470_v11 = vsub.f32 %v9401_v12, %v172_v18  ;;  %v9473_v23 = vsub.f32 %v9403_v13, %v173_v20 }
  0xf2   :  { %v156_v28 = vpop.xlane.xlu0 %155  ;;  %v158_v29 = vpop.xlane.xlu1 %157  ;;  %559 = vmatpush1.bf16.msra.mxu0 %v8448_v38  ;;  %672 = vmatpush1.bf16.msra.mxu1 %v8449_v39 }
  0xf3   :  { %v174_v30 = vmul.f32 0.0078125, %v156_v28  ;;  %v204_v31 = vmul.f32 %v9470_v11, %v9470_v11  ;;  %v175_v34 = vmul.f32 0.0078125, %v158_v29  ;;  %v205_v12 = vmul.f32 %v9473_v23, %v9473_v23  ;;  %560 = vmatprep.subr.bf16.mxu0 %v8450_v43  ;;  %673 = vmatprep.subr.bf16.mxu1 %v8452_v44 }
  0xf5   :  { %230 = vadd.xlane.f32.xlu1 %v203_v10  ;;  %232 = vadd.xlane.f32.xlu0 %v204_v31  ;;  %v9480_v13 = vsub.f32 %v9407_v14, %v174_v30  ;;  %v9483_v37 = vsub.f32 %v9409_v15, %v175_v34  ;;  %v8456_v15 = vld [vmem:[#allocation7 + $0x24] ss:$16 sps:$4 sm:$0xff]   ;;  %v9495_v31 = vld [vmem:[%s12109_s2] ss:$0 sm:$0xff]  ;;  %s9307_s2 = smov [#allocation13]  }
  0xf6   :  { %561 = vmatpush1.bf16.msra.mxu0 %v8454_v45  ;;  %674 = vmatpush1.bf16.msra.mxu1 %v8455_v46 }
  0xf7   :  { %v206_v42 = vmul.f32 %v9480_v13, %v9480_v13  ;;  %v207_v14 = vmul.f32 %v9483_v37, %v9483_v37  ;;  %562 = vmatprep.subr.bf16.mxu0 %v8456_v15  ;;  %675 = vmatprep.subr.bf16.mxu1 %v8458_v47 }
  0xf9   :  { %234 = vadd.xlane.f32.xlu1 %v205_v12  ;;  %236 = vadd.xlane.f32.xlu0 %v206_v42 }
  0xfa   :  { %563 = vmatpush1.bf16.msra.mxu0 %v8460_v50  ;;  %676 = vmatpush1.bf16.msra.mxu1 %v8461_v51  ;;  %v8468_v51 = vld [vmem:[#allocation8 + $0xe0] ss:$16 sps:$4 sm:$0xff]  }
  0xfb   :  { %564 = vmatprep.subr.bf16.mxu0 %v8462_v52  ;;  %677 = vmatprep.subr.bf16.mxu1 %v8464_v53 }
  0xfd   :  { %238 = vadd.xlane.f32.xlu1 %v207_v14 }
  0xfe   :  { %565 = vmatpush1.bf16.msra.mxu0 %v8466_v54  ;;  %678 = vmatpush1.bf16.msra.mxu1 %v8467_v55  ;;  %v8473_v55 = vld [vmem:[#allocation8 + $0xc4] ss:$16 sps:$4 sm:$0xff]  }
  0xff   :  { %968 = vmatprep.subr.bf16.mxu0 %v8470_v57  ;;  %1081 = vmatprep.subr.bf16.mxu1 %v8485_v58 }
 0x166   :  { %v209_v59 = vpop.xlane.xlu0 %208 }
 0x167   :  { %v240_v62 = vmul.f32 0.0078125, %v209_v59  ;;  %v8483_v59 = vld [vmem:[#allocation8 + $0xe8] ss:$16 sps:$4 sm:$0xff]  }
 0x169   :  { %v256_v63 = vadd.f32 1e-05, %v240_v62 }
 0x16a   :  { %v211_v0 = vpop.xlane.xlu1 %210  ;;  %v213_v1 = vpop.xlane.xlu0 %212 }
 0x16b   :  { %8596 = vrsqrt.f32 %v256_v63  ;;  %v241_v2 = vmul.f32 0.0078125, %v211_v0  ;;  %v242_v3 = vmul.f32 0.0078125, %v213_v1  ;;  %v8471_v1 = vld [vmem:[#allocation8 + $0xc0] ss:$16 sps:$4 sm:$0xff]  }
 0x16d   :  { %v257_v4 = vadd.f32 1e-05, %v241_v2  ;;  %v258_v5 = vadd.f32 1e-05, %v242_v3 }
 0x16e   :  { %v215_v8 = vpop.xlane.xlu1 %214  ;;  %v217_v16 = vpop.xlane.xlu0 %216 }
 0x16f   :  { %8598 = vrsqrt.f32 %v257_v4  ;;  %v243_v9 = vmul.f32 0.0078125, %v215_v8  ;;  %v244_v18 = vmul.f32 0.0078125, %v217_v16  ;;  %v8486_v8 = vld [vmem:[#allocation8 + $0xc8] ss:$16 sps:$4 sm:$0xff]  }
 0x170   :  { %8600 = vrsqrt.f32 %v258_v5  ;;  %v8476_v5 = vld [vmem:[#allocation8 + $0xa4] ss:$16 sps:$4 sm:$0xff]  }
 0x171   :  { %v259_v17 = vadd.f32 1e-05, %v243_v9  ;;  %v260_v22 = vadd.f32 1e-05, %v244_v18 }
 0x172   :  { %v219_v19 = vpop.xlane.xlu1 %218  ;;  %v221_v26 = vpop.xlane.xlu0 %220 }
 0x173   :  { %8602 = vrsqrt.f32 %v259_v17  ;;  %v245_v20 = vmul.f32 0.0078125, %v219_v19  ;;  %v246_v30 = vmul.f32 0.0078125, %v221_v26  ;;  %v8479_v26 = vld [vmem:[#allocation8 + $0x84] ss:$16 sps:$4 sm:$0xff]  }
 0x175   :  { %v261_v21 = vadd.f32 1e-05, %v245_v20  ;;  %v262_v39 = vadd.f32 1e-05, %v246_v30  ;;  %v8474_v20 = vld [vmem:[#allocation8 + $0xa0] ss:$16 sps:$4 sm:$0xff]  }
 0x176   :  { %v223_v10 = vpop.xlane.xlu1 %222  ;;  %v225_v44 = vpop.xlane.xlu0 %224 }
 0x177   :  { %8604 = vrsqrt.f32 %v261_v21  ;;  %v247_v28 = vmul.f32 0.0078125, %v223_v10  ;;  %v248_v47 = vmul.f32 0.0078125, %v225_v44  ;;  %v8494_v21 = vld [vmem:[#allocation8 + $0xac] ss:$16 sps:$4 sm:$0xff]  }
 0x178   :  { %v8597_v27 = vpop.eup %8596  ;;  %8606 = vrsqrt.f32 %v260_v22 }
 0x179   :  { %v288_v29 = vmul.f32 %v8597_v27, %v9415_v24  ;;  %v263_v35 = vadd.f32 1e-05, %v247_v28  ;;  %v9503_v24 = vld [vmem:[%s12110_s3] ss:$0 sm:$0xff]  ;;  %v264_v62 = vadd.f32 1e-05, %v248_v47 }
 0x17a   :  { %v227_v12 = vpop.xlane.xlu1 %226  ;;  %v229_v0 = vpop.xlane.xlu0 %228  ;;  %v8492_v27 = vld [vmem:[#allocation8 + $0xa8] ss:$16 sps:$4 sm:$0xff]   ;;  %s6994_s3 = sshll.u32 %s9307_s2, 4  ;;  %s6995_s3 = int_to_ptr.vmem [resolvable:$true] %s6994_s3 }
 0x17b   :  { %v311_v38 = vmul.f32 %v9495_v31, %v288_v29  ;;  %8608 = vrsqrt.f32 %v263_v35  ;;  %v249_v45 = vmul.f32 0.0078125, %v227_v12  ;;  %v250_v16 = vmul.f32 0.0078125, %v229_v0  ;;  %v8497_v29 = vld [vmem:[#allocation8 + $0x8c] ss:$16 sps:$4 sm:$0xff]   ;;  %v8504_v0 = vld [vmem:[#allocation8 + $0x48] ss:$16 sps:$4 sm:$0xff]   ;;  %p9269_p3 = scmp.lt.s32.totalorder %s6995_s3, %s6995_s3 }
 0x17c   :  { %v8599_v34 = vpop.eup %8598  ;;  %8610 = vrsqrt.f32 %v262_v39  ;;  %v8482_v39 = vld [vmem:[#allocation8 + $0x64] ss:$16 sps:$4 sm:$0xff]   ;;  %s9264_s17 = scalar_lea.vmem %s6995_s3, 2048 }
 0x17d   :  { %v289_v36 = vmul.f32 %v8599_v34, %v9423_v32  ;;  %v8601_v42 = vpop.eup %8600  ;;  %v334_v50 = vadd.f32 %v9503_v24, %v311_v38  ;;  %v265_v53 = vadd.f32 1e-05, %v249_v45  ;;  %v266_v28 = vadd.f32 1e-05, %v250_v16  ;;  %v8477_v38 = vld [vmem:[#allocation8 + $0x80] ss:$16 sps:$4 sm:$0xff]   ;;  %p9265_p2 = scmp.ne.s32.totalorder %s6995_s3, %s9264_s17  ;;  %p9270_p4 = scmp.lt.s32.totalorder %s9264_s17, %s9264_s17 }
 0x17e   :  { %v290_v15 = vmul.f32 %v8601_v42, %v9417_v25  ;;  %v231_v58 = vpop.xlane.xlu1 %230  ;;  %v8488_v25 = vld [vmem:[#allocation8 + $0xcc] ss:$16 sps:$4 sm:$0xff]   ;;  %v233_v34 = vpop.xlane.xlu0 %232  ;;  %v8495_v42 = vld [vmem:[#allocation8 + $0x88] ss:$16 sps:$4 sm:$0xff]  }
 0x17f   :  { %v312_v43 = vmul.f32 %v9495_v31, %v289_v36  ;;  %8612 = vrsqrt.f32 %v265_v53  ;;  %v251_v3 = vmul.f32 0.0078125, %v231_v58  ;;  %v252_v44 = vmul.f32 0.0078125, %v233_v34  ;;  %p9271_p5 = por %p9270_p4, %p9269_p3 }
 0x180   :  { %v8603_v14 = vpop.eup %8602  ;;  %8614 = vrsqrt.f32 %v264_v62 }
 0x181   :  { %v291_v46 = vmul.f32 %v8603_v14, %v9425_v33  ;;  %v335_v32 = vadd.f32 %v9503_v24, %v312_v43  ;;  %v313_v33 = vmul.f32 %v9495_v31, %v290_v15  ;;  %v267_v18 = vadd.f32 1e-05, %v251_v3  ;;  %v8503_v15 = vld [vmem:[#allocation8 + $0x6c] ss:$16 sps:$4 sm:$0xff]   ;;  %p9272_p6 = pnand %p9271_p5, %p9265_p2 }
 0x182   :  { %v235_v10 = vpop.xlane.xlu1 %234  ;;  %v268_v53 = vadd.f32 1e-05, %v252_v44  ;;  %v237_v58 = vpop.xlane.xlu0 %236 }
 0x183   :  { %v314_v52 = vmul.f32 %v9495_v31, %v291_v46  ;;  %v9510_v54 = vpack.c.bf16 %v335_v32, %v334_v50  ;;  %v336_v17 = vadd.f32 %v9503_v24, %v313_v33  ;;  %8616 = vrsqrt.f32 %v267_v18  ;;  %v8480_v32 = vld [vmem:[#allocation8 + $0x60] ss:$16 sps:$4 sm:$0xff]  }
 0x184   :  { %v8605_v57 = vpop.eup %8604  ;;  %v253_v36 = vmul.f32 0.0078125, %v235_v10  ;;  %8618 = vrsqrt.f32 %v266_v28 }
 0x185   :  { %583 = vmatmul.mubr.bf16.vlgmr.msra.gmra.mxu0 %v9510_v54  ;;  %696 = vmatmul.mubr.bf16.vlgmr.msra.gmra.mxu1 %v9510_v54  ;;  %v8607_v63 = vpop.eup %8606  ;;  %v293_v2 = vmul.f32 %v8605_v57, %v9433_v41  ;;  %v337_v4 = vadd.f32 %v9503_v24, %v314_v52  ;;  %v8501_v52 = vld [vmem:[#allocation8 + $0x68] ss:$16 sps:$4 sm:$0xff]  }
 0x186   :  { %969 = vmatpush1.bf16.msra.mxu0 %v8468_v51  ;;  %592 = vmatprep.mubr.bf16.mxu0 %v9306_v56  ;;  %v292_v9 = vmul.f32 %v8607_v63, %v9431_v40  ;;  %v269_v45 = vadd.f32 1e-05, %v253_v36  ;;  %v239_v50 = vpop.xlane.xlu1 %238  ;;  %v8491_v51 = vld [vmem:[#allocation8 + $0x44] ss:$16 sps:$4 sm:$0xff]  }
 0x187   :  { %705 = vmatprep.mubr.bf16.mxu1 %v9306_v56  ;;  %970 = vmatprep.subr.bf16.mxu0 %v8473_v55  ;;  %v316_v41 = vmul.f32 %v9495_v31, %v293_v2  ;;  %v9522_v19 = vpack.c.bf16 %v337_v4, %v336_v17  ;;  %v8506_v55 = vld [vmem:[#allocation8 + $0x4c] ss:$16 sps:$4 sm:$0xff]   ;;  %v255_v33 = vmul.f32 0.0078125, %v239_v50  ;;  %v8500_v63 = vld [vmem:[#allocation8 + $0x24] ss:$16 sps:$4 sm:$0xff]   ;;  %v254_v2 = vmul.f32 0.0078125, %v237_v58 }
 0x188   :  { %1082 = vmatpush1.bf16.msra.mxu1 %v8483_v59  ;;  %v8609_v22 = vpop.eup %8608  ;;  %v315_v40 = vmul.f32 %v9495_v31, %v292_v9  ;;  %8620 = vrsqrt.f32 %v269_v45  ;;  %v8512_v9 = vld [vmem:[#allocation8 + $0x2c] ss:$16 sps:$4 sm:$0xff]   ;;  %v8509_v17 = vld [vmem:[#allocation8 + $0x4] ss:$16 sps:$4 sm:$0xff]  }
 0x189   :  { %1083 = vmatprep.subr.bf16.mxu1 %v8488_v25  ;;  %v8611_v30 = vpop.eup %8610  ;;  %v295_v35 = vmul.f32 %v8609_v22, %v9443_v49  ;;  %v339_v12 = vadd.f32 %v9503_v24, %v316_v41  ;;  %v8489_v25 = vld [vmem:[#allocation8 + $0x40] ss:$16 sps:$4 sm:$0xff]   ;;  %8622 = vrsqrt.f32 %v268_v53  ;;  %v271_v4 = vadd.f32 1e-05, %v255_v33  ;;  %v8510_v41 = vld [vmem:[#allocation8 + $0x28] ss:$16 sps:$4 sm:$0xff]  }
 0x18a   :  { %971 = vmatpush1.bf16.msra.mxu0 %v8471_v1  ;;  %v294_v43 = vmul.f32 %v8611_v30, %v9440_v48  ;;  %v338_v14 = vadd.f32 %v9503_v24, %v315_v40  ;;  %v270_v18 = vadd.f32 1e-05, %v254_v2  ;;  %v8518_v40 = vld [vmem:[#allocation10 + $0xe4] ss:$16 sps:$4 sm:$0xff]   ;;  %v8528_v33 = vld [vmem:[#allocation10 + $0xa0] ss:$16 sps:$4 sm:$0xff]  }
 0x18b   :  { %972 = vmatprep.subr.bf16.mxu0 %v8476_v5  ;;  %v318_v49 = vmul.f32 %v9495_v31, %v295_v35  ;;  %8624 = vrsqrt.f32 %v271_v4  ;;  %v8524_v53 = vld [vmem:[#allocation10 + $0xc4] ss:$16 sps:$4 sm:$0xff]   ;;  %v8543_v4 = vld [vmem:[#allocation10 + $0x68] ss:$16 sps:$4 sm:$0xff]  }
 0x18c   :  { %1084 = vmatpush1.bf16.msra.mxu1 %v8486_v8  ;;  %v9534_v46 = vpack.c.bf16 %v339_v12, %v338_v14  ;;  %v8613_v47 = vpop.eup %8612  ;;  %v317_v48 = vmul.f32 %v9495_v31, %v294_v43  ;;  %v8498_v8 = vld [vmem:[#allocation8 + $0x20] ss:$16 sps:$4 sm:$0xff]   ;;  %8626 = vrsqrt.f32 %v270_v18  ;;  %v8530_v58 = vld [vmem:[#allocation10 + $0xa4] ss:$16 sps:$4 sm:$0xff]  }
 0x18d   :  { %593 = vmatmul.mubr.bf16.gmra.mxu0 %v9522_v19  ;;  %706 = vmatmul.mubr.bf16.gmra.mxu1 %v9522_v19  ;;  %v8615_v57 = vpop.eup %8614  ;;  %v297_v59 = vmul.f32 %v8613_v47, %v9453_v61  ;;  %v341_v62 = vadd.f32 %v9503_v24, %v318_v49  ;;  %v8542_v2 = vld [vmem:[#allocation10 + $0x64] ss:$16 sps:$4 sm:$0xff]   ;;  %v8552_v18 = vld [vmem:[#allocation10 + $0x20] ss:$16 sps:$4 sm:$0xff]  }
 0x18e   :  { %602 = vmatprep.mubr.bf16.mxu0 %v9306_v56  ;;  %715 = vmatprep.mubr.bf16.mxu1 %v9306_v56  ;;  %v296_v1 = vmul.f32 %v8615_v57, %v9450_v60  ;;  %v340_v3 = vadd.f32 %v9503_v24, %v317_v48  ;;  %v8519_v48 = vld [vmem:[#allocation10 + $0xe8] ss:$16 sps:$4 sm:$0xff]  }
 0x18f   :  { %973 = vmatpush1.bf16.msra.mxu0 %v8474_v20  ;;  %1085 = vmatprep.subr.bf16.mxu1 %v8494_v21  ;;  %v320_v61 = vmul.f32 %v9495_v31, %v297_v59  ;;  %v8515_v20 = vld [vmem:[#allocation8 + $0xc] ss:$16 sps:$4 sm:$0xff]   ;;  %v8525_v57 = vld [vmem:[#allocation10 + $0xc8] ss:$16 sps:$4 sm:$0xff]  }
 0x190   :  { %974 = vmatprep.subr.bf16.mxu0 %v8479_v26  ;;  %1086 = vmatpush1.bf16.msra.mxu1 %v8492_v27  ;;  %v9546_v5 = vpack.c.bf16 %v341_v62, %v340_v3  ;;  %v8617_v16 = vpop.eup %8616  ;;  %v319_v60 = vmul.f32 %v9495_v31, %v296_v1  ;;  %v8507_v26 = vld [vmem:[#allocation8] ss:$16 sps:$4 sm:$0xff]   ;;  %v8513_v27 = vld [vmem:[#allocation8 + $0x8] ss:$16 sps:$4 sm:$0xff]   ;;  %v8533_v59 = vld [vmem:[#allocation10 + $0xac] ss:$16 sps:$4 sm:$0xff]  }
 0x191   :  { %1087 = vmatprep.subr.bf16.mxu1 %v8497_v29  ;;  %v8619_v21 = vpop.eup %8618  ;;  %v299_v22 = vmul.f32 %v8617_v16, %v9463_v7  ;;  %v343_v10 = vadd.f32 %v9503_v24, %v320_v61  ;;  %v8521_v7 = vld [vmem:[#allocation10 + $0xec] ss:$16 sps:$4 sm:$0xff]   ;;  %v8531_v62 = vld [vmem:[#allocation10 + $0xa8] ss:$16 sps:$4 sm:$0xff]   ;;  %v8540_v61 = vld [vmem:[#allocation10 + $0x60] ss:$16 sps:$4 sm:$0xff]  }
 0x192   :  { %v298_v28 = vmul.f32 %v8619_v21, %v9460_v6  ;;  %v342_v29 = vadd.f32 %v9503_v24, %v319_v60  ;;  %v8537_v1 = vld [vmem:[#allocation10 + $0x88] ss:$16 sps:$4 sm:$0xff]   ;;  %v8545_v3 = vld [vmem:[#allocation10 + $0x6c] ss:$16 sps:$4 sm:$0xff]   ;;  %v8546_v16 = vld [vmem:[#allocation10 + $0x40] ss:$16 sps:$4 sm:$0xff]  }
 0x193   :  { %975 = vmatpush1.bf16.msra.mxu0 %v8477_v38  ;;  %v322_v30 = vmul.f32 %v9495_v31, %v299_v22  ;;  %v8557_v60 = vld [vmem:[#allocation10 + $0x2c] ss:$16 sps:$4 sm:$0xff]   ;;  %v8560_v21 = vld [vmem:[#allocation10 + $0x4] ss:$16 sps:$4 sm:$0xff]  }
 0x194   :  { %976 = vmatprep.subr.bf16.mxu0 %v8482_v39  ;;  %1088 = vmatpush1.bf16.msra.mxu1 %v8495_v42  ;;  %v9558_v34 = vpack.c.bf16 %v343_v10, %v342_v29  ;;  %v321_v36 = vmul.f32 %v9495_v31, %v298_v28  ;;  %v8563_v22 = vld [vmem:[#allocation10 + $0xc] ss:$16 sps:$4 sm:$0xff]   ;;  %v8558_v10 = vld [vmem:[#allocation10] ss:$16 sps:$4 sm:$0xff]  }
 0x195   :  { %603 = vmatmul.mubr.bf16.gmra.mxu0 %v9534_v46  ;;  %716 = vmatmul.mubr.bf16.gmra.mxu1 %v9534_v46  ;;  %v8621_v35 = vpop.eup %8620  ;;  %v345_v38 = vadd.f32 %v9503_v24, %v322_v30 }
 0x196   :  { %612 = vmatprep.mubr.bf16.mxu0 %v9306_v56  ;;  %725 = vmatprep.mubr.bf16.mxu1 %v9306_v56  ;;  %v8623_v6 = vpop.eup %8622  ;;  %v301_v12 = vmul.f32 %v8621_v35, %v9473_v23  ;;  %v344_v42 = vadd.f32 %v9503_v24, %v321_v36 }
 0x197   :  { %977 = vmatpush1.bf16.msra.mxu0 %v8480_v32  ;;  %1089 = vmatprep.subr.bf16.mxu1 %v8503_v15  ;;  %v300_v39 = vmul.f32 %v8623_v6, %v9470_v11 }
 0x198   :  { %978 = vmatprep.subr.bf16.mxu0 %v8491_v51  ;;  %1090 = vmatpush1.bf16.msra.mxu1 %v8501_v52  ;;  %v324_v43 = vmul.f32 %v9495_v31, %v301_v12  ;;  %v9570_v44 = vpack.c.bf16 %v345_v38, %v344_v42  ;;  %v8625_v14 = vpop.eup %8624 }
 0x199   :  { %1091 = vmatprep.subr.bf16.mxu1 %v8506_v55  ;;  %v323_v49 = vmul.f32 %v9495_v31, %v300_v39  ;;  %v8627_v45 = vpop.eup %8626  ;;  %v303_v11 = vmul.f32 %v8625_v14, %v9483_v37  ;;  %v8527_v55 = vld [vmem:[#allocation10 + $0xcc] ss:$16 sps:$4 sm:$0xff]  }
 0x19a   :  { %v347_v23 = vadd.f32 %v9503_v24, %v324_v43  ;;  %v302_v32 = vmul.f32 %v8627_v45, %v9480_v13 }
 0x19b   :  { %979 = vmatpush1.bf16.msra.mxu0 %v8489_v25  ;;  %v346_v15 = vadd.f32 %v9503_v24, %v323_v49  ;;  %v326_v47 = vmul.f32 %v9495_v31, %v303_v11  ;;  %v8536_v25 = vld [vmem:[#allocation10 + $0x84] ss:$16 sps:$4 sm:$0xff]  }
 0x19c   :  { %980 = vmatprep.subr.bf16.mxu0 %v8500_v63  ;;  %1092 = vmatpush1.bf16.msra.mxu1 %v8504_v0  ;;  %v325_v51 = vmul.f32 %v9495_v31, %v302_v32  ;;  %v8516_v31 = vld [vmem:[#allocation10 + $0xe0] ss:$16 sps:$4 sm:$0xff]   ;;  %v8539_v63 = vld [vmem:[#allocation10 + $0x8c] ss:$16 sps:$4 sm:$0xff]  }
 0x19d   :  { %613 = vmatmul.mubr.bf16.gmra.mxu0 %v9546_v5  ;;  %726 = vmatmul.mubr.bf16.gmra.mxu1 %v9546_v5  ;;  %v9582_v50 = vpack.c.bf16 %v347_v23, %v346_v15  ;;  %v349_v37 = vadd.f32 %v9503_v24, %v326_v47  ;;  %v8534_v0 = vld [vmem:[#allocation10 + $0x80] ss:$16 sps:$4 sm:$0xff]  }
 0x19e   :  { %622 = vmatprep.mubr.bf16.mxu0 %v9306_v56  ;;  %735 = vmatprep.mubr.bf16.mxu1 %v9306_v56  ;;  %v348_v13 = vadd.f32 %v9503_v24, %v325_v51  ;;  %v8522_v24 = vld [vmem:[#allocation10 + $0xc0] ss:$16 sps:$4 sm:$0xff]  }
 0x19f   :  { %981 = vmatpush1.bf16.msra.mxu0 %v8498_v8  ;;  %1093 = vmatprep.subr.bf16.mxu1 %v8512_v9  ;;  %v8548_v8 = vld [vmem:[#allocation10 + $0x44] ss:$16 sps:$4 sm:$0xff]   ;;  %v8551_v9 = vld [vmem:[#allocation10 + $0x4c] ss:$16 sps:$4 sm:$0xff]  }
 0x1a0   :  { %982 = vmatprep.subr.bf16.mxu0 %v8509_v17  ;;  %1094 = vmatpush1.bf16.msra.mxu1 %v8510_v41  ;;  %v9591_v52 = vpack.c.bf16 %v349_v37, %v348_v13  ;;  %v8549_v17 = vld [vmem:[#allocation10 + $0x48] ss:$16 sps:$4 sm:$0xff]   ;;  %v8554_v41 = vld [vmem:[#allocation10 + $0x24] ss:$16 sps:$4 sm:$0xff]  }
 0x1a1   :  { %1095 = vmatprep.subr.bf16.mxu1 %v8515_v20  ;;  %v8555_v20 = vld [vmem:[#allocation10 + $0x28] ss:$16 sps:$4 sm:$0xff]  }
 0x1a3   :  { %983 = vmatpush1.bf16.msra.mxu0 %v8507_v26  ;;  %v8561_v26 = vld [vmem:[#allocation10 + $0x8] ss:$16 sps:$4 sm:$0xff]  }
 0x1a4   :  { %1096 = vmatpush1.bf16.msra.mxu1 %v8513_v27  ;;  %1386 = vmatprep.subr.bf16.mxu0 %v8518_v40 }
 0x1a5   :  { %623 = vmatmul.mubr.bf16.gmra.mxu0 %v9558_v34  ;;  %736 = vmatmul.mubr.bf16.gmra.mxu1 %v9558_v34 }
 0x1a6   :  { %632 = vmatprep.mubr.bf16.mxu0 %v9306_v56  ;;  %745 = vmatprep.mubr.bf16.mxu1 %v9306_v56 }
 0x1a7   :  { %1499 = vmatprep.subr.bf16.mxu1 %v8521_v7 }
 0x1ad   :  { %633 = vmatmul.mubr.bf16.gmra.mxu0 %v9570_v44  ;;  %746 = vmatmul.mubr.bf16.gmra.mxu1 %v9570_v44 }
 0x1ae   :  { %642 = vmatprep.mubr.bf16.mxu0 %v9306_v56  ;;  %755 = vmatprep.mubr.bf16.mxu1 %v9306_v56 }
 0x1b5   :  { %643 = vmatmul.mubr.bf16.gmra.mxu0 %v9582_v50  ;;  %756 = vmatmul.mubr.bf16.gmra.mxu1 %v9582_v50 }
 0x1b6   :  { %652 = vmatprep.mubr.bf16.mxu0 %v9306_v56  ;;  %765 = vmatprep.mubr.bf16.mxu1 %v9306_v56 }
 0x1bd   :  { %653 = vmatmul.mubr.bf16.gmra.mxu0 %v9591_v52  ;;  %766 = vmatmul.mubr.bf16.gmra.mxu1 %v9591_v52 }
 0x1be   :  { %1000 = vmatprep.mubr.bf16.mxu0 %v9306_v56  ;;  %1113 = vmatprep.mubr.bf16.mxu1 %v9306_v56 }
 0x1c5   :  { %1001 = vmatmul.mubr.bf16.vlgmr.msra.gmra.mxu0 %v9510_v54  ;;  %1114 = vmatmul.mubr.bf16.vlgmr.msra.gmra.mxu1 %v9510_v54 }
 0x1c6   :  { %1010 = vmatprep.mubr.bf16.mxu0 %v9306_v56  ;;  %1123 = vmatprep.mubr.bf16.mxu1 %v9306_v56 }
 0x1c7   :  { %1387 = vmatpush1.bf16.msra.mxu0 %v8516_v31  ;;  %1500 = vmatpush1.bf16.msra.mxu1 %v8519_v48 }
 0x1c8   :  { %1388 = vmatprep.subr.bf16.mxu0 %v8524_v53  ;;  %1501 = vmatprep.subr.bf16.mxu1 %v8527_v55 }
 0x1cb   :  { %1389 = vmatpush1.bf16.msra.mxu0 %v8522_v24  ;;  %1502 = vmatpush1.bf16.msra.mxu1 %v8525_v57 }
 0x1cc   :  { %1390 = vmatprep.subr.bf16.mxu0 %v8530_v58  ;;  %1503 = vmatprep.subr.bf16.mxu1 %v8533_v59 }
 0x1cd   :  { %1011 = vmatmul.mubr.bf16.gmra.mxu0 %v9522_v19  ;;  %1124 = vmatmul.mubr.bf16.gmra.mxu1 %v9522_v19 }
 0x1ce   :  { %1020 = vmatprep.mubr.bf16.mxu0 %v9306_v56  ;;  %1133 = vmatprep.mubr.bf16.mxu1 %v9306_v56 }
 0x1cf   :  { %1391 = vmatpush1.bf16.msra.mxu0 %v8528_v33  ;;  %1504 = vmatpush1.bf16.msra.mxu1 %v8531_v62 }
 0x1d0   :  { %1392 = vmatprep.subr.bf16.mxu0 %v8536_v25  ;;  %1505 = vmatprep.subr.bf16.mxu1 %v8539_v63 }
 0x1d3   :  { %1393 = vmatpush1.bf16.msra.mxu0 %v8534_v0  ;;  %1506 = vmatpush1.bf16.msra.mxu1 %v8537_v1 }
 0x1d4   :  { %1394 = vmatprep.subr.bf16.mxu0 %v8542_v2  ;;  %1507 = vmatprep.subr.bf16.mxu1 %v8545_v3 }
 0x1d5   :  { %1021 = vmatmul.mubr.bf16.gmra.mxu0 %v9534_v46  ;;  %1134 = vmatmul.mubr.bf16.gmra.mxu1 %v9534_v46 }
 0x1d6   :  { %1030 = vmatprep.mubr.bf16.mxu0 %v9306_v56  ;;  %1143 = vmatprep.mubr.bf16.mxu1 %v9306_v56 }
 0x1d7   :  { %1395 = vmatpush1.bf16.msra.mxu0 %v8540_v61  ;;  %1508 = vmatpush1.bf16.msra.mxu1 %v8543_v4 }
 0x1d8   :  { %1396 = vmatprep.subr.bf16.mxu0 %v8548_v8  ;;  %1509 = vmatprep.subr.bf16.mxu1 %v8551_v9 }
 0x1db   :  { %1397 = vmatpush1.bf16.msra.mxu0 %v8546_v16  ;;  %1510 = vmatpush1.bf16.msra.mxu1 %v8549_v17 }
 0x1dc   :  { %1398 = vmatprep.subr.bf16.mxu0 %v8554_v41  ;;  %1511 = vmatprep.subr.bf16.mxu1 %v8557_v60 }
 0x1dd   :  { %1031 = vmatmul.mubr.bf16.gmra.mxu0 %v9546_v5  ;;  %1144 = vmatmul.mubr.bf16.gmra.mxu1 %v9546_v5 }
 0x1de   :  { %1040 = vmatprep.mubr.bf16.mxu0 %v9306_v56  ;;  %1153 = vmatprep.mubr.bf16.mxu1 %v9306_v56 }
 0x1df   :  { %1399 = vmatpush1.bf16.msra.mxu0 %v8552_v18  ;;  %1512 = vmatpush1.bf16.msra.mxu1 %v8555_v20 }
 0x1e0   :  { %1400 = vmatprep.subr.bf16.mxu0 %v8560_v21  ;;  %1513 = vmatprep.subr.bf16.mxu1 %v8563_v22 }
 0x1e3   :  { %1401 = vmatpush1.bf16.msra.mxu0 %v8558_v10  ;;  %1514 = vmatpush1.bf16.msra.mxu1 %v8561_v26 }
 0x1e5   :  { %1041 = vmatmul.mubr.bf16.gmra.mxu0 %v9558_v34  ;;  %1154 = vmatmul.mubr.bf16.gmra.mxu1 %v9558_v34 }
 0x1e6   :  { %1050 = vmatprep.mubr.bf16.mxu0 %v9306_v56  ;;  %1163 = vmatprep.mubr.bf16.mxu1 %v9306_v56 }
 0x1ed   :  { %1051 = vmatmul.mubr.bf16.gmra.mxu0 %v9570_v44  ;;  %1164 = vmatmul.mubr.bf16.gmra.mxu1 %v9570_v44 }
 0x1ee   :  { %1060 = vmatprep.mubr.bf16.mxu0 %v9306_v56  ;;  %1173 = vmatprep.mubr.bf16.mxu1 %v9306_v56 }
 0x1f5   :  { %1061 = vmatmul.mubr.bf16.gmra.mxu0 %v9582_v50  ;;  %1174 = vmatmul.mubr.bf16.gmra.mxu1 %v9582_v50 }
 0x1f6   :  { %1070 = vmatprep.mubr.bf16.mxu0 %v9306_v56  ;;  %1183 = vmatprep.mubr.bf16.mxu1 %v9306_v56 }
 0x1fd   :  { %1071 = vmatmul.mubr.bf16.gmra.mxu0 %v9591_v52  ;;  %1184 = vmatmul.mubr.bf16.gmra.mxu1 %v9591_v52 }
 0x1fe   :  { %1418 = vmatprep.mubr.bf16.mxu0 %v9306_v56  ;;  %1531 = vmatprep.mubr.bf16.mxu1 %v9306_v56 }
 0x205   :  { %1419 = vmatmul.mubr.bf16.vlgmr.msra.gmra.mxu0 %v9510_v54  ;;  %1532 = vmatmul.mubr.bf16.vlgmr.msra.gmra.mxu1 %v9510_v54 }
 0x206   :  { %1428 = vmatprep.mubr.bf16.mxu0 %v9306_v56  ;;  %1541 = vmatprep.mubr.bf16.mxu1 %v9306_v56 }
 0x20d   :  { %1429 = vmatmul.mubr.bf16.gmra.mxu0 %v9522_v19  ;;  %1542 = vmatmul.mubr.bf16.gmra.mxu1 %v9522_v19 }
 0x20e   :  { %1438 = vmatprep.mubr.bf16.mxu0 %v9306_v56  ;;  %1551 = vmatprep.mubr.bf16.mxu1 %v9306_v56 }
 0x215   :  { %1439 = vmatmul.mubr.bf16.gmra.mxu0 %v9534_v46  ;;  %1552 = vmatmul.mubr.bf16.gmra.mxu1 %v9534_v46 }
 0x216   :  { %1448 = vmatprep.mubr.bf16.mxu0 %v9306_v56  ;;  %1561 = vmatprep.mubr.bf16.mxu1 %v9306_v56 }
 0x21d   :  { %1449 = vmatmul.mubr.bf16.gmra.mxu0 %v9546_v5  ;;  %1562 = vmatmul.mubr.bf16.gmra.mxu1 %v9546_v5 }
 0x21e   :  { %1458 = vmatprep.mubr.bf16.mxu0 %v9306_v56  ;;  %1571 = vmatprep.mubr.bf16.mxu1 %v9306_v56 }
 0x225   :  { %1459 = vmatmul.mubr.bf16.gmra.mxu0 %v9558_v34  ;;  %1572 = vmatmul.mubr.bf16.gmra.mxu1 %v9558_v34 }
 0x226   :  { %1468 = vmatprep.mubr.bf16.mxu0 %v9306_v56  ;;  %1581 = vmatprep.mubr.bf16.mxu1 %v9306_v56 }
 0x22d   :  { %1469 = vmatmul.mubr.bf16.gmra.mxu0 %v9570_v44  ;;  %1582 = vmatmul.mubr.bf16.gmra.mxu1 %v9570_v44 }
 0x22e   :  { %1478 = vmatprep.mubr.bf16.mxu0 %v9306_v56  ;;  %1591 = vmatprep.mubr.bf16.mxu1 %v9306_v56 }
 0x235   :  { %1479 = vmatmul.mubr.bf16.gmra.mxu0 %v9582_v50  ;;  %1592 = vmatmul.mubr.bf16.gmra.mxu1 %v9582_v50 }
 0x236   :  { %1488 = vmatprep.mubr.bf16.mxu0 %v9306_v56  ;;  %1601 = vmatprep.mubr.bf16.mxu1 %v9306_v56 }
 0x23d   :  { %1489 = vmatmul.mubr.bf16.gmra.mxu0 %v9591_v52  ;;  %1602 = vmatmul.mubr.bf16.gmra.mxu1 %v9591_v52 }
 0x245   :  { %v584_v54 = vpop.f32.mrf.mxu0  ;;  %v697_v19 = vpop.f32.mrf.mxu1 }
 0x247   :  { %v9659_v46 = vpop.f32.mrf.mxu0  ;;  %v9661_v5 = vpop.f32.mrf.mxu1 }
 0x248   :  { %12169 = vst [vmem:[#allocation19_spill] sm:$0xff] %v9661_v5 }
 0x249   :  { %v588_v27 = vpop.f32.mrf.mxu0  ;;  %v701_v40 = vpop.f32.mrf.mxu1 }
 0x24a   :  { %v9663_v28 = vpack.c.bf16 %v588_v27, %v584_v54  ;;  %v9665_v29 = vpack.c.bf16 %v701_v40, %v697_v19 }
 0x24b   :  { %v9667_v30 = vpop.f32.mrf.mxu0  ;;  %v9669_v56 = vpop.f32.mrf.mxu1 }
 0x24c   :  { %12170 = vst [vmem:[#allocation20_spill] sm:$0xff] %v9669_v56  ;;  %7662 = vmatprep.mubr.msk.bf16.mxu0 %vm1631_vm0, %v9663_v28 }
 0x24d   :  { %v594_v34 = vpop.f32.mrf.mxu0  ;;  %v707_v7 = vpop.f32.mrf.mxu1 }
 0x24f   :  { %v9673_v35 = vpop.f32.mrf.mxu0  ;;  %v9675_v36 = vpop.f32.mrf.mxu1 }
 0x250   :  { %12171 = vst [vmem:[#allocation21_spill] sm:$0xff] %v9675_v36 }
 0x251   :  { %v598_v6 = vpop.f32.mrf.mxu0  ;;  %v711_v12 = vpop.f32.mrf.mxu1 }
 0x252   :  { %v9677_v38 = vpack.c.bf16 %v598_v6, %v594_v34  ;;  %v9679_v39 = vpack.c.bf16 %v711_v12, %v707_v7 }
 0x253   :  { %v9681_v42 = vpop.f32.mrf.mxu0  ;;  %v9683_v43 = vpop.f32.mrf.mxu1 }
 0x254   :  { %12172 = vst [vmem:[#allocation22_spill] sm:$0xff] %v9679_v39  ;;  %12173 = vst [vmem:[#allocation23_spill] sm:$0xff] %v9683_v43 }
 0x255   :  { %v604_v44 = vpop.f32.mrf.mxu0  ;;  %v717_v14 = vpop.f32.mrf.mxu1 }
 0x257   :  { %v9685_v49 = vpop.f32.mrf.mxu0  ;;  %v9687_v45 = vpop.f32.mrf.mxu1 }
 0x258   :  { %12174 = vst [vmem:[#allocation24_spill] sm:$0xff] %v9687_v45 }
 0x259   :  { %v608_v11 = vpop.f32.mrf.mxu0  ;;  %v721_v23 = vpop.f32.mrf.mxu1 }
 0x25a   :  { %v9689_v32 = vpack.c.bf16 %v608_v11, %v604_v44  ;;  %v9691_v15 = vpack.c.bf16 %v721_v23, %v717_v14 }
 0x25b   :  { %v9693_v47 = vpop.f32.mrf.mxu0  ;;  %v9695_v50 = vpop.f32.mrf.mxu1 }
 0x25c   :  { %12175 = vst [vmem:[#allocation25_spill] sm:$0xff] %v9691_v15  ;;  %12176 = vst [vmem:[#allocation26_spill] sm:$0xff] %v9695_v50 }
 0x25d   :  { %v614_v51 = vpop.f32.mrf.mxu0  ;;  %v727_v37 = vpop.f32.mrf.mxu1 }
 0x25f   :  { %v9697_v13 = vpop.f32.mrf.mxu0  ;;  %v9699_v52 = vpop.f32.mrf.mxu1 }
 0x260   :  { %12177 = vst [vmem:[#allocation27_spill] sm:$0xff] %v9699_v52 }
 0x261   :  { %v618_v31 = vpop.f32.mrf.mxu0  ;;  %v731_v48 = vpop.f32.mrf.mxu1 }
 0x262   :  { %v9701_v53 = vpack.c.bf16 %v618_v31, %v614_v51  ;;  %v9703_v55 = vpack.c.bf16 %v731_v48, %v727_v37 }
 0x263   :  { %v9705_v24 = vpop.f32.mrf.mxu0  ;;  %v9707_v57 = vpop.f32.mrf.mxu1 }
 0x264   :  { %12178 = vst [vmem:[#allocation28_spill] sm:$0xff] %v9703_v55  ;;  %12179 = vst [vmem:[#allocation29_spill] sm:$0xff] %v9707_v57 }
 0x265   :  { %v624_v58 = vpop.f32.mrf.mxu0  ;;  %v737_v59 = vpop.f32.mrf.mxu1 }
 0x267   :  { %v9709_v33 = vpop.f32.mrf.mxu0  ;;  %v9711_v62 = vpop.f32.mrf.mxu1 }
 0x268   :  { %12180 = vst [vmem:[#allocation30_spill] sm:$0xff] %v9709_v33  ;;  %12181 = vst [vmem:[#allocation31_spill] sm:$0xff] %v9711_v62 }
 0x269   :  { %v628_v25 = vpop.f32.mrf.mxu0  ;;  %v741_v63 = vpop.f32.mrf.mxu1 }
 0x26a   :  { %v9713_v0 = vpack.c.bf16 %v628_v25, %v624_v58  ;;  %v9715_v1 = vpack.c.bf16 %v741_v63, %v737_v59 }
 0x26b   :  { %v9717_v2 = vpop.f32.mrf.mxu0  ;;  %v9719_v3 = vpop.f32.mrf.mxu1 }
 0x26c   :  { %12182 = vst [vmem:[#allocation32_spill] sm:$0xff] %v9713_v0  ;;  %12183 = vst [vmem:[#allocation33_spill] sm:$0xff] %v9715_v1 }
 0x26d   :  { %12184 = vst [vmem:[#allocation34_spill] sm:$0xff] %v9717_v2  ;;  %12185 = vst [vmem:[#allocation35_spill] sm:$0xff] %v9719_v3  ;;  %v634_v61 = vpop.f32.mrf.mxu0  ;;  %v747_v4 = vpop.f32.mrf.mxu1 }
 0x26f   :  { %v9721_v8 = vpop.f32.mrf.mxu0  ;;  %v9723_v9 = vpop.f32.mrf.mxu1 }
 0x270   :  { %12186 = vst [vmem:[#allocation36_spill] sm:$0xff] %v9721_v8  ;;  %12187 = vst [vmem:[#allocation37_spill] sm:$0xff] %v9723_v9 }
 0x271   :  { %v638_v16 = vpop.f32.mrf.mxu0  ;;  %v751_v17 = vpop.f32.mrf.mxu1 }
 0x272   :  { %v9725_v41 = vpack.c.bf16 %v638_v16, %v634_v61  ;;  %v9727_v60 = vpack.c.bf16 %v751_v17, %v747_v4 }
 0x273   :  { %v9729_v18 = vpop.f32.mrf.mxu0  ;;  %v9731_v20 = vpop.f32.mrf.mxu1 }
 0x274   :  { %12188 = vst [vmem:[#allocation38_spill] sm:$0xff] %v9725_v41  ;;  %12189 = vst [vmem:[#allocation39_spill] sm:$0xff] %v9727_v60 }
 0x275   :  { %12190 = vst [vmem:[#allocation40_spill] sm:$0xff] %v9729_v18  ;;  %12191 = vst [vmem:[#allocation41_spill] sm:$0xff] %v9731_v20  ;;  %v644_v21 = vpop.f32.mrf.mxu0  ;;  %v757_v22 = vpop.f32.mrf.mxu1 }
 0x277   :  { %v9733_v10 = vpop.f32.mrf.mxu0  ;;  %v9735_v26 = vpop.f32.mrf.mxu1 }
 0x278   :  { %12192 = vst [vmem:[#allocation42_spill] sm:$0xff] %v9733_v10  ;;  %12193 = vst [vmem:[#allocation43_spill] sm:$0xff] %v9735_v26 }
 0x279   :  { %v648_v54 = vpop.f32.mrf.mxu0  ;;  %v761_v19 = vpop.f32.mrf.mxu1 }
 0x27a   :  { %v9737_v27 = vpack.c.bf16 %v648_v54, %v644_v21  ;;  %v9739_v40 = vpack.c.bf16 %v761_v19, %v757_v22 }
 0x27b   :  { %v9741_v34 = vpop.f32.mrf.mxu0  ;;  %v9743_v7 = vpop.f32.mrf.mxu1 }
 0x27c   :  { %12194 = vst [vmem:[#allocation44_spill] sm:$0xff] %v9737_v27  ;;  %12195 = vst [vmem:[#allocation45_spill] sm:$0xff] %v9739_v40 }
 0x27d   :  { %12196 = vst [vmem:[#allocation46_spill] sm:$0xff] %v9741_v34  ;;  %12197 = vst [vmem:[#allocation47_spill] sm:$0xff] %v9743_v7  ;;  %v654_v6 = vpop.f32.mrf.mxu0  ;;  %v767_v12 = vpop.f32.mrf.mxu1 }
 0x27f   :  { %v9745_v44 = vpop.f32.mrf.mxu0  ;;  %v9747_v14 = vpop.f32.mrf.mxu1 }
 0x280   :  { %12198 = vst [vmem:[#allocation48_spill] sm:$0xff] %v9745_v44  ;;  %12199 = vst [vmem:[#allocation49_spill] sm:$0xff] %v9747_v14 }
 0x281   :  { %v658_v11 = vpop.f32.mrf.mxu0  ;;  %v771_v23 = vpop.f32.mrf.mxu1 }
 0x282   :  { %v9749_v51 = vpack.c.bf16 %v658_v11, %v654_v6  ;;  %v9751_v37 = vpack.c.bf16 %v771_v23, %v767_v12 }
 0x283   :  { %v9753_v31 = vpop.f32.mrf.mxu0  ;;  %v9755_v48 = vpop.f32.mrf.mxu1 }
 0x284   :  { %12200 = vst [vmem:[#allocation50_spill] sm:$0xff] %v9749_v51  ;;  %12201 = vst [vmem:[#allocation51_spill] sm:$0xff] %v9751_v37 }
 0x285   :  { %12202 = vst [vmem:[#allocation52_spill] sm:$0xff] %v9753_v31  ;;  %12203 = vst [vmem:[#allocation53_spill] sm:$0xff] %v9755_v48  ;;  %v1002_v58 = vpop.f32.mrf.mxu0  ;;  %v1115_v59 = vpop.f32.mrf.mxu1 }
 0x287   :  { %v9757_v25 = vpop.f32.mrf.mxu0  ;;  %v9759_v63 = vpop.f32.mrf.mxu1 }
 0x288   :  { %12204 = vst [vmem:[#allocation54_spill] sm:$0xff] %v9759_v63 }
 0x289   :  { %v1006_v61 = vpop.f32.mrf.mxu0  ;;  %v1119_v4 = vpop.f32.mrf.mxu1 }
 0x28a   :  { %v9761_v16 = vpack.c.bf16 %v1119_v4, %v1115_v59 }
 0x28b   :  { %v9763_v17 = vpop.f32.mrf.mxu0  ;;  %v9765_v21 = vpop.f32.mrf.mxu1 }
 0x28c   :  { %12205 = vst [vmem:[#allocation55_spill] sm:$0xff] %v9765_v21 }
 0x28d   :  { %v1012_v22 = vpop.f32.mrf.mxu0  ;;  %v1125_v54 = vpop.f32.mrf.mxu1 }
 0x28f   :  { %v9767_v19 = vpop.f32.mrf.mxu0  ;;  %v9769_v6 = vpop.f32.mrf.mxu1 }
 0x290   :  { %12206 = vst [vmem:[#allocation56_spill] sm:$0xff] %v9769_v6 }
 0x291   :  { %v1016_v12 = vpop.f32.mrf.mxu0  ;;  %v1129_v11 = vpop.f32.mrf.mxu1 }
 0x292   :  { %v9771_v23 = vpack.c.bf16 %v1129_v11, %v1125_v54  ;;  %v1620_v60 = vpack.c.bf16 %v1016_v12, %v1012_v22 }
 0x293   :  { %v9773_v48 = vpop.f32.mrf.mxu0  ;;  %v9775_v14 = vpop.f32.mrf.mxu1 }
 0x294   :  { %12207 = vst [vmem:[#allocation57_spill] sm:$0xff] %v9775_v14 }
 0x295   :  { %v1022_v59 = vpop.f32.mrf.mxu0  ;;  %v1135_v4 = vpop.f32.mrf.mxu1 }
 0x297   :  { %v9777_v7 = vpop.f32.mrf.mxu0  ;;  %v9779_v26 = vpop.f32.mrf.mxu1 }
 0x298   :  { %12208 = vst [vmem:[#allocation58_spill] sm:$0xff] %v9779_v26 }
 0x299   :  { %v1026_v20 = vpop.f32.mrf.mxu0  ;;  %v1139_v9 = vpop.f32.mrf.mxu1 }
 0x29a   :  { %v1621_v3 = vpack.c.bf16 %v1026_v20, %v1022_v59  ;;  %v9781_v62 = vpack.c.bf16 %v1139_v9, %v1135_v4  ;;  %v1619_v20 = vpack.c.bf16 %v1006_v61, %v1002_v58 }
 0x29b   :  { %v9783_v37 = vpop.f32.mrf.mxu0  ;;  %v9785_v40 = vpop.f32.mrf.mxu1 }
 0x29c   :  { %12209 = vst [vmem:[#allocation59_spill] sm:$0xff] %v9785_v40  ;;  %1910 = vrot.lane.b32.xlu1 %v1621_v3, %s9304_s4 }
 0x29d   :  { %v1032_v54 = vpop.f32.mrf.mxu0  ;;  %v1145_v11 = vpop.f32.mrf.mxu1 }
 0x29f   :  { %v9788_v1 = vpop.f32.mrf.mxu0  ;;  %v9790_v31 = vpop.f32.mrf.mxu1 }
 0x2a0   :  { %12210 = vst [vmem:[#allocation60_spill] sm:$0xff] %v9790_v31  ;;  %1908 = vrot.lane.b32.xlu1 %v1620_v60, %s9304_s4 }
 0x2a1   :  { %v1036_v44 = vpop.f32.mrf.mxu0  ;;  %v1149_v34 = vpop.f32.mrf.mxu1 }
 0x2a2   :  { %v1622_v9 = vpack.c.bf16 %v1036_v44, %v1032_v54  ;;  %v9793_v59 = vpack.c.bf16 %v1149_v34, %v1145_v11 }
 0x2a3   :  { %v9795_v4 = vpop.f32.mrf.mxu0  ;;  %v9797_v10 = vpop.f32.mrf.mxu1 }
 0x2a4   :  { %12211 = vst [vmem:[#allocation61_spill] sm:$0xff] %v9797_v10  ;;  %1906 = vrot.lane.b32.xlu1 %v1619_v20, %s9304_s4  ;;  %1912 = vrot.lane.b32.xlu0 %v1622_v9, %s9304_s4  ;;  %v1654_v22 = vsel %vm1631_vm0, %v1622_v9, 0 }
 0x2a5   :  { %8182 = vmatprep.subr.msk.bf16.mxu0 %vm1631_vm0, %v1622_v9  ;;  %v1042_v12 = vpop.f32.mrf.mxu0  ;;  %v1155_v18 = vpop.f32.mrf.mxu1 }
 0x2a6   :  { %7655 = vmatpush3.bf16.xpose.msra.mxu0 %v1654_v22 }
 0x2a7   :  { %8183 = vmatprep.subr.msk.bf16.mxu0 %vm1631_vm0, %v1621_v3  ;;  %v9804_v44 = vpop.f32.mrf.mxu0  ;;  %v9806_v34 = vpop.f32.mrf.mxu1 }
 0x2a8   :  { %12212 = vst [vmem:[#allocation62_spill] sm:$0xff] %v9804_v44  ;;  %12213 = vst [vmem:[#allocation63_spill] sm:$0xff] %v9806_v34  ;;  %1896 = vrot.lane.b32.xlu1 %v9677_v38, %s9304_s4  ;;  %1894 = vrot.lane.b32.xlu0 %v9663_v28, %s9304_s4  ;;  %v1651_v28 = vsel %vm1631_vm0, %v1621_v3, 0  ;;  %v1648_v3 = vsel %vm1631_vm0, %v1620_v60, 0 }
 0x2a9   :  { %v1046_v58 = vpop.f32.mrf.mxu0  ;;  %v1159_v61 = vpop.f32.mrf.mxu1 }
 0x2aa   :  { %v9812_v54 = vpack.c.bf16 %v1046_v58, %v1042_v12  ;;  %v9814_v11 = vpack.c.bf16 %v1159_v61, %v1155_v18 }
 0x2ab   :  { %v9816_v9 = vpop.f32.mrf.mxu0  ;;  %v9818_v22 = vpop.f32.mrf.mxu1 }
 0x2ac   :  { %12214 = vst [vmem:[#allocation64_spill] sm:$0xff] %v9812_v54  ;;  %12215 = vst [vmem:[#allocation65_spill] sm:$0xff] %v9814_v11  ;;  %1900 = vrot.lane.b32.xlu1 %v9701_v53, %s9304_s4  ;;  %1898 = vrot.lane.b32.xlu0 %v9689_v32, %s9304_s4 }
 0x2ad   :  { %12216 = vst [vmem:[#allocation66_spill] sm:$0xff] %v9816_v9  ;;  %12217 = vst [vmem:[#allocation67_spill] sm:$0xff] %v9818_v22  ;;  %v1052_v34 = vpop.f32.mrf.mxu0  ;;  %v1165_v8 = vpop.f32.mrf.mxu1 }
 0x2ae   :  { %7657 = vmatpush3.bf16.xpose.msra.mxu0 %v1651_v28 }
 0x2af   :  { %8184 = vmatprep.subr.msk.bf16.mxu0 %vm1631_vm0, %v1620_v60  ;;  %v9826_v12 = vpop.f32.mrf.mxu0  ;;  %v9828_v18 = vpop.f32.mrf.mxu1  ;;  %v1645_v60 = vsel %vm1631_vm0, %v1619_v20, 0 }
 0x2b0   :  { %12218 = vst [vmem:[#allocation68_spill] sm:$0xff] %v9826_v12  ;;  %12219 = vst [vmem:[#allocation69_spill] sm:$0xff] %v9828_v18 }
 0x2b1   :  { %v1056_v58 = vpop.f32.mrf.mxu0  ;;  %v1169_v61 = vpop.f32.mrf.mxu1 }
 0x2b2   :  { %v9830_v22 = vpack.c.bf16 %v1056_v58, %v1052_v34  ;;  %v9832_v11 = vpack.c.bf16 %v1169_v61, %v1165_v8 }
 0x2b3   :  { %v9834_v2 = vpop.f32.mrf.mxu0  ;;  %v9836_v33 = vpop.f32.mrf.mxu1 }
 0x2b4   :  { %12220 = vst [vmem:[#allocation70_spill] sm:$0xff] %v9830_v22  ;;  %12221 = vst [vmem:[#allocation71_spill] sm:$0xff] %v9832_v11 }
 0x2b5   :  { %12222 = vst [vmem:[#allocation72_spill] sm:$0xff] %v9834_v2  ;;  %12223 = vst [vmem:[#allocation73_spill] sm:$0xff] %v9836_v33  ;;  %v1062_v9 = vpop.f32.mrf.mxu0  ;;  %v1175_v44 = vpop.f32.mrf.mxu1 }
 0x2b6   :  { %7659 = vmatpush3.bf16.xpose.msra.mxu0 %v1648_v3 }
 0x2b7   :  { %8185 = vmatprep.subr.msk.bf16.mxu0 %vm1631_vm0, %v1619_v20  ;;  %v9840_v28 = vpop.f32.mrf.mxu0  ;;  %v9842_v18 = vpop.f32.mrf.mxu1 }
 0x2b8   :  { %12224 = vst [vmem:[#allocation74_spill] sm:$0xff] %v9840_v28  ;;  %12225 = vst [vmem:[#allocation75_spill] sm:$0xff] %v9842_v18 }
 0x2b9   :  { %v1066_v12 = vpop.f32.mrf.mxu0  ;;  %v1179_v34 = vpop.f32.mrf.mxu1 }
 0x2ba   :  { %v9844_v58 = vpack.c.bf16 %v1066_v12, %v1062_v9  ;;  %v9846_v8 = vpack.c.bf16 %v1179_v34, %v1175_v44 }
 0x2bb   :  { %v9848_v61 = vpop.f32.mrf.mxu0  ;;  %v9850_v33 = vpop.f32.mrf.mxu1 }
 0x2bc   :  { %12226 = vst [vmem:[#allocation76_spill] sm:$0xff] %v9844_v58  ;;  %12227 = vst [vmem:[#allocation77_spill] sm:$0xff] %v9846_v8 }
 0x2bd   :  { %12228 = vst [vmem:[#allocation78_spill] sm:$0xff] %v9848_v61  ;;  %12229 = vst [vmem:[#allocation79_spill] sm:$0xff] %v9850_v33  ;;  %v1072_v11 = vpop.f32.mrf.mxu0  ;;  %v1185_v2 = vpop.f32.mrf.mxu1 }
 0x2be   :  { %7661 = vmatpush3.bf16.xpose.msra.mxu0 %v1645_v60 }
 0x2bf   :  { %v9853_v3 = vpop.f32.mrf.mxu0  ;;  %v9855_v28 = vpop.f32.mrf.mxu1 }
 0x2c0   :  { %12230 = vst [vmem:[#allocation80_spill] sm:$0xff] %v9853_v3  ;;  %12231 = vst [vmem:[#allocation81_spill] sm:$0xff] %v9855_v28 }
 0x2c1   :  { %v1076_v18 = vpop.f32.mrf.mxu0  ;;  %v1189_v51 = vpop.f32.mrf.mxu1 }
 0x2c2   :  { %v9857_v27 = vpack.c.bf16 %v1076_v18, %v1072_v11  ;;  %v9859_v9 = vpack.c.bf16 %v1189_v51, %v1185_v2 }
 0x2c3   :  { %v9861_v44 = vpop.f32.mrf.mxu0  ;;  %v9863_v12 = vpop.f32.mrf.mxu1 }
 0x2c4   :  { %12232 = vst [vmem:[#allocation82_spill] sm:$0xff] %v9857_v27  ;;  %12233 = vst [vmem:[#allocation83_spill] sm:$0xff] %v9859_v9 }
 0x2c5   :  { %12234 = vst [vmem:[#allocation84_spill] sm:$0xff] %v9861_v44  ;;  %12235 = vst [vmem:[#allocation85_spill] sm:$0xff] %v9863_v12  ;;  %7663 = vmatmul.mubr.msk.bf16.vlgmr.msra.gmra.mxu0 %vm1631_vm0, %v9677_v38  ;;  %v1420_v34 = vpop.f32.mrf.mxu0  ;;  %v1533_v20 = vpop.f32.mrf.mxu1 }
 0x2c6   :  { %7666 = vmatprep.mubr.msk.bf16.mxu0 %vm1631_vm0, %v9689_v32 }
 0x2c7   :  { %v9869_v60 = vpop.f32.mrf.mxu0  ;;  %v9871_v33 = vpop.f32.mrf.mxu1 }
 0x2c8   :  { %12236 = vst [vmem:[#allocation86_spill] sm:$0xff] %v9871_v33 }
 0x2c9   :  { %v1424_v11 = vpop.f32.mrf.mxu0  ;;  %v1537_v18 = vpop.f32.mrf.mxu1 }
 0x2ca   :  { %v9873_v2 = vpack.c.bf16 %v1537_v18, %v1533_v20  ;;  %v9934_v26 = vpack.c.bf16 %v1424_v11, %v1420_v34 }
 0x2cb   :  { %v9875_v51 = vpop.f32.mrf.mxu0  ;;  %v9877_v28 = vpop.f32.mrf.mxu1 }
 0x2cc   :  { %12237 = vst [vmem:[#allocation87_spill] sm:$0xff] %v9877_v28 }
 0x2cd   :  { %7667 = vmatmul.mubr.msk.bf16.gmra.mxu0 %vm1631_vm0, %v9701_v53  ;;  %v1430_v38 = vpop.f32.mrf.mxu0  ;;  %v1543_v12 = vpop.f32.mrf.mxu1 }
 0x2cf   :  { %v9881_v8 = vpop.f32.mrf.mxu0  ;;  %v9883_v32 = vpop.f32.mrf.mxu1 }
 0x2d0   :  { %12238 = vst [vmem:[#allocation88_spill] sm:$0xff] %v9883_v32 }
 0x2d1   :  { %v1434_v9 = vpop.f32.mrf.mxu0  ;;  %v1547_v61 = vpop.f32.mrf.mxu1 }
 0x2d2   :  { %v9885_v44 = vpack.c.bf16 %v1547_v61, %v1543_v12 }
 0x2d3   :  { %v9887_v3 = vpop.f32.mrf.mxu0  ;;  %v9889_v20 = vpop.f32.mrf.mxu1 }
 0x2d4   :  { %12239 = vst [vmem:[#allocation89_spill] sm:$0xff] %v9889_v20 }
 0x2d5   :  { %v1440_v18 = vpop.f32.mrf.mxu0  ;;  %v1553_v41 = vpop.f32.mrf.mxu1 }
 0x2d7   :  { %v9891_v0 = vpop.f32.mrf.mxu0  ;;  %v9893_v54 = vpop.f32.mrf.mxu1 }
 0x2d8   :  { %12240 = vst [vmem:[#allocation90_spill] sm:$0xff] %v9893_v54 }
 0x2d9   :  { %v1444_v53 = vpop.f32.mrf.mxu0  ;;  %v1557_v22 = vpop.f32.mrf.mxu1 }
 0x2da   :  { %v9895_v58 = vpack.c.bf16 %v1557_v22, %v1553_v41  ;;  %v9913_v22 = vpack.c.bf16 %v1444_v53, %v1440_v18 }
 0x2db   :  { %v9897_v27 = vpop.f32.mrf.mxu0  ;;  %v9899_v57 = vpop.f32.mrf.mxu1 }
 0x2dc   :  { %12241 = vst [vmem:[#allocation91_spill] sm:$0xff] %v9899_v57 }
 0x2dd   :  { %v1450_v61 = vpop.f32.mrf.mxu0  ;;  %v1563_v12 = vpop.f32.mrf.mxu1 }
 0x2df   :  { %v9901_v52 = vpop.f32.mrf.mxu0  ;;  %v9903_v50 = vpop.f32.mrf.mxu1 }
 0x2e0   :  { %12242 = vst [vmem:[#allocation92_spill] sm:$0xff] %v9903_v50 }
 0x2e1   :  { %v1454_v45 = vpop.f32.mrf.mxu0  ;;  %v1567_v43 = vpop.f32.mrf.mxu1 }
 0x2e2   :  { %v9905_v36 = vpack.c.bf16 %v1454_v45, %v1450_v61  ;;  %v9907_v56 = vpack.c.bf16 %v1567_v43, %v1563_v12  ;;  %v9922_v43 = vpack.c.bf16 %v1434_v9, %v1430_v38 }
 0x2e3   :  { %v9909_v5 = vpop.f32.mrf.mxu0  ;;  %v9911_v41 = vpop.f32.mrf.mxu1 }
 0x2e4   :  { %12243 = vst [vmem:[#allocation93_spill] sm:$0xff] %v9911_v41  ;;  %7670 = vmatprep.subr.bf16.mxu1 %v9905_v36 }
 0x2e5   :  { %v1460_v21 = vpop.f32.mrf.mxu0  ;;  %v1573_v63 = vpop.f32.mrf.mxu1  ;;  %7671 = vmatpush3.bf16.msra.mxu1 %v9905_v36 }
 0x2e6   :  { %7672 = vmatprep.subr.bf16.mxu1 %v9913_v22 }
 0x2e7   :  { %v9918_v14 = vpop.f32.mrf.mxu0  ;;  %v9920_v45 = vpop.f32.mrf.mxu1 }
 0x2e8   :  { %12244 = vst [vmem:[#allocation94_spill] sm:$0xff] %v9918_v14  ;;  %12245 = vst [vmem:[#allocation95_spill] sm:$0xff] %v9920_v45 }
 0x2e9   :  { %v1464_v61 = vpop.f32.mrf.mxu0  ;;  %v1577_v12 = vpop.f32.mrf.mxu1  ;;  %7673 = vmatpush3.bf16.msra.mxu1 %v9913_v22 }
 0x2ea   :  { %v9925_v18 = vpack.c.bf16 %v1464_v61, %v1460_v21  ;;  %v9927_v53 = vpack.c.bf16 %v1577_v12, %v1573_v63  ;;  %7674 = vmatprep.subr.bf16.mxu1 %v9922_v43 }
 0x2eb   :  { %v9930_v6 = vpop.f32.mrf.mxu0  ;;  %v9932_v40 = vpop.f32.mrf.mxu1 }
 0x2ec   :  { %12246 = vst [vmem:[#allocation96_spill] sm:$0xff] %v9925_v18  ;;  %12247 = vst [vmem:[#allocation97_spill] sm:$0xff] %v9927_v53 }
 0x2ed   :  { %12248 = vst [vmem:[#allocation98_spill] sm:$0xff] %v9930_v6  ;;  %12249 = vst [vmem:[#allocation99_spill] sm:$0xff] %v9932_v40  ;;  %v1470_v14 = vpop.f32.mrf.mxu0  ;;  %v1583_v45 = vpop.f32.mrf.mxu1  ;;  %7675 = vmatpush3.bf16.msra.mxu1 %v9922_v43 }
 0x2ee   :  { %7676 = vmatprep.subr.bf16.mxu1 %v9934_v26 }
 0x2ef   :  { %v9938_v9 = vpop.f32.mrf.mxu0  ;;  %v9940_v21 = vpop.f32.mrf.mxu1 }
 0x2f0   :  { %12250 = vst [vmem:[#allocation100_spill] sm:$0xff] %v9938_v9  ;;  %12251 = vst [vmem:[#allocation101_spill] sm:$0xff] %v9940_v21 }
 0x2f1   :  { %v1474_v63 = vpop.f32.mrf.mxu0  ;;  %v1587_v38 = vpop.f32.mrf.mxu1  ;;  %7677 = vmatpush3.bf16.msra.mxu1 %v9934_v26 }
 0x2f2   :  { %v9943_v61 = vpack.c.bf16 %v1474_v63, %v1470_v14  ;;  %v9945_v12 = vpack.c.bf16 %v1587_v38, %v1583_v45 }
 0x2f3   :  { %v9947_v34 = vpop.f32.mrf.mxu0  ;;  %v9949_v11 = vpop.f32.mrf.mxu1 }
 0x2f4   :  { %12252 = vst [vmem:[#allocation102_spill] sm:$0xff] %v9943_v61  ;;  %12253 = vst [vmem:[#allocation103_spill] sm:$0xff] %v9945_v12 }
 0x2f5   :  { %12254 = vst [vmem:[#allocation104_spill] sm:$0xff] %v9947_v34  ;;  %12255 = vst [vmem:[#allocation105_spill] sm:$0xff] %v9949_v11  ;;  %v1480_v40 = vpop.f32.mrf.mxu0  ;;  %v1593_v53 = vpop.f32.mrf.mxu1 }
 0x2f7   :  { %v9951_v6 = vpop.f32.mrf.mxu0  ;;  %v9953_v18 = vpop.f32.mrf.mxu1 }
 0x2f8   :  { %12256 = vst [vmem:[#allocation106_spill] sm:$0xff] %v9951_v6  ;;  %12257 = vst [vmem:[#allocation107_spill] sm:$0xff] %v9953_v18 }
 0x2f9   :  { %v1484_v9 = vpop.f32.mrf.mxu0  ;;  %v1597_v21 = vpop.f32.mrf.mxu1 }
 0x2fa   :  { %v9955_v10 = vpack.c.bf16 %v1484_v9, %v1480_v40  ;;  %v9957_v31 = vpack.c.bf16 %v1597_v21, %v1593_v53 }
 0x2fb   :  { %v9959_v14 = vpop.f32.mrf.mxu0  ;;  %v9961_v45 = vpop.f32.mrf.mxu1 }
 0x2fc   :  { %12258 = vst [vmem:[#allocation108_spill] sm:$0xff] %v9955_v10  ;;  %12259 = vst [vmem:[#allocation109_spill] sm:$0xff] %v9957_v31 }
 0x2fd   :  { %12260 = vst [vmem:[#allocation110_spill] sm:$0xff] %v9959_v14  ;;  %12261 = vst [vmem:[#allocation111_spill] sm:$0xff] %v9961_v45  ;;  %v1490_v63 = vpop.f32.mrf.mxu0  ;;  %v1603_v38 = vpop.f32.mrf.mxu1 }
 0x2ff   :  { %v9963_v12 = vpop.f32.mrf.mxu0  ;;  %v9965_v11 = vpop.f32.mrf.mxu1 }
 0x300   :  { %12262 = vst [vmem:[#allocation112_spill] sm:$0xff] %v9963_v12  ;;  %12263 = vst [vmem:[#allocation113_spill] sm:$0xff] %v9965_v11 }
 0x301   :  { %v1494_v34 = vpop.f32.mrf.mxu0  ;;  %v1607_v6 = vpop.f32.mrf.mxu1 }
 0x302   :  { %v9967_v61 = vpack.c.bf16 %v1494_v34, %v1490_v63  ;;  %v9969_v18 = vpack.c.bf16 %v1607_v6, %v1603_v38  ;;  %v9981_v63 = vpack.c.bf16 %v9909_v5, %v9901_v52  ;;  %v9995_v5 = vpack.c.bf16 %v9887_v3, %v9881_v8  ;;  %v10009_v8 = vld [vmem:[#allocation5] ss:$0 sm:$0xff] }
 0x304   :  { %12264 = vst [vmem:[#allocation114_spill] sm:$0xff] %v9967_v61  ;;  %12265 = vst [vmem:[#allocation115_spill] sm:$0xff] %v9969_v18 }
 0x30e   :  { %v1911_v9 = vpop.permute.xlu1 %1910 }
 0x30f   :  { %v1933_v45 = vsel %vm1631_vm0, %v1911_v9, 0 }
 0x312   :  { %v1909_v11 = vpop.permute.xlu1 %1908 }
 0x313   :  { %v1930_v6 = vsel %vm1631_vm0, %v1909_v11, 0 }
 0x316   :  { %v1913_v40 = vpop.permute.xlu0 %1912  ;;  %v1907_v34 = vpop.permute.xlu1 %1906 }
 0x317   :  { %8186 = vmatprep.subr.msk.bf16.mxu0 %vm1631_vm0, %v1913_v40  ;;  %v1936_v53 = vsel %vm1631_vm0, %v1913_v40, 0  ;;  %v1927_v38 = vsel %vm1631_vm0, %v1907_v34, 0 }
 0x318   :  { %7687 = vmatpush3.bf16.xpose.msra.mxu0 %v1936_v53 }
 0x319   :  { %8187 = vmatprep.subr.msk.bf16.mxu0 %vm1631_vm0, %v1911_v9 }
 0x31a   :  { %v1895_v21 = vpop.permute.xlu0 %1894  ;;  %v1897_v40 = vpop.permute.xlu1 %1896 }
 0x31b   :  { %7694 = vmatprep.mubr.msk.bf16.mxu0 %vm1631_vm0, %v1895_v21 }
 0x31e   :  { %v1899_v53 = vpop.permute.xlu0 %1898  ;;  %v1901_v52 = vpop.permute.xlu1 %1900 }
 0x320   :  { %7689 = vmatpush3.bf16.xpose.msra.mxu0 %v1933_v45  ;;  %v9987_v45 = vpack.c.bf16 %v9897_v27, %v9891_v0  ;;  %v10001_v0 = vpack.c.bf16 %v9875_v51, %v9869_v60  ;;  %v10007_v27 = vpop.f32.mrf.mxu0 }
 0x321   :  { %8188 = vmatprep.subr.msk.bf16.mxu0 %vm1631_vm0, %v1909_v11  ;;  %12266 = vst [vmem:[#allocation116_spill] sm:$0xff] %v10007_v27 }
 0x328   :  { %7691 = vmatpush3.bf16.xpose.msra.mxu0 %v1930_v6 }
 0x329   :  { %8189 = vmatprep.subr.msk.bf16.mxu0 %vm1631_vm0, %v1907_v34 }
 0x330   :  { %7693 = vmatpush3.bf16.xpose.msra.mxu0 %v1927_v38 }
 0x331   :  { %7734 = vmatprep.subr.bf16.mxu0 %v9981_v63 }
 0x337   :  { %7695 = vmatmul.mubr.msk.bf16.vlgmr.msra.gmra.mxu0 %vm1631_vm0, %v1897_v40 }
 0x338   :  { %7698 = vmatprep.mubr.msk.bf16.mxu0 %vm1631_vm0, %v1899_v53  ;;  %7735 = vmatpush3.bf16.msra.mxu0 %v9981_v63 }
 0x339   :  { %7736 = vmatprep.subr.bf16.mxu0 %v9987_v45 }
 0x33c   :  { %7737 = vmatpush3.bf16.msra.mxu0 %v9987_v45 }
 0x33d   :  { %7738 = vmatprep.subr.bf16.mxu0 %v9995_v5 }
 0x33f   :  { %7699 = vmatmul.mubr.msk.bf16.gmra.mxu0 %vm1631_vm0, %v1901_v52 }
 0x340   :  { %7739 = vmatpush3.bf16.msra.mxu0 %v9995_v5 }
 0x341   :  { %7740 = vmatprep.subr.bf16.mxu0 %v10001_v0 }
 0x344   :  { %7741 = vmatpush3.bf16.msra.mxu0 %v10001_v0 }
 0x385   :  { %v7664_v3 = vpop.f32.mrf.mxu0 }
 0x386   :  { %v10012_v11 = vadd.f32 %v7664_v3, %v10009_v8 }
 0x387   :  { %v1690_v9 = vpop.f32.mrf.mxu0 }
 0x388   :  { %v10015_v60 = vadd.f32 %v10009_v8, %v1690_v9  ;;  %v1727_v51 = vsel %vm1631_vm0, %v10012_v11, -inf }
 0x389   :  { %1728 = vmax.xlane.f32.xlu0 %v1727_v51  ;;  %v7665_v21 = vpop.f32.mrf.mxu0 }
 0x38a   :  { %v10020_v34 = vadd.f32 %v7665_v21, %v10009_v8  ;;  %v1721_v40 = vsel %vm1631_vm0, %v10015_v60, -inf }
 0x38b   :  { %v1693_v6 = vpop.f32.mrf.mxu0 }
 0x38c   :  { %v10023_v38 = vadd.f32 %v10009_v8, %v1693_v6  ;;  %v1730_v51 = vsel %vm1631_vm0, %v10020_v34, -inf }
 0x38d   :  { %v7668_v53 = vpop.f32.mrf.mxu0  ;;  %1722 = vmax.xlane.f32.xlu0 %v1721_v40 }
 0x38e   :  { %v1724_v52 = vsel %vm1631_vm0, %v10023_v38, -inf  ;;  %v10038_v18 = vadd.f32 %v7668_v53, %v10009_v8 }
 0x38f   :  { %v1706_v3 = vpop.f32.mrf.mxu0  ;;  %1725 = vmax.xlane.f32.xlu1 %v1724_v52 }
 0x390   :  { %v10030_v9 = vadd.f32 %v10009_v8, %v1706_v3 }
 0x391   :  { %v7669_v21 = vpop.f32.mrf.mxu0  ;;  %1731 = vmax.xlane.f32.xlu0 %v1730_v51 }
 0x392   :  { %v10035_v6 = vadd.f32 %v7669_v21, %v10009_v8  ;;  %v1733_v3 = vsel %vm1631_vm0, %v10030_v9, -inf  ;;  %v1739_v21 = vsel %vm1631_vm0, %v10038_v18, -inf }
 0x393   :  { %v1709_v31 = vpop.f32.mrf.mxu0 }
 0x394   :  { %v10041_v40 = vadd.f32 %v10009_v8, %v1709_v31  ;;  %v1742_v52 = vsel %vm1631_vm0, %v10035_v6, -inf }
 0x395   :  { %1743 = vmax.xlane.f32.xlu1 %v1742_v52  ;;  %1734 = vmax.xlane.f32.xlu0 %v1733_v3 }
 0x396   :  { %v1736_v51 = vsel %vm1631_vm0, %v10041_v40, -inf }
 0x399   :  { %1737 = vmax.xlane.f32.xlu1 %v1736_v51  ;;  %1740 = vmax.xlane.f32.xlu0 %v1739_v21 }
 0x3f7   :  { %v7696_v53 = vpop.f32.mrf.mxu0 }
 0x3f8   :  { %v10055_v12 = vadd.f32 %v7696_v53, %v10009_v8 }
 0x3f9   :  { %v1972_v14 = vpop.f32.mrf.mxu0 }
 0x3fa   :  { %v10052_v31 = vadd.f32 %v10009_v8, %v1972_v14  ;;  %v2009_v53 = vsel %vm1631_vm0, %v10055_v12, -inf }
 0x3fb   :  { %v7697_v27 = vpop.f32.mrf.mxu0 }
 0x3fc   :  { %v10058_v52 = vadd.f32 %v7697_v27, %v10009_v8  ;;  %v2003_v3 = vsel %vm1631_vm0, %v10052_v31, -inf }
 0x3fd   :  { %v1975_v10 = vpop.f32.mrf.mxu0  ;;  %2004 = vmax.xlane.f32.xlu0 %v2003_v3 }
 0x3fe   :  { %v10063_v51 = vadd.f32 %v10009_v8, %v1975_v10  ;;  %v2012_v21 = vsel %vm1631_vm0, %v10058_v52, -inf }
 0x3ff   :  { %v7700_v14 = vpop.f32.mrf.mxu0  ;;  %2013 = vmax.xlane.f32.xlu1 %v2012_v21 }
 0x400   :  { %v2006_v28 = vsel %vm1631_vm0, %v10063_v51, -inf  ;;  %v10075_v10 = vadd.f32 %v7700_v14, %v10009_v8 }
 0x401   :  { %v1988_v61 = vpop.f32.mrf.mxu0  ;;  %2010 = vmax.xlane.f32.xlu0 %v2009_v53 }
 0x402   :  { %v10070_v27 = vadd.f32 %v10009_v8, %v1988_v61 }
 0x403   :  { %v7701_v3 = vpop.f32.mrf.mxu0  ;;  %2007 = vmax.xlane.f32.xlu1 %v2006_v28  ;;  %v2021_v28 = vsel %vm1631_vm0, %v10075_v10, -inf }
 0x404   :  { %v10078_v33 = vadd.f32 %v7701_v3, %v10009_v8  ;;  %v2015_v21 = vsel %vm1631_vm0, %v10070_v27, -inf }
 0x405   :  { %v1991_v20 = vpop.f32.mrf.mxu0  ;;  %2016 = vmax.xlane.f32.xlu0 %v2015_v21 }
 0x406   :  { %v10083_v53 = vadd.f32 %v10009_v8, %v1991_v20  ;;  %v2024_v61 = vsel %vm1631_vm0, %v10078_v33, -inf }
 0x407   :  { %2025 = vmax.xlane.f32.xlu1 %v2024_v61 }
 0x408   :  { %v2018_v14 = vsel %vm1631_vm0, %v10083_v53, -inf }
 0x409   :  { %2022 = vmax.xlane.f32.xlu0 %v2021_v28 }
 0x40b   :  { %2019 = vmax.xlane.f32.xlu1 %v2018_v14 }
 0x412   :  { %v1729_v3 = vpop.xlane.xlu0 %1728 }
 0x413   :  { %v1747_v32 = vsub.f32 %v10012_v11, %v1729_v3 }
 0x415   :  { %v1757_v57 = vmul.f32 1.442695, %v1747_v32 }
 0x416   :  { %v1723_v21 = vpop.xlane.xlu0 %1722 }
 0x417   :  { %8628 = vpow2.f32 %v1757_v57  ;;  %v1745_v20 = vsub.f32 %v10015_v60, %v1723_v21 }
 0x418   :  { %v1726_v54 = vpop.xlane.xlu1 %1725 }
 0x419   :  { %v1753_v41 = vmul.f32 1.442695, %v1745_v20  ;;  %v1746_v61 = vsub.f32 %v10023_v38, %v1726_v54 }
 0x41a   :  { %v1732_v50 = vpop.xlane.xlu0 %1731 }
 0x41b   :  { %8630 = vpow2.f32 %v1753_v41  ;;  %v1748_v28 = vsub.f32 %v10020_v34, %v1732_v50  ;;  %v1755_v55 = vmul.f32 1.442695, %v1746_v61 }
 0x41d   :  { %v1759_v15 = vmul.f32 1.442695, %v1748_v28 }
 0x41e   :  { %v1744_v39 = vpop.xlane.xlu1 %1743  ;;  %v1735_v14 = vpop.xlane.xlu0 %1734 }
 0x41f   :  { %8632 = vpow2.f32 %v1759_v15  ;;  %v1752_v11 = vsub.f32 %v10035_v6, %v1744_v39  ;;  %v1749_v57 = vsub.f32 %v10030_v9, %v1735_v14 }
 0x420   :  { %8634 = vpow2.f32 %v1755_v55 }
 0x421   :  { %v1767_v32 = vmul.f32 1.442695, %v1752_v11  ;;  %v1761_v38 = vmul.f32 1.442695, %v1749_v57 }
 0x422   :  { %v1738_v60 = vpop.xlane.xlu1 %1737  ;;  %v1741_v3 = vpop.xlane.xlu0 %1740 }
 0x423   :  { %v1750_v21 = vsub.f32 %v10041_v40, %v1738_v60  ;;  %v1751_v54 = vsub.f32 %v10038_v18, %v1741_v3  ;;  %8636 = vpow2.f32 %v1767_v32 }
 0x424   :  { %v10099_v41 = vpop.eup %8628 }
 0x425   :  { %v1763_v50 = vmul.f32 1.442695, %v1750_v21  ;;  %v1765_v34 = vmul.f32 1.442695, %v1751_v54  ;;  %v1775_v15 = vsel %vm1631_vm0, %v10099_v41, 0.0 }
 0x426   :  { %1776 = vadd.xlane.f32.xlu0 %v1775_v15 }
 0x427   :  { %8638 = vpow2.f32 %v1765_v34 }
 0x428   :  { %v10103_v39 = vpop.eup %8630  ;;  %8640 = vpow2.f32 %v1763_v50 }
 0x429   :  { %v1769_v55 = vsel %vm1631_vm0, %v10103_v39, 0.0  ;;  %8642 = vpow2.f32 %v1761_v38 }
 0x42a   :  { %1770 = vadd.xlane.f32.xlu0 %v1769_v55 }
 0x42c   :  { %v10107_v18 = vpop.eup %8632 }
 0x42d   :  { %v1778_v9 = vsel %vm1631_vm0, %v10107_v18, 0.0  ;;  %v10111_v6 = vpop.eup %8634 }
 0x42e   :  { %1779 = vadd.xlane.f32.xlu1 %v1778_v9  ;;  %v1772_v40 = vsel %vm1631_vm0, %v10111_v6, 0.0 }
 0x430   :  { %v10115_v20 = vpop.eup %8636 }
 0x431   :  { %v1790_v28 = vsel %vm1631_vm0, %v10115_v20, 0.0 }
 0x432   :  { %1773 = vadd.xlane.f32.xlu1 %v1772_v40 }
 0x434   :  { %v10117_v61 = vpop.eup %8638 }
 0x435   :  { %v10121_v14 = vpop.eup %8640  ;;  %v1787_v11 = vsel %vm1631_vm0, %v10117_v61, 0.0 }
 0x436   :  { %1791 = vadd.xlane.f32.xlu1 %v1790_v28  ;;  %v10125_v32 = vpop.eup %8642  ;;  %1788 = vadd.xlane.f32.xlu0 %v1787_v11  ;;  %v1784_v57 = vsel %vm1631_vm0, %v10121_v14, 0.0 }
 0x437   :  { %v1781_v60 = vsel %vm1631_vm0, %v10125_v32, 0.0 }
 0x43a   :  { %1785 = vadd.xlane.f32.xlu1 %v1784_v57  ;;  %1782 = vadd.xlane.f32.xlu0 %v1781_v60 }
 0x44b   :  { %2103 = vrot.lane.b32.xlu1 %v9913_v22, %s9304_s4 }
 0x44f   :  { %2101 = vrot.lane.b32.xlu1 %v9922_v43, %s9304_s4 }
 0x486   :  { %v2005_v3 = vpop.xlane.xlu0 %2004 }
 0x487   :  { %v2027_v21 = vsub.f32 %v10052_v31, %v2005_v3 }
 0x488   :  { %v2014_v54 = vpop.xlane.xlu1 %2013 }
 0x489   :  { %v2030_v50 = vsub.f32 %v10058_v52, %v2014_v54  ;;  %v2035_v55 = vmul.f32 1.442695, %v2027_v21 }
 0x48a   :  { %v2011_v34 = vpop.xlane.xlu0 %2010 }
 0x48b   :  { %v2041_v15 = vmul.f32 1.442695, %v2030_v50  ;;  %v2029_v38 = vsub.f32 %v10055_v12, %v2011_v34 }
 0x48c   :  { %v2008_v9 = vpop.xlane.xlu1 %2007 }
 0x48d   :  { %8644 = vpow2.f32 %v2041_v15  ;;  %v2039_v40 = vmul.f32 1.442695, %v2029_v38  ;;  %v2028_v28 = vsub.f32 %v10063_v51, %v2008_v9 }
 0x48e   :  { %v2017_v22 = vpop.xlane.xlu0 %2016 }
 0x48f   :  { %8646 = vpow2.f32 %v2039_v40  ;;  %v2037_v11 = vmul.f32 1.442695, %v2028_v28  ;;  %v2031_v43 = vsub.f32 %v10070_v27, %v2017_v22 }
 0x490   :  { %8648 = vpow2.f32 %v2035_v55  ;;  %v2026_v34 = vpop.xlane.xlu1 %2025 }
 0x491   :  { %8650 = vpow2.f32 %v2037_v11  ;;  %v2043_v31 = vmul.f32 1.442695, %v2031_v43 }
 0x492   :  { %v2023_v15 = vpop.xlane.xlu0 %2022 }
 0x493   :  { %8652 = vpow2.f32 %v2043_v31  ;;  %v2033_v22 = vsub.f32 %v10075_v10, %v2023_v15 }
 0x494   :  { %v2020_v55 = vpop.xlane.xlu1 %2019 }
 0x495   :  { %v2047_v31 = vmul.f32 1.442695, %v2033_v22 }
 0x49a   :  { %v10140_v52 = vpop.eup %8644 }
 0x49b   :  { %v2060_v12 = vsel %vm1631_vm0, %v10140_v52, 0.0 }
 0x49c   :  { %v10144_v57 = vpop.eup %8646  ;;  %2061 = vadd.xlane.f32.xlu1 %v2060_v12  ;;  %v2032_v12 = vsub.f32 %v10083_v53, %v2020_v55 }
 0x49d   :  { %v10146_v60 = vpop.eup %8648  ;;  %v2057_v51 = vsel %vm1631_vm0, %v10144_v57, 0.0 }
 0x49e   :  { %v10150_v3 = vpop.eup %8650  ;;  %2058 = vadd.xlane.f32.xlu0 %v2057_v51  ;;  %v2051_v54 = vsel %vm1631_vm0, %v10146_v60, 0.0 }
 0x49f   :  { %v2054_v27 = vsel %vm1631_vm0, %v10150_v3, 0.0 }
 0x4a0   :  { %v10154_v21 = vpop.eup %8652  ;;  %2055 = vadd.xlane.f32.xlu1 %v2054_v27 }
 0x4a1   :  { %v2063_v50 = vsel %vm1631_vm0, %v10154_v21, 0.0 }
 0x4a2   :  { %2052 = vadd.xlane.f32.xlu0 %v2051_v54  ;;  %v2045_v54 = vmul.f32 1.442695, %v2032_v12 }
 0x4a4   :  { %2064 = vadd.xlane.f32.xlu1 %v2063_v50 }
 0x4af   :  { %v1777_v38 = vpop.xlane.xlu0 %1776 }
 0x4b3   :  { %v1771_v9 = vpop.xlane.xlu0 %1770 }
 0x4b5   :  { %2099 = vrot.lane.b32.xlu1 %v9934_v26, %s9304_s4 }
 0x4b7   :  { %v1780_v40 = vpop.xlane.xlu1 %1779 }
 0x4b8   :  { %2105 = vrot.lane.b32.xlu0 %v9905_v36, %s9304_s4  ;;  %8654 = vrcp.f32 %v1780_v40  ;;  %v2034_v36 = vsub.f32 %v10078_v33, %v2026_v34 }
 0x4b9   :  { %8656 = vrcp.f32 %v1771_v9 }
 0x4ba   :  { %8658 = vrcp.f32 %v1777_v38  ;;  %v2049_v15 = vmul.f32 1.442695, %v2034_v36 }
 0x4bb   :  { %v1774_v28 = vpop.xlane.xlu1 %1773 }
 0x4bc   :  { %8660 = vrcp.f32 %v1774_v28 }
 0x4bf   :  { %v1792_v11 = vpop.xlane.xlu1 %1791  ;;  %v1789_v43 = vpop.xlane.xlu0 %1788 }
 0x4c0   :  { %8662 = vrcp.f32 %v1792_v11 }
 0x4c1   :  { %8664 = vrcp.f32 %v1789_v43 }
 0x4c3   :  { %v1786_v26 = vpop.xlane.xlu1 %1785  ;;  %v1783_v51 = vpop.xlane.xlu0 %1782 }
 0x4c4   :  { %8666 = vrcp.f32 %v1786_v26 }
 0x4c5   :  { %8668 = vrcp.f32 %v1783_v51  ;;  %v8655_v27 = vpop.eup %8654 }
 0x4c6   :  { %8670 = vpow2.f32 %v2047_v31  ;;  %v8657_v50 = vpop.eup %8656  ;;  %v1804_v10 = vmul.f32 %v8655_v27, %v10107_v18 }
 0x4c7   :  { %v8659_v38 = vpop.eup %8658  ;;  %8672 = vpow2.f32 %v2045_v54  ;;  %v1801_v40 = vmul.f32 %v8657_v50, %v10103_v39 }
 0x4c8   :  { %v1803_v55 = vmul.f32 %v8659_v38, %v10099_v41  ;;  %8674 = vpow2.f32 %v2049_v15 }
 0x4c9   :  { %v8661_v9 = vpop.eup %8660 }
 0x4ca   :  { %v1802_v53 = vmul.f32 %v8661_v9, %v10111_v6  ;;  %v1810_v22 = vpack.c.bf16 %v1804_v10, %v1803_v55 }
 0x4cc   :  { %v1809_v28 = vpack.c.bf16 %v1802_v53, %v1801_v40 }
 0x4cd   :  { %v8663_v11 = vpop.eup %8662 }
 0x4ce   :  { %7678 = vmatprep.mubr.msk.bf16.mxu1 %vm1631_vm0, %v1809_v28  ;;  %v8665_v33 = vpop.eup %8664  ;;  %v1808_v39 = vmul.f32 %v8663_v11, %v10115_v20 }
 0x4cf   :  { %7679 = vmatmul.mubr.msk.bf16.vlgmr.msra.gmra.mxu1 %vm1631_vm0, %v1810_v22  ;;  %v1807_v31 = vmul.f32 %v8665_v33, %v10117_v61 }
 0x4d1   :  { %v8667_v34 = vpop.eup %8666  ;;  %v1812_v26 = vpack.c.bf16 %v1808_v39, %v1807_v31 }
 0x4d2   :  { %v8669_v43 = vpop.eup %8668  ;;  %v1806_v18 = vmul.f32 %v8667_v34, %v10121_v14 }
 0x4d3   :  { %v10176_v6 = vpop.eup %8670  ;;  %v1805_v41 = vmul.f32 %v8669_v43, %v10125_v32  ;;  %v2104_v32 = vpop.permute.xlu1 %2103  ;;  %v10196_v43 = vpack.c.bf16 %v9795_v4, %v9788_v1  ;;  %v10213_v4 = vpack.c.bf16 %v9773_v48, %v9767_v19 }
 0x4d4   :  { %v2069_v51 = vsel %vm1631_vm0, %v10176_v6, 0.0  ;;  %v10181_v27 = vpop.eup %8672 }
 0x4d5   :  { %v1811_v12 = vpack.c.bf16 %v1806_v18, %v1805_v41  ;;  %v2066_v61 = vsel %vm1631_vm0, %v10181_v27, 0.0  ;;  %v10187_v20 = vpop.eup %8674  ;;  %v2222_v1 = vsel %vm1631_vm0, %v10196_v43, 0 }
 0x4d6   :  { %v2072_v14 = vsel %vm1631_vm0, %v10187_v20, 0.0 }
 0x4d7   :  { %7682 = vmatprep.mubr.msk.bf16.mxu1 %vm1631_vm0, %v1811_v12  ;;  %2070 = vadd.xlane.f32.xlu0 %v2069_v51  ;;  %v2102_v36 = vpop.permute.xlu1 %2101 }
 0x4d8   :  { %7683 = vmatmul.mubr.msk.bf16.gmra.mxu1 %vm1631_vm0, %v1812_v26 }
 0x4db   :  { %2067 = vadd.xlane.f32.xlu0 %v2066_v61 }
 0x4df   :  { %2073 = vadd.xlane.f32.xlu0 %v2072_v14 }
 0x525   :  { %v2062_v54 = vpop.xlane.xlu1 %2061 }
 0x527   :  { %v2059_v50 = vpop.xlane.xlu0 %2058 }
 0x528   :  { %8676 = vrcp.f32 %v2059_v50 }
 0x529   :  { %v2056_v38 = vpop.xlane.xlu1 %2055 }
 0x52a   :  { %8678 = vrcp.f32 %v2056_v38 }
 0x52b   :  { %8680 = vrcp.f32 %v2062_v54  ;;  %v2053_v9 = vpop.xlane.xlu0 %2052  ;;  %v10236_v54 = vpack.c.bf16 %v9667_v30, %v9659_v46  ;;  %v10255_v46 = vpack.c.bf16 %v9705_v24, %v9697_v13  ;;  %v10259_v30 = vpop.f32.mrf.mxu1 }
 0x52c   :  { %8682 = vrcp.f32 %v2053_v9 }
 0x52d   :  { %v2065_v15 = vpop.xlane.xlu1 %2064 }
 0x52e   :  { %8684 = vrcp.f32 %v2065_v15 }
 0x52f   :  { %v2106_v10 = vpop.permute.xlu0 %2105 }
 0x530   :  { %7702 = vmatprep.subr.bf16.mxu1 %v2106_v10 }
 0x531   :  { %7703 = vmatpush3.bf16.msra.mxu1 %v2106_v10  ;;  %v2100_v22 = vpop.permute.xlu1 %2099 }
 0x532   :  { %7704 = vmatprep.subr.bf16.mxu1 %v2104_v32 }
 0x535   :  { %7705 = vmatpush3.bf16.msra.mxu1 %v2104_v32  ;;  %v8677_v40 = vpop.eup %8676 }
 0x536   :  { %7706 = vmatprep.subr.bf16.mxu1 %v2102_v36  ;;  %v2085_v11 = vmul.f32 %v8677_v40, %v10144_v57  ;;  %v10204_v57 = vpack.c.bf16 %v9783_v37, %v9777_v7  ;;  %v10221_v7 = vpack.c.bf16 %v9763_v17, %v9757_v25  ;;  %v2216_v37 = vsel %vm1631_vm0, %v10213_v4, 0 }
 0x537   :  { %v8679_v53 = vpop.eup %8678 }
 0x538   :  { %v8681_v55 = vpop.eup %8680  ;;  %v2084_v34 = vmul.f32 %v8679_v53, %v10150_v3  ;;  %v2213_v48 = vsel %vm1631_vm0, %v10221_v7, 0 }
 0x539   :  { %v8683_v28 = vpop.eup %8682  ;;  %7707 = vmatpush3.bf16.msra.mxu1 %v2102_v36  ;;  %v2086_v18 = vmul.f32 %v8681_v55, %v10140_v52  ;;  %v2219_v52 = vsel %vm1631_vm0, %v10204_v57, 0 }
 0x53a   :  { %7708 = vmatprep.subr.bf16.mxu1 %v2100_v22  ;;  %v2083_v33 = vmul.f32 %v8683_v28, %v10146_v60 }
 0x53b   :  { %v2092_v39 = vpack.c.bf16 %v2086_v18, %v2085_v11  ;;  %v8685_v25 = vpop.eup %8684 }
 0x53c   :  { %v2091_v31 = vpack.c.bf16 %v2084_v34, %v2083_v33  ;;  %v2087_v41 = vmul.f32 %v8685_v25, %v10154_v21  ;;  %v10243_v21 = vpack.c.bf16 %v9681_v42, %v9673_v35 }
 0x53d   :  { %7709 = vmatpush3.bf16.msra.mxu1 %v2100_v22 }
 0x53e   :  { %7710 = vmatprep.mubr.msk.bf16.mxu1 %vm1631_vm0, %v2091_v31  ;;  %8190 = vmatprep.subr.msk.bf16.mxu1 %vm1631_vm0, %v10196_v43 }
 0x540   :  { %7711 = vmatmul.mubr.msk.bf16.vlgmr.msra.gmra.mxu1 %vm1631_vm0, %v2092_v39 }
 0x541   :  { %7719 = vmatpush3.bf16.xpose.msra.mxu1 %v2222_v1 }
 0x542   :  { %8191 = vmatprep.subr.msk.bf16.mxu1 %vm1631_vm0, %v10204_v57 }
 0x549   :  { %7721 = vmatpush3.bf16.xpose.msra.mxu1 %v2219_v52 }
 0x54a   :  { %8192 = vmatprep.subr.msk.bf16.mxu1 %vm1631_vm0, %v10213_v4 }
 0x551   :  { %7723 = vmatpush3.bf16.xpose.msra.mxu1 %v2216_v37 }
 0x552   :  { %8193 = vmatprep.subr.msk.bf16.mxu1 %vm1631_vm0, %v10221_v7 }
 0x559   :  { %7725 = vmatpush3.bf16.xpose.msra.mxu1 %v2213_v48 }
 0x560   :  { %v2071_v19 = vpop.xlane.xlu0 %2070 }
 0x564   :  { %v2068_v60 = vpop.xlane.xlu0 %2067 }
 0x565   :  { %8686 = vrcp.f32 %v2068_v60 }
 0x566   :  { %8688 = vrcp.f32 %v2071_v19 }
 0x568   :  { %v2074_v3 = vpop.xlane.xlu0 %2073 }
 0x569   :  { %8690 = vrcp.f32 %v2074_v3 }
 0x572   :  { %v8687_v17 = vpop.eup %8686 }
 0x573   :  { %v2088_v12 = vmul.f32 %v8687_v17, %v10181_v27  ;;  %v8689_v26 = vpop.eup %8688  ;;  %v10247_v27 = vpack.c.bf16 %v9693_v47, %v9685_v49 }
 0x574   :  { %v2089_v14 = vmul.f32 %v8689_v26, %v10176_v6 }
 0x575   :  { %v2093_v51 = vpack.c.bf16 %v2088_v12, %v2087_v41 }
 0x576   :  { %v8691_v61 = vpop.eup %8690 }
 0x577   :  { %7714 = vmatprep.mubr.msk.bf16.mxu1 %vm1631_vm0, %v2093_v51  ;;  %v2090_v32 = vmul.f32 %v8691_v61, %v10187_v20 }
 0x579   :  { %v2094_v36 = vpack.c.bf16 %v2090_v32, %v2089_v14 }
 0x57b   :  { %7715 = vmatmul.mubr.msk.bf16.gmra.mxu1 %vm1631_vm0, %v2094_v36 }
 0x57c   :  { %7726 = vmatprep.mubr.msk.bf16.mxu1 %vm1631_vm0, %v10236_v54 }
 0x583   :  { %7727 = vmatmul.mubr.msk.bf16.vlgmr.msra.gmra.mxu1 %vm1631_vm0, %v10243_v21 }
 0x584   :  { %7730 = vmatprep.mubr.msk.bf16.mxu1 %vm1631_vm0, %v10247_v27 }
 0x58b   :  { %7731 = vmatmul.mubr.msk.bf16.gmra.mxu1 %vm1631_vm0, %v10255_v46 }
 0x58f   :  { %v10261_v35 = vpop.f32.mrf.mxu1 }
 0x590   :  { %12267 = vst [vmem:[#allocation117_spill] sm:$0xff] %v10261_v35 }
 0x591   :  { %v10263_v42 = vpop.f32.mrf.mxu1 }
 0x592   :  { %12268 = vst [vmem:[#allocation118_spill] sm:$0xff] %v10263_v42 }
 0x593   :  { %v10265_v49 = vpop.f32.mrf.mxu1 }
 0x594   :  { %12269 = vst [vmem:[#allocation119_spill] sm:$0xff] %v10265_v49 }
 0x595   :  { %v10267_v47 = vpop.f32.mrf.mxu1 }
 0x596   :  { %12270 = vst [vmem:[#allocation120_spill] sm:$0xff] %v10267_v47 }
 0x598   :  { %v10269_v6 = vpop.f32.mrf.mxu1 }
 0x599   :  { %12271 = vst [vmem:[#allocation121_spill] sm:$0xff] %v10269_v6 }
 0x59a   :  { %v10271_v20 = vpop.f32.mrf.mxu1 }
 0x59b   :  { %12272 = vst [vmem:[#allocation122_spill] sm:$0xff] %v10271_v20 }
 0x59c   :  { %v10273_v50 = vpop.f32.mrf.mxu1 }
 0x59d   :  { %12273 = vst [vmem:[#allocation123_spill] sm:$0xff] %v10273_v50 }
 0x59e   :  { %v10275_v13 = vpop.f32.mrf.mxu1 }
 0x59f   :  { %12274 = vst [vmem:[#allocation124_spill] sm:$0xff] %v10275_v13 }
 0x600   :  { %v10277_v24 = vpop.f32.mrf.mxu1 }
 0x602   :  { %v10279_v38 = vpop.f32.mrf.mxu1 }
 0x604   :  { %v10281_v9 = vpop.f32.mrf.mxu1 }
 0x606   :  { %v10285_v15 = vpop.f32.mrf.mxu1 }
 0x63b   :  { %v10287_v40 = vpop.f32.mrf.mxu1 }
 0x63c   :  { %12275 = vst [vmem:[#allocation125_spill] sm:$0xff] %v10287_v40 }
 0x63d   :  { %v10289_v53 = vpop.f32.mrf.mxu1 }
 0x63f   :  { %v10291_v55 = vpop.f32.mrf.mxu1 }
 0x640   :  { %12276 = vst [vmem:[#allocation126_spill] sm:$0xff] %v10291_v55 }
 0x641   :  { %v10295_v22 = vpop.f32.mrf.mxu1 }
 0x643   :  { %v7728_v11 = vpop.f32.mrf.mxu1 }
 0x644   :  { %v2267_v33 = vadd.f32 %v7728_v11, %v10009_v8 }
 0x645   :  { %v2258_v34 = vpop.f32.mrf.mxu1 }
 0x646   :  { %v2259_v18 = vadd.f32 %v10009_v8, %v2258_v34  ;;  %v2295_v31 = vsel %vm1631_vm0, %v2267_v33, -inf }
 0x647   :  { %2296 = vmax.xlane.f32.xlu0 %v2295_v31  ;;  %v7729_v39 = vpop.f32.mrf.mxu1 }
 0x648   :  { %v2289_v37 = vsel %vm1631_vm0, %v2259_v18, -inf  ;;  %v2270_v60 = vadd.f32 %v7729_v39, %v10009_v8 }
 0x649   :  { %v2261_v1 = vpop.f32.mrf.mxu1 }
 0x64a   :  { %v2262_v52 = vadd.f32 %v10009_v8, %v2261_v1  ;;  %v2298_v26 = vsel %vm1631_vm0, %v2270_v60, -inf }
 0x64b   :  { %v7732_v48 = vpop.f32.mrf.mxu1  ;;  %2290 = vmax.xlane.f32.xlu0 %v2289_v37 }
 0x64c   :  { %v2292_v25 = vsel %vm1631_vm0, %v2262_v52, -inf  ;;  %v2283_v12 = vadd.f32 %v7732_v48, %v10009_v8 }
 0x64d   :  { %v2274_v19 = vpop.f32.mrf.mxu1 }
 0x64e   :  { %v2275_v3 = vadd.f32 %v10009_v8, %v2274_v19  ;;  %v2307_v14 = vsel %vm1631_vm0, %v2283_v12, -inf }
 0x64f   :  { %v7733_v17 = vpop.f32.mrf.mxu1  ;;  %2293 = vmax.xlane.f32.xlu0 %v2292_v25 }
 0x650   :  { %v2301_v41 = vsel %vm1631_vm0, %v2275_v3, -inf  ;;  %v2286_v32 = vadd.f32 %v7733_v17, %v10009_v8 }
 0x651   :  { %2302 = vmax.xlane.f32.xlu1 %v2301_v41  ;;  %v2277_v51 = vpop.f32.mrf.mxu1 }
 0x652   :  { %v2278_v61 = vadd.f32 %v10009_v8, %v2277_v51  ;;  %v2310_v11 = vsel %vm1631_vm0, %v2286_v32, -inf }
 0x653   :  { %2299 = vmax.xlane.f32.xlu0 %v2298_v26 }
 0x654   :  { %v2304_v36 = vsel %vm1631_vm0, %v2278_v61, -inf }
 0x657   :  { %2308 = vmax.xlane.f32.xlu0 %v2307_v14 }
 0x65b   :  { %2305 = vmax.xlane.f32.xlu0 %v2304_v36 }
 0x65f   :  { %2311 = vmax.xlane.f32.xlu0 %v2310_v11 }
 0x662   :  { %2480 = vrot.lane.b32.xlu1 %v10196_v43, %s9304_s4 }
 0x6d0   :  { %v2297_v34 = vpop.xlane.xlu0 %2296 }
 0x6d1   :  { %v2315_v31 = vsub.f32 %v2267_v33, %v2297_v34 }
 0x6d3   :  { %v2325_v39 = vmul.f32 1.442695, %v2315_v31 }
 0x6d4   :  { %v2291_v1 = vpop.xlane.xlu0 %2290 }
 0x6d5   :  { %8692 = vpow2.f32 %v2325_v39  ;;  %v2313_v37 = vsub.f32 %v2259_v18, %v2291_v1 }
 0x6d7   :  { %v2321_v48 = vmul.f32 1.442695, %v2313_v37 }
 0x6d8   :  { %v2294_v19 = vpop.xlane.xlu0 %2293 }
 0x6d9   :  { %8694 = vpow2.f32 %v2321_v48  ;;  %v2314_v17 = vsub.f32 %v2262_v52, %v2294_v19 }
 0x6da   :  { %v2303_v25 = vpop.xlane.xlu1 %2302 }
 0x6db   :  { %v2323_v14 = vmul.f32 1.442695, %v2314_v17  ;;  %v2317_v36 = vsub.f32 %v2275_v3, %v2303_v25 }
 0x6dc   :  { %v2300_v41 = vpop.xlane.xlu0 %2299 }
 0x6dd   :  { %v2316_v26 = vsub.f32 %v2270_v60, %v2300_v41  ;;  %v2329_v18 = vmul.f32 1.442695, %v2317_v36 }
 0x6de   :  { %v10315_v51 = vpop.permute.xlu1 %2480 }
 0x6df   :  { %v2327_v11 = vmul.f32 1.442695, %v2316_v26  ;;  %8194 = vmatprep.subr.msk.bf16.mxu0 %vm1631_vm0, %v10315_v51 }
 0x6e0   :  { %v2309_v43 = vpop.xlane.xlu0 %2308 }
 0x6e1   :  { %8696 = vpow2.f32 %v2327_v11  ;;  %v2319_v33 = vsub.f32 %v2283_v12, %v2309_v43 }
 0x6e2   :  { %v10319_v34 = vpop.eup %8692  ;;  %8698 = vpow2.f32 %v2323_v14 }
 0x6e3   :  { %v2333_v31 = vmul.f32 1.442695, %v2319_v33  ;;  %v2343_v52 = vsel %vm1631_vm0, %v10319_v34, 0.0 }
 0x6e4   :  { %2344 = vadd.xlane.f32.xlu0 %v2343_v52  ;;  %v2306_v60 = vpop.xlane.xlu0 %2305 }
 0x6e5   :  { %8700 = vpow2.f32 %v2333_v31  ;;  %v2318_v3 = vsub.f32 %v2278_v61, %v2306_v60 }
 0x6e6   :  { %v8695_v39 = vpop.eup %8694  ;;  %8702 = vpow2.f32 %v2329_v18 }
 0x6e7   :  { %v2337_v1 = vsel %vm1631_vm0, %v8695_v39, 0.0  ;;  %v2331_v12 = vmul.f32 1.442695, %v2318_v3 }
 0x6e8   :  { %2338 = vadd.xlane.f32.xlu0 %v2337_v1  ;;  %v2312_v37 = vpop.xlane.xlu0 %2311 }
 0x6e9   :  { %v2320_v48 = vsub.f32 %v2286_v32, %v2312_v37 }
 0x6eb   :  { %v2335_v19 = vmul.f32 1.442695, %v2320_v48 }
 0x6ed   :  { %8704 = vpow2.f32 %v2335_v19 }
 0x6ee   :  { %v8697_v25 = vpop.eup %8696  ;;  %8706 = vpow2.f32 %v2331_v12 }
 0x6ef   :  { %v2346_v17 = vsel %vm1631_vm0, %v8697_v25, 0.0  ;;  %v8699_v41 = vpop.eup %8698 }
 0x6f0   :  { %2347 = vadd.xlane.f32.xlu0 %v2346_v17  ;;  %v2340_v14 = vsel %vm1631_vm0, %v8699_v41, 0.0 }
 0x6f2   :  { %v8701_v26 = vpop.eup %8700 }
 0x6f3   :  { %v2355_v36 = vsel %vm1631_vm0, %v8701_v26, 0.0  ;;  %v8703_v61 = vpop.eup %8702 }
 0x6f4   :  { %2341 = vadd.xlane.f32.xlu0 %v2340_v14  ;;  %2356 = vadd.xlane.f32.xlu1 %v2355_v36  ;;  %v2349_v11 = vsel %vm1631_vm0, %v8703_v61, 0.0  ;;  %v2504_v36 = vsel %vm1631_vm0, %v10315_v51, 0 }
 0x6f8   :  { %2350 = vadd.xlane.f32.xlu0 %v2349_v11 }
 0x6fa   :  { %v8705_v32 = vpop.eup %8704 }
 0x6fb   :  { %v2358_v43 = vsel %vm1631_vm0, %v8705_v32, 0.0  ;;  %v8707_v33 = vpop.eup %8706 }
 0x6fc   :  { %2359 = vadd.xlane.f32.xlu0 %v2358_v43  ;;  %v2352_v18 = vsel %vm1631_vm0, %v8707_v33, 0.0 }
 0x700   :  { %2353 = vadd.xlane.f32.xlu0 %v2352_v18 }
 0x705   :  { %2476 = vrot.lane.b32.xlu1 %v10213_v4, %s9304_s4 }
 0x709   :  { %2474 = vrot.lane.b32.xlu1 %v10221_v7, %s9304_s4 }
 0x70d   :  { %2464 = vrot.lane.b32.xlu1 %v10243_v21, %s9304_s4 }
 0x711   :  { %2468 = vrot.lane.b32.xlu1 %v10255_v46, %s9304_s4 }
 0x716   :  { %2478 = vrot.lane.b32.xlu0 %v10204_v57, %s9304_s4 }
 0x71a   :  { %2462 = vrot.lane.b32.xlu0 %v10236_v54, %s9304_s4 }
 0x71e   :  { %2466 = vrot.lane.b32.xlu0 %v10247_v27, %s9304_s4 }
 0x76d   :  { %v2345_v31 = vpop.xlane.xlu0 %2344 }
 0x771   :  { %v2339_v4 = vpop.xlane.xlu0 %2338 }
 0x779   :  { %v2348_v52 = vpop.xlane.xlu0 %2347 }
 0x77a   :  { %8708 = vrcp.f32 %v2348_v52 }
 0x77b   :  { %8710 = vrcp.f32 %v2339_v4 }
 0x77c   :  { %8712 = vrcp.f32 %v2345_v31 }
 0x77d   :  { %v2342_v7 = vpop.xlane.xlu0 %2341  ;;  %v2357_v46 = vpop.xlane.xlu1 %2356 }
 0x77e   :  { %8714 = vrcp.f32 %v2342_v7 }
 0x781   :  { %v2351_v21 = vpop.xlane.xlu0 %2350 }
 0x785   :  { %v2360_v60 = vpop.xlane.xlu0 %2359 }
 0x786   :  { %8716 = vrcp.f32 %v2360_v60 }
 0x787   :  { %8718 = vrcp.f32 %v2351_v21  ;;  %v8709_v57 = vpop.eup %8708  ;;  %v2477_v21 = vpop.permute.xlu1 %2476 }
 0x788   :  { %8720 = vrcp.f32 %v2357_v46  ;;  %v8711_v54 = vpop.eup %8710  ;;  %v2372_v37 = vmul.f32 %v8709_v57, %v8697_v25 }
 0x789   :  { %v2354_v3 = vpop.xlane.xlu0 %2353  ;;  %v8713_v1 = vpop.eup %8712  ;;  %v2369_v48 = vmul.f32 %v8711_v54, %v8695_v39 }
 0x78a   :  { %8722 = vrcp.f32 %v2354_v3  ;;  %v2371_v19 = vmul.f32 %v8713_v1, %v10319_v34 }
 0x78b   :  { %v8715_v27 = vpop.eup %8714 }
 0x78c   :  { %v2370_v12 = vmul.f32 %v8715_v27, %v8699_v41  ;;  %v2378_v14 = vpack.c.bf16 %v2372_v37, %v2371_v19 }
 0x78d   :  { %v2479_v11 = vpop.permute.xlu0 %2478 }
 0x78e   :  { %v2377_v17 = vpack.c.bf16 %v2370_v12, %v2369_v48  ;;  %v2501_v52 = vsel %vm1631_vm0, %v2479_v11, 0 }
 0x790   :  { %7742 = vmatprep.mubr.msk.bf16.mxu0 %vm1631_vm0, %v2377_v17 }
 0x791   :  { %7743 = vmatmul.mubr.msk.bf16.vlgmr.msra.gmra.mxu0 %vm1631_vm0, %v2378_v14  ;;  %v2463_v51 = vpop.permute.xlu0 %2462 }
 0x792   :  { %7751 = vmatpush3.bf16.xpose.msra.mxu0 %v2504_v36 }
 0x793   :  { %v8717_v43 = vpop.eup %8716  ;;  %8195 = vmatprep.subr.msk.bf16.mxu0 %vm1631_vm0, %v2479_v11 }
 0x794   :  { %v8719_v18 = vpop.eup %8718  ;;  %v2376_v41 = vmul.f32 %v8717_v43, %v8705_v32  ;;  %v2498_v32 = vsel %vm1631_vm0, %v2477_v21, 0 }
 0x795   :  { %v8721_v25 = vpop.eup %8720  ;;  %v2373_v31 = vmul.f32 %v8719_v18, %v8703_v61  ;;  %v2475_v61 = vpop.permute.xlu1 %2474 }
 0x796   :  { %v2375_v4 = vmul.f32 %v8721_v25, %v8701_v26  ;;  %v2495_v26 = vsel %vm1631_vm0, %v2475_v61, 0  ;;  %v2467_v46 = vpop.permute.xlu0 %2466 }
 0x797   :  { %v8723_v39 = vpop.eup %8722 }
 0x798   :  { %v2374_v34 = vmul.f32 %v8723_v39, %v8707_v33  ;;  %v2380_v60 = vpack.c.bf16 %v2376_v41, %v2375_v4 }
 0x799   :  { %v2465_v33 = vpop.permute.xlu1 %2464 }
 0x79a   :  { %v2379_v7 = vpack.c.bf16 %v2374_v34, %v2373_v31  ;;  %7753 = vmatpush3.bf16.xpose.msra.mxu0 %v2501_v52 }
 0x79b   :  { %8196 = vmatprep.subr.msk.bf16.mxu0 %vm1631_vm0, %v2477_v21 }
 0x79c   :  { %7746 = vmatprep.mubr.msk.bf16.mxu0 %vm1631_vm0, %v2379_v7 }
 0x79d   :  { %7747 = vmatmul.mubr.msk.bf16.gmra.mxu0 %vm1631_vm0, %v2380_v60  ;;  %v2469_v57 = vpop.permute.xlu1 %2468 }
 0x79e   :  { %7758 = vmatprep.mubr.msk.bf16.mxu0 %vm1631_vm0, %v2463_v51  ;;  %v10394_v51 = vld [vmem:[#allocation5] ss:$0 sm:$0xff] }
 0x7a2   :  { %7755 = vmatpush3.bf16.xpose.msra.mxu0 %v2498_v32 }
 0x7a3   :  { %8197 = vmatprep.subr.msk.bf16.mxu0 %vm1631_vm0, %v2475_v61 }
 0x7aa   :  { %7757 = vmatpush3.bf16.xpose.msra.mxu0 %v2495_v26 }
 0x7ab   :  { %7798 = vmatprep.subr.bf16.mxu0 %v9907_v56 }
 0x7b1   :  { %7759 = vmatmul.mubr.msk.bf16.vlgmr.msra.gmra.mxu0 %vm1631_vm0, %v2465_v33 }
 0x7b2   :  { %7762 = vmatprep.mubr.msk.bf16.mxu0 %vm1631_vm0, %v2467_v46  ;;  %7799 = vmatpush3.bf16.msra.mxu0 %v9907_v56 }
 0x7b3   :  { %7800 = vmatprep.subr.bf16.mxu0 %v9895_v58 }
 0x7b6   :  { %7801 = vmatpush3.bf16.msra.mxu0 %v9895_v58 }
 0x7b7   :  { %7802 = vmatprep.subr.bf16.mxu0 %v9885_v44 }
 0x7b9   :  { %7763 = vmatmul.mubr.msk.bf16.gmra.mxu0 %vm1631_vm0, %v2469_v57 }
 0x7ba   :  { %7803 = vmatpush3.bf16.msra.mxu0 %v9885_v44 }
 0x7bb   :  { %7804 = vmatprep.subr.bf16.mxu0 %v9873_v2 }
 0x7be   :  { %7805 = vmatpush3.bf16.msra.mxu0 %v9873_v2 }
 0x851   :  { %v10369_v3 = vpop.f32.mrf.mxu0 }
 0x852   :  { %12277 = vst [vmem:[#allocation127_spill] sm:$0xff] %v10369_v3 }
 0x853   :  { %v10371_v54 = vpop.f32.mrf.mxu0 }
 0x854   :  { %12278 = vst [vmem:[#allocation128_spill] sm:$0xff] %v10371_v54 }
 0x855   :  { %v10373_v1 = vpop.f32.mrf.mxu0 }
 0x856   :  { %12279 = vst [vmem:[#allocation129_spill] sm:$0xff] %v10373_v1 }
 0x857   :  { %v10375_v27 = vpop.f32.mrf.mxu0 }
 0x858   :  { %12280 = vst [vmem:[#allocation130_spill] sm:$0xff] %v10375_v27 }
 0x85d   :  { %v10377_v37 = vpop.f32.mrf.mxu0 }
 0x85e   :  { %12281 = vst [vmem:[#allocation131_spill] sm:$0xff] %v10377_v37 }
 0x85f   :  { %v10379_v48 = vpop.f32.mrf.mxu0 }
 0x860   :  { %12282 = vst [vmem:[#allocation132_spill] sm:$0xff] %v10379_v48 }
 0x861   :  { %v10381_v12 = vpop.f32.mrf.mxu0 }
 0x862   :  { %12283 = vst [vmem:[#allocation133_spill] sm:$0xff] %v10381_v12 }
 0x863   :  { %v10383_v19 = vpop.f32.mrf.mxu0 }
 0x864   :  { %12284 = vst [vmem:[#allocation134_spill] sm:$0xff] %v10383_v19 }
 0x871   :  { %v7760_v17 = vpop.f32.mrf.mxu0 }
 0x872   :  { %v2549_v14 = vadd.f32 %v7760_v17, %v10009_v8 }
 0x873   :  { %v2540_v36 = vpop.f32.mrf.mxu0 }
 0x874   :  { %v2541_v11 = vadd.f32 %v10009_v8, %v2540_v36  ;;  %v2577_v43 = vsel %vm1631_vm0, %v2549_v14, -inf }
 0x875   :  { %2578 = vmax.xlane.f32.xlu0 %v2577_v43  ;;  %v7761_v18 = vpop.f32.mrf.mxu0 }
 0x876   :  { %v2552_v39 = vadd.f32 %v7761_v18, %v10009_v8  ;;  %v2571_v31 = vsel %vm1631_vm0, %v2541_v11, -inf }
 0x877   :  { %v2543_v25 = vpop.f32.mrf.mxu0 }
 0x878   :  { %v2544_v41 = vadd.f32 %v10009_v8, %v2543_v25  ;;  %v2580_v21 = vsel %vm1631_vm0, %v2552_v39, -inf }
 0x879   :  { %2572 = vmax.xlane.f32.xlu0 %v2571_v31  ;;  %v7764_v34 = vpop.f32.mrf.mxu0 }
 0x87a   :  { %v2565_v4 = vadd.f32 %v7764_v34, %v10009_v8  ;;  %v2574_v52 = vsel %vm1631_vm0, %v2544_v41, -inf }
 0x87b   :  { %2575 = vmax.xlane.f32.xlu1 %v2574_v52  ;;  %v2556_v7 = vpop.f32.mrf.mxu0 }
 0x87c   :  { %v10397_v32 = vadd.f32 %v10394_v51, %v2556_v7  ;;  %v2589_v26 = vsel %vm1631_vm0, %v2565_v4, -inf }
 0x87d   :  { %2581 = vmax.xlane.f32.xlu0 %v2580_v21  ;;  %v7765_v60 = vpop.f32.mrf.mxu0 }
 0x87e   :  { %v10400_v61 = vadd.f32 %v10394_v51, %v7765_v60  ;;  %v2583_v57 = vsel %vm1631_vm0, %v10397_v32, -inf }
 0x87f   :  { %2590 = vmax.xlane.f32.xlu1 %v2589_v26  ;;  %v2559_v8 = vpop.f32.mrf.mxu0 }
 0x880   :  { %v2560_v33 = vadd.f32 %v10394_v51, %v2559_v8  ;;  %v2592_v46 = vsel %vm1631_vm0, %v10400_v61, -inf }
 0x881   :  { %2593 = vmax.xlane.f32.xlu0 %v2592_v46 }
 0x882   :  { %v2586_v17 = vsel %vm1631_vm0, %v2560_v33, -inf }
 0x883   :  { %2584 = vmax.xlane.f32.xlu1 %v2583_v57 }
 0x885   :  { %2587 = vmax.xlane.f32.xlu0 %v2586_v17 }
 0x894   :  { %2673 = vrot.lane.b32.xlu1 %v9981_v63, %s9304_s4 }
 0x89b   :  { %2671 = vrot.lane.b32.xlu0 %v9987_v45, %s9304_s4 }
 0x8fe   :  { %v2579_v36 = vpop.xlane.xlu0 %2578 }
 0x8ff   :  { %v2597_v43 = vsub.f32 %v2549_v14, %v2579_v36 }
 0x901   :  { %v2607_v18 = vmul.f32 1.442695, %v2597_v43 }
 0x902   :  { %v2573_v25 = vpop.xlane.xlu0 %2572 }
 0x903   :  { %8724 = vpow2.f32 %v2607_v18  ;;  %v2595_v31 = vsub.f32 %v2541_v11, %v2573_v25 }
 0x904   :  { %v2576_v34 = vpop.xlane.xlu1 %2575 }
 0x905   :  { %v2603_v52 = vmul.f32 1.442695, %v2595_v31  ;;  %v2596_v7 = vsub.f32 %v2544_v41, %v2576_v34 }
 0x906   :  { %v2582_v21 = vpop.xlane.xlu0 %2581 }
 0x907   :  { %8726 = vpow2.f32 %v2603_v52  ;;  %v2598_v60 = vsub.f32 %v2552_v39, %v2582_v21  ;;  %v2605_v8 = vmul.f32 1.442695, %v2596_v7 }
 0x908   :  { %v2591_v26 = vpop.xlane.xlu1 %2590 }
 0x909   :  { %v2609_v46 = vmul.f32 1.442695, %v2598_v60  ;;  %v2601_v57 = vsub.f32 %v2565_v4, %v2591_v26 }
 0x90a   :  { %v2594_v63 = vpop.xlane.xlu0 %2593 }
 0x90b   :  { %8728 = vpow2.f32 %v2609_v46  ;;  %v2615_v45 = vmul.f32 1.442695, %v2601_v57  ;;  %v2602_v46 = vsub.f32 %v10400_v61, %v2594_v63 }
 0x90c   :  { %v2585_v17 = vpop.xlane.xlu1 %2584  ;;  %8730 = vpow2.f32 %v2605_v8 }
 0x90d   :  { %8732 = vpow2.f32 %v2615_v45  ;;  %v2599_v8 = vsub.f32 %v10397_v32, %v2585_v17  ;;  %v2617_v45 = vmul.f32 1.442695, %v2602_v46 }
 0x90e   :  { %v2588_v14 = vpop.xlane.xlu0 %2587 }
 0x90f   :  { %v2600_v36 = vsub.f32 %v2560_v33, %v2588_v14  ;;  %v2611_v57 = vmul.f32 1.442695, %v2599_v8 }
 0x910   :  { %v10413_v43 = vpop.eup %8724  ;;  %v2674_v11 = vpop.permute.xlu1 %2673 }
 0x911   :  { %v2613_v18 = vmul.f32 1.442695, %v2600_v36  ;;  %7766 = vmatprep.subr.bf16.mxu1 %v2674_v11  ;;  %v2625_v39 = vsel %vm1631_vm0, %v10413_v43, 0.0 }
 0x912   :  { %7767 = vmatpush3.bf16.msra.mxu1 %v2674_v11  ;;  %2626 = vadd.xlane.f32.xlu1 %v2625_v39  ;;  %v2672_v41 = vpop.permute.xlu0 %2671 }
 0x913   :  { %7768 = vmatprep.subr.bf16.mxu1 %v2672_v41  ;;  %8734 = vpow2.f32 %v2613_v18 }
 0x914   :  { %v8727_v4 = vpop.eup %8726  ;;  %8736 = vpow2.f32 %v2611_v57 }
 0x915   :  { %v2619_v25 = vsel %vm1631_vm0, %v8727_v4, 0.0  ;;  %8738 = vpow2.f32 %v2617_v45 }
 0x916   :  { %2620 = vadd.xlane.f32.xlu1 %v2619_v25  ;;  %7769 = vmatpush3.bf16.msra.mxu1 %v2672_v41 }
 0x918   :  { %v8729_v33 = vpop.eup %8728 }
 0x919   :  { %v2628_v31 = vsel %vm1631_vm0, %v8729_v33, 0.0  ;;  %v8731_v34 = vpop.eup %8730 }
 0x91a   :  { %2629 = vadd.xlane.f32.xlu0 %v2628_v31  ;;  %v2622_v52 = vsel %vm1631_vm0, %v8731_v34, 0.0  ;;  %v10420_v7 = vpop.eup %8732 }
 0x91b   :  { %v2637_v21 = vsel %vm1631_vm0, %v10420_v7, 0.0 }
 0x91e   :  { %2623 = vadd.xlane.f32.xlu0 %v2622_v52 }
 0x920   :  { %v10424_v60 = vpop.eup %8734 }
 0x921   :  { %v2634_v26 = vsel %vm1631_vm0, %v10424_v60, 0.0  ;;  %v8737_v14 = vpop.eup %8736 }
 0x922   :  { %2638 = vadd.xlane.f32.xlu0 %v2637_v21  ;;  %v2631_v36 = vsel %vm1631_vm0, %v8737_v14, 0.0  ;;  %v8739_v11 = vpop.eup %8738 }
 0x923   :  { %v2640_v18 = vsel %vm1631_vm0, %v8739_v11, 0.0 }
 0x926   :  { %2635 = vadd.xlane.f32.xlu0 %v2634_v26 }
 0x927   :  { %2669 = vrot.lane.b32.xlu1 %v9995_v5, %s9304_s4 }
 0x93c   :  { %2667 = vrot.lane.b32.xlu0 %v10001_v0, %s9304_s4 }
 0x94b   :  { %2632 = vadd.xlane.f32.xlu1 %v2631_v36 }
 0x94f   :  { %2641 = vadd.xlane.f32.xlu1 %v2640_v18  ;;  %v2790_v18 = vsel %vm1631_vm0, %v9793_v59, 0 }
 0x99b   :  { %v2627_v5 = vpop.xlane.xlu1 %2626 }
 0x99f   :  { %v2621_v39 = vpop.xlane.xlu1 %2620 }
 0x9a3   :  { %v2670_v32 = vpop.permute.xlu1 %2669  ;;  %v2630_v17 = vpop.xlane.xlu0 %2629 }
 0x9a4   :  { %7770 = vmatprep.subr.bf16.mxu1 %v2670_v32  ;;  %8740 = vrcp.f32 %v2630_v17 }
 0x9a5   :  { %7771 = vmatpush3.bf16.msra.mxu1 %v2670_v32  ;;  %8742 = vrcp.f32 %v2621_v39 }
 0x9a6   :  { %8744 = vrcp.f32 %v2627_v5 }
 0x9a7   :  { %v2624_v61 = vpop.xlane.xlu0 %2623 }
 0x9a8   :  { %8746 = vrcp.f32 %v2624_v61 }
 0x9ab   :  { %v2639_v0 = vpop.xlane.xlu0 %2638 }
 0x9af   :  { %v2636_v63 = vpop.xlane.xlu0 %2635 }
 0x9b0   :  { %8748 = vrcp.f32 %v2636_v63 }
 0x9b1   :  { %v8741_v41 = vpop.eup %8740 }
 0x9b2   :  { %v8743_v25 = vpop.eup %8742  ;;  %v2654_v26 = vmul.f32 %v8741_v41, %v8729_v33  ;;  %v2787_v33 = vsel %vm1631_vm0, %v9781_v62, 0 }
 0x9b3   :  { %v2668_v31 = vpop.permute.xlu0 %2667  ;;  %v8745_v52 = vpop.eup %8744  ;;  %v2651_v8 = vmul.f32 %v8743_v25, %v8727_v4  ;;  %v2781_v4 = vsel %vm1631_vm0, %v9761_v16, 0 }
 0x9b4   :  { %7772 = vmatprep.subr.bf16.mxu1 %v2668_v31  ;;  %v2653_v57 = vmul.f32 %v8745_v52, %v10413_v43  ;;  %v2784_v43 = vsel %vm1631_vm0, %v9771_v23, 0 }
 0x9b5   :  { %v8747_v21 = vpop.eup %8746  ;;  %7773 = vmatpush3.bf16.msra.mxu1 %v2668_v31 }
 0x9b6   :  { %8198 = vmatprep.subr.msk.bf16.mxu1 %vm1631_vm0, %v9793_v59  ;;  %v2652_v46 = vmul.f32 %v8747_v21, %v8731_v34  ;;  %v2660_v36 = vpack.c.bf16 %v2654_v26, %v2653_v57 }
 0x9b8   :  { %v2659_v45 = vpack.c.bf16 %v2652_v46, %v2651_v8 }
 0x9ba   :  { %7774 = vmatprep.mubr.msk.bf16.mxu1 %vm1631_vm0, %v2659_v45 }
 0x9bb   :  { %7775 = vmatmul.mubr.msk.bf16.vlgmr.msra.gmra.mxu1 %vm1631_vm0, %v2660_v36 }
 0x9bc   :  { %7783 = vmatpush3.bf16.xpose.msra.mxu1 %v2790_v18 }
 0x9bd   :  { %8199 = vmatprep.subr.msk.bf16.mxu1 %vm1631_vm0, %v9781_v62  ;;  %v8749_v39 = vpop.eup %8748 }
 0x9be   :  { %v2656_v61 = vmul.f32 %v8749_v39, %v10424_v60  ;;  %v12287_v60 = vld [vmem:[#allocation28_spill] sm:$0xff] }
 0x9c4   :  { %7785 = vmatpush3.bf16.xpose.msra.mxu1 %v2787_v33 }
 0x9c5   :  { %8200 = vmatprep.subr.msk.bf16.mxu1 %vm1631_vm0, %v9771_v23 }
 0x9cc   :  { %7787 = vmatpush3.bf16.xpose.msra.mxu1 %v2784_v43 }
 0x9cd   :  { %8201 = vmatprep.subr.msk.bf16.mxu1 %vm1631_vm0, %v9761_v16 }
 0x9d4   :  { %7789 = vmatpush3.bf16.xpose.msra.mxu1 %v2781_v4  ;;  %v2633_v34 = vpop.xlane.xlu1 %2632 }
 0x9d5   :  { %8750 = vrcp.f32 %v2633_v34 }
 0x9d6   :  { %8752 = vrcp.f32 %v2639_v0  ;;  %v12285_v0 = vld [vmem:[#allocation22_spill] sm:$0xff] }
 0x9d8   :  { %v2642_v5 = vpop.xlane.xlu1 %2641 }
 0x9d9   :  { %8754 = vrcp.f32 %v2642_v5 }
 0x9e2   :  { %v8751_v32 = vpop.eup %8750 }
 0x9e3   :  { %v2655_v17 = vmul.f32 %v8751_v32, %v8737_v14  ;;  %v8753_v41 = vpop.eup %8752  ;;  %v12286_v14 = vld [vmem:[#allocation25_spill] sm:$0xff] }
 0x9e4   :  { %v2657_v63 = vmul.f32 %v8753_v41, %v10420_v7 }
 0x9e5   :  { %v2661_v25 = vpack.c.bf16 %v2656_v61, %v2655_v17 }
 0x9e6   :  { %v8755_v31 = vpop.eup %8754 }
 0x9e7   :  { %7778 = vmatprep.mubr.msk.bf16.mxu1 %vm1631_vm0, %v2661_v25  ;;  %v2658_v52 = vmul.f32 %v8755_v31, %v8739_v11 }
 0x9e9   :  { %v2662_v21 = vpack.c.bf16 %v2658_v52, %v2657_v63 }
 0x9eb   :  { %7779 = vmatmul.mubr.msk.bf16.gmra.mxu1 %vm1631_vm0, %v2662_v21 }
 0x9ec   :  { %7790 = vmatprep.mubr.msk.bf16.mxu1 %vm1631_vm0, %v9665_v29 }
 0x9f3   :  { %7791 = vmatmul.mubr.msk.bf16.vlgmr.msra.gmra.mxu1 %vm1631_vm0, %v12285_v0 }
 0x9f4   :  { %7794 = vmatprep.mubr.msk.bf16.mxu1 %vm1631_vm0, %v12286_v14 }
 0x9fb   :  { %7795 = vmatmul.mubr.msk.bf16.gmra.mxu1 %vm1631_vm0, %v12287_v60 }
 0xa7b   :  { %v10467_v26 = vpop.f32.mrf.mxu1 }
 0xa7d   :  { %v10469_v8 = vpop.f32.mrf.mxu1 }
 0xa7f   :  { %v10471_v7 = vpop.f32.mrf.mxu1 }
 0xa81   :  { %v10475_v46 = vpop.f32.mrf.mxu1 }
 0xaab   :  { %v10477_v57 = vpop.f32.mrf.mxu1 }
 0xaad   :  { %v10479_v45 = vpop.f32.mrf.mxu1 }
 0xaaf   :  { %v10481_v36 = vpop.f32.mrf.mxu1 }
 0xab1   :  { %v10485_v33 = vpop.f32.mrf.mxu1 }
 0xab3   :  { %v7792_v43 = vpop.f32.mrf.mxu1 }
 0xab4   :  { %v2835_v4 = vadd.f32 %v10394_v51, %v7792_v43 }
 0xab5   :  { %v2826_v34 = vpop.f32.mrf.mxu1 }
 0xab6   :  { %v2827_v5 = vadd.f32 %v10394_v51, %v2826_v34  ;;  %v2863_v39 = vsel %vm1631_vm0, %v2835_v4, -inf }
 0xab7   :  { %2864 = vmax.xlane.f32.xlu1 %v2863_v39  ;;  %v7793_v32 = vpop.f32.mrf.mxu1 }
 0xab8   :  { %v2857_v41 = vsel %vm1631_vm0, %v2827_v5, -inf  ;;  %v2838_v52 = vadd.f32 %v10394_v51, %v7793_v32 }
 0xab9   :  { %v2829_v17 = vpop.f32.mrf.mxu1 }
 0xaba   :  { %v2830_v61 = vadd.f32 %v10394_v51, %v2829_v17  ;;  %v2866_v17 = vsel %vm1631_vm0, %v2838_v52, -inf }
 0xabb   :  { %v7796_v25 = vpop.f32.mrf.mxu1  ;;  %2858 = vmax.xlane.f32.xlu1 %v2857_v41 }
 0xabc   :  { %v2851_v31 = vadd.f32 %v10394_v51, %v7796_v25  ;;  %v2860_v43 = vsel %vm1631_vm0, %v2830_v61, -inf }
 0xabd   :  { %v2842_v63 = vpop.f32.mrf.mxu1 }
 0xabe   :  { %v2875_v21 = vsel %vm1631_vm0, %v2851_v31, -inf  ;;  %v2843_v39 = vadd.f32 %v10394_v51, %v2842_v63 }
 0xabf   :  { %2876 = vmax.xlane.f32.xlu0 %v2875_v21  ;;  %v7797_v34 = vpop.f32.mrf.mxu1  ;;  %2861 = vmax.xlane.f32.xlu1 %v2860_v43 }
 0xac0   :  { %v2869_v25 = vsel %vm1631_vm0, %v2843_v39, -inf  ;;  %v2854_v32 = vadd.f32 %v10394_v51, %v7797_v34 }
 0xac1   :  { %v2845_v28 = vpop.f32.mrf.mxu1 }
 0xac2   :  { %v2846_v41 = vadd.f32 %v10394_v51, %v2845_v28  ;;  %v2878_v21 = vsel %vm1631_vm0, %v2854_v32, -inf }
 0xac3   :  { %2867 = vmax.xlane.f32.xlu1 %v2866_v17 }
 0xac4   :  { %v2872_v18 = vsel %vm1631_vm0, %v2846_v41, -inf }
 0xac7   :  { %2870 = vmax.xlane.f32.xlu1 %v2869_v25 }
 0xacb   :  { %2873 = vmax.xlane.f32.xlu1 %v2872_v18 }
 0xacf   :  { %2879 = vmax.xlane.f32.xlu1 %v2878_v21 }
 0xb40   :  { %v2865_v43 = vpop.xlane.xlu1 %2864 }
 0xb41   :  { %v2883_v10 = vsub.f32 %v2835_v4, %v2865_v43 }
 0xb43   :  { %v2893_v63 = vmul.f32 1.442695, %v2883_v10 }
 0xb44   :  { %v2859_v11 = vpop.xlane.xlu1 %2858 }
 0xb45   :  { %8756 = vpow2.f32 %v2893_v63  ;;  %v2881_v6 = vsub.f32 %v2827_v5, %v2859_v11 }
 0xb47   :  { %v2889_v17 = vmul.f32 1.442695, %v2881_v6 }
 0xb48   :  { %v2877_v50 = vpop.xlane.xlu0 %2876  ;;  %v2862_v28 = vpop.xlane.xlu1 %2861 }
 0xb49   :  { %8758 = vpow2.f32 %v2889_v17  ;;  %v2887_v12 = vsub.f32 %v2851_v31, %v2877_v50  ;;  %v2882_v37 = vsub.f32 %v2830_v61, %v2862_v28 }
 0xb4b   :  { %v2901_v25 = vmul.f32 1.442695, %v2887_v12  ;;  %v2891_v18 = vmul.f32 1.442695, %v2882_v37 }
 0xb4c   :  { %v2868_v34 = vpop.xlane.xlu1 %2867 }
 0xb4d   :  { %8760 = vpow2.f32 %v2901_v25  ;;  %v2884_v20 = vsub.f32 %v2838_v52, %v2868_v34 }
 0xb4f   :  { %v2895_v13 = vmul.f32 1.442695, %v2884_v20 }
 0xb50   :  { %v2871_v5 = vpop.xlane.xlu1 %2870 }
 0xb51   :  { %8762 = vpow2.f32 %v2895_v13  ;;  %v2885_v31 = vsub.f32 %v2843_v39, %v2871_v5 }
 0xb52   :  { %v10503_v21 = vpop.eup %8756  ;;  %8764 = vpow2.f32 %v2891_v18 }
 0xb53   :  { %v2911_v10 = vsel %vm1631_vm0, %v10503_v21, 0.0  ;;  %v2897_v43 = vmul.f32 1.442695, %v2885_v31 }
 0xb54   :  { %2912 = vadd.xlane.f32.xlu1 %v2911_v10  ;;  %v2874_v61 = vpop.xlane.xlu1 %2873 }
 0xb55   :  { %8766 = vpow2.f32 %v2897_v43 }
 0xb56   :  { %v8759_v6 = vpop.eup %8758 }
 0xb57   :  { %v2905_v11 = vsel %vm1631_vm0, %v8759_v6, 0.0 }
 0xb58   :  { %2906 = vadd.xlane.f32.xlu1 %v2905_v11  ;;  %v2880_v52 = vpop.xlane.xlu1 %2879 }
 0xb59   :  { %v2888_v63 = vsub.f32 %v2854_v32, %v2880_v52 }
 0xb5a   :  { %v10508_v50 = vpop.eup %8760 }
 0xb5b   :  { %v2923_v12 = vsel %vm1631_vm0, %v10508_v50, 0.0  ;;  %v2903_v17 = vmul.f32 1.442695, %v2888_v63 }
 0xb5c   :  { %2924 = vadd.xlane.f32.xlu0 %v2923_v12 }
 0xb5d   :  { %8768 = vpow2.f32 %v2903_v17 }
 0xb5e   :  { %v8763_v37 = vpop.eup %8762 }
 0xb5f   :  { %v2914_v20 = vsel %vm1631_vm0, %v8763_v37, 0.0  ;;  %v8765_v13 = vpop.eup %8764 }
 0xb60   :  { %2915 = vadd.xlane.f32.xlu1 %v2914_v20  ;;  %v2908_v4 = vsel %vm1631_vm0, %v8765_v13, 0.0 }
 0xb64   :  { %2909 = vadd.xlane.f32.xlu1 %v2908_v4 }
 0xb72   :  { %3048 = vrot.lane.b32.xlu0 %v9793_v59, %s9304_s4  ;;  %v2886_v59 = vsub.f32 %v2846_v41, %v2874_v61 }
 0xb74   :  { %v2899_v28 = vmul.f32 1.442695, %v2886_v59 }
 0xb75   :  { %3046 = vrot.lane.b32.xlu1 %v9781_v62, %s9304_s4  ;;  %v10524_v62 = vpop.eup %8766 }
 0xb76   :  { %3030 = vrot.lane.b32.xlu0 %v9665_v29, %s9304_s4  ;;  %8770 = vpow2.f32 %v2899_v28  ;;  %v2917_v29 = vsel %vm1631_vm0, %v10524_v62, 0.0 }
 0xb79   :  { %3044 = vrot.lane.b32.xlu1 %v9771_v23, %s9304_s4  ;;  %v8769_v23 = vpop.eup %8768 }
 0xb7a   :  { %3034 = vrot.lane.b32.xlu0 %v12286_v14, %s9304_s4  ;;  %v2926_v14 = vsel %vm1631_vm0, %v8769_v23, 0.0 }
 0xb83   :  { %v8771_v25 = vpop.eup %8770 }
 0xb84   :  { %v2920_v39 = vsel %vm1631_vm0, %v8771_v25, 0.0 }
 0xb9d   :  { %2918 = vadd.xlane.f32.xlu1 %v2917_v29  ;;  %v12288_v29 = vld [vmem:[#allocation92_spill] sm:$0xff] }
 0xba1   :  { %2927 = vadd.xlane.f32.xlu1 %v2926_v14  ;;  %v12289_v14 = vld [vmem:[#allocation93_spill] sm:$0xff] }
 0xba5   :  { %2921 = vadd.xlane.f32.xlu1 %v2920_v39  ;;  %v10547_v39 = vpack.c.bf16 %v12289_v14, %v12288_v29 }
 0xbb6   :  { %3042 = vrot.lane.b32.xlu1 %v9761_v16, %s9304_s4 }
 0xbba   :  { %3032 = vrot.lane.b32.xlu1 %v12285_v0, %s9304_s4 }
 0xbbe   :  { %3036 = vrot.lane.b32.xlu1 %v12287_v60, %s9304_s4 }
 0xbdd   :  { %v2913_v41 = vpop.xlane.xlu1 %2912 }
 0xbe1   :  { %v2907_v32 = vpop.xlane.xlu1 %2906 }
 0xbe5   :  { %v2925_v34 = vpop.xlane.xlu0 %2924 }
 0xbe9   :  { %v3049_v18 = vpop.permute.xlu0 %3048  ;;  %v2916_v10 = vpop.xlane.xlu1 %2915 }
 0xbea   :  { %8202 = vmatprep.subr.msk.bf16.mxu0 %vm1631_vm0, %v3049_v18  ;;  %8772 = vrcp.f32 %v2916_v10  ;;  %v3072_v43 = vsel %vm1631_vm0, %v3049_v18, 0 }
 0xbeb   :  { %8774 = vrcp.f32 %v2907_v32 }
 0xbec   :  { %8776 = vrcp.f32 %v2913_v41 }
 0xbed   :  { %v2910_v11 = vpop.xlane.xlu1 %2909 }
 0xbee   :  { %8778 = vrcp.f32 %v2910_v11 }
 0xbf1   :  { %v3047_v63 = vpop.permute.xlu1 %3046 }
 0xbf2   :  { %v3069_v59 = vsel %vm1631_vm0, %v3047_v63, 0 }
 0xbf5   :  { %v3045_v17 = vpop.permute.xlu1 %3044 }
 0xbf7   :  { %v8773_v12 = vpop.eup %8772 }
 0xbf8   :  { %v8775_v16 = vpop.eup %8774  ;;  %v2940_v0 = vmul.f32 %v8773_v12, %v8763_v37 }
 0xbf9   :  { %v8777_v20 = vpop.eup %8776  ;;  %v2937_v5 = vmul.f32 %v8775_v16, %v8759_v6 }
 0xbfa   :  { %v2939_v60 = vmul.f32 %v8777_v20, %v10503_v21  ;;  %v3066_v21 = vsel %vm1631_vm0, %v3045_v17, 0 }
 0xbfb   :  { %v8779_v4 = vpop.eup %8778 }
 0xbfc   :  { %v2938_v61 = vmul.f32 %v8779_v4, %v8765_v13  ;;  %v2946_v52 = vpack.c.bf16 %v2940_v0, %v2939_v60  ;;  %v12290_v60 = vld [vmem:[#allocation90_spill] sm:$0xff] }
 0xbfe   :  { %v2945_v31 = vpack.c.bf16 %v2938_v61, %v2937_v5  ;;  %v3031_v5 = vpop.permute.xlu0 %3030 }
 0xc00   :  { %7806 = vmatprep.mubr.msk.bf16.mxu0 %vm1631_vm0, %v2945_v31  ;;  %v12291_v31 = vld [vmem:[#allocation91_spill] sm:$0xff] }
 0xc01   :  { %7807 = vmatmul.mubr.msk.bf16.vlgmr.msra.gmra.mxu0 %vm1631_vm0, %v2946_v52  ;;  %v10559_v52 = vpack.c.bf16 %v12291_v31, %v12290_v60 }
 0xc02   :  { %7815 = vmatpush3.bf16.xpose.msra.mxu0 %v3072_v43 }
 0xc03   :  { %8203 = vmatprep.subr.msk.bf16.mxu0 %vm1631_vm0, %v3047_v63  ;;  %v12294_v63 = vld [vmem:[#allocation86_spill] sm:$0xff] }
 0xc0a   :  { %7817 = vmatpush3.bf16.xpose.msra.mxu0 %v3069_v59  ;;  %v12295_v59 = vld [vmem:[#allocation87_spill] sm:$0xff] }
 0xc0b   :  { %8204 = vmatprep.subr.msk.bf16.mxu0 %vm1631_vm0, %v3045_v17  ;;  %v10573_v17 = vpack.c.bf16 %v12295_v59, %v12294_v63 }
 0xc12   :  { %7819 = vmatpush3.bf16.xpose.msra.mxu0 %v3066_v21 }
 0xc26   :  { %v2919_v6 = vpop.xlane.xlu1 %2918 }
 0xc2a   :  { %v2928_v37 = vpop.xlane.xlu1 %2927 }
 0xc2b   :  { %8780 = vrcp.f32 %v2928_v37 }
 0xc2c   :  { %8782 = vrcp.f32 %v2919_v6 }
 0xc2d   :  { %8784 = vrcp.f32 %v2925_v34 }
 0xc2e   :  { %v2922_v13 = vpop.xlane.xlu1 %2921 }
 0xc2f   :  { %8786 = vrcp.f32 %v2922_v13 }
 0xc32   :  { %v3043_v28 = vpop.permute.xlu1 %3042 }
 0xc33   :  { %8205 = vmatprep.subr.msk.bf16.mxu0 %vm1631_vm0, %v3043_v28  ;;  %v3063_v41 = vsel %vm1631_vm0, %v3043_v28, 0 }
 0xc34   :  { %7821 = vmatpush3.bf16.xpose.msra.mxu0 %v3063_v41 }
 0xc35   :  { %7862 = vmatprep.subr.bf16.mxu0 %v10547_v39 }
 0xc36   :  { %v3033_v61 = vpop.permute.xlu1 %3032 }
 0xc38   :  { %v8781_v32 = vpop.eup %8780 }
 0xc39   :  { %v8783_v18 = vpop.eup %8782  ;;  %v2944_v12 = vmul.f32 %v8781_v32, %v8769_v23  ;;  %v3035_v23 = vpop.permute.xlu0 %3034 }
 0xc3a   :  { %v8785_v10 = vpop.eup %8784  ;;  %v2941_v34 = vmul.f32 %v8783_v18, %v10524_v62  ;;  %v12293_v62 = vld [vmem:[#allocation89_spill] sm:$0xff]  ;;  %v3037_v43 = vpop.permute.xlu1 %3036 }
 0xc3b   :  { %v2943_v20 = vmul.f32 %v8785_v10, %v10508_v50  ;;  %v12292_v50 = vld [vmem:[#allocation88_spill] sm:$0xff] }
 0xc3c   :  { %v8787_v11 = vpop.eup %8786 }
 0xc3d   :  { %v2942_v16 = vmul.f32 %v8787_v11, %v8771_v25  ;;  %v2948_v0 = vpack.c.bf16 %v2944_v12, %v2943_v20  ;;  %v10567_v25 = vpack.c.bf16 %v12293_v62, %v12292_v50 }
 0xc3f   :  { %v2947_v4 = vpack.c.bf16 %v2942_v16, %v2941_v34 }
 0xc41   :  { %7810 = vmatprep.mubr.msk.bf16.mxu0 %vm1631_vm0, %v2947_v4 }
 0xc42   :  { %7811 = vmatmul.mubr.msk.bf16.gmra.mxu0 %vm1631_vm0, %v2948_v0 }
 0xc43   :  { %7822 = vmatprep.mubr.msk.bf16.mxu0 %vm1631_vm0, %v3031_v5 }
 0xc4a   :  { %7823 = vmatmul.mubr.msk.bf16.vlgmr.msra.gmra.mxu0 %vm1631_vm0, %v3033_v61 }
 0xc4b   :  { %7863 = vmatpush3.bf16.msra.mxu0 %v10547_v39  ;;  %7826 = vmatprep.mubr.msk.bf16.mxu0 %vm1631_vm0, %v3035_v23 }
 0xc4c   :  { %7864 = vmatprep.subr.bf16.mxu0 %v10559_v52 }
 0xc4f   :  { %7865 = vmatpush3.bf16.msra.mxu0 %v10559_v52 }
 0xc50   :  { %7866 = vmatprep.subr.bf16.mxu0 %v10567_v25 }
 0xc52   :  { %7827 = vmatmul.mubr.msk.bf16.gmra.mxu0 %vm1631_vm0, %v3037_v43 }
 0xc53   :  { %7867 = vmatpush3.bf16.msra.mxu0 %v10567_v25 }
 0xc54   :  { %7868 = vmatprep.subr.bf16.mxu0 %v10573_v17 }
 0xc57   :  { %7869 = vmatpush3.bf16.msra.mxu0 %v10573_v17 }
 0xcc1   :  { %v10579_v21 = vpop.f32.mrf.mxu0 }
 0xcc2   :  { %12296 = vst [vmem:[#allocation22_spill] sm:$0xff] %v10579_v21 }
 0xcc3   :  { %v10581_v6 = vpop.f32.mrf.mxu0 }
 0xcc4   :  { %12297 = vst [vmem:[#allocation25_spill] sm:$0xff] %v10581_v6 }
 0xcc5   :  { %v10583_v37 = vpop.f32.mrf.mxu0 }
 0xcc6   :  { %12298 = vst [vmem:[#allocation28_spill] sm:$0xff] %v10583_v37 }
 0xcc7   :  { %v10585_v13 = vpop.f32.mrf.mxu0 }
 0xcc8   :  { %12299 = vst [vmem:[#allocation92_spill] sm:$0xff] %v10585_v13 }
 0xd02   :  { %v10587_v28 = vpop.f32.mrf.mxu0 }
 0xd03   :  { %12300 = vst [vmem:[#allocation93_spill] sm:$0xff] %v10587_v28 }
 0xd04   :  { %v10589_v29 = vpop.f32.mrf.mxu0 }
 0xd05   :  { %12301 = vst [vmem:[#allocation90_spill] sm:$0xff] %v10589_v29 }
 0xd06   :  { %v10591_v14 = vpop.f32.mrf.mxu0 }
 0xd07   :  { %12302 = vst [vmem:[#allocation91_spill] sm:$0xff] %v10591_v14 }
 0xd08   :  { %v10593_v41 = vpop.f32.mrf.mxu0 }
 0xd09   :  { %12303 = vst [vmem:[#allocation88_spill] sm:$0xff] %v10593_v41 }
 0xd0a   :  { %v7824_v32 = vpop.f32.mrf.mxu0 }
 0xd0b   :  { %v3117_v12 = vadd.f32 %v10394_v51, %v7824_v32 }
 0xd0c   :  { %v3108_v18 = vpop.f32.mrf.mxu0 }
 0xd0d   :  { %v3109_v10 = vadd.f32 %v10394_v51, %v3108_v18  ;;  %v3145_v61 = vsel %vm1631_vm0, %v3117_v12, -inf }
 0xd0e   :  { %v7825_v11 = vpop.f32.mrf.mxu0 }
 0xd0f   :  { %v3139_v34 = vsel %vm1631_vm0, %v3109_v10, -inf  ;;  %v3120_v0 = vadd.f32 %v10394_v51, %v7825_v11 }
 0xd10   :  { %v3111_v16 = vpop.f32.mrf.mxu0  ;;  %3140 = vmax.xlane.f32.xlu0 %v3139_v34 }
 0xd11   :  { %v3112_v20 = vadd.f32 %v10394_v51, %v3111_v16  ;;  %v3148_v62 = vsel %vm1631_vm0, %v3120_v0, -inf }
 0xd12   :  { %v7828_v4 = vpop.f32.mrf.mxu0 }
 0xd13   :  { %v3142_v5 = vsel %vm1631_vm0, %v3112_v20, -inf  ;;  %v3133_v32 = vadd.f32 %v10394_v51, %v7828_v4 }
 0xd14   :  { %3143 = vmax.xlane.f32.xlu1 %v3142_v5  ;;  %3146 = vmax.xlane.f32.xlu0 %v3145_v61  ;;  %v3124_v60 = vpop.f32.mrf.mxu0 }
 0xd15   :  { %v3125_v23 = vadd.f32 %v10394_v51, %v3124_v60  ;;  %v3157_v34 = vsel %vm1631_vm0, %v3133_v32, -inf }
 0xd16   :  { %v7829_v31 = vpop.f32.mrf.mxu0 }
 0xd17   :  { %v3136_v50 = vadd.f32 %v10394_v51, %v7829_v31  ;;  %v3151_v18 = vsel %vm1631_vm0, %v3125_v23, -inf }
 0xd18   :  { %3149 = vmax.xlane.f32.xlu0 %v3148_v62  ;;  %v3127_v43 = vpop.f32.mrf.mxu0 }
 0xd19   :  { %v3128_v63 = vadd.f32 %v10394_v51, %v3127_v43  ;;  %v3160_v59 = vsel %vm1631_vm0, %v3136_v50, -inf }
 0xd1a   :  { %3161 = vmax.xlane.f32.xlu1 %v3160_v59 }
 0xd1b   :  { %v3154_v11 = vsel %vm1631_vm0, %v3128_v63, -inf }
 0xd1c   :  { %3152 = vmax.xlane.f32.xlu0 %v3151_v18 }
 0xd1e   :  { %3155 = vmax.xlane.f32.xlu1 %v3154_v11 }
 0xd20   :  { %3158 = vmax.xlane.f32.xlu0 %v3157_v34 }
 0xd2f   :  { %3239 = vrot.lane.b32.xlu1 %v9895_v58, %s9304_s4 }
 0xd33   :  { %3237 = vrot.lane.b32.xlu1 %v9885_v44, %s9304_s4 }
 0xd99   :  { %v3141_v16 = vpop.xlane.xlu0 %3140 }
 0xd9a   :  { %v3163_v5 = vsub.f32 %v3109_v10, %v3141_v16 }
 0xd9c   :  { %v3171_v31 = vmul.f32 1.442695, %v3163_v5 }
 0xd9d   :  { %v3147_v61 = vpop.xlane.xlu0 %3146  ;;  %v3144_v60 = vpop.xlane.xlu1 %3143 }
 0xd9e   :  { %v3165_v4 = vsub.f32 %v3117_v12, %v3147_v61  ;;  %v3164_v43 = vsub.f32 %v3112_v20, %v3144_v60 }
 0xda0   :  { %v3175_v62 = vmul.f32 1.442695, %v3165_v4  ;;  %v3173_v11 = vmul.f32 1.442695, %v3164_v43 }
 0xda1   :  { %v3150_v59 = vpop.xlane.xlu0 %3149 }
 0xda2   :  { %8788 = vpow2.f32 %v3175_v62  ;;  %v3166_v18 = vsub.f32 %v3120_v0, %v3150_v59 }
 0xda3   :  { %8790 = vpow2.f32 %v3171_v31  ;;  %v3162_v61 = vpop.xlane.xlu1 %3161 }
 0xda4   :  { %v3177_v34 = vmul.f32 1.442695, %v3166_v18  ;;  %v3170_v59 = vsub.f32 %v3136_v50, %v3162_v61 }
 0xda5   :  { %v3153_v19 = vpop.xlane.xlu0 %3152 }
 0xda6   :  { %8792 = vpow2.f32 %v3177_v34  ;;  %v3167_v58 = vsub.f32 %v3125_v23, %v3153_v19 }
 0xda7   :  { %8794 = vpow2.f32 %v3173_v11  ;;  %v3156_v31 = vpop.xlane.xlu1 %3155  ;;  %v3185_v11 = vmul.f32 1.442695, %v3170_v59  ;;  %v12304_v59 = vld [vmem:[#allocation60_spill] sm:$0xff] }
 0xda8   :  { %v3179_v48 = vmul.f32 1.442695, %v3167_v58  ;;  %v3168_v62 = vsub.f32 %v3128_v63, %v3156_v31 }
 0xda9   :  { %v3159_v60 = vpop.xlane.xlu0 %3158 }
 0xdaa   :  { %8796 = vpow2.f32 %v3179_v48  ;;  %v3169_v4 = vsub.f32 %v3133_v32, %v3159_v60  ;;  %v3181_v18 = vmul.f32 1.442695, %v3168_v62 }
 0xdab   :  { %v3240_v63 = vpop.permute.xlu1 %3239 }
 0xdac   :  { %v3183_v43 = vmul.f32 1.442695, %v3169_v4 }
 0xdae   :  { %8798 = vpow2.f32 %v3183_v43 }
 0xdaf   :  { %v10615_v44 = vpop.eup %8788  ;;  %8800 = vpow2.f32 %v3181_v18  ;;  %v12305_v18 = vld [vmem:[#allocation61_spill] sm:$0xff] }
 0xdb0   :  { %v3193_v10 = vsel %vm1631_vm0, %v10615_v44, 0.0  ;;  %v10619_v12 = vpop.eup %8790  ;;  %8802 = vpow2.f32 %v3185_v11  ;;  %v10647_v11 = vpack.c.bf16 %v12305_v18, %v12304_v59 }
 0xdb1   :  { %3194 = vadd.xlane.f32.xlu0 %v3193_v10  ;;  %v3187_v16 = vsel %vm1631_vm0, %v10619_v12, 0.0  ;;  %v3238_v10 = vpop.permute.xlu1 %3237 }
 0xdb3   :  { %v8793_v20 = vpop.eup %8792 }
 0xdb4   :  { %v3196_v0 = vsel %vm1631_vm0, %v8793_v20, 0.0  ;;  %v8795_v5 = vpop.eup %8794 }
 0xdb5   :  { %3197 = vadd.xlane.f32.xlu1 %v3196_v0  ;;  %3188 = vadd.xlane.f32.xlu0 %v3187_v16  ;;  %v3190_v19 = vsel %vm1631_vm0, %v8795_v5, 0.0 }
 0xdb7   :  { %v10625_v48 = vpop.eup %8796 }
 0xdb8   :  { %v3199_v23 = vsel %vm1631_vm0, %v10625_v48, 0.0 }
 0xdb9   :  { %3191 = vadd.xlane.f32.xlu1 %v3190_v19 }
 0xdbb   :  { %v10633_v34 = vpop.eup %8798 }
 0xdbc   :  { %v10637_v58 = vpop.eup %8800 }
 0xdbd   :  { %3200 = vadd.xlane.f32.xlu1 %v3199_v23  ;;  %v10641_v32 = vpop.eup %8802 }
 0xdbe   :  { %v3208_v50 = vsel %vm1631_vm0, %v10641_v32, 0.0 }
 0xdcb   :  { %3241 = vrot.lane.b32.xlu0 %v9907_v56, %s9304_s4  ;;  %v3205_v56 = vsel %vm1631_vm0, %v10633_v34, 0.0 }
 0xdce   :  { %3235 = vrot.lane.b32.xlu1 %v9873_v2, %s9304_s4  ;;  %v3202_v2 = vsel %vm1631_vm0, %v10637_v58, 0.0 }
 0xdea   :  { %3206 = vadd.xlane.f32.xlu0 %v3205_v56 }
 0xdee   :  { %3203 = vadd.xlane.f32.xlu0 %v3202_v2 }
 0xdf2   :  { %3209 = vadd.xlane.f32.xlu0 %v3208_v50 }
 0xe3a   :  { %v3195_v0 = vpop.xlane.xlu0 %3194 }
 0xe3e   :  { %v3189_v16 = vpop.xlane.xlu0 %3188  ;;  %v3198_v19 = vpop.xlane.xlu1 %3197 }
 0xe3f   :  { %8804 = vrcp.f32 %v3198_v19  ;;  %v12306_v19 = vld [vmem:[#allocation58_spill] sm:$0xff] }
 0xe40   :  { %8806 = vrcp.f32 %v3189_v16 }
 0xe41   :  { %8808 = vrcp.f32 %v3195_v0 }
 0xe42   :  { %v3242_v23 = vpop.permute.xlu0 %3241  ;;  %v3192_v61 = vpop.xlane.xlu1 %3191 }
 0xe43   :  { %8810 = vrcp.f32 %v3192_v61  ;;  %7830 = vmatprep.subr.bf16.mxu1 %v3242_v23 }
 0xe44   :  { %7831 = vmatpush3.bf16.msra.mxu1 %v3242_v23  ;;  %v12307_v23 = vld [vmem:[#allocation59_spill] sm:$0xff] }
 0xe45   :  { %7832 = vmatprep.subr.bf16.mxu1 %v3240_v63  ;;  %v10656_v61 = vpack.c.bf16 %v12307_v23, %v12306_v19 }
 0xe46   :  { %v3201_v60 = vpop.xlane.xlu1 %3200 }
 0xe47   :  { %8812 = vrcp.f32 %v3201_v60 }
 0xe48   :  { %7833 = vmatpush3.bf16.msra.mxu1 %v3240_v63 }
 0xe49   :  { %7834 = vmatprep.subr.bf16.mxu1 %v3238_v10 }
 0xe4a   :  { %v3236_v4 = vpop.permute.xlu1 %3235 }
 0xe4c   :  { %7835 = vmatpush3.bf16.msra.mxu1 %v3238_v10  ;;  %v8805_v31 = vpop.eup %8804 }
 0xe4d   :  { %7836 = vmatprep.subr.bf16.mxu1 %v3236_v4  ;;  %v8807_v62 = vpop.eup %8806  ;;  %v3222_v2 = vmul.f32 %v8805_v31, %v8793_v20  ;;  %v3358_v20 = vsel %vm1631_vm0, %v10647_v11, 0  ;;  %v12310_v31 = vld [vmem:[#allocation54_spill] sm:$0xff] }
 0xe4e   :  { %v8809_v43 = vpop.eup %8808  ;;  %v3219_v50 = vmul.f32 %v8807_v62, %v10619_v12  ;;  %v12308_v12 = vld [vmem:[#allocation56_spill] sm:$0xff]  ;;  %v12311_v62 = vld [vmem:[#allocation55_spill] sm:$0xff] }
 0xe4f   :  { %v3221_v0 = vmul.f32 %v8809_v43, %v10615_v44  ;;  %v10673_v43 = vpack.c.bf16 %v12311_v62, %v12310_v31  ;;  %v12313_v31 = vld [vmem:[#allocation20_spill] sm:$0xff] }
 0xe50   :  { %v8811_v56 = vpop.eup %8810  ;;  %7837 = vmatpush3.bf16.msra.mxu1 %v3236_v4  ;;  %v3355_v4 = vsel %vm1631_vm0, %v10656_v61, 0 }
 0xe51   :  { %8206 = vmatprep.subr.msk.bf16.mxu1 %vm1631_vm0, %v10647_v11  ;;  %v3220_v63 = vmul.f32 %v8811_v56, %v8795_v5  ;;  %v3228_v16 = vpack.c.bf16 %v3222_v2, %v3221_v0  ;;  %v12309_v5 = vld [vmem:[#allocation57_spill] sm:$0xff]  ;;  %v3349_v18 = vsel %vm1631_vm0, %v10673_v43, 0 }
 0xe52   :  { %v10665_v44 = vpack.c.bf16 %v12309_v5, %v12308_v12 }
 0xe53   :  { %v3227_v10 = vpack.c.bf16 %v3220_v63, %v3219_v50 }
 0xe54   :  { %v3352_v59 = vsel %vm1631_vm0, %v10665_v44, 0  ;;  %v8813_v63 = vpop.eup %8812 }
 0xe55   :  { %7838 = vmatprep.mubr.msk.bf16.mxu1 %vm1631_vm0, %v3227_v10  ;;  %v3223_v10 = vmul.f32 %v8813_v63, %v10625_v48  ;;  %v12314_v48 = vld [vmem:[#allocation21_spill] sm:$0xff] }
 0xe56   :  { %7839 = vmatmul.mubr.msk.bf16.vlgmr.msra.gmra.mxu1 %vm1631_vm0, %v3228_v16 }
 0xe57   :  { %7847 = vmatpush3.bf16.xpose.msra.mxu1 %v3358_v20 }
 0xe58   :  { %8207 = vmatprep.subr.msk.bf16.mxu1 %vm1631_vm0, %v10656_v61 }
 0xe5f   :  { %7849 = vmatpush3.bf16.xpose.msra.mxu1 %v3355_v4  ;;  %v12312_v4 = vld [vmem:[#allocation19_spill] sm:$0xff] }
 0xe60   :  { %8208 = vmatprep.subr.msk.bf16.mxu1 %vm1631_vm0, %v10665_v44  ;;  %v10688_v62 = vpack.c.bf16 %v12313_v31, %v12312_v4 }
 0xe67   :  { %7851 = vmatpush3.bf16.xpose.msra.mxu1 %v3352_v59 }
 0xe68   :  { %8209 = vmatprep.subr.msk.bf16.mxu1 %vm1631_vm0, %v10673_v43 }
 0xe6f   :  { %7853 = vmatpush3.bf16.xpose.msra.mxu1 %v3349_v18  ;;  %v12316_v18 = vld [vmem:[#allocation24_spill] sm:$0xff] }
 0xe73   :  { %v3207_v56 = vpop.xlane.xlu0 %3206 }
 0xe77   :  { %v3204_v2 = vpop.xlane.xlu0 %3203 }
 0xe78   :  { %8814 = vrcp.f32 %v3204_v2 }
 0xe79   :  { %8816 = vrcp.f32 %v3207_v56  ;;  %v12317_v56 = vld [vmem:[#allocation26_spill] sm:$0xff] }
 0xe7a   :  { %v10699_v2 = vpack.c.bf16 %v12317_v56, %v12316_v18 }
 0xe7b   :  { %v3210_v50 = vpop.xlane.xlu0 %3209 }
 0xe7c   :  { %8818 = vrcp.f32 %v3210_v50 }
 0xe85   :  { %v8815_v0 = vpop.eup %8814 }
 0xe86   :  { %v3224_v16 = vmul.f32 %v8815_v0, %v10637_v58  ;;  %v8817_v19 = vpop.eup %8816  ;;  %v12315_v58 = vld [vmem:[#allocation23_spill] sm:$0xff] }
 0xe87   :  { %v3225_v12 = vmul.f32 %v8817_v19, %v10633_v34  ;;  %v10695_v59 = vpack.c.bf16 %v12315_v58, %v12314_v48  ;;  %v12318_v34 = vld [vmem:[#allocation27_spill] sm:$0xff] }
 0xe88   :  { %v3229_v23 = vpack.c.bf16 %v3224_v16, %v3223_v10 }
 0xe89   :  { %v8819_v20 = vpop.eup %8818 }
 0xe8a   :  { %7842 = vmatprep.mubr.msk.bf16.mxu1 %vm1631_vm0, %v3229_v23  ;;  %v3226_v60 = vmul.f32 %v8819_v20, %v10641_v32  ;;  %v12319_v32 = vld [vmem:[#allocation29_spill] sm:$0xff] }
 0xe8b   :  { %v10707_v50 = vpack.c.bf16 %v12319_v32, %v12318_v34  ;;  %v10734_v32 = vld [vmem:[#allocation5] ss:$0 sm:$0xff] }
 0xe8c   :  { %v3230_v5 = vpack.c.bf16 %v3226_v60, %v3225_v12 }
 0xe8e   :  { %7843 = vmatmul.mubr.msk.bf16.gmra.mxu1 %vm1631_vm0, %v3230_v5 }
 0xe8f   :  { %7854 = vmatprep.mubr.msk.bf16.mxu1 %vm1631_vm0, %v10688_v62 }
 0xe96   :  { %7855 = vmatmul.mubr.msk.bf16.vlgmr.msra.gmra.mxu1 %vm1631_vm0, %v10695_v59 }
 0xe97   :  { %7858 = vmatprep.mubr.msk.bf16.mxu1 %vm1631_vm0, %v10699_v2 }
 0xe9e   :  { %7859 = vmatmul.mubr.msk.bf16.gmra.mxu1 %vm1631_vm0, %v10707_v50 }
 0xf16   :  { %v10711_v63 = vpop.f32.mrf.mxu1 }
 0xf18   :  { %v10713_v0 = vpop.f32.mrf.mxu1 }
 0xf1a   :  { %v10715_v10 = vpop.f32.mrf.mxu1 }
 0xf1c   :  { %v10719_v19 = vpop.f32.mrf.mxu1 }
 0xf4e   :  { %v10721_v23 = vpop.f32.mrf.mxu1 }
 0xf4f   :  { %12320 = vst [vmem:[#allocation89_spill] sm:$0xff] %v10721_v23 }
 0xf50   :  { %v10723_v20 = vpop.f32.mrf.mxu1 }
 0xf51   :  { %12321 = vst [vmem:[#allocation86_spill] sm:$0xff] %v10723_v20 }
 0xf52   :  { %v10725_v12 = vpop.f32.mrf.mxu1 }
 0xf53   :  { %12322 = vst [vmem:[#allocation87_spill] sm:$0xff] %v10725_v12 }
 0xf54   :  { %v10729_v5 = vpop.f32.mrf.mxu1 }
 0xf55   :  { %12323 = vst [vmem:[#allocation60_spill] sm:$0xff] %v10729_v5 }
 0xf56   :  { %v7856_v4 = vpop.f32.mrf.mxu1 }
 0xf57   :  { %v3403_v31 = vadd.f32 %v10394_v51, %v7856_v4 }
 0xf58   :  { %v3394_v48 = vpop.f32.mrf.mxu1 }
 0xf59   :  { %v3395_v58 = vadd.f32 %v10394_v51, %v3394_v48  ;;  %v3431_v18 = vsel %vm1631_vm0, %v3403_v31, -inf }
 0xf5a   :  { %3432 = vmax.xlane.f32.xlu0 %v3431_v18  ;;  %v7857_v56 = vpop.f32.mrf.mxu1 }
 0xf5b   :  { %v3425_v35 = vsel %vm1631_vm0, %v3395_v58, -inf  ;;  %v3406_v1 = vadd.f32 %v10734_v32, %v7857_v56 }
 0xf5c   :  { %v3397_v34 = vpop.f32.mrf.mxu1 }
 0xf5d   :  { %v3398_v16 = vadd.f32 %v10734_v32, %v3397_v34  ;;  %v3434_v34 = vsel %vm1631_vm0, %v3406_v1, -inf }
 0xf5e   :  { %v7860_v60 = vpop.f32.mrf.mxu1  ;;  %3426 = vmax.xlane.f32.xlu0 %v3425_v35 }
 0xf5f   :  { %v3428_v51 = vsel %vm1631_vm0, %v3398_v16, -inf  ;;  %v3419_v3 = vadd.f32 %v10734_v32, %v7860_v60 }
 0xf60   :  { %v3410_v49 = vpop.f32.mrf.mxu1 }
 0xf61   :  { %v3411_v4 = vadd.f32 %v10734_v32, %v3410_v49  ;;  %v3443_v47 = vsel %vm1631_vm0, %v3419_v3, -inf }
 0xf62   :  { %v7861_v48 = vpop.f32.mrf.mxu1  ;;  %3429 = vmax.xlane.f32.xlu0 %v3428_v51 }
 0xf63   :  { %v3437_v18 = vsel %vm1631_vm0, %v3411_v4, -inf  ;;  %v3422_v49 = vadd.f32 %v10734_v32, %v7861_v48 }
 0xf64   :  { %3438 = vmax.xlane.f32.xlu1 %v3437_v18  ;;  %v3413_v42 = vpop.f32.mrf.mxu1 }
 0xf65   :  { %v3414_v35 = vadd.f32 %v10734_v32, %v3413_v42  ;;  %v3446_v51 = vsel %vm1631_vm0, %v3422_v49, -inf }
 0xf66   :  { %3435 = vmax.xlane.f32.xlu0 %v3434_v34 }
 0xf67   :  { %v3440_v56 = vsel %vm1631_vm0, %v3414_v35, -inf }
 0xf6a   :  { %3444 = vmax.xlane.f32.xlu0 %v3443_v47 }
 0xf6e   :  { %3441 = vmax.xlane.f32.xlu0 %v3440_v56 }
 0xf72   :  { %3447 = vmax.xlane.f32.xlu0 %v3446_v51 }
 0xf75   :  { %3616 = vrot.lane.b32.xlu1 %v10647_v11, %s9304_s4 }
 0xfe3   :  { %v3433_v60 = vpop.xlane.xlu0 %3432 }
 0xfe4   :  { %v3451_v18 = vsub.f32 %v3403_v31, %v3433_v60 }
 0xfe6   :  { %v3461_v28 = vmul.f32 1.442695, %v3451_v18 }
 0xfe7   :  { %v3427_v34 = vpop.xlane.xlu0 %3426 }
 0xfe8   :  { %8820 = vpow2.f32 %v3461_v28  ;;  %v3449_v42 = vsub.f32 %v3395_v58, %v3427_v34 }
 0xfea   :  { %v3457_v14 = vmul.f32 1.442695, %v3449_v42 }
 0xfeb   :  { %v3430_v29 = vpop.xlane.xlu0 %3429 }
 0xfec   :  { %8822 = vpow2.f32 %v3457_v14  ;;  %v3450_v48 = vsub.f32 %v3398_v16, %v3430_v29 }
 0xfed   :  { %v3439_v47 = vpop.xlane.xlu1 %3438 }
 0xfee   :  { %v3459_v37 = vmul.f32 1.442695, %v3450_v48  ;;  %v3453_v51 = vsub.f32 %v3411_v4, %v3439_v47 }
 0xfef   :  { %v3436_v41 = vpop.xlane.xlu0 %3435 }
 0xff0   :  { %v3452_v21 = vsub.f32 %v3406_v1, %v3436_v41  ;;  %v3465_v58 = vmul.f32 1.442695, %v3453_v51 }
 0xff1   :  { %v10751_v56 = vpop.permute.xlu1 %3616 }
 0xff2   :  { %v3463_v27 = vmul.f32 1.442695, %v3452_v21  ;;  %8210 = vmatprep.subr.msk.bf16.mxu0 %vm1631_vm0, %v10751_v56 }
 0xff3   :  { %v3445_v11 = vpop.xlane.xlu0 %3444 }
 0xff4   :  { %8824 = vpow2.f32 %v3463_v27  ;;  %v3455_v31 = vsub.f32 %v3419_v3, %v3445_v11 }
 0xff5   :  { %v10755_v28 = vpop.eup %8820  ;;  %8826 = vpow2.f32 %v3459_v37 }
 0xff6   :  { %v3469_v14 = vmul.f32 1.442695, %v3455_v31  ;;  %v3479_v29 = vsel %vm1631_vm0, %v10755_v28, 0.0 }
 0xff7   :  { %3480 = vadd.xlane.f32.xlu0 %v3479_v29  ;;  %v3442_v1 = vpop.xlane.xlu0 %3441 }
 0xff8   :  { %8828 = vpow2.f32 %v3469_v14  ;;  %v3454_v21 = vsub.f32 %v3414_v35, %v3442_v1 }
 0xff9   :  { %v8823_v41 = vpop.eup %8822  ;;  %8830 = vpow2.f32 %v3465_v58 }
 0xffa   :  { %v3473_v16 = vsel %vm1631_vm0, %v8823_v41, 0.0  ;;  %v3467_v3 = vmul.f32 1.442695, %v3454_v21 }
 0xffb   :  { %3474 = vadd.xlane.f32.xlu0 %v3473_v16  ;;  %v3448_v4 = vpop.xlane.xlu0 %3447 }
 0xffc   :  { %v3456_v27 = vsub.f32 %v3422_v49, %v3448_v4 }
 0xffe   :  { %v3471_v60 = vmul.f32 1.442695, %v3456_v27 }
0x1000   :  { %8832 = vpow2.f32 %v3471_v60 }
0x1001   :  { %v8825_v37 = vpop.eup %8824  ;;  %8834 = vpow2.f32 %v3467_v3 }
0x1002   :  { %v3482_v18 = vsel %vm1631_vm0, %v8825_v37, 0.0  ;;  %v8827_v34 = vpop.eup %8826 }
0x1003   :  { %3483 = vadd.xlane.f32.xlu0 %v3482_v18  ;;  %v3476_v47 = vsel %vm1631_vm0, %v8827_v34, 0.0 }
0x1005   :  { %v8829_v42 = vpop.eup %8828 }
0x1006   :  { %v3491_v48 = vsel %vm1631_vm0, %v8829_v42, 0.0  ;;  %v8831_v35 = vpop.eup %8830 }
0x1007   :  { %3477 = vadd.xlane.f32.xlu0 %v3476_v47  ;;  %3492 = vadd.xlane.f32.xlu1 %v3491_v48  ;;  %v3485_v51 = vsel %vm1631_vm0, %v8831_v35, 0.0  ;;  %v3640_v48 = vsel %vm1631_vm0, %v10751_v56, 0 }
0x100b   :  { %3486 = vadd.xlane.f32.xlu0 %v3485_v51 }
0x100d   :  { %v8833_v49 = vpop.eup %8832 }
0x100e   :  { %v3494_v11 = vsel %vm1631_vm0, %v8833_v49, 0.0  ;;  %v8835_v31 = vpop.eup %8834 }
0x100f   :  { %3495 = vadd.xlane.f32.xlu0 %v3494_v11  ;;  %v3488_v58 = vsel %vm1631_vm0, %v8835_v31, 0.0 }
0x1013   :  { %3489 = vadd.xlane.f32.xlu0 %v3488_v58 }
0x1018   :  { %3612 = vrot.lane.b32.xlu1 %v10665_v44, %s9304_s4 }
0x101c   :  { %3610 = vrot.lane.b32.xlu1 %v10673_v43, %s9304_s4 }
0x1020   :  { %3600 = vrot.lane.b32.xlu1 %v10695_v59, %s9304_s4 }
0x1024   :  { %3604 = vrot.lane.b32.xlu1 %v10707_v50, %s9304_s4 }
0x1029   :  { %3614 = vrot.lane.b32.xlu0 %v10656_v61, %s9304_s4 }
0x102d   :  { %3598 = vrot.lane.b32.xlu0 %v10688_v62, %s9304_s4 }
0x1031   :  { %3602 = vrot.lane.b32.xlu0 %v10699_v2, %s9304_s4 }
0x1080   :  { %v3481_v14 = vpop.xlane.xlu0 %3480 }
0x1084   :  { %v3475_v44 = vpop.xlane.xlu0 %3474 }
0x108c   :  { %v3484_v29 = vpop.xlane.xlu0 %3483 }
0x108d   :  { %8836 = vrcp.f32 %v3484_v29 }
0x108e   :  { %8838 = vrcp.f32 %v3475_v44 }
0x108f   :  { %8840 = vrcp.f32 %v3481_v14 }
0x1090   :  { %v3478_v43 = vpop.xlane.xlu0 %3477  ;;  %v3493_v50 = vpop.xlane.xlu1 %3492 }
0x1091   :  { %8842 = vrcp.f32 %v3478_v43 }
0x1094   :  { %v3487_v59 = vpop.xlane.xlu0 %3486 }
0x1098   :  { %v3496_v1 = vpop.xlane.xlu0 %3495 }
0x1099   :  { %8844 = vrcp.f32 %v3496_v1 }
0x109a   :  { %8846 = vrcp.f32 %v3487_v59  ;;  %v8837_v61 = vpop.eup %8836  ;;  %v3613_v59 = vpop.permute.xlu1 %3612 }
0x109b   :  { %8848 = vrcp.f32 %v3493_v50  ;;  %v8839_v62 = vpop.eup %8838  ;;  %v3508_v4 = vmul.f32 %v8837_v61, %v8825_v37 }
0x109c   :  { %v3490_v21 = vpop.xlane.xlu0 %3489  ;;  %v8841_v16 = vpop.eup %8840  ;;  %v3505_v27 = vmul.f32 %v8839_v62, %v8823_v41  ;;  %v12326_v62 = vld [vmem:[#allocation102_spill] sm:$0xff] }
0x109d   :  { %8850 = vrcp.f32 %v3490_v21  ;;  %v3507_v60 = vmul.f32 %v8841_v16, %v10755_v28  ;;  %v12325_v21 = vld [vmem:[#allocation108_spill] sm:$0xff] }
0x109e   :  { %v8843_v2 = vpop.eup %8842 }
0x109f   :  { %v3506_v3 = vmul.f32 %v8843_v2, %v8827_v34  ;;  %v3514_v47 = vpack.c.bf16 %v3508_v4, %v3507_v60  ;;  %v12327_v2 = vld [vmem:[#allocation96_spill] sm:$0xff] }
0x10a0   :  { %v3615_v51 = vpop.permute.xlu0 %3614 }
0x10a1   :  { %v3513_v18 = vpack.c.bf16 %v3506_v3, %v3505_v27  ;;  %v3637_v29 = vsel %vm1631_vm0, %v3615_v51, 0 }
0x10a3   :  { %7870 = vmatprep.mubr.msk.bf16.mxu0 %vm1631_vm0, %v3513_v18 }
0x10a4   :  { %7871 = vmatmul.mubr.msk.bf16.vlgmr.msra.gmra.mxu0 %vm1631_vm0, %v3514_v47  ;;  %v3599_v56 = vpop.permute.xlu0 %3598 }
0x10a5   :  { %7879 = vmatpush3.bf16.xpose.msra.mxu0 %v3640_v48 }
0x10a6   :  { %v8845_v11 = vpop.eup %8844  ;;  %8211 = vmatprep.subr.msk.bf16.mxu0 %vm1631_vm0, %v3615_v51 }
0x10a7   :  { %v8847_v58 = vpop.eup %8846  ;;  %v3512_v34 = vmul.f32 %v8845_v11, %v8833_v49  ;;  %v3634_v49 = vsel %vm1631_vm0, %v3613_v59, 0 }
0x10a8   :  { %v8849_v37 = vpop.eup %8848  ;;  %v3509_v14 = vmul.f32 %v8847_v58, %v8831_v35  ;;  %v3611_v35 = vpop.permute.xlu1 %3610 }
0x10a9   :  { %v3511_v44 = vmul.f32 %v8849_v37, %v8829_v42  ;;  %v3631_v42 = vsel %vm1631_vm0, %v3611_v35, 0  ;;  %v3603_v61 = vpop.permute.xlu0 %3602 }
0x10aa   :  { %v8851_v41 = vpop.eup %8850 }
0x10ab   :  { %v3510_v28 = vmul.f32 %v8851_v41, %v8835_v31  ;;  %v3516_v1 = vpack.c.bf16 %v3512_v34, %v3511_v44  ;;  %v12324_v31 = vld [vmem:[#allocation114_spill] sm:$0xff] }
0x10ac   :  { %v3601_v50 = vpop.permute.xlu1 %3600 }
0x10ad   :  { %v3515_v43 = vpack.c.bf16 %v3510_v28, %v3509_v14  ;;  %7881 = vmatpush3.bf16.xpose.msra.mxu0 %v3637_v29 }
0x10ae   :  { %8212 = vmatprep.subr.msk.bf16.mxu0 %vm1631_vm0, %v3613_v59 }
0x10af   :  { %7874 = vmatprep.mubr.msk.bf16.mxu0 %vm1631_vm0, %v3515_v43 }
0x10b0   :  { %7875 = vmatmul.mubr.msk.bf16.gmra.mxu0 %vm1631_vm0, %v3516_v1  ;;  %v3605_v16 = vpop.permute.xlu1 %3604 }
0x10b1   :  { %7886 = vmatprep.mubr.msk.bf16.mxu0 %vm1631_vm0, %v3599_v56 }
0x10b5   :  { %7883 = vmatpush3.bf16.xpose.msra.mxu0 %v3634_v49 }
0x10b6   :  { %8213 = vmatprep.subr.msk.bf16.mxu0 %vm1631_vm0, %v3611_v35 }
0x10bd   :  { %7885 = vmatpush3.bf16.xpose.msra.mxu0 %v3631_v42 }
0x10be   :  { %7926 = vmatprep.subr.bf16.mxu0 %v12324_v31 }
0x10c4   :  { %7887 = vmatmul.mubr.msk.bf16.vlgmr.msra.gmra.mxu0 %vm1631_vm0, %v3601_v50 }
0x10c5   :  { %7890 = vmatprep.mubr.msk.bf16.mxu0 %vm1631_vm0, %v3603_v61  ;;  %7927 = vmatpush3.bf16.msra.mxu0 %v12324_v31 }
0x10c6   :  { %7928 = vmatprep.subr.bf16.mxu0 %v12325_v21 }
0x10c9   :  { %7929 = vmatpush3.bf16.msra.mxu0 %v12325_v21 }
0x10ca   :  { %7930 = vmatprep.subr.bf16.mxu0 %v12326_v62 }
0x10cc   :  { %7891 = vmatmul.mubr.msk.bf16.gmra.mxu0 %vm1631_vm0, %v3605_v16 }
0x10cd   :  { %7931 = vmatpush3.bf16.msra.mxu0 %v12326_v62 }
0x10ce   :  { %7932 = vmatprep.subr.bf16.mxu0 %v12327_v2 }
0x10d1   :  { %7933 = vmatpush3.bf16.msra.mxu0 %v12327_v2 }
0x1164   :  { %v10805_v4 = vpop.f32.mrf.mxu0 }
0x1165   :  { %12328 = vst [vmem:[#allocation61_spill] sm:$0xff] %v10805_v4 }
0x1166   :  { %v10807_v27 = vpop.f32.mrf.mxu0 }
0x1167   :  { %12329 = vst [vmem:[#allocation58_spill] sm:$0xff] %v10807_v27 }
0x1168   :  { %v10809_v3 = vpop.f32.mrf.mxu0 }
0x1169   :  { %12330 = vst [vmem:[#allocation59_spill] sm:$0xff] %v10809_v3 }
0x116a   :  { %v10811_v60 = vpop.f32.mrf.mxu0 }
0x116b   :  { %12331 = vst [vmem:[#allocation56_spill] sm:$0xff] %v10811_v60 }
0x1170   :  { %v10813_v18 = vpop.f32.mrf.mxu0 }
0x1171   :  { %12332 = vst [vmem:[#allocation57_spill] sm:$0xff] %v10813_v18 }
0x1172   :  { %v10815_v47 = vpop.f32.mrf.mxu0 }
0x1173   :  { %12333 = vst [vmem:[#allocation54_spill] sm:$0xff] %v10815_v47 }
0x1174   :  { %v10817_v48 = vpop.f32.mrf.mxu0 }
0x1175   :  { %12334 = vst [vmem:[#allocation55_spill] sm:$0xff] %v10817_v48 }
0x1176   :  { %v10819_v51 = vpop.f32.mrf.mxu0 }
0x1177   :  { %12335 = vst [vmem:[#allocation19_spill] sm:$0xff] %v10819_v51 }
0x1184   :  { %v7888_v11 = vpop.f32.mrf.mxu0 }
0x1185   :  { %v3685_v58 = vadd.f32 %v10734_v32, %v7888_v11 }
0x1186   :  { %v3676_v37 = vpop.f32.mrf.mxu0 }
0x1187   :  { %v3677_v41 = vadd.f32 %v10734_v32, %v3676_v37  ;;  %v3713_v34 = vsel %vm1631_vm0, %v3685_v58, -inf }
0x1188   :  { %3714 = vmax.xlane.f32.xlu0 %v3713_v34  ;;  %v7889_v14 = vpop.f32.mrf.mxu0 }
0x1189   :  { %v3688_v44 = vadd.f32 %v10734_v32, %v7889_v14  ;;  %v3707_v43 = vsel %vm1631_vm0, %v3677_v41, -inf }
0x118a   :  { %v3679_v28 = vpop.f32.mrf.mxu0 }
0x118b   :  { %v3680_v29 = vadd.f32 %v10734_v32, %v3679_v28  ;;  %v3716_v35 = vsel %vm1631_vm0, %v3688_v44, -inf }
0x118c   :  { %3708 = vmax.xlane.f32.xlu0 %v3707_v43  ;;  %v7892_v59 = vpop.f32.mrf.mxu0 }
0x118d   :  { %v3701_v1 = vadd.f32 %v10734_v32, %v7892_v59  ;;  %v3710_v56 = vsel %vm1631_vm0, %v3680_v29, -inf }
0x118e   :  { %3711 = vmax.xlane.f32.xlu1 %v3710_v56  ;;  %v3692_v49 = vpop.f32.mrf.mxu0 }
0x118f   :  { %v10831_v50 = vadd.f32 %v10734_v32, %v3692_v49  ;;  %v3725_v16 = vsel %vm1631_vm0, %v3701_v1, -inf }
0x1190   :  { %3717 = vmax.xlane.f32.xlu0 %v3716_v35  ;;  %v7893_v42 = vpop.f32.mrf.mxu0 }
0x1191   :  { %v10834_v61 = vadd.f32 %v10734_v32, %v7893_v42  ;;  %v3719_v14 = vsel %vm1631_vm0, %v10831_v50, -inf }
0x1192   :  { %3726 = vmax.xlane.f32.xlu1 %v3725_v16  ;;  %v3695_v11 = vpop.f32.mrf.mxu0 }
0x1193   :  { %v3696_v37 = vadd.f32 %v10734_v32, %v3695_v11  ;;  %v3728_v34 = vsel %vm1631_vm0, %v10834_v61, -inf }
0x1194   :  { %3729 = vmax.xlane.f32.xlu0 %v3728_v34 }
0x1195   :  { %v3722_v28 = vsel %vm1631_vm0, %v3696_v37, -inf }
0x1196   :  { %3720 = vmax.xlane.f32.xlu1 %v3719_v14 }
0x1198   :  { %3723 = vmax.xlane.f32.xlu0 %v3722_v28 }
0x11a7   :  { %3809 = vrot.lane.b32.xlu1 %v10547_v39, %s9304_s4 }
0x11ae   :  { %3807 = vrot.lane.b32.xlu0 %v10559_v52, %s9304_s4 }
0x1211   :  { %v3715_v43 = vpop.xlane.xlu0 %3714 }
0x1212   :  { %v3733_v59 = vsub.f32 %v3685_v58, %v3715_v43 }
0x1214   :  { %v3743_v32 = vmul.f32 1.442695, %v3733_v59 }
0x1215   :  { %v3709_v56 = vpop.xlane.xlu0 %3708 }
0x1216   :  { %8852 = vpow2.f32 %v3743_v32  ;;  %v3731_v49 = vsub.f32 %v3677_v41, %v3709_v56 }
0x1217   :  { %v3712_v35 = vpop.xlane.xlu1 %3711 }
0x1218   :  { %v3739_v42 = vmul.f32 1.442695, %v3731_v49  ;;  %v3732_v16 = vsub.f32 %v3680_v29, %v3712_v35 }
0x1219   :  { %v3718_v11 = vpop.xlane.xlu0 %3717 }
0x121a   :  { %8854 = vpow2.f32 %v3739_v42  ;;  %v3734_v34 = vsub.f32 %v3688_v44, %v3718_v11  ;;  %v3741_v28 = vmul.f32 1.442695, %v3732_v16 }
0x121b   :  { %v3727_v14 = vpop.xlane.xlu1 %3726 }
0x121c   :  { %v3745_v48 = vmul.f32 1.442695, %v3734_v34  ;;  %v3737_v18 = vsub.f32 %v3701_v1, %v3727_v14 }
0x121d   :  { %v3730_v39 = vpop.xlane.xlu0 %3729 }
0x121e   :  { %8856 = vpow2.f32 %v3745_v48  ;;  %v3751_v52 = vmul.f32 1.442695, %v3737_v18  ;;  %v3738_v14 = vsub.f32 %v10834_v61, %v3730_v39 }
0x121f   :  { %v3721_v51 = vpop.xlane.xlu1 %3720  ;;  %8858 = vpow2.f32 %v3741_v28 }
0x1220   :  { %8860 = vpow2.f32 %v3751_v52  ;;  %v3735_v34 = vsub.f32 %v10831_v50, %v3721_v51  ;;  %v3753_v52 = vmul.f32 1.442695, %v3738_v14 }
0x1221   :  { %v3724_v58 = vpop.xlane.xlu0 %3723 }
0x1222   :  { %v3736_v43 = vsub.f32 %v3696_v37, %v3724_v58  ;;  %v3747_v28 = vmul.f32 1.442695, %v3735_v34  ;;  %v12336_v34 = vld [vmem:[#allocation82_spill] sm:$0xff] }
0x1223   :  { %v10847_v59 = vpop.eup %8852  ;;  %v3810_v41 = vpop.permute.xlu1 %3809 }
0x1224   :  { %v3749_v32 = vmul.f32 1.442695, %v3736_v43  ;;  %7894 = vmatprep.subr.bf16.mxu1 %v3810_v41  ;;  %v3761_v44 = vsel %vm1631_vm0, %v10847_v59, 0.0 }
0x1225   :  { %7895 = vmatpush3.bf16.msra.mxu1 %v3810_v41  ;;  %3762 = vadd.xlane.f32.xlu1 %v3761_v44  ;;  %v3808_v29 = vpop.permute.xlu0 %3807 }
0x1226   :  { %7896 = vmatprep.subr.bf16.mxu1 %v3808_v29  ;;  %8862 = vpow2.f32 %v3749_v32 }
0x1227   :  { %v8855_v1 = vpop.eup %8854  ;;  %8864 = vpow2.f32 %v3747_v28 }
0x1228   :  { %v3755_v48 = vsel %vm1631_vm0, %v8855_v1, 0.0  ;;  %8866 = vpow2.f32 %v3753_v52 }
0x1229   :  { %3756 = vadd.xlane.f32.xlu1 %v3755_v48  ;;  %7897 = vmatpush3.bf16.msra.mxu1 %v3808_v29 }
0x122b   :  { %v8857_v18 = vpop.eup %8856 }
0x122c   :  { %v3764_v37 = vsel %vm1631_vm0, %v8857_v18, 0.0  ;;  %v8859_v56 = vpop.eup %8858 }
0x122d   :  { %3765 = vadd.xlane.f32.xlu0 %v3764_v37  ;;  %v3758_v49 = vsel %vm1631_vm0, %v8859_v56, 0.0  ;;  %v10854_v35 = vpop.eup %8860 }
0x122e   :  { %v3773_v42 = vsel %vm1631_vm0, %v10854_v35, 0.0 }
0x1231   :  { %3759 = vadd.xlane.f32.xlu0 %v3758_v49 }
0x1233   :  { %v10858_v16 = vpop.eup %8862 }
0x1234   :  { %v3770_v11 = vsel %vm1631_vm0, %v10858_v16, 0.0  ;;  %v8865_v58 = vpop.eup %8864 }
0x1235   :  { %3774 = vadd.xlane.f32.xlu0 %v3773_v42  ;;  %v3767_v43 = vsel %vm1631_vm0, %v8865_v58, 0.0  ;;  %v8867_v41 = vpop.eup %8866 }
0x1236   :  { %v3776_v32 = vsel %vm1631_vm0, %v8867_v41, 0.0 }
0x1239   :  { %3771 = vadd.xlane.f32.xlu0 %v3770_v11 }
0x123a   :  { %3805 = vrot.lane.b32.xlu1 %v10567_v25, %s9304_s4 }
0x124f   :  { %3803 = vrot.lane.b32.xlu0 %v10573_v17, %s9304_s4 }
0x125e   :  { %3768 = vadd.xlane.f32.xlu1 %v3767_v43 }
0x1262   :  { %3777 = vadd.xlane.f32.xlu1 %v3776_v32 }
0x12ae   :  { %v3763_v25 = vpop.xlane.xlu1 %3762 }
0x12b2   :  { %v3757_v44 = vpop.xlane.xlu1 %3756 }
0x12b6   :  { %v3806_v51 = vpop.permute.xlu1 %3805  ;;  %v3766_v50 = vpop.xlane.xlu0 %3765 }
0x12b7   :  { %7898 = vmatprep.subr.bf16.mxu1 %v3806_v51  ;;  %8868 = vrcp.f32 %v3766_v50 }
0x12b8   :  { %7899 = vmatpush3.bf16.msra.mxu1 %v3806_v51  ;;  %8870 = vrcp.f32 %v3757_v44  ;;  %v12337_v44 = vld [vmem:[#allocation76_spill] sm:$0xff] }
0x12b9   :  { %8872 = vrcp.f32 %v3763_v25  ;;  %v4093_v25 = vsel %vm1631_vm0, %v12336_v34, 0 }
0x12ba   :  { %v3760_v61 = vpop.xlane.xlu0 %3759 }
0x12bb   :  { %8874 = vrcp.f32 %v3760_v61 }
0x12be   :  { %v3775_v17 = vpop.xlane.xlu0 %3774 }
0x12c2   :  { %v3772_v39 = vpop.xlane.xlu0 %3771 }
0x12c3   :  { %8876 = vrcp.f32 %v3772_v39 }
0x12c4   :  { %v8869_v29 = vpop.eup %8868 }
0x12c5   :  { %v8871_v48 = vpop.eup %8870  ;;  %v3790_v11 = vmul.f32 %v8869_v29, %v8857_v18  ;;  %v4090_v18 = vsel %vm1631_vm0, %v12337_v44, 0 }
0x12c6   :  { %v3804_v37 = vpop.permute.xlu0 %3803  ;;  %v8873_v49 = vpop.eup %8872  ;;  %v3787_v14 = vmul.f32 %v8871_v48, %v8855_v1  ;;  %v12338_v1 = vld [vmem:[#allocation70_spill] sm:$0xff] }
0x12c7   :  { %7900 = vmatprep.subr.bf16.mxu1 %v3804_v37  ;;  %v3789_v52 = vmul.f32 %v8873_v49, %v10847_v59  ;;  %v4087_v59 = vsel %vm1631_vm0, %v12338_v1, 0 }
0x12c8   :  { %v8875_v42 = vpop.eup %8874  ;;  %7901 = vmatpush3.bf16.msra.mxu1 %v3804_v37 }
0x12c9   :  { %8214 = vmatprep.subr.msk.bf16.mxu1 %vm1631_vm0, %v12336_v34  ;;  %v3788_v28 = vmul.f32 %v8875_v42, %v8859_v56  ;;  %v3796_v32 = vpack.c.bf16 %v3790_v11, %v3789_v52  ;;  %v12339_v56 = vld [vmem:[#allocation64_spill] sm:$0xff] }
0x12ca   :  { %v4084_v51 = vsel %vm1631_vm0, %v12339_v56, 0 }
0x12cb   :  { %v3795_v43 = vpack.c.bf16 %v3788_v28, %v3787_v14 }
0x12cd   :  { %7902 = vmatprep.mubr.msk.bf16.mxu1 %vm1631_vm0, %v3795_v43  ;;  %v12340_v43 = vld [vmem:[#allocation32_spill] sm:$0xff] }
0x12ce   :  { %7903 = vmatmul.mubr.msk.bf16.vlgmr.msra.gmra.mxu1 %vm1631_vm0, %v3796_v32 }
0x12cf   :  { %7911 = vmatpush3.bf16.xpose.msra.mxu1 %v4093_v25 }
0x12d0   :  { %8215 = vmatprep.subr.msk.bf16.mxu1 %vm1631_vm0, %v12337_v44  ;;  %v8877_v29 = vpop.eup %8876 }
0x12d1   :  { %v3792_v49 = vmul.f32 %v8877_v29, %v10858_v16  ;;  %v12343_v16 = vld [vmem:[#allocation50_spill] sm:$0xff] }
0x12d7   :  { %7913 = vmatpush3.bf16.xpose.msra.mxu1 %v4090_v18 }
0x12d8   :  { %8216 = vmatprep.subr.msk.bf16.mxu1 %vm1631_vm0, %v12338_v1 }
0x12df   :  { %7915 = vmatpush3.bf16.xpose.msra.mxu1 %v4087_v59 }
0x12e0   :  { %8217 = vmatprep.subr.msk.bf16.mxu1 %vm1631_vm0, %v12339_v56 }
0x12e7   :  { %7917 = vmatpush3.bf16.xpose.msra.mxu1 %v4084_v51  ;;  %v3769_v50 = vpop.xlane.xlu1 %3768 }
0x12e8   :  { %8878 = vrcp.f32 %v3769_v50 }
0x12e9   :  { %8880 = vrcp.f32 %v3775_v17  ;;  %v12341_v17 = vld [vmem:[#allocation38_spill] sm:$0xff] }
0x12eb   :  { %v3778_v61 = vpop.xlane.xlu1 %3777 }
0x12ec   :  { %8882 = vrcp.f32 %v3778_v61 }
0x12f5   :  { %v8879_v48 = vpop.eup %8878 }
0x12f6   :  { %v3791_v37 = vmul.f32 %v8879_v48, %v8865_v58  ;;  %v8881_v42 = vpop.eup %8880  ;;  %v12342_v58 = vld [vmem:[#allocation44_spill] sm:$0xff] }
0x12f7   :  { %v3793_v39 = vmul.f32 %v8881_v42, %v10854_v35 }
0x12f8   :  { %v3797_v11 = vpack.c.bf16 %v3792_v49, %v3791_v37  ;;  %v10923_v37 = vld [vmem:[#allocation5 + $0x1] ss:$0 sm:$0xff] }
0x12f9   :  { %v8883_v14 = vpop.eup %8882 }
0x12fa   :  { %7906 = vmatprep.mubr.msk.bf16.mxu1 %vm1631_vm0, %v3797_v11  ;;  %v3794_v28 = vmul.f32 %v8883_v14, %v8867_v41 }
0x12fc   :  { %v3798_v52 = vpack.c.bf16 %v3794_v28, %v3793_v39 }
0x12fe   :  { %7907 = vmatmul.mubr.msk.bf16.gmra.mxu1 %vm1631_vm0, %v3798_v52 }
0x12ff   :  { %7918 = vmatprep.mubr.msk.bf16.mxu1 %vm1631_vm0, %v12340_v43 }
0x1306   :  { %7919 = vmatmul.mubr.msk.bf16.vlgmr.msra.gmra.mxu1 %vm1631_vm0, %v12341_v17 }
0x1307   :  { %7922 = vmatprep.mubr.msk.bf16.mxu1 %vm1631_vm0, %v12342_v58 }
0x130e   :  { %7923 = vmatmul.mubr.msk.bf16.gmra.mxu1 %vm1631_vm0, %v12343_v16 }
0x138e   :  { %v10901_v32 = vpop.f32.mrf.mxu1 }
0x1390   :  { %v10903_v25 = vpop.f32.mrf.mxu1 }
0x1392   :  { %v10905_v35 = vpop.f32.mrf.mxu1 }
0x1394   :  { %v10909_v18 = vpop.f32.mrf.mxu1 }
0x13be   :  { %v10913_v51 = vpop.f32.mrf.mxu1 }
0x13bf   :  { %12344 = vst [vmem:[#allocation20_spill] sm:$0xff] %v10913_v51 }
0x13c0   :  { %v10915_v50 = vpop.f32.mrf.mxu1 }
0x13c1   :  { %12345 = vst [vmem:[#allocation21_spill] sm:$0xff] %v10915_v50 }
0x13c2   :  { %v10917_v61 = vpop.f32.mrf.mxu1 }
0x13c3   :  { %12346 = vst [vmem:[#allocation23_spill] sm:$0xff] %v10917_v61 }
0x13c4   :  { %v10921_v48 = vpop.f32.mrf.mxu1 }
0x13c5   :  { %12347 = vst [vmem:[#allocation24_spill] sm:$0xff] %v10921_v48 }
0x13c6   :  { %v7920_v42 = vpop.f32.mrf.mxu1 }
0x13c7   :  { %v4138_v11 = vadd.f32 %v7920_v42, %v10923_v37 }
0x13c8   :  { %v4129_v14 = vpop.f32.mrf.mxu1 }
0x13c9   :  { %v4130_v39 = vadd.f32 %v10923_v37, %v4129_v14  ;;  %v4166_v28 = vsel %vm1631_vm0, %v4138_v11, -inf }
0x13ca   :  { %4167 = vmax.xlane.f32.xlu1 %v4166_v28  ;;  %v7921_v52 = vpop.f32.mrf.mxu1 }
0x13cb   :  { %v4160_v59 = vsel %vm1631_vm0, %v4130_v39, -inf  ;;  %v4141_v3 = vadd.f32 %v7921_v52, %v10923_v37 }
0x13cc   :  { %v4132_v41 = vpop.f32.mrf.mxu1 }
0x13cd   :  { %v4133_v29 = vadd.f32 %v10923_v37, %v4132_v41  ;;  %v4169_v41 = vsel %vm1631_vm0, %v4141_v3, -inf }
0x13ce   :  { %v7924_v47 = vpop.f32.mrf.mxu1  ;;  %4161 = vmax.xlane.f32.xlu1 %v4160_v59 }
0x13cf   :  { %v4154_v54 = vadd.f32 %v7924_v47, %v10923_v37  ;;  %v4163_v14 = vsel %vm1631_vm0, %v4133_v29, -inf }
0x13d0   :  { %v4145_v49 = vpop.f32.mrf.mxu1 }
0x13d1   :  { %v4178_v42 = vsel %vm1631_vm0, %v4154_v54, -inf  ;;  %v4146_v28 = vadd.f32 %v10923_v37, %v4145_v49 }
0x13d2   :  { %4179 = vmax.xlane.f32.xlu0 %v4178_v42  ;;  %v7925_v4 = vpop.f32.mrf.mxu1  ;;  %4164 = vmax.xlane.f32.xlu1 %v4163_v14 }
0x13d3   :  { %v4172_v47 = vsel %vm1631_vm0, %v4146_v28, -inf  ;;  %v4157_v52 = vadd.f32 %v7925_v4, %v10923_v37 }
0x13d4   :  { %v4148_v6 = vpop.f32.mrf.mxu1 }
0x13d5   :  { %v4149_v59 = vadd.f32 %v10923_v37, %v4148_v6  ;;  %v4181_v42 = vsel %vm1631_vm0, %v4157_v52, -inf }
0x13d6   :  { %4170 = vmax.xlane.f32.xlu1 %v4169_v41 }
0x13d7   :  { %v4175_v13 = vsel %vm1631_vm0, %v4149_v59, -inf }
0x13da   :  { %4173 = vmax.xlane.f32.xlu1 %v4172_v47 }
0x13de   :  { %4176 = vmax.xlane.f32.xlu1 %v4175_v13 }
0x13e2   :  { %4182 = vmax.xlane.f32.xlu1 %v4181_v42 }
0x1453   :  { %v4168_v14 = vpop.xlane.xlu1 %4167 }
0x1454   :  { %v4186_v60 = vsub.f32 %v4138_v11, %v4168_v14 }
0x1456   :  { %v4196_v49 = vmul.f32 1.442695, %v4186_v60 }
0x1457   :  { %v4162_v27 = vpop.xlane.xlu1 %4161 }
0x1458   :  { %8884 = vpow2.f32 %v4196_v49  ;;  %v4184_v23 = vsub.f32 %v4130_v39, %v4162_v27 }
0x145a   :  { %v4192_v41 = vmul.f32 1.442695, %v4184_v23 }
0x145b   :  { %v4180_v12 = vpop.xlane.xlu0 %4179  ;;  %v4165_v6 = vpop.xlane.xlu1 %4164 }
0x145c   :  { %8886 = vpow2.f32 %v4192_v41  ;;  %v4190_v51 = vsub.f32 %v4154_v54, %v4180_v12  ;;  %v4185_v61 = vsub.f32 %v4133_v29, %v4165_v6 }
0x145e   :  { %v4204_v47 = vmul.f32 1.442695, %v4190_v51  ;;  %v4194_v13 = vmul.f32 1.442695, %v4185_v61 }
0x145f   :  { %v4171_v4 = vpop.xlane.xlu1 %4170 }
0x1460   :  { %8888 = vpow2.f32 %v4204_v47  ;;  %v4187_v5 = vsub.f32 %v4141_v3, %v4171_v4 }
0x1462   :  { %v4198_v20 = vmul.f32 1.442695, %v4187_v5 }
0x1463   :  { %v4174_v61 = vpop.xlane.xlu1 %4173 }
0x1464   :  { %8890 = vpow2.f32 %v4198_v20  ;;  %v4188_v11 = vsub.f32 %v4146_v28, %v4174_v61 }
0x1465   :  { %v10943_v42 = vpop.eup %8884  ;;  %8892 = vpow2.f32 %v4194_v13 }
0x1466   :  { %v4214_v60 = vsel %vm1631_vm0, %v10943_v42, 0.0  ;;  %v4200_v14 = vmul.f32 1.442695, %v4188_v11 }
0x1467   :  { %4215 = vadd.xlane.f32.xlu1 %v4214_v60  ;;  %v4177_v29 = vpop.xlane.xlu1 %4176 }
0x1468   :  { %8894 = vpow2.f32 %v4200_v14 }
0x1469   :  { %v8887_v23 = vpop.eup %8886 }
0x146a   :  { %v4208_v27 = vsel %vm1631_vm0, %v8887_v23, 0.0 }
0x146b   :  { %4209 = vadd.xlane.f32.xlu1 %v4208_v27  ;;  %v4183_v39 = vpop.xlane.xlu1 %4182 }
0x146c   :  { %v4191_v49 = vsub.f32 %v4157_v52, %v4183_v39 }
0x146d   :  { %v10948_v54 = vpop.eup %8888 }
0x146e   :  { %v4226_v12 = vsel %vm1631_vm0, %v10948_v54, 0.0  ;;  %v4206_v41 = vmul.f32 1.442695, %v4191_v49 }
0x146f   :  { %4227 = vadd.xlane.f32.xlu0 %v4226_v12 }
0x1470   :  { %8896 = vpow2.f32 %v4206_v41 }
0x1471   :  { %v8891_v3 = vpop.eup %8890 }
0x1472   :  { %v4217_v20 = vsel %vm1631_vm0, %v8891_v3, 0.0  ;;  %v8893_v5 = vpop.eup %8892 }
0x1473   :  { %4218 = vadd.xlane.f32.xlu1 %v4217_v20  ;;  %v4211_v51 = vsel %vm1631_vm0, %v8893_v5, 0.0 }
0x1477   :  { %4212 = vadd.xlane.f32.xlu1 %v4211_v51 }
0x1485   :  { %4351 = vrot.lane.b32.xlu0 %v12336_v34, %s9304_s4  ;;  %v4189_v34 = vsub.f32 %v4149_v59, %v4177_v29 }
0x1487   :  { %v4202_v6 = vmul.f32 1.442695, %v4189_v34 }
0x1488   :  { %4349 = vrot.lane.b32.xlu1 %v12337_v44, %s9304_s4  ;;  %v10964_v44 = vpop.eup %8894 }
0x1489   :  { %4333 = vrot.lane.b32.xlu0 %v12340_v43, %s9304_s4  ;;  %8898 = vpow2.f32 %v4202_v6  ;;  %v4220_v43 = vsel %vm1631_vm0, %v10964_v44, 0.0 }
0x148c   :  { %4347 = vrot.lane.b32.xlu1 %v12338_v1, %s9304_s4  ;;  %v8897_v1 = vpop.eup %8896 }
0x148d   :  { %4337 = vrot.lane.b32.xlu0 %v12342_v58, %s9304_s4  ;;  %v4229_v58 = vsel %vm1631_vm0, %v8897_v1, 0.0 }
0x1496   :  { %v8899_v47 = vpop.eup %8898 }
0x1497   :  { %v4223_v28 = vsel %vm1631_vm0, %v8899_v47, 0.0 }
0x14b0   :  { %4221 = vadd.xlane.f32.xlu1 %v4220_v43  ;;  %v12348_v43 = vld [vmem:[#allocation112_spill] sm:$0xff] }
0x14b4   :  { %4230 = vadd.xlane.f32.xlu1 %v4229_v58  ;;  %v12349_v58 = vld [vmem:[#allocation116_spill] sm:$0xff] }
0x14b8   :  { %4224 = vadd.xlane.f32.xlu1 %v4223_v28  ;;  %v10987_v28 = vpack.c.bf16 %v12349_v58, %v12348_v43 }
0x14c9   :  { %4345 = vrot.lane.b32.xlu1 %v12339_v56, %s9304_s4 }
0x14cd   :  { %4335 = vrot.lane.b32.xlu1 %v12341_v17, %s9304_s4 }
0x14d1   :  { %4339 = vrot.lane.b32.xlu1 %v12343_v16, %s9304_s4 }
0x14f0   :  { %v4216_v59 = vpop.xlane.xlu1 %4215 }
0x14f4   :  { %v4210_v52 = vpop.xlane.xlu1 %4209 }
0x14f8   :  { %v4228_v4 = vpop.xlane.xlu0 %4227 }
0x14fc   :  { %v4352_v13 = vpop.permute.xlu0 %4351  ;;  %v4219_v60 = vpop.xlane.xlu1 %4218 }
0x14fd   :  { %8218 = vmatprep.subr.msk.bf16.mxu0 %vm1631_vm0, %v4352_v13  ;;  %8900 = vrcp.f32 %v4219_v60  ;;  %v4375_v14 = vsel %vm1631_vm0, %v4352_v13, 0 }
0x14fe   :  { %8902 = vrcp.f32 %v4210_v52 }
0x14ff   :  { %8904 = vrcp.f32 %v4216_v59 }
0x1500   :  { %v4213_v27 = vpop.xlane.xlu1 %4212 }
0x1501   :  { %8906 = vrcp.f32 %v4213_v27 }
0x1504   :  { %v4350_v49 = vpop.permute.xlu1 %4349 }
0x1505   :  { %v4372_v34 = vsel %vm1631_vm0, %v4350_v49, 0 }
0x1508   :  { %v4348_v41 = vpop.permute.xlu1 %4347 }
0x150a   :  { %v8901_v12 = vpop.eup %8900 }
0x150b   :  { %v8903_v56 = vpop.eup %8902  ;;  %v4243_v17 = vmul.f32 %v8901_v12, %v8891_v3 }
0x150c   :  { %v8905_v20 = vpop.eup %8904  ;;  %v4240_v61 = vmul.f32 %v8903_v56, %v8887_v23 }
0x150d   :  { %v4242_v16 = vmul.f32 %v8905_v20, %v10943_v42  ;;  %v4369_v42 = vsel %vm1631_vm0, %v4348_v41, 0 }
0x150e   :  { %v8907_v51 = vpop.eup %8906 }
0x150f   :  { %v4241_v29 = vmul.f32 %v8907_v51, %v8893_v5  ;;  %v4249_v39 = vpack.c.bf16 %v4243_v17, %v4242_v16  ;;  %v12350_v16 = vld [vmem:[#allocation106_spill] sm:$0xff] }
0x1511   :  { %v4248_v11 = vpack.c.bf16 %v4241_v29, %v4240_v61  ;;  %v4334_v61 = vpop.permute.xlu0 %4333 }
0x1513   :  { %7934 = vmatprep.mubr.msk.bf16.mxu0 %vm1631_vm0, %v4248_v11  ;;  %v12351_v11 = vld [vmem:[#allocation110_spill] sm:$0xff] }
0x1514   :  { %7935 = vmatmul.mubr.msk.bf16.vlgmr.msra.gmra.mxu0 %vm1631_vm0, %v4249_v39  ;;  %v10999_v39 = vpack.c.bf16 %v12351_v11, %v12350_v16 }
0x1515   :  { %7943 = vmatpush3.bf16.xpose.msra.mxu0 %v4375_v14 }
0x1516   :  { %8219 = vmatprep.subr.msk.bf16.mxu0 %vm1631_vm0, %v4350_v49  ;;  %v12354_v49 = vld [vmem:[#allocation94_spill] sm:$0xff] }
0x151d   :  { %7945 = vmatpush3.bf16.xpose.msra.mxu0 %v4372_v34  ;;  %v12355_v34 = vld [vmem:[#allocation98_spill] sm:$0xff] }
0x151e   :  { %8220 = vmatprep.subr.msk.bf16.mxu0 %vm1631_vm0, %v4348_v41  ;;  %v11013_v41 = vpack.c.bf16 %v12355_v34, %v12354_v49 }
0x1525   :  { %7947 = vmatpush3.bf16.xpose.msra.mxu0 %v4369_v42 }
0x1539   :  { %v4222_v23 = vpop.xlane.xlu1 %4221 }
0x153d   :  { %v4231_v3 = vpop.xlane.xlu1 %4230 }
0x153e   :  { %8908 = vrcp.f32 %v4231_v3 }
0x153f   :  { %8910 = vrcp.f32 %v4222_v23 }
0x1540   :  { %8912 = vrcp.f32 %v4228_v4 }
0x1541   :  { %v4225_v5 = vpop.xlane.xlu1 %4224 }
0x1542   :  { %8914 = vrcp.f32 %v4225_v5 }
0x1545   :  { %v4346_v6 = vpop.permute.xlu1 %4345 }
0x1546   :  { %8221 = vmatprep.subr.msk.bf16.mxu0 %vm1631_vm0, %v4346_v6  ;;  %v4366_v59 = vsel %vm1631_vm0, %v4346_v6, 0 }
0x1547   :  { %7949 = vmatpush3.bf16.xpose.msra.mxu0 %v4366_v59 }
0x1548   :  { %7990 = vmatprep.subr.bf16.mxu0 %v10987_v28 }
0x1549   :  { %v4336_v29 = vpop.permute.xlu1 %4335 }
0x154b   :  { %v8909_v52 = vpop.eup %8908 }
0x154c   :  { %v8911_v13 = vpop.eup %8910  ;;  %v4247_v12 = vmul.f32 %v8909_v52, %v8897_v1  ;;  %v4338_v1 = vpop.permute.xlu0 %4337 }
0x154d   :  { %v8913_v60 = vpop.eup %8912  ;;  %v4244_v4 = vmul.f32 %v8911_v13, %v10964_v44  ;;  %v12353_v44 = vld [vmem:[#allocation104_spill] sm:$0xff]  ;;  %v4340_v14 = vpop.permute.xlu1 %4339 }
0x154e   :  { %v4246_v20 = vmul.f32 %v8913_v60, %v10948_v54  ;;  %v12352_v54 = vld [vmem:[#allocation100_spill] sm:$0xff] }
0x154f   :  { %v8915_v27 = vpop.eup %8914 }
0x1550   :  { %v4245_v56 = vmul.f32 %v8915_v27, %v8899_v47  ;;  %v4251_v17 = vpack.c.bf16 %v4247_v12, %v4246_v20  ;;  %v11007_v47 = vpack.c.bf16 %v12353_v44, %v12352_v54 }
0x1552   :  { %v4250_v51 = vpack.c.bf16 %v4245_v56, %v4244_v4 }
0x1554   :  { %7938 = vmatprep.mubr.msk.bf16.mxu0 %vm1631_vm0, %v4250_v51 }
0x1555   :  { %7939 = vmatmul.mubr.msk.bf16.gmra.mxu0 %vm1631_vm0, %v4251_v17 }
0x1556   :  { %7950 = vmatprep.mubr.msk.bf16.mxu0 %vm1631_vm0, %v4334_v61 }
0x155d   :  { %7951 = vmatmul.mubr.msk.bf16.vlgmr.msra.gmra.mxu0 %vm1631_vm0, %v4336_v29 }
0x155e   :  { %7991 = vmatpush3.bf16.msra.mxu0 %v10987_v28  ;;  %7954 = vmatprep.mubr.msk.bf16.mxu0 %vm1631_vm0, %v4338_v1 }
0x155f   :  { %7992 = vmatprep.subr.bf16.mxu0 %v10999_v39 }
0x1562   :  { %7993 = vmatpush3.bf16.msra.mxu0 %v10999_v39 }
0x1563   :  { %7994 = vmatprep.subr.bf16.mxu0 %v11007_v47 }
0x1565   :  { %7955 = vmatmul.mubr.msk.bf16.gmra.mxu0 %vm1631_vm0, %v4340_v14 }
0x1566   :  { %7995 = vmatpush3.bf16.msra.mxu0 %v11007_v47 }
0x1567   :  { %7996 = vmatprep.subr.bf16.mxu0 %v11013_v41 }
0x156a   :  { %7997 = vmatpush3.bf16.msra.mxu0 %v11013_v41 }
0x15d4   :  { %v11019_v42 = vpop.f32.mrf.mxu0 }
0x15d5   :  { %12356 = vst [vmem:[#allocation26_spill] sm:$0xff] %v11019_v42 }
0x15d6   :  { %v11021_v23 = vpop.f32.mrf.mxu0 }
0x15d7   :  { %12357 = vst [vmem:[#allocation27_spill] sm:$0xff] %v11021_v23 }
0x15d8   :  { %v11023_v3 = vpop.f32.mrf.mxu0 }
0x15d9   :  { %12358 = vst [vmem:[#allocation29_spill] sm:$0xff] %v11023_v3 }
0x15da   :  { %v11025_v5 = vpop.f32.mrf.mxu0 }
0x15db   :  { %12359 = vst [vmem:[#allocation114_spill] sm:$0xff] %v11025_v5 }
0x1615   :  { %v11027_v6 = vpop.f32.mrf.mxu0 }
0x1616   :  { %12360 = vst [vmem:[#allocation108_spill] sm:$0xff] %v11027_v6 }
0x1617   :  { %v11029_v43 = vpop.f32.mrf.mxu0 }
0x1618   :  { %12361 = vst [vmem:[#allocation102_spill] sm:$0xff] %v11029_v43 }
0x1619   :  { %v11031_v58 = vpop.f32.mrf.mxu0 }
0x161a   :  { %12362 = vst [vmem:[#allocation96_spill] sm:$0xff] %v11031_v58 }
0x161b   :  { %v11033_v59 = vpop.f32.mrf.mxu0 }
0x161c   :  { %12363 = vst [vmem:[#allocation82_spill] sm:$0xff] %v11033_v59 }
0x161d   :  { %v7952_v52 = vpop.f32.mrf.mxu0 }
0x161e   :  { %v4420_v12 = vadd.f32 %v7952_v52, %v10923_v37 }
0x161f   :  { %v4411_v13 = vpop.f32.mrf.mxu0 }
0x1620   :  { %v4412_v60 = vadd.f32 %v10923_v37, %v4411_v13  ;;  %v4448_v29 = vsel %vm1631_vm0, %v4420_v12, -inf }
0x1621   :  { %v7953_v27 = vpop.f32.mrf.mxu0 }
0x1622   :  { %v4442_v4 = vsel %vm1631_vm0, %v4412_v60, -inf  ;;  %v4423_v17 = vadd.f32 %v7953_v27, %v10923_v37 }
0x1623   :  { %v4414_v56 = vpop.f32.mrf.mxu0  ;;  %4443 = vmax.xlane.f32.xlu0 %v4442_v4 }
0x1624   :  { %v4415_v20 = vadd.f32 %v10923_v37, %v4414_v56  ;;  %v4451_v44 = vsel %vm1631_vm0, %v4423_v17, -inf }
0x1625   :  { %v7956_v51 = vpop.f32.mrf.mxu0 }
0x1626   :  { %v4445_v61 = vsel %vm1631_vm0, %v4415_v20, -inf  ;;  %v4436_v52 = vadd.f32 %v7956_v51, %v10923_v37 }
0x1627   :  { %4446 = vmax.xlane.f32.xlu1 %v4445_v61  ;;  %4449 = vmax.xlane.f32.xlu0 %v4448_v29  ;;  %v4427_v16 = vpop.f32.mrf.mxu0 }
0x1628   :  { %v4428_v1 = vadd.f32 %v10923_v37, %v4427_v16  ;;  %v4460_v4 = vsel %vm1631_vm0, %v4436_v52, -inf }
0x1629   :  { %v7957_v11 = vpop.f32.mrf.mxu0 }
0x162a   :  { %v4439_v54 = vadd.f32 %v7957_v11, %v10923_v37  ;;  %v4454_v13 = vsel %vm1631_vm0, %v4428_v1, -inf }
0x162b   :  { %4452 = vmax.xlane.f32.xlu0 %v4451_v44  ;;  %v4430_v14 = vpop.f32.mrf.mxu0 }
0x162c   :  { %v4431_v49 = vadd.f32 %v10923_v37, %v4430_v14  ;;  %v4463_v34 = vsel %vm1631_vm0, %v4439_v54, -inf }
0x162d   :  { %4464 = vmax.xlane.f32.xlu1 %v4463_v34 }
0x162e   :  { %v4457_v27 = vsel %vm1631_vm0, %v4431_v49, -inf }
0x162f   :  { %4455 = vmax.xlane.f32.xlu0 %v4454_v13 }
0x1631   :  { %4458 = vmax.xlane.f32.xlu1 %v4457_v27 }
0x1633   :  { %4461 = vmax.xlane.f32.xlu0 %v4460_v4 }
0x1642   :  { %4542 = vrot.lane.b32.xlu1 %v12325_v21, %s9304_s4 }
0x1646   :  { %4540 = vrot.lane.b32.xlu1 %v12326_v62, %s9304_s4 }
0x16ac   :  { %v4444_v56 = vpop.xlane.xlu0 %4443 }
0x16ad   :  { %v4466_v61 = vsub.f32 %v4412_v60, %v4444_v56 }
0x16af   :  { %v4474_v11 = vmul.f32 1.442695, %v4466_v61 }
0x16b0   :  { %v4450_v29 = vpop.xlane.xlu0 %4449  ;;  %v4447_v16 = vpop.xlane.xlu1 %4446 }
0x16b1   :  { %v4468_v51 = vsub.f32 %v4420_v12, %v4450_v29  ;;  %v4467_v14 = vsub.f32 %v4415_v20, %v4447_v16 }
0x16b3   :  { %v4478_v44 = vmul.f32 1.442695, %v4468_v51  ;;  %v4476_v27 = vmul.f32 1.442695, %v4467_v14 }
0x16b4   :  { %v4453_v34 = vpop.xlane.xlu0 %4452 }
0x16b5   :  { %8916 = vpow2.f32 %v4478_v44  ;;  %v4469_v13 = vsub.f32 %v4423_v17, %v4453_v34 }
0x16b6   :  { %8918 = vpow2.f32 %v4474_v11  ;;  %v4465_v29 = vpop.xlane.xlu1 %4464 }
0x16b7   :  { %v4480_v4 = vmul.f32 1.442695, %v4469_v13  ;;  %v4473_v34 = vsub.f32 %v4439_v54, %v4465_v29 }
0x16b8   :  { %v4456_v6 = vpop.xlane.xlu0 %4455 }
0x16b9   :  { %8920 = vpow2.f32 %v4480_v4  ;;  %v4470_v21 = vsub.f32 %v4428_v1, %v4456_v6 }
0x16ba   :  { %8922 = vpow2.f32 %v4476_v27  ;;  %v4459_v11 = vpop.xlane.xlu1 %4458  ;;  %v4488_v27 = vmul.f32 1.442695, %v4473_v34  ;;  %v12364_v34 = vld [vmem:[#allocation80_spill] sm:$0xff] }
0x16bb   :  { %v4482_v58 = vmul.f32 1.442695, %v4470_v21  ;;  %v4471_v44 = vsub.f32 %v4431_v49, %v4459_v11 }
0x16bc   :  { %v4462_v16 = vpop.xlane.xlu0 %4461 }
0x16bd   :  { %8924 = vpow2.f32 %v4482_v58  ;;  %v4472_v51 = vsub.f32 %v4436_v52, %v4462_v16  ;;  %v4484_v13 = vmul.f32 1.442695, %v4471_v44 }
0x16be   :  { %v4543_v49 = vpop.permute.xlu1 %4542 }
0x16bf   :  { %v4486_v14 = vmul.f32 1.442695, %v4472_v51 }
0x16c1   :  { %8926 = vpow2.f32 %v4486_v14 }
0x16c2   :  { %v11055_v62 = vpop.eup %8916  ;;  %8928 = vpow2.f32 %v4484_v13  ;;  %v12365_v13 = vld [vmem:[#allocation84_spill] sm:$0xff] }
0x16c3   :  { %v4496_v60 = vsel %vm1631_vm0, %v11055_v62, 0.0  ;;  %v11059_v12 = vpop.eup %8918  ;;  %8930 = vpow2.f32 %v4488_v27  ;;  %v11087_v27 = vpack.c.bf16 %v12365_v13, %v12364_v34 }
0x16c4   :  { %4497 = vadd.xlane.f32.xlu0 %v4496_v60  ;;  %v4490_v56 = vsel %vm1631_vm0, %v11059_v12, 0.0  ;;  %v4541_v60 = vpop.permute.xlu1 %4540 }
0x16c6   :  { %v8921_v20 = vpop.eup %8920 }
0x16c7   :  { %v4499_v17 = vsel %vm1631_vm0, %v8921_v20, 0.0  ;;  %v8923_v61 = vpop.eup %8922 }
0x16c8   :  { %4500 = vadd.xlane.f32.xlu1 %v4499_v17  ;;  %4491 = vadd.xlane.f32.xlu0 %v4490_v56  ;;  %v4493_v6 = vsel %vm1631_vm0, %v8923_v61, 0.0 }
0x16ca   :  { %v11065_v58 = vpop.eup %8924 }
0x16cb   :  { %v4502_v1 = vsel %vm1631_vm0, %v11065_v58, 0.0 }
0x16cc   :  { %4494 = vadd.xlane.f32.xlu1 %v4493_v6 }
0x16ce   :  { %v11073_v4 = vpop.eup %8926 }
0x16cf   :  { %v11077_v21 = vpop.eup %8928 }
0x16d0   :  { %4503 = vadd.xlane.f32.xlu1 %v4502_v1  ;;  %v11081_v52 = vpop.eup %8930 }
0x16d1   :  { %v4511_v54 = vsel %vm1631_vm0, %v11081_v52, 0.0 }
0x16de   :  { %4544 = vrot.lane.b32.xlu0 %v12324_v31, %s9304_s4  ;;  %v4508_v31 = vsel %vm1631_vm0, %v11073_v4, 0.0 }
0x16e1   :  { %4538 = vrot.lane.b32.xlu1 %v12327_v2, %s9304_s4  ;;  %v4505_v2 = vsel %vm1631_vm0, %v11077_v21, 0.0 }
0x16fd   :  { %4509 = vadd.xlane.f32.xlu0 %v4508_v31 }
0x1701   :  { %4506 = vadd.xlane.f32.xlu0 %v4505_v2 }
0x1705   :  { %4512 = vadd.xlane.f32.xlu0 %v4511_v54 }
0x174d   :  { %v4498_v17 = vpop.xlane.xlu0 %4497 }
0x1751   :  { %v4492_v56 = vpop.xlane.xlu0 %4491  ;;  %v4501_v6 = vpop.xlane.xlu1 %4500 }
0x1752   :  { %8932 = vrcp.f32 %v4501_v6  ;;  %v12366_v6 = vld [vmem:[#allocation74_spill] sm:$0xff] }
0x1753   :  { %8934 = vrcp.f32 %v4492_v56 }
0x1754   :  { %8936 = vrcp.f32 %v4498_v17 }
0x1755   :  { %v4545_v1 = vpop.permute.xlu0 %4544  ;;  %v4495_v29 = vpop.xlane.xlu1 %4494 }
0x1756   :  { %8938 = vrcp.f32 %v4495_v29  ;;  %7958 = vmatprep.subr.bf16.mxu1 %v4545_v1 }
0x1757   :  { %7959 = vmatpush3.bf16.msra.mxu1 %v4545_v1  ;;  %v12367_v1 = vld [vmem:[#allocation78_spill] sm:$0xff] }
0x1758   :  { %7960 = vmatprep.subr.bf16.mxu1 %v4543_v49  ;;  %v11096_v29 = vpack.c.bf16 %v12367_v1, %v12366_v6 }
0x1759   :  { %v4504_v16 = vpop.xlane.xlu1 %4503 }
0x175a   :  { %8940 = vrcp.f32 %v4504_v16 }
0x175b   :  { %7961 = vmatpush3.bf16.msra.mxu1 %v4543_v49 }
0x175c   :  { %7962 = vmatprep.subr.bf16.mxu1 %v4541_v60 }
0x175d   :  { %v4539_v51 = vpop.permute.xlu1 %4538 }
0x175f   :  { %7963 = vmatpush3.bf16.msra.mxu1 %v4541_v60  ;;  %v8933_v11 = vpop.eup %8932 }
0x1760   :  { %7964 = vmatprep.subr.bf16.mxu1 %v4539_v51  ;;  %v8935_v44 = vpop.eup %8934  ;;  %v4525_v2 = vmul.f32 %v8933_v11, %v8921_v20  ;;  %v4661_v20 = vsel %vm1631_vm0, %v11087_v27, 0  ;;  %v12370_v11 = vld [vmem:[#allocation62_spill] sm:$0xff] }
0x1761   :  { %v8937_v14 = vpop.eup %8936  ;;  %v4522_v54 = vmul.f32 %v8935_v44, %v11059_v12  ;;  %v12368_v12 = vld [vmem:[#allocation68_spill] sm:$0xff]  ;;  %v12371_v44 = vld [vmem:[#allocation66_spill] sm:$0xff] }
0x1762   :  { %v4524_v17 = vmul.f32 %v8937_v14, %v11055_v62  ;;  %v11113_v14 = vpack.c.bf16 %v12371_v44, %v12370_v11  ;;  %v12373_v11 = vld [vmem:[#allocation34_spill] sm:$0xff] }
0x1763   :  { %v8939_v31 = vpop.eup %8938  ;;  %7965 = vmatpush3.bf16.msra.mxu1 %v4539_v51  ;;  %v4658_v51 = vsel %vm1631_vm0, %v11096_v29, 0 }
0x1764   :  { %8222 = vmatprep.subr.msk.bf16.mxu1 %vm1631_vm0, %v11087_v27  ;;  %v4523_v49 = vmul.f32 %v8939_v31, %v8923_v61  ;;  %v4531_v56 = vpack.c.bf16 %v4525_v2, %v4524_v17  ;;  %v12369_v61 = vld [vmem:[#allocation72_spill] sm:$0xff]  ;;  %v4652_v13 = vsel %vm1631_vm0, %v11113_v14, 0 }
0x1765   :  { %v11105_v62 = vpack.c.bf16 %v12369_v61, %v12368_v12 }
0x1766   :  { %v4530_v60 = vpack.c.bf16 %v4523_v49, %v4522_v54 }
0x1767   :  { %v4655_v34 = vsel %vm1631_vm0, %v11105_v62, 0  ;;  %v8941_v49 = vpop.eup %8940 }
0x1768   :  { %7966 = vmatprep.mubr.msk.bf16.mxu1 %vm1631_vm0, %v4530_v60  ;;  %v4526_v60 = vmul.f32 %v8941_v49, %v11065_v58  ;;  %v12374_v58 = vld [vmem:[#allocation36_spill] sm:$0xff] }
0x1769   :  { %7967 = vmatmul.mubr.msk.bf16.vlgmr.msra.gmra.mxu1 %vm1631_vm0, %v4531_v56 }
0x176a   :  { %7975 = vmatpush3.bf16.xpose.msra.mxu1 %v4661_v20 }
0x176b   :  { %8223 = vmatprep.subr.msk.bf16.mxu1 %vm1631_vm0, %v11096_v29 }
0x1772   :  { %7977 = vmatpush3.bf16.xpose.msra.mxu1 %v4658_v51  ;;  %v12372_v51 = vld [vmem:[#allocation30_spill] sm:$0xff] }
0x1773   :  { %8224 = vmatprep.subr.msk.bf16.mxu1 %vm1631_vm0, %v11105_v62  ;;  %v11128_v44 = vpack.c.bf16 %v12373_v11, %v12372_v51 }
0x177a   :  { %7979 = vmatpush3.bf16.xpose.msra.mxu1 %v4655_v34 }
0x177b   :  { %8225 = vmatprep.subr.msk.bf16.mxu1 %vm1631_vm0, %v11113_v14 }
0x1782   :  { %7981 = vmatpush3.bf16.xpose.msra.mxu1 %v4652_v13  ;;  %v12376_v13 = vld [vmem:[#allocation42_spill] sm:$0xff] }
0x1786   :  { %v4510_v31 = vpop.xlane.xlu0 %4509 }
0x178a   :  { %v4507_v2 = vpop.xlane.xlu0 %4506 }
0x178b   :  { %8942 = vrcp.f32 %v4507_v2 }
0x178c   :  { %8944 = vrcp.f32 %v4510_v31  ;;  %v12377_v31 = vld [vmem:[#allocation46_spill] sm:$0xff] }
0x178d   :  { %v11139_v2 = vpack.c.bf16 %v12377_v31, %v12376_v13 }
0x178e   :  { %v4513_v54 = vpop.xlane.xlu0 %4512 }
0x178f   :  { %8946 = vrcp.f32 %v4513_v54 }
0x1798   :  { %v8943_v17 = vpop.eup %8942 }
0x1799   :  { %v4527_v56 = vmul.f32 %v8943_v17, %v11077_v21  ;;  %v8945_v6 = vpop.eup %8944  ;;  %v12375_v21 = vld [vmem:[#allocation40_spill] sm:$0xff] }
0x179a   :  { %v4528_v12 = vmul.f32 %v8945_v6, %v11073_v4  ;;  %v11135_v34 = vpack.c.bf16 %v12375_v21, %v12374_v58  ;;  %v12378_v4 = vld [vmem:[#allocation48_spill] sm:$0xff] }
0x179b   :  { %v4532_v1 = vpack.c.bf16 %v4527_v56, %v4526_v60 }
0x179c   :  { %v8947_v20 = vpop.eup %8946 }
0x179d   :  { %7970 = vmatprep.mubr.msk.bf16.mxu1 %vm1631_vm0, %v4532_v1  ;;  %v4529_v16 = vmul.f32 %v8947_v20, %v11081_v52  ;;  %v12379_v52 = vld [vmem:[#allocation52_spill] sm:$0xff] }
0x179e   :  { %v11147_v54 = vpack.c.bf16 %v12379_v52, %v12378_v4 }
0x179f   :  { %v4533_v61 = vpack.c.bf16 %v4529_v16, %v4528_v12 }
0x17a1   :  { %7971 = vmatmul.mubr.msk.bf16.gmra.mxu1 %vm1631_vm0, %v4533_v61 }
0x17a2   :  { %7982 = vmatprep.mubr.msk.bf16.mxu1 %vm1631_vm0, %v11128_v44 }
0x17a9   :  { %7983 = vmatmul.mubr.msk.bf16.vlgmr.msra.gmra.mxu1 %vm1631_vm0, %v11135_v34 }
0x17aa   :  { %7986 = vmatprep.mubr.msk.bf16.mxu1 %vm1631_vm0, %v11139_v2 }
0x17b1   :  { %7987 = vmatmul.mubr.msk.bf16.gmra.mxu1 %vm1631_vm0, %v11147_v54 }
0x1829   :  { %v11151_v49 = vpop.f32.mrf.mxu1 }
0x182a   :  { %12380 = vst [vmem:[#allocation76_spill] sm:$0xff] %v11151_v49 }
0x182b   :  { %v11153_v17 = vpop.f32.mrf.mxu1 }
0x182d   :  { %v11155_v60 = vpop.f32.mrf.mxu1 }
0x182e   :  { %12381 = vst [vmem:[#allocation70_spill] sm:$0xff] %v11155_v60 }
0x182f   :  { %v11159_v6 = vpop.f32.mrf.mxu1 }
0x1861   :  { %v11163_v20 = vpop.f32.mrf.mxu1 }
0x1862   :  { %12382 = vst [vmem:[#allocation64_spill] sm:$0xff] %v11163_v20 }
0x1863   :  { %v11165_v12 = vpop.f32.mrf.mxu1 }
0x1864   :  { %12383 = vst [vmem:[#allocation32_spill] sm:$0xff] %v11165_v12 }
0x1865   :  { %v11167_v16 = vpop.f32.mrf.mxu1 }
0x1866   :  { %12384 = vst [vmem:[#allocation38_spill] sm:$0xff] %v11167_v16 }
0x1867   :  { %v11171_v51 = vpop.f32.mrf.mxu1 }
0x1868   :  { %12385 = vst [vmem:[#allocation44_spill] sm:$0xff] %v11171_v51 }
0x1869   :  { %v7984_v58 = vpop.f32.mrf.mxu1 }
0x186a   :  { %v4706_v21 = vadd.f32 %v7984_v58, %v10923_v37 }
0x186b   :  { %v4697_v13 = vpop.f32.mrf.mxu1 }
0x186c   :  { %v4698_v31 = vadd.f32 %v10923_v37, %v4697_v13  ;;  %v4734_v4 = vsel %vm1631_vm0, %v4706_v21, -inf }
0x186d   :  { %4735 = vmax.xlane.f32.xlu0 %v4734_v4  ;;  %v7985_v52 = vpop.f32.mrf.mxu1 }
0x186e   :  { %v4728_v61 = vsel %vm1631_vm0, %v4698_v31, -inf  ;;  %v4709_v11 = vadd.f32 %v7985_v52, %v10923_v37 }
0x186f   :  { %v4700_v56 = vpop.f32.mrf.mxu1 }
0x1870   :  { %v4701_v1 = vadd.f32 %v10923_v37, %v4700_v56  ;;  %v4737_v56 = vsel %vm1631_vm0, %v4709_v11, -inf }
0x1871   :  { %v7988_v43 = vpop.f32.mrf.mxu1  ;;  %4729 = vmax.xlane.f32.xlu0 %v4728_v61 }
0x1872   :  { %v4731_v58 = vsel %vm1631_vm0, %v4701_v1, -inf  ;;  %v4722_v4 = vadd.f32 %v7988_v43, %v10923_v37 }
0x1873   :  { %v4713_v59 = vpop.f32.mrf.mxu1 }
0x1874   :  { %v4714_v42 = vadd.f32 %v10923_v37, %v4713_v59  ;;  %v4746_v5 = vsel %vm1631_vm0, %v4722_v4, -inf }
0x1875   :  { %v7989_v3 = vpop.f32.mrf.mxu1  ;;  %4732 = vmax.xlane.f32.xlu0 %v4731_v58 }
0x1876   :  { %v4740_v13 = vsel %vm1631_vm0, %v4714_v42, -inf  ;;  %v4725_v59 = vadd.f32 %v7989_v3, %v10923_v37 }
0x1877   :  { %4741 = vmax.xlane.f32.xlu1 %v4740_v13  ;;  %v4716_v23 = vpop.f32.mrf.mxu1 }
0x1878   :  { %v4717_v61 = vadd.f32 %v10923_v37, %v4716_v23  ;;  %v4749_v58 = vsel %vm1631_vm0, %v4725_v59, -inf }
0x1879   :  { %4738 = vmax.xlane.f32.xlu0 %v4737_v56 }
0x187a   :  { %v4743_v52 = vsel %vm1631_vm0, %v4717_v61, -inf }
0x187d   :  { %4747 = vmax.xlane.f32.xlu0 %v4746_v5 }
0x1881   :  { %4744 = vmax.xlane.f32.xlu0 %v4743_v52 }
0x1885   :  { %4750 = vmax.xlane.f32.xlu0 %v4749_v58 }
0x1888   :  { %4919 = vrot.lane.b32.xlu1 %v11087_v27, %s9304_s4 }
0x18f6   :  { %v4736_v43 = vpop.xlane.xlu0 %4735 }
0x18f7   :  { %v4754_v13 = vsub.f32 %v4706_v21, %v4736_v43 }
0x18f9   :  { %v4764_v20 = vmul.f32 1.442695, %v4754_v13 }
0x18fa   :  { %v4730_v56 = vpop.xlane.xlu0 %4729 }
0x18fb   :  { %8948 = vpow2.f32 %v4764_v20  ;;  %v4752_v23 = vsub.f32 %v4698_v31, %v4730_v56 }
0x18fd   :  { %v4760_v16 = vmul.f32 1.442695, %v4752_v23 }
0x18fe   :  { %v4733_v12 = vpop.xlane.xlu0 %4732 }
0x18ff   :  { %8950 = vpow2.f32 %v4760_v16  ;;  %v4753_v37 = vsub.f32 %v4701_v1, %v4733_v12 }
0x1900   :  { %v4742_v5 = vpop.xlane.xlu1 %4741 }
0x1901   :  { %v4762_v49 = vmul.f32 1.442695, %v4753_v37  ;;  %v4756_v58 = vsub.f32 %v4714_v42, %v4742_v5 }
0x1902   :  { %v4739_v3 = vpop.xlane.xlu0 %4738 }
0x1903   :  { %v4755_v51 = vsub.f32 %v4709_v11, %v4739_v3  ;;  %v4768_v31 = vmul.f32 1.442695, %v4756_v58 }
0x1904   :  { %v11193_v52 = vpop.permute.xlu1 %4919 }
0x1905   :  { %v4766_v60 = vmul.f32 1.442695, %v4755_v51  ;;  %8226 = vmatprep.subr.msk.bf16.mxu0 %vm1631_vm0, %v11193_v52 }
0x1906   :  { %v4748_v27 = vpop.xlane.xlu0 %4747 }
0x1907   :  { %8952 = vpow2.f32 %v4766_v60  ;;  %v4758_v21 = vsub.f32 %v4722_v4, %v4748_v27 }
0x1908   :  { %v11197_v20 = vpop.eup %8948  ;;  %8954 = vpow2.f32 %v4762_v49 }
0x1909   :  { %v4772_v16 = vmul.f32 1.442695, %v4758_v21  ;;  %v4782_v1 = vsel %vm1631_vm0, %v11197_v20, 0.0 }
0x190a   :  { %4783 = vadd.xlane.f32.xlu0 %v4782_v1  ;;  %v4745_v12 = vpop.xlane.xlu0 %4744 }
0x190b   :  { %8956 = vpow2.f32 %v4772_v16  ;;  %v4757_v42 = vsub.f32 %v4717_v61, %v4745_v12 }
0x190c   :  { %v8951_v11 = vpop.eup %8950  ;;  %8958 = vpow2.f32 %v4768_v31 }
0x190d   :  { %v4776_v51 = vsel %vm1631_vm0, %v8951_v11, 0.0  ;;  %v4770_v4 = vmul.f32 1.442695, %v4757_v42 }
0x190e   :  { %4777 = vadd.xlane.f32.xlu0 %v4776_v51  ;;  %v4751_v43 = vpop.xlane.xlu0 %4750 }
0x190f   :  { %v4759_v60 = vsub.f32 %v4725_v59, %v4751_v43 }
0x1911   :  { %v4774_v13 = vmul.f32 1.442695, %v4759_v60 }
0x1913   :  { %8960 = vpow2.f32 %v4774_v13 }
0x1914   :  { %v8953_v49 = vpop.eup %8952  ;;  %8962 = vpow2.f32 %v4770_v4 }
0x1915   :  { %v4785_v56 = vsel %vm1631_vm0, %v8953_v49, 0.0  ;;  %v8955_v23 = vpop.eup %8954 }
0x1916   :  { %4786 = vadd.xlane.f32.xlu0 %v4785_v56  ;;  %v4779_v37 = vsel %vm1631_vm0, %v8955_v23, 0.0 }
0x1918   :  { %v8957_v5 = vpop.eup %8956 }
0x1919   :  { %v4794_v3 = vsel %vm1631_vm0, %v8957_v5, 0.0  ;;  %v8959_v61 = vpop.eup %8958 }
0x191a   :  { %4780 = vadd.xlane.f32.xlu0 %v4779_v37  ;;  %4795 = vadd.xlane.f32.xlu1 %v4794_v3  ;;  %v4788_v58 = vsel %vm1631_vm0, %v8959_v61, 0.0  ;;  %v4943_v3 = vsel %vm1631_vm0, %v11193_v52, 0 }
0x191e   :  { %4789 = vadd.xlane.f32.xlu0 %v4788_v58 }
0x1920   :  { %v8961_v59 = vpop.eup %8960 }
0x1921   :  { %v4797_v27 = vsel %vm1631_vm0, %v8961_v59, 0.0  ;;  %v8963_v21 = vpop.eup %8962 }
0x1922   :  { %4798 = vadd.xlane.f32.xlu0 %v4797_v27  ;;  %v4791_v31 = vsel %vm1631_vm0, %v8963_v21, 0.0 }
0x1926   :  { %4792 = vadd.xlane.f32.xlu0 %v4791_v31 }
0x192b   :  { %4915 = vrot.lane.b32.xlu1 %v11105_v62, %s9304_s4 }
0x192f   :  { %4913 = vrot.lane.b32.xlu1 %v11113_v14, %s9304_s4 }
0x1933   :  { %4903 = vrot.lane.b32.xlu1 %v11135_v34, %s9304_s4 }
0x1937   :  { %4907 = vrot.lane.b32.xlu1 %v11147_v54, %s9304_s4 }
0x193c   :  { %4917 = vrot.lane.b32.xlu0 %v11096_v29, %s9304_s4 }
0x1940   :  { %4901 = vrot.lane.b32.xlu0 %v11128_v44, %s9304_s4 }
0x1944   :  { %4905 = vrot.lane.b32.xlu0 %v11139_v2, %s9304_s4 }
0x1993   :  { %v4784_v16 = vpop.xlane.xlu0 %4783 }
0x1997   :  { %v4778_v62 = vpop.xlane.xlu0 %4777 }
0x199f   :  { %v4787_v1 = vpop.xlane.xlu0 %4786 }
0x19a0   :  { %8964 = vrcp.f32 %v4787_v1 }
0x19a1   :  { %8966 = vrcp.f32 %v4778_v62 }
0x19a2   :  { %8968 = vrcp.f32 %v4784_v16 }
0x19a3   :  { %v4781_v14 = vpop.xlane.xlu0 %4780  ;;  %v4796_v54 = vpop.xlane.xlu1 %4795 }
0x19a4   :  { %8970 = vrcp.f32 %v4781_v14 }
0x19a7   :  { %v4790_v34 = vpop.xlane.xlu0 %4789 }
0x19ab   :  { %v4799_v12 = vpop.xlane.xlu0 %4798 }
0x19ac   :  { %8972 = vrcp.f32 %v4799_v12 }
0x19ad   :  { %8974 = vrcp.f32 %v4790_v34  ;;  %v8965_v29 = vpop.eup %8964  ;;  %v4916_v34 = vpop.permute.xlu1 %4915 }
0x19ae   :  { %8976 = vrcp.f32 %v4796_v54  ;;  %v8967_v44 = vpop.eup %8966  ;;  %v4811_v43 = vmul.f32 %v8965_v29, %v8953_v49 }
0x19af   :  { %v4793_v42 = vpop.xlane.xlu0 %4792  ;;  %v8969_v51 = vpop.eup %8968  ;;  %v4808_v60 = vmul.f32 %v8967_v44, %v8951_v11  ;;  %v12388_v44 = vld [vmem:[#allocation103_spill] sm:$0xff] }
0x19b0   :  { %8978 = vrcp.f32 %v4793_v42  ;;  %v4810_v13 = vmul.f32 %v8969_v51, %v11197_v20  ;;  %v12387_v42 = vld [vmem:[#allocation109_spill] sm:$0xff] }
0x19b1   :  { %v8971_v2 = vpop.eup %8970 }
0x19b2   :  { %v4809_v4 = vmul.f32 %v8971_v2, %v8955_v23  ;;  %v4817_v37 = vpack.c.bf16 %v4811_v43, %v4810_v13  ;;  %v12389_v2 = vld [vmem:[#allocation97_spill] sm:$0xff] }
0x19b3   :  { %v4918_v58 = vpop.permute.xlu0 %4917 }
0x19b4   :  { %v4816_v56 = vpack.c.bf16 %v4809_v4, %v4808_v60  ;;  %v4940_v1 = vsel %vm1631_vm0, %v4918_v58, 0 }
0x19b6   :  { %7998 = vmatprep.mubr.msk.bf16.mxu0 %vm1631_vm0, %v4816_v56 }
0x19b7   :  { %7999 = vmatmul.mubr.msk.bf16.vlgmr.msra.gmra.mxu0 %vm1631_vm0, %v4817_v37  ;;  %v4902_v52 = vpop.permute.xlu0 %4901 }
0x19b8   :  { %8007 = vmatpush3.bf16.xpose.msra.mxu0 %v4943_v3 }
0x19b9   :  { %v8973_v27 = vpop.eup %8972  ;;  %8227 = vmatprep.subr.msk.bf16.mxu0 %vm1631_vm0, %v4918_v58 }
0x19ba   :  { %v8975_v31 = vpop.eup %8974  ;;  %v4815_v23 = vmul.f32 %v8973_v27, %v8961_v59  ;;  %v4937_v59 = vsel %vm1631_vm0, %v4916_v34, 0 }
0x19bb   :  { %v8977_v49 = vpop.eup %8976  ;;  %v4812_v16 = vmul.f32 %v8975_v31, %v8959_v61  ;;  %v4914_v61 = vpop.permute.xlu1 %4913  ;;  %v11263_v31 = vld [vmem:[#allocation5 + $0x1] ss:$0 sm:$0xff] }
0x19bc   :  { %v4814_v62 = vmul.f32 %v8977_v49, %v8957_v5  ;;  %v4934_v5 = vsel %vm1631_vm0, %v4914_v61, 0  ;;  %v4906_v29 = vpop.permute.xlu0 %4905 }
0x19bd   :  { %v8979_v11 = vpop.eup %8978 }
0x19be   :  { %v4813_v20 = vmul.f32 %v8979_v11, %v8963_v21  ;;  %v4819_v12 = vpack.c.bf16 %v4815_v23, %v4814_v62  ;;  %v12386_v21 = vld [vmem:[#allocation115_spill] sm:$0xff] }
0x19bf   :  { %v4904_v54 = vpop.permute.xlu1 %4903 }
0x19c0   :  { %v4818_v14 = vpack.c.bf16 %v4813_v20, %v4812_v16  ;;  %8009 = vmatpush3.bf16.xpose.msra.mxu0 %v4940_v1 }
0x19c1   :  { %8228 = vmatprep.subr.msk.bf16.mxu0 %vm1631_vm0, %v4916_v34 }
0x19c2   :  { %8002 = vmatprep.mubr.msk.bf16.mxu0 %vm1631_vm0, %v4818_v14 }
0x19c3   :  { %8003 = vmatmul.mubr.msk.bf16.gmra.mxu0 %vm1631_vm0, %v4819_v12  ;;  %v4908_v51 = vpop.permute.xlu1 %4907 }
0x19c4   :  { %8014 = vmatprep.mubr.msk.bf16.mxu0 %vm1631_vm0, %v4902_v52 }
0x19c8   :  { %8011 = vmatpush3.bf16.xpose.msra.mxu0 %v4937_v59 }
0x19c9   :  { %8229 = vmatprep.subr.msk.bf16.mxu0 %vm1631_vm0, %v4914_v61 }
0x19d0   :  { %8013 = vmatpush3.bf16.xpose.msra.mxu0 %v4934_v5 }
0x19d1   :  { %8054 = vmatprep.subr.bf16.mxu0 %v12386_v21 }
0x19d7   :  { %8015 = vmatmul.mubr.msk.bf16.vlgmr.msra.gmra.mxu0 %vm1631_vm0, %v4904_v54 }
0x19d8   :  { %8018 = vmatprep.mubr.msk.bf16.mxu0 %vm1631_vm0, %v4906_v29  ;;  %8055 = vmatpush3.bf16.msra.mxu0 %v12386_v21 }
0x19d9   :  { %8056 = vmatprep.subr.bf16.mxu0 %v12387_v42 }
0x19dc   :  { %8057 = vmatpush3.bf16.msra.mxu0 %v12387_v42 }
0x19dd   :  { %8058 = vmatprep.subr.bf16.mxu0 %v12388_v44 }
0x19df   :  { %8019 = vmatmul.mubr.msk.bf16.gmra.mxu0 %vm1631_vm0, %v4908_v51 }
0x19e0   :  { %8059 = vmatpush3.bf16.msra.mxu0 %v12388_v44 }
0x19e1   :  { %8060 = vmatprep.subr.bf16.mxu0 %v12389_v2 }
0x19e4   :  { %8061 = vmatpush3.bf16.msra.mxu0 %v12389_v2 }
0x1a77   :  { %v11247_v43 = vpop.f32.mrf.mxu0 }
0x1a78   :  { %12390 = vst [vmem:[#allocation50_spill] sm:$0xff] %v11247_v43 }
0x1a79   :  { %v11249_v60 = vpop.f32.mrf.mxu0 }
0x1a7a   :  { %12391 = vst [vmem:[#allocation112_spill] sm:$0xff] %v11249_v60 }
0x1a7b   :  { %v11251_v4 = vpop.f32.mrf.mxu0 }
0x1a7c   :  { %12392 = vst [vmem:[#allocation116_spill] sm:$0xff] %v11251_v4 }
0x1a7d   :  { %v11253_v13 = vpop.f32.mrf.mxu0 }
0x1a7e   :  { %12393 = vst [vmem:[#allocation106_spill] sm:$0xff] %v11253_v13 }
0x1a83   :  { %v11255_v56 = vpop.f32.mrf.mxu0 }
0x1a84   :  { %12394 = vst [vmem:[#allocation110_spill] sm:$0xff] %v11255_v56 }
0x1a85   :  { %v11257_v37 = vpop.f32.mrf.mxu0 }
0x1a86   :  { %12395 = vst [vmem:[#allocation100_spill] sm:$0xff] %v11257_v37 }
0x1a87   :  { %v11259_v3 = vpop.f32.mrf.mxu0 }
0x1a88   :  { %12396 = vst [vmem:[#allocation104_spill] sm:$0xff] %v11259_v3 }
0x1a89   :  { %v11261_v58 = vpop.f32.mrf.mxu0 }
0x1a8a   :  { %12397 = vst [vmem:[#allocation94_spill] sm:$0xff] %v11261_v58 }
0x1a97   :  { %v8016_v27 = vpop.f32.mrf.mxu0 }
0x1a98   :  { %v4988_v49 = vadd.f32 %v11263_v31, %v8016_v27 }
0x1a99   :  { %v4979_v11 = vpop.f32.mrf.mxu0 }
0x1a9a   :  { %v4980_v23 = vadd.f32 %v11263_v31, %v4979_v11  ;;  %v5016_v16 = vsel %vm1631_vm0, %v4988_v49, -inf }
0x1a9b   :  { %5017 = vmax.xlane.f32.xlu0 %v5016_v16  ;;  %v8017_v20 = vpop.f32.mrf.mxu0 }
0x1a9c   :  { %v4991_v1 = vadd.f32 %v11263_v31, %v8017_v20  ;;  %v5010_v34 = vsel %vm1631_vm0, %v4980_v23, -inf }
0x1a9d   :  { %v4982_v62 = vpop.f32.mrf.mxu0 }
0x1a9e   :  { %v4983_v14 = vadd.f32 %v11263_v31, %v4982_v62  ;;  %v5019_v5 = vsel %vm1631_vm0, %v4991_v1, -inf }
0x1a9f   :  { %5011 = vmax.xlane.f32.xlu0 %v5010_v34  ;;  %v8020_v12 = vpop.f32.mrf.mxu0 }
0x1aa0   :  { %v5004_v52 = vadd.f32 %v11263_v31, %v8020_v12  ;;  %v5013_v59 = vsel %vm1631_vm0, %v4983_v14, -inf }
0x1aa1   :  { %5014 = vmax.xlane.f32.xlu1 %v5013_v59  ;;  %v4995_v61 = vpop.f32.mrf.mxu0 }
0x1aa2   :  { %v11275_v29 = vadd.f32 %v11263_v31, %v4995_v61  ;;  %v5028_v27 = vsel %vm1631_vm0, %v5004_v52, -inf }
0x1aa3   :  { %5020 = vmax.xlane.f32.xlu0 %v5019_v5  ;;  %v8021_v54 = vpop.f32.mrf.mxu0 }
0x1aa4   :  { %v11278_v51 = vadd.f32 %v11263_v31, %v8021_v54  ;;  %v5022_v62 = vsel %vm1631_vm0, %v11275_v29, -inf }
0x1aa5   :  { %5029 = vmax.xlane.f32.xlu1 %v5028_v27  ;;  %v4998_v11 = vpop.f32.mrf.mxu0 }
0x1aa6   :  { %v4999_v16 = vadd.f32 %v11263_v31, %v4998_v11  ;;  %v5031_v20 = vsel %vm1631_vm0, %v11278_v51, -inf }
0x1aa7   :  { %5032 = vmax.xlane.f32.xlu0 %v5031_v20 }
0x1aa8   :  { %v5025_v34 = vsel %vm1631_vm0, %v4999_v16, -inf }
0x1aa9   :  { %5023 = vmax.xlane.f32.xlu1 %v5022_v62 }
0x1aab   :  { %5026 = vmax.xlane.f32.xlu0 %v5025_v34 }
0x1aba   :  { %5112 = vrot.lane.b32.xlu1 %v10987_v28, %s9304_s4 }
0x1ac1   :  { %5110 = vrot.lane.b32.xlu0 %v10999_v39, %s9304_s4 }
0x1b24   :  { %v5018_v12 = vpop.xlane.xlu0 %5017 }
0x1b25   :  { %v5036_v59 = vsub.f32 %v4988_v49, %v5018_v12 }
0x1b27   :  { %v5046_v61 = vmul.f32 1.442695, %v5036_v59 }
0x1b28   :  { %v5012_v5 = vpop.xlane.xlu0 %5011 }
0x1b29   :  { %8980 = vpow2.f32 %v5046_v61  ;;  %v5034_v54 = vsub.f32 %v4980_v23, %v5012_v5 }
0x1b2a   :  { %v5015_v27 = vpop.xlane.xlu1 %5014 }
0x1b2b   :  { %v5042_v11 = vmul.f32 1.442695, %v5034_v54  ;;  %v5035_v20 = vsub.f32 %v4983_v14, %v5015_v27 }
0x1b2c   :  { %v5021_v3 = vpop.xlane.xlu0 %5020 }
0x1b2d   :  { %8982 = vpow2.f32 %v5042_v11  ;;  %v5037_v62 = vsub.f32 %v4991_v1, %v5021_v3  ;;  %v5044_v34 = vmul.f32 1.442695, %v5035_v20 }
0x1b2e   :  { %v5030_v56 = vpop.xlane.xlu1 %5029 }
0x1b2f   :  { %v5048_v58 = vmul.f32 1.442695, %v5037_v62  ;;  %v5040_v37 = vsub.f32 %v5004_v52, %v5030_v56 }
0x1b30   :  { %v5033_v28 = vpop.xlane.xlu0 %5032 }
0x1b31   :  { %8984 = vpow2.f32 %v5048_v58  ;;  %v5054_v39 = vmul.f32 1.442695, %v5040_v37  ;;  %v5041_v62 = vsub.f32 %v11278_v51, %v5033_v28 }
0x1b32   :  { %v5024_v4 = vpop.xlane.xlu1 %5023  ;;  %8986 = vpow2.f32 %v5044_v34 }
0x1b33   :  { %8988 = vpow2.f32 %v5054_v39  ;;  %v5038_v20 = vsub.f32 %v11275_v29, %v5024_v4  ;;  %v5056_v39 = vmul.f32 1.442695, %v5041_v62 }
0x1b34   :  { %v5027_v49 = vpop.xlane.xlu0 %5026 }
0x1b35   :  { %v5039_v12 = vsub.f32 %v4999_v16, %v5027_v49  ;;  %v5050_v34 = vmul.f32 1.442695, %v5038_v20  ;;  %v12398_v20 = vld [vmem:[#allocation83_spill] sm:$0xff] }
0x1b36   :  { %v11291_v59 = vpop.eup %8980  ;;  %v5113_v23 = vpop.permute.xlu1 %5112 }
0x1b37   :  { %v5052_v61 = vmul.f32 1.442695, %v5039_v12  ;;  %8022 = vmatprep.subr.bf16.mxu1 %v5113_v23  ;;  %v5064_v3 = vsel %vm1631_vm0, %v11291_v59, 0.0 }
0x1b38   :  { %8023 = vmatpush3.bf16.msra.mxu1 %v5113_v23  ;;  %5065 = vadd.xlane.f32.xlu1 %v5064_v3  ;;  %v5111_v1 = vpop.permute.xlu0 %5110 }
0x1b39   :  { %8024 = vmatprep.subr.bf16.mxu1 %v5111_v1  ;;  %8990 = vpow2.f32 %v5052_v61 }
0x1b3a   :  { %v8983_v56 = vpop.eup %8982  ;;  %8992 = vpow2.f32 %v5050_v34 }
0x1b3b   :  { %v5058_v58 = vsel %vm1631_vm0, %v8983_v56, 0.0  ;;  %8994 = vpow2.f32 %v5056_v39 }
0x1b3c   :  { %5059 = vadd.xlane.f32.xlu1 %v5058_v58  ;;  %8025 = vmatpush3.bf16.msra.mxu1 %v5111_v1 }
0x1b3e   :  { %v8985_v37 = vpop.eup %8984 }
0x1b3f   :  { %v5067_v14 = vsel %vm1631_vm0, %v8985_v37, 0.0  ;;  %v8987_v52 = vpop.eup %8986 }
0x1b40   :  { %5068 = vadd.xlane.f32.xlu0 %v5067_v14  ;;  %v5061_v16 = vsel %vm1631_vm0, %v8987_v52, 0.0  ;;  %v11298_v5 = vpop.eup %8988 }
0x1b41   :  { %v5076_v54 = vsel %vm1631_vm0, %v11298_v5, 0.0 }
0x1b44   :  { %5062 = vadd.xlane.f32.xlu0 %v5061_v16 }
0x1b46   :  { %v11302_v27 = vpop.eup %8990 }
0x1b47   :  { %v5073_v11 = vsel %vm1631_vm0, %v11302_v27, 0.0  ;;  %v8993_v49 = vpop.eup %8992 }
0x1b48   :  { %5077 = vadd.xlane.f32.xlu0 %v5076_v54  ;;  %v5070_v12 = vsel %vm1631_vm0, %v8993_v49, 0.0  ;;  %v8995_v23 = vpop.eup %8994 }
0x1b49   :  { %v5079_v61 = vsel %vm1631_vm0, %v8995_v23, 0.0 }
0x1b4c   :  { %5074 = vadd.xlane.f32.xlu0 %v5073_v11 }
0x1b4d   :  { %5108 = vrot.lane.b32.xlu1 %v11007_v47, %s9304_s4 }
0x1b62   :  { %5106 = vrot.lane.b32.xlu0 %v11013_v41, %s9304_s4 }
0x1b71   :  { %5071 = vadd.xlane.f32.xlu1 %v5070_v12 }
0x1b75   :  { %5080 = vadd.xlane.f32.xlu1 %v5079_v61 }
0x1bc1   :  { %v5066_v47 = vpop.xlane.xlu1 %5065 }
0x1bc5   :  { %v5060_v3 = vpop.xlane.xlu1 %5059 }
0x1bc9   :  { %v5109_v4 = vpop.permute.xlu1 %5108  ;;  %v5069_v29 = vpop.xlane.xlu0 %5068 }
0x1bca   :  { %8026 = vmatprep.subr.bf16.mxu1 %v5109_v4  ;;  %8996 = vrcp.f32 %v5069_v29 }
0x1bcb   :  { %8027 = vmatpush3.bf16.msra.mxu1 %v5109_v4  ;;  %8998 = vrcp.f32 %v5060_v3  ;;  %v12399_v3 = vld [vmem:[#allocation77_spill] sm:$0xff] }
0x1bcc   :  { %9000 = vrcp.f32 %v5066_v47  ;;  %v5229_v47 = vsel %vm1631_vm0, %v12398_v20, 0 }
0x1bcd   :  { %v5063_v51 = vpop.xlane.xlu0 %5062 }
0x1bce   :  { %9002 = vrcp.f32 %v5063_v51 }
0x1bd1   :  { %v5078_v41 = vpop.xlane.xlu0 %5077 }
0x1bd5   :  { %v5075_v28 = vpop.xlane.xlu0 %5074 }
0x1bd6   :  { %9004 = vrcp.f32 %v5075_v28 }
0x1bd7   :  { %v8997_v1 = vpop.eup %8996 }
0x1bd8   :  { %v8999_v58 = vpop.eup %8998  ;;  %v5093_v11 = vmul.f32 %v8997_v1, %v8985_v37  ;;  %v5226_v37 = vsel %vm1631_vm0, %v12399_v3, 0 }
0x1bd9   :  { %v5107_v14 = vpop.permute.xlu0 %5106  ;;  %v9001_v16 = vpop.eup %9000  ;;  %v5090_v62 = vmul.f32 %v8999_v58, %v8983_v56  ;;  %v12400_v56 = vld [vmem:[#allocation71_spill] sm:$0xff] }
0x1bda   :  { %8028 = vmatprep.subr.bf16.mxu1 %v5107_v14  ;;  %v5092_v39 = vmul.f32 %v9001_v16, %v11291_v59  ;;  %v5223_v59 = vsel %vm1631_vm0, %v12400_v56, 0 }
0x1bdb   :  { %v9003_v54 = vpop.eup %9002  ;;  %8029 = vmatpush3.bf16.msra.mxu1 %v5107_v14 }
0x1bdc   :  { %8230 = vmatprep.subr.msk.bf16.mxu1 %vm1631_vm0, %v12398_v20  ;;  %v5091_v34 = vmul.f32 %v9003_v54, %v8987_v52  ;;  %v5099_v61 = vpack.c.bf16 %v5093_v11, %v5092_v39  ;;  %v12401_v52 = vld [vmem:[#allocation65_spill] sm:$0xff] }
0x1bdd   :  { %v5220_v4 = vsel %vm1631_vm0, %v12401_v52, 0 }
0x1bde   :  { %v5098_v12 = vpack.c.bf16 %v5091_v34, %v5090_v62 }
0x1be0   :  { %8030 = vmatprep.mubr.msk.bf16.mxu1 %vm1631_vm0, %v5098_v12  ;;  %v12402_v12 = vld [vmem:[#allocation33_spill] sm:$0xff] }
0x1be1   :  { %8031 = vmatmul.mubr.msk.bf16.vlgmr.msra.gmra.mxu1 %vm1631_vm0, %v5099_v61 }
0x1be2   :  { %8039 = vmatpush3.bf16.xpose.msra.mxu1 %v5229_v47 }
0x1be3   :  { %8231 = vmatprep.subr.msk.bf16.mxu1 %vm1631_vm0, %v12399_v3  ;;  %v9005_v1 = vpop.eup %9004 }
0x1be4   :  { %v5095_v16 = vmul.f32 %v9005_v1, %v11302_v27  ;;  %v12405_v27 = vld [vmem:[#allocation51_spill] sm:$0xff] }
0x1bea   :  { %8041 = vmatpush3.bf16.xpose.msra.mxu1 %v5226_v37 }
0x1beb   :  { %8232 = vmatprep.subr.msk.bf16.mxu1 %vm1631_vm0, %v12400_v56 }
0x1bf2   :  { %8043 = vmatpush3.bf16.xpose.msra.mxu1 %v5223_v59 }
0x1bf3   :  { %8233 = vmatprep.subr.msk.bf16.mxu1 %vm1631_vm0, %v12401_v52 }
0x1bfa   :  { %8045 = vmatpush3.bf16.xpose.msra.mxu1 %v5220_v4  ;;  %v5072_v29 = vpop.xlane.xlu1 %5071 }
0x1bfb   :  { %9006 = vrcp.f32 %v5072_v29 }
0x1bfc   :  { %9008 = vrcp.f32 %v5078_v41  ;;  %v12403_v41 = vld [vmem:[#allocation39_spill] sm:$0xff] }
0x1bfe   :  { %v5081_v51 = vpop.xlane.xlu1 %5080 }
0x1bff   :  { %9010 = vrcp.f32 %v5081_v51 }
0x1c08   :  { %v9007_v58 = vpop.eup %9006 }
0x1c09   :  { %v5094_v14 = vmul.f32 %v9007_v58, %v8993_v49  ;;  %v9009_v54 = vpop.eup %9008  ;;  %v12404_v49 = vld [vmem:[#allocation45_spill] sm:$0xff] }
0x1c0a   :  { %v5096_v28 = vmul.f32 %v9009_v54, %v11298_v5 }
0x1c0b   :  { %v5100_v11 = vpack.c.bf16 %v5095_v16, %v5094_v14 }
0x1c0c   :  { %v9011_v62 = vpop.eup %9010 }
0x1c0d   :  { %8034 = vmatprep.mubr.msk.bf16.mxu1 %vm1631_vm0, %v5100_v11  ;;  %v5097_v34 = vmul.f32 %v9011_v62, %v8995_v23 }
0x1c0f   :  { %v5101_v39 = vpack.c.bf16 %v5097_v34, %v5096_v28 }
0x1c11   :  { %8035 = vmatmul.mubr.msk.bf16.gmra.mxu1 %vm1631_vm0, %v5101_v39 }
0x1c12   :  { %8046 = vmatprep.mubr.msk.bf16.mxu1 %vm1631_vm0, %v12402_v12 }
0x1c19   :  { %8047 = vmatmul.mubr.msk.bf16.vlgmr.msra.gmra.mxu1 %vm1631_vm0, %v12403_v41 }
0x1c1a   :  { %8050 = vmatprep.mubr.msk.bf16.mxu1 %vm1631_vm0, %v12404_v49 }
0x1c21   :  { %8051 = vmatmul.mubr.msk.bf16.gmra.mxu1 %vm1631_vm0, %v12405_v27 }
0x1ca1   :  { %v11345_v61 = vpop.f32.mrf.mxu1 }
0x1ca2   :  { %12406 = vst [vmem:[#allocation98_spill] sm:$0xff] %v11345_v61 }
0x1ca3   :  { %v11347_v47 = vpop.f32.mrf.mxu1 }
0x1ca5   :  { %v11349_v5 = vpop.f32.mrf.mxu1 }
0x1ca6   :  { %12407 = vst [vmem:[#allocation80_spill] sm:$0xff] %v11349_v5 }
0x1ca7   :  { %v11353_v37 = vpop.f32.mrf.mxu1 }
0x1cd1   :  { %v11357_v4 = vpop.f32.mrf.mxu1 }
0x1cd2   :  { %12408 = vst [vmem:[#allocation84_spill] sm:$0xff] %v11357_v4 }
0x1cd3   :  { %v11359_v29 = vpop.f32.mrf.mxu1 }
0x1cd4   :  { %12409 = vst [vmem:[#allocation74_spill] sm:$0xff] %v11359_v29 }
0x1cd5   :  { %v11361_v51 = vpop.f32.mrf.mxu1 }
0x1cd6   :  { %12410 = vst [vmem:[#allocation78_spill] sm:$0xff] %v11361_v51 }
0x1cd7   :  { %v11365_v58 = vpop.f32.mrf.mxu1 }
0x1cd8   :  { %12411 = vst [vmem:[#allocation68_spill] sm:$0xff] %v11365_v58 }
0x1cd9   :  { %v8048_v16 = vpop.f32.mrf.mxu1 }
0x1cda   :  { %v5274_v54 = vadd.f32 %v11263_v31, %v8048_v16 }
0x1cdb   :  { %v5265_v11 = vpop.f32.mrf.mxu1 }
0x1cdc   :  { %v5266_v62 = vadd.f32 %v11263_v31, %v5265_v11  ;;  %v5302_v28 = vsel %vm1631_vm0, %v5274_v54, -inf }
0x1cdd   :  { %5303 = vmax.xlane.f32.xlu1 %v5302_v28  ;;  %v8049_v34 = vpop.f32.mrf.mxu1 }
0x1cde   :  { %v5296_v1 = vsel %vm1631_vm0, %v5266_v62, -inf  ;;  %v5277_v13 = vadd.f32 %v11263_v31, %v8049_v34 }
0x1cdf   :  { %v5268_v39 = vpop.f32.mrf.mxu1 }
0x1ce0   :  { %v5269_v23 = vadd.f32 %v11263_v31, %v5268_v39  ;;  %v5305_v39 = vsel %vm1631_vm0, %v5277_v13, -inf }
0x1ce1   :  { %v8052_v59 = vpop.f32.mrf.mxu1  ;;  %5297 = vmax.xlane.f32.xlu1 %v5296_v1 }
0x1ce2   :  { %v5290_v43 = vadd.f32 %v11263_v31, %v8052_v59  ;;  %v5299_v11 = vsel %vm1631_vm0, %v5269_v23, -inf }
0x1ce3   :  { %v5281_v14 = vpop.f32.mrf.mxu1 }
0x1ce4   :  { %v5314_v16 = vsel %vm1631_vm0, %v5290_v43, -inf  ;;  %v5282_v28 = vadd.f32 %v11263_v31, %v5281_v14 }
0x1ce5   :  { %5315 = vmax.xlane.f32.xlu0 %v5314_v16  ;;  %v8053_v60 = vpop.f32.mrf.mxu1  ;;  %5300 = vmax.xlane.f32.xlu1 %v5299_v11 }
0x1ce6   :  { %v5308_v59 = vsel %vm1631_vm0, %v5282_v28, -inf  ;;  %v5293_v34 = vadd.f32 %v11263_v31, %v8053_v60 }
0x1ce7   :  { %v5284_v4 = vpop.f32.mrf.mxu1 }
0x1ce8   :  { %v5285_v1 = vadd.f32 %v11263_v31, %v5284_v4  ;;  %v5317_v16 = vsel %vm1631_vm0, %v5293_v34, -inf }
0x1ce9   :  { %5306 = vmax.xlane.f32.xlu1 %v5305_v39 }
0x1cea   :  { %v5311_v51 = vsel %vm1631_vm0, %v5285_v1, -inf }
0x1ced   :  { %5309 = vmax.xlane.f32.xlu1 %v5308_v59 }
0x1cf1   :  { %5312 = vmax.xlane.f32.xlu1 %v5311_v51 }
0x1cf5   :  { %5318 = vmax.xlane.f32.xlu1 %v5317_v16 }
0x1d66   :  { %v5304_v11 = vpop.xlane.xlu1 %5303 }
0x1d67   :  { %v5322_v29 = vsub.f32 %v5274_v54, %v5304_v11 }
0x1d69   :  { %v5332_v14 = vmul.f32 1.442695, %v5322_v29 }
0x1d6a   :  { %v5298_v58 = vpop.xlane.xlu1 %5297 }
0x1d6b   :  { %9012 = vpow2.f32 %v5332_v14  ;;  %v5320_v50 = vsub.f32 %v5266_v62, %v5298_v58 }
0x1d6d   :  { %v5328_v39 = vmul.f32 1.442695, %v5320_v50 }
0x1d6e   :  { %v5316_v48 = vpop.xlane.xlu0 %5315  ;;  %v5301_v4 = vpop.xlane.xlu1 %5300 }
0x1d6f   :  { %9014 = vpow2.f32 %v5328_v39  ;;  %v5326_v61 = vsub.f32 %v5290_v43, %v5316_v48  ;;  %v5321_v5 = vsub.f32 %v5269_v23, %v5301_v4 }
0x1d71   :  { %v5340_v59 = vmul.f32 1.442695, %v5326_v61  ;;  %v5330_v51 = vmul.f32 1.442695, %v5321_v5 }
0x1d72   :  { %v5307_v60 = vpop.xlane.xlu1 %5306 }
0x1d73   :  { %9016 = vpow2.f32 %v5340_v59  ;;  %v5323_v40 = vsub.f32 %v5277_v13, %v5307_v60 }
0x1d75   :  { %v5334_v55 = vmul.f32 1.442695, %v5323_v40 }
0x1d76   :  { %v5310_v5 = vpop.xlane.xlu1 %5309 }
0x1d77   :  { %9018 = vpow2.f32 %v5334_v55  ;;  %v5324_v54 = vsub.f32 %v5282_v28, %v5310_v5 }
0x1d78   :  { %v11385_v16 = vpop.eup %9012  ;;  %9020 = vpow2.f32 %v5330_v51 }
0x1d79   :  { %v5350_v29 = vsel %vm1631_vm0, %v11385_v16, 0.0  ;;  %v5336_v11 = vmul.f32 1.442695, %v5324_v54 }
0x1d7a   :  { %5351 = vadd.xlane.f32.xlu1 %v5350_v29  ;;  %v5313_v23 = vpop.xlane.xlu1 %5312 }
0x1d7b   :  { %9022 = vpow2.f32 %v5336_v11 }
0x1d7c   :  { %v9015_v50 = vpop.eup %9014 }
0x1d7d   :  { %v5344_v58 = vsel %vm1631_vm0, %v9015_v50, 0.0 }
0x1d7e   :  { %5345 = vadd.xlane.f32.xlu1 %v5344_v58  ;;  %v5319_v62 = vpop.xlane.xlu1 %5318 }
0x1d7f   :  { %v5327_v14 = vsub.f32 %v5293_v34, %v5319_v62 }
0x1d80   :  { %v11390_v48 = vpop.eup %9016 }
0x1d81   :  { %v5362_v43 = vsel %vm1631_vm0, %v11390_v48, 0.0  ;;  %v5342_v39 = vmul.f32 1.442695, %v5327_v14 }
0x1d82   :  { %5363 = vadd.xlane.f32.xlu0 %v5362_v43 }
0x1d83   :  { %9024 = vpow2.f32 %v5342_v39 }
0x1d84   :  { %v9019_v13 = vpop.eup %9018 }
0x1d85   :  { %v5353_v40 = vsel %vm1631_vm0, %v9019_v13, 0.0  ;;  %v9021_v55 = vpop.eup %9020 }
0x1d86   :  { %5354 = vadd.xlane.f32.xlu1 %v5353_v40  ;;  %v5347_v61 = vsel %vm1631_vm0, %v9021_v55, 0.0 }
0x1d8a   :  { %5348 = vadd.xlane.f32.xlu1 %v5347_v61 }
0x1d98   :  { %5487 = vrot.lane.b32.xlu0 %v12398_v20, %s9304_s4  ;;  %v5325_v20 = vsub.f32 %v5285_v1, %v5313_v23 }
0x1d9a   :  { %v5338_v4 = vmul.f32 1.442695, %v5325_v20 }
0x1d9b   :  { %5485 = vrot.lane.b32.xlu1 %v12399_v3, %s9304_s4  ;;  %v11406_v3 = vpop.eup %9022 }
0x1d9c   :  { %5469 = vrot.lane.b32.xlu0 %v12402_v12, %s9304_s4  ;;  %9026 = vpow2.f32 %v5338_v4  ;;  %v5356_v12 = vsel %vm1631_vm0, %v11406_v3, 0.0 }
0x1d9f   :  { %5483 = vrot.lane.b32.xlu1 %v12400_v56, %s9304_s4  ;;  %v9025_v56 = vpop.eup %9024 }
0x1da0   :  { %5473 = vrot.lane.b32.xlu0 %v12404_v49, %s9304_s4  ;;  %v5365_v49 = vsel %vm1631_vm0, %v9025_v56, 0.0 }
0x1da9   :  { %v9027_v59 = vpop.eup %9026 }
0x1daa   :  { %v5359_v28 = vsel %vm1631_vm0, %v9027_v59, 0.0 }
0x1dc3   :  { %5357 = vadd.xlane.f32.xlu1 %v5356_v12  ;;  %v12412_v12 = vld [vmem:[#allocation113_spill] sm:$0xff] }
0x1dc7   :  { %5366 = vadd.xlane.f32.xlu1 %v5365_v49  ;;  %v11429_v49 = vpack.c.bf16 %v10259_v30, %v12412_v12 }
0x1dcb   :  { %5360 = vadd.xlane.f32.xlu1 %v5359_v28 }
0x1ddc   :  { %5481 = vrot.lane.b32.xlu1 %v12401_v52, %s9304_s4 }
0x1de0   :  { %5471 = vrot.lane.b32.xlu1 %v12403_v41, %s9304_s4 }
0x1de4   :  { %5475 = vrot.lane.b32.xlu1 %v12405_v27, %s9304_s4 }
0x1e03   :  { %v5352_v1 = vpop.xlane.xlu1 %5351 }
0x1e07   :  { %v5346_v34 = vpop.xlane.xlu1 %5345 }
0x1e0b   :  { %v5364_v60 = vpop.xlane.xlu0 %5363 }
0x1e0f   :  { %v5488_v51 = vpop.permute.xlu0 %5487  ;;  %v5355_v29 = vpop.xlane.xlu1 %5354 }
0x1e10   :  { %8234 = vmatprep.subr.msk.bf16.mxu0 %vm1631_vm0, %v5488_v51  ;;  %9028 = vrcp.f32 %v5355_v29  ;;  %v5511_v11 = vsel %vm1631_vm0, %v5488_v51, 0 }
0x1e11   :  { %9030 = vrcp.f32 %v5346_v34 }
0x1e12   :  { %9032 = vrcp.f32 %v5352_v1 }
0x1e13   :  { %v5349_v58 = vpop.xlane.xlu1 %5348 }
0x1e14   :  { %9034 = vrcp.f32 %v5349_v58 }
0x1e17   :  { %v5486_v14 = vpop.permute.xlu1 %5485 }
0x1e18   :  { %v5508_v20 = vsel %vm1631_vm0, %v5486_v14, 0 }
0x1e1b   :  { %v5484_v39 = vpop.permute.xlu1 %5483 }
0x1e1d   :  { %v9029_v43 = vpop.eup %9028 }
0x1e1e   :  { %v9031_v52 = vpop.eup %9030  ;;  %v5379_v41 = vmul.f32 %v9029_v43, %v9019_v13 }
0x1e1f   :  { %v9033_v40 = vpop.eup %9032  ;;  %v5376_v5 = vmul.f32 %v9031_v52, %v9015_v50 }
0x1e20   :  { %v5378_v27 = vmul.f32 %v9033_v40, %v11385_v16  ;;  %v5505_v16 = vsel %vm1631_vm0, %v5484_v39, 0 }
0x1e21   :  { %v9035_v61 = vpop.eup %9034 }
0x1e22   :  { %v5377_v23 = vmul.f32 %v9035_v61, %v9021_v55  ;;  %v5385_v62 = vpack.c.bf16 %v5379_v41, %v5378_v27  ;;  %v5470_v61 = vpop.permute.xlu0 %5469 }
0x1e24   :  { %v5384_v54 = vpack.c.bf16 %v5377_v23, %v5376_v5  ;;  %v12413_v5 = vld [vmem:[#allocation107_spill] sm:$0xff] }
0x1e25   :  { %v12414_v23 = vld [vmem:[#allocation111_spill] sm:$0xff] }
0x1e26   :  { %8062 = vmatprep.mubr.msk.bf16.mxu0 %vm1631_vm0, %v5384_v54  ;;  %v11441_v27 = vpack.c.bf16 %v12414_v23, %v12413_v5 }
0x1e27   :  { %8063 = vmatmul.mubr.msk.bf16.vlgmr.msra.gmra.mxu0 %vm1631_vm0, %v5385_v62  ;;  %v12417_v62 = vld [vmem:[#allocation95_spill] sm:$0xff] }
0x1e28   :  { %8071 = vmatpush3.bf16.xpose.msra.mxu0 %v5511_v11  ;;  %v12418_v11 = vld [vmem:[#allocation99_spill] sm:$0xff] }
0x1e29   :  { %8235 = vmatprep.subr.msk.bf16.mxu0 %vm1631_vm0, %v5486_v14  ;;  %v11455_v14 = vpack.c.bf16 %v12418_v11, %v12417_v62 }
0x1e30   :  { %8073 = vmatpush3.bf16.xpose.msra.mxu0 %v5508_v20 }
0x1e31   :  { %8236 = vmatprep.subr.msk.bf16.mxu0 %vm1631_vm0, %v5484_v39 }
0x1e38   :  { %8075 = vmatpush3.bf16.xpose.msra.mxu0 %v5505_v16 }
0x1e4c   :  { %v5358_v50 = vpop.xlane.xlu1 %5357 }
0x1e50   :  { %v5367_v13 = vpop.xlane.xlu1 %5366 }
0x1e51   :  { %9036 = vrcp.f32 %v5367_v13 }
0x1e52   :  { %9038 = vrcp.f32 %v5358_v50 }
0x1e53   :  { %9040 = vrcp.f32 %v5364_v60 }
0x1e54   :  { %v5361_v55 = vpop.xlane.xlu1 %5360 }
0x1e55   :  { %9042 = vrcp.f32 %v5361_v55 }
0x1e58   :  { %v5482_v4 = vpop.permute.xlu1 %5481 }
0x1e59   :  { %v5502_v28 = vsel %vm1631_vm0, %v5482_v4, 0  ;;  %8237 = vmatprep.subr.msk.bf16.mxu0 %vm1631_vm0, %v5482_v4 }
0x1e5a   :  { %8077 = vmatpush3.bf16.xpose.msra.mxu0 %v5502_v28 }
0x1e5b   :  { %8118 = vmatprep.subr.bf16.mxu0 %v11429_v49 }
0x1e5c   :  { %v5472_v41 = vpop.permute.xlu1 %5471 }
0x1e5e   :  { %v9037_v1 = vpop.eup %9036 }
0x1e5f   :  { %v9039_v34 = vpop.eup %9038  ;;  %v5383_v58 = vmul.f32 %v9037_v1, %v9025_v56  ;;  %v5474_v56 = vpop.permute.xlu0 %5473 }
0x1e60   :  { %v9041_v51 = vpop.eup %9040  ;;  %v5380_v60 = vmul.f32 %v9039_v34, %v11406_v3  ;;  %v12416_v3 = vld [vmem:[#allocation105_spill] sm:$0xff]  ;;  %v5476_v54 = vpop.permute.xlu1 %5475 }
0x1e61   :  { %v5382_v52 = vmul.f32 %v9041_v51, %v11390_v48  ;;  %v12415_v48 = vld [vmem:[#allocation101_spill] sm:$0xff] }
0x1e62   :  { %v9043_v29 = vpop.eup %9042 }
0x1e63   :  { %v5381_v43 = vmul.f32 %v9043_v29, %v9027_v59  ;;  %v5387_v30 = vpack.c.bf16 %v5383_v58, %v5382_v52  ;;  %v11449_v59 = vpack.c.bf16 %v12416_v3, %v12415_v48 }
0x1e65   :  { %v5386_v40 = vpack.c.bf16 %v5381_v43, %v5380_v60 }
0x1e67   :  { %8066 = vmatprep.mubr.msk.bf16.mxu0 %vm1631_vm0, %v5386_v40 }
0x1e68   :  { %8067 = vmatmul.mubr.msk.bf16.gmra.mxu0 %vm1631_vm0, %v5387_v30 }
0x1e69   :  { %8078 = vmatprep.mubr.msk.bf16.mxu0 %vm1631_vm0, %v5470_v61 }
0x1e70   :  { %8079 = vmatmul.mubr.msk.bf16.vlgmr.msra.gmra.mxu0 %vm1631_vm0, %v5472_v41 }
0x1e71   :  { %8119 = vmatpush3.bf16.msra.mxu0 %v11429_v49  ;;  %8082 = vmatprep.mubr.msk.bf16.mxu0 %vm1631_vm0, %v5474_v56 }
0x1e72   :  { %8120 = vmatprep.subr.bf16.mxu0 %v11441_v27 }
0x1e75   :  { %8121 = vmatpush3.bf16.msra.mxu0 %v11441_v27 }
0x1e76   :  { %8122 = vmatprep.subr.bf16.mxu0 %v11449_v59 }
0x1e78   :  { %8083 = vmatmul.mubr.msk.bf16.gmra.mxu0 %vm1631_vm0, %v5476_v54 }
0x1e79   :  { %8123 = vmatpush3.bf16.msra.mxu0 %v11449_v59 }
0x1e7a   :  { %8124 = vmatprep.subr.bf16.mxu0 %v11455_v14 }
0x1e7d   :  { %8125 = vmatpush3.bf16.msra.mxu0 %v11455_v14 }
0x1ee7   :  { %v11461_v20 = vpop.f32.mrf.mxu0 }
0x1ee8   :  { %12419 = vst [vmem:[#allocation72_spill] sm:$0xff] %v11461_v20 }
0x1ee9   :  { %v11463_v39 = vpop.f32.mrf.mxu0 }
0x1eea   :  { %12420 = vst [vmem:[#allocation62_spill] sm:$0xff] %v11463_v39 }
0x1eeb   :  { %v11465_v16 = vpop.f32.mrf.mxu0 }
0x1eec   :  { %12421 = vst [vmem:[#allocation66_spill] sm:$0xff] %v11465_v16 }
0x1eed   :  { %v11467_v50 = vpop.f32.mrf.mxu0 }
0x1eee   :  { %12422 = vst [vmem:[#allocation30_spill] sm:$0xff] %v11467_v50 }
0x1f28   :  { %v11469_v13 = vpop.f32.mrf.mxu0 }
0x1f29   :  { %12423 = vst [vmem:[#allocation34_spill] sm:$0xff] %v11469_v13 }
0x1f2a   :  { %v11471_v55 = vpop.f32.mrf.mxu0 }
0x1f2b   :  { %12424 = vst [vmem:[#allocation36_spill] sm:$0xff] %v11471_v55 }
0x1f2c   :  { %v11473_v4 = vpop.f32.mrf.mxu0 }
0x1f2d   :  { %12425 = vst [vmem:[#allocation40_spill] sm:$0xff] %v11473_v4 }
0x1f2e   :  { %v11475_v12 = vpop.f32.mrf.mxu0 }
0x1f2f   :  { %12426 = vst [vmem:[#allocation42_spill] sm:$0xff] %v11475_v12 }
0x1f30   :  { %v8080_v28 = vpop.f32.mrf.mxu0 }
0x1f31   :  { %v5556_v29 = vadd.f32 %v11263_v31, %v8080_v28 }
0x1f32   :  { %v5547_v1 = vpop.f32.mrf.mxu0 }
0x1f33   :  { %v5548_v34 = vadd.f32 %v11263_v31, %v5547_v1  ;;  %v5584_v61 = vsel %vm1631_vm0, %v5556_v29, -inf }
0x1f34   :  { %v8081_v51 = vpop.f32.mrf.mxu0 }
0x1f35   :  { %v5578_v58 = vsel %vm1631_vm0, %v5548_v34, -inf  ;;  %v5559_v40 = vadd.f32 %v11263_v31, %v8081_v51 }
0x1f36   :  { %v5550_v60 = vpop.f32.mrf.mxu0  ;;  %5579 = vmax.xlane.f32.xlu0 %v5578_v58 }
0x1f37   :  { %v5551_v43 = vadd.f32 %v11263_v31, %v5550_v60  ;;  %v5587_v48 = vsel %vm1631_vm0, %v5559_v40, -inf }
0x1f38   :  { %v8084_v52 = vpop.f32.mrf.mxu0 }
0x1f39   :  { %v5581_v30 = vsel %vm1631_vm0, %v5551_v43, -inf  ;;  %v5572_v11 = vadd.f32 %v11263_v31, %v8084_v52 }
0x1f3a   :  { %5582 = vmax.xlane.f32.xlu1 %v5581_v30  ;;  %5585 = vmax.xlane.f32.xlu0 %v5584_v61  ;;  %v5563_v41 = vpop.f32.mrf.mxu0 }
0x1f3b   :  { %v5564_v23 = vadd.f32 %v11263_v31, %v5563_v41  ;;  %v5596_v51 = vsel %vm1631_vm0, %v5572_v11, -inf }
0x1f3c   :  { %v8085_v5 = vpop.f32.mrf.mxu0 }
0x1f3d   :  { %v5575_v56 = vadd.f32 %v11263_v31, %v8085_v5  ;;  %v5590_v28 = vsel %vm1631_vm0, %v5564_v23, -inf }
0x1f3e   :  { %5588 = vmax.xlane.f32.xlu0 %v5587_v48  ;;  %v5566_v3 = vpop.f32.mrf.mxu0 }
0x1f3f   :  { %v5567_v54 = vadd.f32 %v11263_v31, %v5566_v3  ;;  %v5599_v62 = vsel %vm1631_vm0, %v5575_v56, -inf }
0x1f40   :  { %5600 = vmax.xlane.f32.xlu1 %v5599_v62 }
0x1f41   :  { %v5593_v1 = vsel %vm1631_vm0, %v5567_v54, -inf }
0x1f42   :  { %5591 = vmax.xlane.f32.xlu0 %v5590_v28 }
0x1f44   :  { %5594 = vmax.xlane.f32.xlu1 %v5593_v1 }
0x1f46   :  { %5597 = vmax.xlane.f32.xlu0 %v5596_v51 }
0x1f55   :  { %5678 = vrot.lane.b32.xlu1 %v12387_v42, %s9304_s4 }
0x1f59   :  { %5676 = vrot.lane.b32.xlu1 %v12388_v44, %s9304_s4 }
0x1fbf   :  { %v5580_v58 = vpop.xlane.xlu0 %5579 }
0x1fc0   :  { %v5602_v60 = vsub.f32 %v5548_v34, %v5580_v58 }
0x1fc2   :  { %v5610_v52 = vmul.f32 1.442695, %v5602_v60 }
0x1fc3   :  { %v5586_v30 = vpop.xlane.xlu0 %5585  ;;  %v5583_v61 = vpop.xlane.xlu1 %5582 }
0x1fc4   :  { %v5604_v31 = vsub.f32 %v5556_v29, %v5586_v30  ;;  %v5603_v5 = vsub.f32 %v5551_v43, %v5583_v61 }
0x1fc6   :  { %v5614_v41 = vmul.f32 1.442695, %v5604_v31  ;;  %v5612_v62 = vmul.f32 1.442695, %v5603_v5 }
0x1fc7   :  { %v5589_v48 = vpop.xlane.xlu0 %5588 }
0x1fc8   :  { %9044 = vpow2.f32 %v5614_v41  ;;  %v5605_v3 = vsub.f32 %v5559_v40, %v5589_v48 }
0x1fc9   :  { %9046 = vpow2.f32 %v5610_v52  ;;  %v5601_v31 = vpop.xlane.xlu1 %5600 }
0x1fca   :  { %v5616_v28 = vmul.f32 1.442695, %v5605_v3 }
0x1fcb   :  { %v5592_v1 = vpop.xlane.xlu0 %5591 }
0x1fcc   :  { %9048 = vpow2.f32 %v5616_v28  ;;  %v5606_v42 = vsub.f32 %v5564_v23, %v5592_v1 }
0x1fcd   :  { %9050 = vpow2.f32 %v5612_v62  ;;  %v5595_v5 = vpop.xlane.xlu1 %5594  ;;  %v5609_v62 = vsub.f32 %v5575_v56, %v5601_v31 }
0x1fce   :  { %v5618_v51 = vmul.f32 1.442695, %v5606_v42  ;;  %v5607_v48 = vsub.f32 %v5567_v54, %v5595_v5 }
0x1fcf   :  { %v5598_v52 = vpop.xlane.xlu0 %5597  ;;  %v5624_v1 = vmul.f32 1.442695, %v5609_v62  ;;  %v12427_v62 = vld [vmem:[#allocation81_spill] sm:$0xff] }
0x1fd0   :  { %9052 = vpow2.f32 %v5618_v51  ;;  %v5608_v41 = vsub.f32 %v5572_v11, %v5598_v52  ;;  %v5620_v28 = vmul.f32 1.442695, %v5607_v48 }
0x1fd1   :  { %v5679_v54 = vpop.permute.xlu1 %5678 }
0x1fd2   :  { %v5622_v3 = vmul.f32 1.442695, %v5608_v41 }
0x1fd4   :  { %9054 = vpow2.f32 %v5622_v3 }
0x1fd5   :  { %v11497_v44 = vpop.eup %9044  ;;  %9056 = vpow2.f32 %v5620_v28  ;;  %v12428_v28 = vld [vmem:[#allocation85_spill] sm:$0xff] }
0x1fd6   :  { %v5632_v34 = vsel %vm1631_vm0, %v11497_v44, 0.0  ;;  %v11501_v29 = vpop.eup %9046  ;;  %9058 = vpow2.f32 %v5624_v1  ;;  %v11529_v1 = vpack.c.bf16 %v12428_v28, %v12427_v62 }
0x1fd7   :  { %5633 = vadd.xlane.f32.xlu0 %v5632_v34  ;;  %v5626_v58 = vsel %vm1631_vm0, %v11501_v29, 0.0  ;;  %v5677_v34 = vpop.permute.xlu1 %5676 }
0x1fd9   :  { %v9049_v43 = vpop.eup %9048 }
0x1fda   :  { %v5635_v40 = vsel %vm1631_vm0, %v9049_v43, 0.0  ;;  %v9051_v60 = vpop.eup %9050 }
0x1fdb   :  { %5636 = vadd.xlane.f32.xlu1 %v5635_v40  ;;  %5627 = vadd.xlane.f32.xlu0 %v5626_v58  ;;  %v5629_v23 = vsel %vm1631_vm0, %v9051_v60, 0.0 }
0x1fdd   :  { %v11507_v30 = vpop.eup %9052 }
0x1fde   :  { %v5638_v61 = vsel %vm1631_vm0, %v11507_v30, 0.0 }
0x1fdf   :  { %5630 = vadd.xlane.f32.xlu1 %v5629_v23 }
0x1fe1   :  { %v11515_v42 = vpop.eup %9054 }
0x1fe2   :  { %v11519_v51 = vpop.eup %9056 }
0x1fe3   :  { %5639 = vadd.xlane.f32.xlu1 %v5638_v61  ;;  %v11523_v11 = vpop.eup %9058 }
0x1fe4   :  { %v5647_v56 = vsel %vm1631_vm0, %v11523_v11, 0.0 }
0x1ff1   :  { %5680 = vrot.lane.b32.xlu0 %v12386_v21, %s9304_s4  ;;  %v5644_v21 = vsel %vm1631_vm0, %v11515_v42, 0.0 }
0x1ff4   :  { %5674 = vrot.lane.b32.xlu1 %v12389_v2, %s9304_s4  ;;  %v5641_v2 = vsel %vm1631_vm0, %v11519_v51, 0.0 }
0x2010   :  { %5645 = vadd.xlane.f32.xlu0 %v5644_v21 }
0x2014   :  { %5642 = vadd.xlane.f32.xlu0 %v5641_v2 }
0x2018   :  { %5648 = vadd.xlane.f32.xlu0 %v5647_v56 }
0x2060   :  { %v5634_v40 = vpop.xlane.xlu0 %5633 }
0x2064   :  { %v5628_v58 = vpop.xlane.xlu0 %5627  ;;  %v5637_v23 = vpop.xlane.xlu1 %5636 }
0x2065   :  { %9060 = vrcp.f32 %v5637_v23  ;;  %v12429_v23 = vld [vmem:[#allocation75_spill] sm:$0xff] }
0x2066   :  { %9062 = vrcp.f32 %v5628_v58 }
0x2067   :  { %9064 = vrcp.f32 %v5634_v40 }
0x2068   :  { %v5681_v61 = vpop.permute.xlu0 %5680  ;;  %v5631_v31 = vpop.xlane.xlu1 %5630 }
0x2069   :  { %9066 = vrcp.f32 %v5631_v31  ;;  %8086 = vmatprep.subr.bf16.mxu1 %v5681_v61 }
0x206a   :  { %8087 = vmatpush3.bf16.msra.mxu1 %v5681_v61  ;;  %v12430_v61 = vld [vmem:[#allocation79_spill] sm:$0xff] }
0x206b   :  { %8088 = vmatprep.subr.bf16.mxu1 %v5679_v54  ;;  %v11538_v31 = vpack.c.bf16 %v12430_v61, %v12429_v23 }
0x206c   :  { %v5640_v52 = vpop.xlane.xlu1 %5639 }
0x206d   :  { %9068 = vrcp.f32 %v5640_v52 }
0x206e   :  { %8089 = vmatpush3.bf16.msra.mxu1 %v5679_v54 }
0x206f   :  { %8090 = vmatprep.subr.bf16.mxu1 %v5677_v34 }
0x2070   :  { %v5675_v41 = vpop.permute.xlu1 %5674 }
0x2072   :  { %8091 = vmatpush3.bf16.msra.mxu1 %v5677_v34  ;;  %v9061_v5 = vpop.eup %9060 }
0x2073   :  { %8092 = vmatprep.subr.bf16.mxu1 %v5675_v41  ;;  %v9063_v48 = vpop.eup %9062  ;;  %v5661_v2 = vmul.f32 %v9061_v5, %v9049_v43  ;;  %v5797_v43 = vsel %vm1631_vm0, %v11529_v1, 0  ;;  %v12433_v5 = vld [vmem:[#allocation63_spill] sm:$0xff] }
0x2074   :  { %v9065_v3 = vpop.eup %9064  ;;  %v5658_v56 = vmul.f32 %v9063_v48, %v11501_v29  ;;  %v12431_v29 = vld [vmem:[#allocation69_spill] sm:$0xff]  ;;  %v12434_v48 = vld [vmem:[#allocation67_spill] sm:$0xff] }
0x2075   :  { %v5660_v40 = vmul.f32 %v9065_v3, %v11497_v44  ;;  %v11555_v3 = vpack.c.bf16 %v12434_v48, %v12433_v5  ;;  %v12436_v5 = vld [vmem:[#allocation35_spill] sm:$0xff] }
0x2076   :  { %v9067_v21 = vpop.eup %9066  ;;  %8093 = vmatpush3.bf16.msra.mxu1 %v5675_v41  ;;  %v5794_v41 = vsel %vm1631_vm0, %v11538_v31, 0 }
0x2077   :  { %8238 = vmatprep.subr.msk.bf16.mxu1 %vm1631_vm0, %v11529_v1  ;;  %v5659_v54 = vmul.f32 %v9067_v21, %v9051_v60  ;;  %v5667_v58 = vpack.c.bf16 %v5661_v2, %v5660_v40  ;;  %v12432_v60 = vld [vmem:[#allocation73_spill] sm:$0xff]  ;;  %v5788_v28 = vsel %vm1631_vm0, %v11555_v3, 0 }
0x2078   :  { %v11547_v44 = vpack.c.bf16 %v12432_v60, %v12431_v29 }
0x2079   :  { %v5666_v34 = vpack.c.bf16 %v5659_v54, %v5658_v56 }
0x207a   :  { %v5791_v62 = vsel %vm1631_vm0, %v11547_v44, 0  ;;  %v9069_v54 = vpop.eup %9068 }
0x207b   :  { %8094 = vmatprep.mubr.msk.bf16.mxu1 %vm1631_vm0, %v5666_v34  ;;  %v5662_v34 = vmul.f32 %v9069_v54, %v11507_v30  ;;  %v12437_v30 = vld [vmem:[#allocation37_spill] sm:$0xff] }
0x207c   :  { %8095 = vmatmul.mubr.msk.bf16.vlgmr.msra.gmra.mxu1 %vm1631_vm0, %v5667_v58 }
0x207d   :  { %8103 = vmatpush3.bf16.xpose.msra.mxu1 %v5797_v43 }
0x207e   :  { %8239 = vmatprep.subr.msk.bf16.mxu1 %vm1631_vm0, %v11538_v31 }
0x2085   :  { %8105 = vmatpush3.bf16.xpose.msra.mxu1 %v5794_v41  ;;  %v12435_v41 = vld [vmem:[#allocation31_spill] sm:$0xff] }
0x2086   :  { %8240 = vmatprep.subr.msk.bf16.mxu1 %vm1631_vm0, %v11547_v44  ;;  %v11570_v48 = vpack.c.bf16 %v12436_v5, %v12435_v41 }
0x208d   :  { %8107 = vmatpush3.bf16.xpose.msra.mxu1 %v5791_v62 }
0x208e   :  { %8241 = vmatprep.subr.msk.bf16.mxu1 %vm1631_vm0, %v11555_v3 }
0x2095   :  { %8109 = vmatpush3.bf16.xpose.msra.mxu1 %v5788_v28  ;;  %v12439_v28 = vld [vmem:[#allocation43_spill] sm:$0xff] }
0x2099   :  { %v5646_v21 = vpop.xlane.xlu0 %5645 }
0x209d   :  { %v5643_v2 = vpop.xlane.xlu0 %5642 }
0x209e   :  { %9070 = vrcp.f32 %v5643_v2 }
0x209f   :  { %9072 = vrcp.f32 %v5646_v21  ;;  %v12440_v21 = vld [vmem:[#allocation47_spill] sm:$0xff] }
0x20a0   :  { %v11581_v2 = vpack.c.bf16 %v12440_v21, %v12439_v28 }
0x20a1   :  { %v5649_v56 = vpop.xlane.xlu0 %5648 }
0x20a2   :  { %9074 = vrcp.f32 %v5649_v56 }
0x20ab   :  { %v9071_v40 = vpop.eup %9070 }
0x20ac   :  { %v5663_v58 = vmul.f32 %v9071_v40, %v11519_v51  ;;  %v9073_v23 = vpop.eup %9072  ;;  %v12438_v51 = vld [vmem:[#allocation41_spill] sm:$0xff] }
0x20ad   :  { %v5664_v29 = vmul.f32 %v9073_v23, %v11515_v42  ;;  %v11577_v62 = vpack.c.bf16 %v12438_v51, %v12437_v30  ;;  %v12441_v42 = vld [vmem:[#allocation49_spill] sm:$0xff]  ;;  %v11617_v51 = vld [vmem:[#allocation5 + $0x1] ss:$0 sm:$0xff] }
0x20ae   :  { %v5668_v61 = vpack.c.bf16 %v5663_v58, %v5662_v34 }
0x20af   :  { %v9075_v43 = vpop.eup %9074 }
0x20b0   :  { %8098 = vmatprep.mubr.msk.bf16.mxu1 %vm1631_vm0, %v5668_v61  ;;  %v5665_v52 = vmul.f32 %v9075_v43, %v11523_v11  ;;  %v12442_v11 = vld [vmem:[#allocation53_spill] sm:$0xff] }
0x20b1   :  { %v11589_v56 = vpack.c.bf16 %v12442_v11, %v12441_v42 }
0x20b2   :  { %v5669_v60 = vpack.c.bf16 %v5665_v52, %v5664_v29 }
0x20b4   :  { %8099 = vmatmul.mubr.msk.bf16.gmra.mxu1 %vm1631_vm0, %v5669_v60 }
0x20b5   :  { %8110 = vmatprep.mubr.msk.bf16.mxu1 %vm1631_vm0, %v11570_v48 }
0x20bc   :  { %8111 = vmatmul.mubr.msk.bf16.vlgmr.msra.gmra.mxu1 %vm1631_vm0, %v11577_v62 }
0x20bd   :  { %8114 = vmatprep.mubr.msk.bf16.mxu1 %vm1631_vm0, %v11581_v2 }
0x20c4   :  { %8115 = vmatmul.mubr.msk.bf16.gmra.mxu1 %vm1631_vm0, %v11589_v56 }
0x213c   :  { %v11593_v54 = vpop.f32.mrf.mxu1 }
0x213d   :  { %12443 = vst [vmem:[#allocation46_spill] sm:$0xff] %v11593_v54 }
0x213e   :  { %v11595_v40 = vpop.f32.mrf.mxu1 }
0x2140   :  { %v11597_v34 = vpop.f32.mrf.mxu1 }
0x2141   :  { %12444 = vst [vmem:[#allocation48_spill] sm:$0xff] %v11597_v34 }
0x2142   :  { %v11601_v23 = vpop.f32.mrf.mxu1 }
0x2174   :  { %v11605_v43 = vpop.f32.mrf.mxu1 }
0x2175   :  { %12445 = vst [vmem:[#allocation52_spill] sm:$0xff] %v11605_v43 }
0x2176   :  { %v11607_v29 = vpop.f32.mrf.mxu1 }
0x2177   :  { %12446 = vst [vmem:[#allocation115_spill] sm:$0xff] %v11607_v29 }
0x2178   :  { %v11609_v52 = vpop.f32.mrf.mxu1 }
0x2179   :  { %12447 = vst [vmem:[#allocation109_spill] sm:$0xff] %v11609_v52 }
0x217a   :  { %v11613_v41 = vpop.f32.mrf.mxu1 }
0x217b   :  { %12448 = vst [vmem:[#allocation103_spill] sm:$0xff] %v11613_v41 }
0x217c   :  { %v8112_v30 = vpop.f32.mrf.mxu1 }
0x217d   :  { %v5842_v28 = vadd.f32 %v11617_v51, %v8112_v30 }
0x217e   :  { %v5833_v21 = vpop.f32.mrf.mxu1 }
0x217f   :  { %v5834_v42 = vadd.f32 %v11617_v51, %v5833_v21  ;;  %v5870_v11 = vsel %vm1631_vm0, %v5842_v28, -inf }
0x2180   :  { %5871 = vmax.xlane.f32.xlu0 %v5870_v11  ;;  %v8113_v58 = vpop.f32.mrf.mxu1 }
0x2181   :  { %v5864_v13 = vsel %vm1631_vm0, %v5834_v42, -inf  ;;  %v5845_v55 = vadd.f32 %v11617_v51, %v8113_v58 }
0x2182   :  { %v5836_v61 = vpop.f32.mrf.mxu1 }
0x2183   :  { %v5837_v60 = vadd.f32 %v11617_v51, %v5836_v61  ;;  %v5873_v61 = vsel %vm1631_vm0, %v5845_v55, -inf }
0x2184   :  { %v8116_v4 = vpop.f32.mrf.mxu1  ;;  %5865 = vmax.xlane.f32.xlu0 %v5864_v13 }
0x2185   :  { %v5867_v30 = vsel %vm1631_vm0, %v5837_v60, -inf  ;;  %v5858_v11 = vadd.f32 %v11617_v51, %v8116_v4 }
0x2186   :  { %v5849_v5 = vpop.f32.mrf.mxu1 }
0x2187   :  { %v5850_v12 = vadd.f32 %v11617_v51, %v5849_v5  ;;  %v5882_v39 = vsel %vm1631_vm0, %v5858_v11, -inf }
0x2188   :  { %v8117_v20 = vpop.f32.mrf.mxu1  ;;  %5868 = vmax.xlane.f32.xlu0 %v5867_v30 }
0x2189   :  { %v5876_v21 = vsel %vm1631_vm0, %v5850_v12, -inf  ;;  %v5861_v58 = vadd.f32 %v11617_v51, %v8117_v20 }
0x218a   :  { %5877 = vmax.xlane.f32.xlu1 %v5876_v21  ;;  %v5852_v16 = vpop.f32.mrf.mxu1 }
0x218b   :  { %v5853_v13 = vadd.f32 %v11617_v51, %v5852_v16  ;;  %v5885_v30 = vsel %vm1631_vm0, %v5861_v58, -inf }
0x218c   :  { %5874 = vmax.xlane.f32.xlu0 %v5873_v61 }
0x218d   :  { %v5879_v5 = vsel %vm1631_vm0, %v5853_v13, -inf }
0x2190   :  { %5883 = vmax.xlane.f32.xlu0 %v5882_v39 }
0x2194   :  { %5880 = vmax.xlane.f32.xlu0 %v5879_v5 }
0x2198   :  { %5886 = vmax.xlane.f32.xlu0 %v5885_v30 }
0x219b   :  { %6055 = vrot.lane.b32.xlu1 %v11529_v1, %s9304_s4 }
0x2209   :  { %v5872_v4 = vpop.xlane.xlu0 %5871 }
0x220a   :  { %v5890_v21 = vsub.f32 %v5842_v28, %v5872_v4 }
0x220c   :  { %v5900_v50 = vmul.f32 1.442695, %v5890_v21 }
0x220d   :  { %v5866_v61 = vpop.xlane.xlu0 %5865 }
0x220e   :  { %9076 = vpow2.f32 %v5900_v50  ;;  %v5888_v16 = vsub.f32 %v5834_v42, %v5866_v61 }
0x2210   :  { %v5896_v43 = vmul.f32 1.442695, %v5888_v16 }
0x2211   :  { %v5869_v52 = vpop.xlane.xlu0 %5868 }
0x2212   :  { %9078 = vpow2.f32 %v5896_v43  ;;  %v5889_v20 = vsub.f32 %v5837_v60, %v5869_v52 }
0x2213   :  { %v5878_v39 = vpop.xlane.xlu1 %5877 }
0x2214   :  { %v5898_v54 = vmul.f32 1.442695, %v5889_v20  ;;  %v5892_v30 = vsub.f32 %v5850_v12, %v5878_v39 }
0x2215   :  { %v5875_v29 = vpop.xlane.xlu0 %5874 }
0x2216   :  { %v5891_v41 = vsub.f32 %v5845_v55, %v5875_v29  ;;  %v5904_v42 = vmul.f32 1.442695, %v5892_v30 }
0x2217   :  { %v11637_v5 = vpop.permute.xlu1 %6055 }
0x2218   :  { %v5902_v34 = vmul.f32 1.442695, %v5891_v41  ;;  %8242 = vmatprep.subr.msk.bf16.mxu0 %vm1631_vm0, %v11637_v5 }
0x2219   :  { %v5884_v1 = vpop.xlane.xlu0 %5883 }
0x221a   :  { %9080 = vpow2.f32 %v5902_v34  ;;  %v5894_v28 = vsub.f32 %v5858_v11, %v5884_v1 }
0x221b   :  { %v11641_v50 = vpop.eup %9076  ;;  %9082 = vpow2.f32 %v5898_v54 }
0x221c   :  { %v5908_v43 = vmul.f32 1.442695, %v5894_v28  ;;  %v5918_v52 = vsel %vm1631_vm0, %v11641_v50, 0.0 }
0x221d   :  { %5919 = vadd.xlane.f32.xlu0 %v5918_v52  ;;  %v5881_v55 = vpop.xlane.xlu0 %5880 }
0x221e   :  { %9084 = vpow2.f32 %v5908_v43  ;;  %v5893_v12 = vsub.f32 %v5853_v13, %v5881_v55 }
0x221f   :  { %v9079_v29 = vpop.eup %9078  ;;  %9086 = vpow2.f32 %v5904_v42 }
0x2220   :  { %v5912_v60 = vsel %vm1631_vm0, %v9079_v29, 0.0  ;;  %v5906_v11 = vmul.f32 1.442695, %v5893_v12 }
0x2221   :  { %5913 = vadd.xlane.f32.xlu0 %v5912_v60  ;;  %v5887_v41 = vpop.xlane.xlu0 %5886 }
0x2222   :  { %v5895_v34 = vsub.f32 %v5861_v58, %v5887_v41 }
0x2224   :  { %v5910_v4 = vmul.f32 1.442695, %v5895_v34 }
0x2226   :  { %9088 = vpow2.f32 %v5910_v4 }
0x2227   :  { %v9081_v54 = vpop.eup %9080  ;;  %9090 = vpow2.f32 %v5906_v11 }
0x2228   :  { %v5921_v21 = vsel %vm1631_vm0, %v9081_v54, 0.0  ;;  %v9083_v61 = vpop.eup %9082 }
0x2229   :  { %5922 = vadd.xlane.f32.xlu0 %v5921_v21  ;;  %v5915_v39 = vsel %vm1631_vm0, %v9083_v61, 0.0 }
0x222b   :  { %v9085_v16 = vpop.eup %9084 }
0x222c   :  { %v5930_v20 = vsel %vm1631_vm0, %v9085_v16, 0.0  ;;  %v9087_v13 = vpop.eup %9086 }
0x222d   :  { %5916 = vadd.xlane.f32.xlu0 %v5915_v39  ;;  %5931 = vadd.xlane.f32.xlu1 %v5930_v20  ;;  %v5924_v30 = vsel %vm1631_vm0, %v9087_v13, 0.0  ;;  %v6079_v20 = vsel %vm1631_vm0, %v11637_v5, 0 }
0x2231   :  { %5925 = vadd.xlane.f32.xlu0 %v5924_v30 }
0x2233   :  { %v9089_v58 = vpop.eup %9088 }
0x2234   :  { %v5933_v1 = vsel %vm1631_vm0, %v9089_v58, 0.0  ;;  %v9091_v28 = vpop.eup %9090 }
0x2235   :  { %5934 = vadd.xlane.f32.xlu0 %v5933_v1  ;;  %v5927_v42 = vsel %vm1631_vm0, %v9091_v28, 0.0 }
0x2239   :  { %5928 = vadd.xlane.f32.xlu0 %v5927_v42 }
0x223e   :  { %6051 = vrot.lane.b32.xlu1 %v11547_v44, %s9304_s4 }
0x2242   :  { %6049 = vrot.lane.b32.xlu1 %v11555_v3, %s9304_s4 }
0x2246   :  { %6039 = vrot.lane.b32.xlu1 %v11577_v62, %s9304_s4 }
0x224a   :  { %6043 = vrot.lane.b32.xlu1 %v11589_v56, %s9304_s4 }
0x224f   :  { %6053 = vrot.lane.b32.xlu0 %v11538_v31, %s9304_s4 }
0x2253   :  { %6037 = vrot.lane.b32.xlu0 %v11570_v48, %s9304_s4 }
0x2257   :  { %6041 = vrot.lane.b32.xlu0 %v11581_v2, %s9304_s4 }
0x22a6   :  { %v5920_v43 = vpop.xlane.xlu0 %5919 }
0x22aa   :  { %v5914_v44 = vpop.xlane.xlu0 %5913 }
0x22b2   :  { %v5923_v52 = vpop.xlane.xlu0 %5922 }
0x22b3   :  { %9092 = vrcp.f32 %v5923_v52 }
0x22b4   :  { %9094 = vrcp.f32 %v5914_v44 }
0x22b5   :  { %9096 = vrcp.f32 %v5920_v43 }
0x22b6   :  { %v5917_v3 = vpop.xlane.xlu0 %5916  ;;  %v5932_v56 = vpop.xlane.xlu1 %5931 }
0x22b7   :  { %9098 = vrcp.f32 %v5917_v3 }
0x22ba   :  { %v5926_v62 = vpop.xlane.xlu0 %5925 }
0x22be   :  { %v5935_v55 = vpop.xlane.xlu0 %5934 }
0x22bf   :  { %9100 = vrcp.f32 %v5935_v55 }
0x22c0   :  { %9102 = vrcp.f32 %v5926_v62  ;;  %v9093_v31 = vpop.eup %9092  ;;  %v6052_v62 = vpop.permute.xlu1 %6051 }
0x22c1   :  { %9104 = vrcp.f32 %v5932_v56  ;;  %v9095_v48 = vpop.eup %9094  ;;  %v5947_v41 = vmul.f32 %v9093_v31, %v9081_v54 }
0x22c2   :  { %v5929_v12 = vpop.xlane.xlu0 %5928  ;;  %v9097_v60 = vpop.eup %9096  ;;  %v5944_v34 = vmul.f32 %v9095_v48, %v9079_v29 }
0x22c3   :  { %9106 = vrcp.f32 %v5929_v12  ;;  %v5946_v4 = vmul.f32 %v9097_v60, %v11641_v50 }
0x22c4   :  { %v9099_v2 = vpop.eup %9098 }
0x22c5   :  { %v5945_v11 = vmul.f32 %v9099_v2, %v9083_v61  ;;  %v5953_v39 = vpack.c.bf16 %v5947_v41, %v5946_v4 }
0x22c6   :  { %v6054_v30 = vpop.permute.xlu0 %6053 }
0x22c7   :  { %v5952_v21 = vpack.c.bf16 %v5945_v11, %v5944_v34  ;;  %v6076_v52 = vsel %vm1631_vm0, %v6054_v30, 0 }
0x22c9   :  { %8126 = vmatprep.mubr.msk.bf16.mxu0 %vm1631_vm0, %v5952_v21 }
0x22ca   :  { %8127 = vmatmul.mubr.msk.bf16.vlgmr.msra.gmra.mxu0 %vm1631_vm0, %v5953_v39  ;;  %v6038_v55 = vpop.permute.xlu0 %6037 }
0x22cb   :  { %8135 = vmatpush3.bf16.xpose.msra.mxu0 %v6079_v20 }
0x22cc   :  { %v9101_v1 = vpop.eup %9100  ;;  %8243 = vmatprep.subr.msk.bf16.mxu0 %vm1631_vm0, %v6054_v30 }
0x22cd   :  { %v9103_v42 = vpop.eup %9102  ;;  %v5951_v61 = vmul.f32 %v9101_v1, %v9089_v58  ;;  %v6073_v58 = vsel %vm1631_vm0, %v6052_v62, 0 }
0x22ce   :  { %v9105_v54 = vpop.eup %9104  ;;  %v5948_v43 = vmul.f32 %v9103_v42, %v9087_v13  ;;  %v6050_v13 = vpop.permute.xlu1 %6049 }
0x22cf   :  { %v5950_v44 = vmul.f32 %v9105_v54, %v9085_v16  ;;  %v6070_v16 = vsel %vm1631_vm0, %v6050_v13, 0  ;;  %v6042_v56 = vpop.permute.xlu0 %6041 }
0x22d0   :  { %v9107_v29 = vpop.eup %9106 }
0x22d1   :  { %v5949_v50 = vmul.f32 %v9107_v29, %v9091_v28  ;;  %v5955_v5 = vpack.c.bf16 %v5951_v61, %v5950_v44 }
0x22d2   :  { %v6040_v28 = vpop.permute.xlu1 %6039 }
0x22d3   :  { %v5954_v3 = vpack.c.bf16 %v5949_v50, %v5948_v43  ;;  %8137 = vmatpush3.bf16.xpose.msra.mxu0 %v6076_v52 }
0x22d4   :  { %8244 = vmatprep.subr.msk.bf16.mxu0 %vm1631_vm0, %v6052_v62 }
0x22d5   :  { %8130 = vmatprep.mubr.msk.bf16.mxu0 %vm1631_vm0, %v5954_v3 }
0x22d6   :  { %8131 = vmatmul.mubr.msk.bf16.gmra.mxu0 %vm1631_vm0, %v5955_v5  ;;  %v6044_v31 = vpop.permute.xlu1 %6043 }
0x22d7   :  { %8142 = vmatprep.mubr.msk.bf16.mxu0 %vm1631_vm0, %v6038_v55 }
0x22db   :  { %8139 = vmatpush3.bf16.xpose.msra.mxu0 %v6073_v58 }
0x22dc   :  { %8245 = vmatprep.subr.msk.bf16.mxu0 %vm1631_vm0, %v6050_v13 }
0x22e3   :  { %8141 = vmatpush3.bf16.xpose.msra.mxu0 %v6070_v16 }
0x22ea   :  { %8143 = vmatmul.mubr.msk.bf16.vlgmr.msra.gmra.mxu0 %vm1631_vm0, %v6040_v28 }
0x22eb   :  { %8146 = vmatprep.mubr.msk.bf16.mxu0 %vm1631_vm0, %v6042_v56 }
0x22f2   :  { %8147 = vmatmul.mubr.msk.bf16.gmra.mxu0 %vm1631_vm0, %v6044_v31 }
0x238a   :  { %v11683_v12 = vpop.f32.mrf.mxu0 }
0x238c   :  { %v11685_v48 = vpop.f32.mrf.mxu0 }
0x238e   :  { %v11687_v60 = vpop.f32.mrf.mxu0 }
0x2390   :  { %v11689_v2 = vpop.f32.mrf.mxu0 }
0x2396   :  { %v11691_v41 = vpop.f32.mrf.mxu0 }
0x2398   :  { %v11693_v34 = vpop.f32.mrf.mxu0 }
0x239a   :  { %v11695_v11 = vpop.f32.mrf.mxu0 }
0x239c   :  { %v11697_v4 = vpop.f32.mrf.mxu0 }
0x23aa   :  { %v8144_v21 = vpop.f32.mrf.mxu0 }
0x23ab   :  { %v6124_v1 = vadd.f32 %v11617_v51, %v8144_v21 }
0x23ac   :  { %v6115_v39 = vpop.f32.mrf.mxu0 }
0x23ad   :  { %v6116_v20 = vadd.f32 %v11617_v51, %v6115_v39  ;;  %v6152_v44 = vsel %vm1631_vm0, %v6124_v1, -inf }
0x23ae   :  { %v8145_v30 = vpop.f32.mrf.mxu0 }
0x23af   :  { %v6146_v42 = vsel %vm1631_vm0, %v6116_v20, -inf  ;;  %v6127_v43 = vadd.f32 %v11617_v51, %v8145_v30 }
0x23b0   :  { %v6118_v54 = vpop.f32.mrf.mxu0  ;;  %6147 = vmax.xlane.f32.xlu0 %v6146_v42 }
0x23b1   :  { %v6119_v29 = vadd.f32 %v11617_v51, %v6118_v54  ;;  %v6155_v55 = vsel %vm1631_vm0, %v6127_v43, -inf }
0x23b2   :  { %v8148_v61 = vpop.f32.mrf.mxu0 }
0x23b3   :  { %v6149_v50 = vsel %vm1631_vm0, %v6119_v29, -inf  ;;  %v6140_v5 = vadd.f32 %v11617_v51, %v8148_v61 }
0x23b4   :  { %6150 = vmax.xlane.f32.xlu1 %v6149_v50  ;;  %6153 = vmax.xlane.f32.xlu0 %v6152_v44  ;;  %v6131_v52 = vpop.f32.mrf.mxu0 }
0x23b5   :  { %v6132_v3 = vadd.f32 %v11617_v51, %v6131_v52  ;;  %v6164_v31 = vsel %vm1631_vm0, %v6140_v5, -inf }
0x23b6   :  { %v8149_v62 = vpop.f32.mrf.mxu0 }
0x23b7   :  { %v6158_v58 = vsel %vm1631_vm0, %v6132_v3, -inf  ;;  %v6143_v28 = vadd.f32 %v11617_v51, %v8149_v62 }
0x23b8   :  { %6156 = vmax.xlane.f32.xlu0 %v6155_v55  ;;  %v6134_v13 = vpop.f32.mrf.mxu0  ;;  %6159 = vmax.xlane.f32.xlu1 %v6158_v58 }
0x23b9   :  { %v6135_v16 = vadd.f32 %v11617_v51, %v6134_v13  ;;  %v6167_v21 = vsel %vm1631_vm0, %v6143_v28, -inf }
0x23bb   :  { %v6161_v56 = vsel %vm1631_vm0, %v6135_v16, -inf }
0x23bc   :  { %6162 = vmax.xlane.f32.xlu0 %v6161_v56  ;;  %6165 = vmax.xlane.f32.xlu1 %v6164_v31 }
0x23c0   :  { %6168 = vmax.xlane.f32.xlu0 %v6167_v21 }
0x23cd   :  { %6248 = vrot.lane.b32.xlu1 %v11429_v49, %s9304_s4 }
0x23d1   :  { %6246 = vrot.lane.b32.xlu1 %v11441_v27, %s9304_s4 }
0x2439   :  { %v6148_v39 = vpop.xlane.xlu0 %6147 }
0x243a   :  { %v6170_v30 = vsub.f32 %v6116_v20, %v6148_v39 }
0x243c   :  { %v6178_v50 = vmul.f32 1.442695, %v6170_v30 }
0x243d   :  { %v6151_v42 = vpop.xlane.xlu1 %6150  ;;  %v6154_v54 = vpop.xlane.xlu0 %6153 }
0x243e   :  { %v6172_v51 = vsub.f32 %v6124_v1, %v6154_v54  ;;  %v6171_v44 = vsub.f32 %v6119_v29, %v6151_v42 }
0x2440   :  { %v6182_v61 = vmul.f32 1.442695, %v6172_v51  ;;  %v6180_v13 = vmul.f32 1.442695, %v6171_v44 }
0x2441   :  { %v6160_v52 = vpop.xlane.xlu1 %6159  ;;  %v6157_v62 = vpop.xlane.xlu0 %6156 }
0x2442   :  { %v6173_v55 = vsub.f32 %v6127_v43, %v6157_v62  ;;  %9108 = vpow2.f32 %v6182_v61  ;;  %v6174_v27 = vsub.f32 %v6132_v3, %v6160_v52 }
0x2443   :  { %9110 = vpow2.f32 %v6178_v50 }
0x2444   :  { %v6184_v58 = vmul.f32 1.442695, %v6173_v55  ;;  %v6186_v1 = vmul.f32 1.442695, %v6174_v27 }
0x2445   :  { %v6166_v56 = vpop.xlane.xlu1 %6165  ;;  %v6163_v49 = vpop.xlane.xlu0 %6162 }
0x2446   :  { %v6176_v31 = vsub.f32 %v6140_v5, %v6166_v56  ;;  %9112 = vpow2.f32 %v6184_v58  ;;  %v6175_v42 = vsub.f32 %v6135_v16, %v6163_v49  ;;  %v11741_v58 = vld [vmem:[#allocation11 + $0xf8] sm:$0xff]  }
0x2447   :  { %9114 = vpow2.f32 %v6180_v13  ;;  %v11745_v56 = vld [vmem:[#allocation11 + $0xb8] sm:$0xff]   ;;  %7590 = vmatprep.subr.bf16.mxu0 %v11741_v58 }
0x2448   :  { %v6190_v20 = vmul.f32 1.442695, %v6176_v31  ;;  %v6188_v61 = vmul.f32 1.442695, %v6175_v42  ;;  %7591 = vmatpush3.bf16.msra.mxu0 %v11745_v56  ;;  %v11751_v31 = vld [vmem:[#allocation11 + $0xf0] sm:$0xff]   ;;  %v8265_v42 = vpack.i.bf16 %v10285_v15, %v10279_v38 }
0x2449   :  { %v6249_v21 = vpop.permute.xlu1 %6248  ;;  %v6169_v39 = vpop.xlane.xlu0 %6168  ;;  %7592 = vmatprep.subr.bf16.mxu0 %v11751_v31  ;;  %v11793_v38 = vld [vmem:[#allocation11 + $0xd0] sm:$0xff]  }
0x244a   :  { %8150 = vmatprep.subr.bf16.mxu1 %v6249_v21  ;;  %9116 = vpow2.f32 %v6190_v20  ;;  %v6177_v29 = vsub.f32 %v6143_v28, %v6169_v39  ;;  %v11755_v20 = vld [vmem:[#allocation11 + $0xb0] sm:$0xff]   ;;  %v11763_v39 = vld [vmem:[#allocation11 + $0xe8] sm:$0xff]  }
0x244b   :  { %8151 = vmatpush3.bf16.msra.mxu1 %v6249_v21  ;;  %9118 = vpow2.f32 %v6186_v1  ;;  %v8260_v1 = vpack.i.bf16 %v10475_v46, %v10469_v8  ;;  %v11783_v8 = vld [vmem:[#allocation11 + $0xd8] sm:$0xff]   ;;  %v11795_v15 = vld [vmem:[#allocation11 + $0x90] sm:$0xff]  }
0x244c   :  { %v6192_v54 = vmul.f32 1.442695, %v6177_v29  ;;  %7593 = vmatpush3.bf16.msra.mxu0 %v11755_v20  ;;  %v11785_v46 = vld [vmem:[#allocation11 + $0x98] sm:$0xff]  }
0x244d   :  { %v6247_v30 = vpop.permute.xlu1 %6246  ;;  %7594 = vmatprep.subr.bf16.mxu0 %v11763_v39 }
0x244e   :  { %8152 = vmatprep.subr.bf16.mxu1 %v6247_v30  ;;  %9120 = vpow2.f32 %v6192_v54  ;;  %v11778_v54 = vld [vmem:[#allocation11 + $0xa0] sm:$0xff]  }
0x244f   :  { %8153 = vmatpush3.bf16.msra.mxu1 %v6247_v30  ;;  %v11719_v43 = vpop.eup %9108  ;;  %9122 = vpow2.f32 %v6188_v61  ;;  %v11769_v30 = vld [vmem:[#allocation11 + $0xa8] sm:$0xff]   ;;  %v12450_v61 = vpack.i.bf16 %v10281_v9, %v10277_v24  ;;  %v8295_v24 = vpack.i.bf16 %v10719_v19, %v10713_v0  ;;  %v11817_v9 = vld [vmem:[#allocation11 + $0x80] sm:$0xff]   ;;  %v8290_v0 = vpack.i.bf16 %v10295_v22, %v10289_v53  ;;  %v12457_v22 = vld [vmem:[#allocation126_spill] sm:$0xff] }
0x2450   :  { %v6200_v5 = vsel %vm1631_vm0, %v11719_v43, 0.0  ;;  %v11723_v3 = vpop.eup %9110  ;;  %7595 = vmatpush3.bf16.msra.mxu0 %v11769_v30  ;;  %v12453_v19 = vpack.i.bf16 %v10715_v10, %v10711_v63  ;;  %v12456_v53 = vpack.i.bf16 %v11159_v6, %v11153_v17  ;;  %v12458_v63 = vld [vmem:[#allocation125_spill] sm:$0xff]  ;;  %v12468_v17 = vld [vmem:[#allocation70_spill] sm:$0xff]  ;;  %v12469_v6 = vld [vmem:[#allocation76_spill] sm:$0xff] }
0x2451   :  { %6201 = vadd.xlane.f32.xlu1 %v6200_v5  ;;  %v6194_v28 = vsel %vm1631_vm0, %v11723_v3, 0.0  ;;  %v12449_v5 = vpack.i.bf16 %v10471_v7, %v10467_v26  ;;  %v12451_v26 = vpack.i.bf16 %v10909_v18, %v10903_v25  ;;  %v11813_v7 = vld [vmem:[#allocation11 + $0xc0] sm:$0xff]   ;;  %v8280_v25 = vpack.i.bf16 %v10485_v33, %v10479_v45 }
0x2452   :  { %v12452_v18 = vpack.i.bf16 %v10905_v35, %v10901_v32  ;;  %v12454_v45 = vpack.i.bf16 %v11353_v37, %v11347_v47  ;;  %v12455_v33 = vpack.i.bf16 %v10481_v36, %v10477_v57  ;;  %v12459_v10 = vpack.i.bf16 %v12457_v22, %v12458_v63  ;;  %v12460_v32 = vld [vmem:[#allocation80_spill] sm:$0xff]  ;;  %v12461_v35 = vld [vmem:[#allocation98_spill] sm:$0xff] }
0x2453   :  { %v11725_v51 = vpop.eup %9112  ;;  %v12462_v47 = vpack.i.bf16 %v12460_v32, %v12461_v35  ;;  %v12463_v37 = vld [vmem:[#allocation24_spill] sm:$0xff]  ;;  %v12466_v36 = vld [vmem:[#allocation86_spill] sm:$0xff] }
0x2454   :  { %v6203_v50 = vsel %vm1631_vm0, %v11725_v51, 0.0  ;;  %v11731_v44 = vpop.eup %9114  ;;  %v12486_v22 = vld [vmem:[#allocation38_spill] sm:$0xff]  ;;  %v12487_v63 = vld [vmem:[#allocation64_spill] sm:$0xff] }
0x2455   :  { %6195 = vadd.xlane.f32.xlu1 %v6194_v28  ;;  %6204 = vadd.xlane.f32.xlu0 %v6203_v50  ;;  %v6197_v16 = vsel %vm1631_vm0, %v11731_v44, 0.0  ;;  %v11803_v28 = vld [vmem:[#allocation11 + $0xc8] sm:$0xff]  }
0x2456   :  { %v11805_v50 = vld [vmem:[#allocation11 + $0x88] sm:$0xff]  }
0x2457   :  { %v11735_v52 = vpop.eup %9116 }
0x2458   :  { %v6212_v62 = vsel %vm1631_vm0, %v11735_v52, 0.0  ;;  %v11739_v55 = vpop.eup %9118 }
0x2459   :  { %6198 = vadd.xlane.f32.xlu0 %v6197_v16  ;;  %v6206_v13 = vsel %vm1631_vm0, %v11739_v55, 0.0  ;;  %v12467_v16 = vld [vmem:[#allocation60_spill] sm:$0xff] }
0x245b   :  { %v11747_v49 = vpop.eup %9120 }
0x245c   :  { %v6215_v27 = vsel %vm1631_vm0, %v11747_v49, 0.0  ;;  %v11757_v21 = vpop.eup %9122 }
0x245d   :  { %6213 = vadd.xlane.f32.xlu0 %v6212_v62  ;;  %v6209_v29 = vsel %vm1631_vm0, %v11757_v21, 0.0  ;;  %v8330_v62 = vpack.i.bf16 %v12467_v16, %v12466_v36 }
0x2461   :  { %6207 = vadd.xlane.f32.xlu0 %v6206_v13  ;;  %v12470_v13 = vpack.i.bf16 %v12468_v17, %v12469_v6 }
0x2465   :  { %6216 = vadd.xlane.f32.xlu0 %v6215_v27  ;;  %v12471_v27 = vld [vmem:[#allocation23_spill] sm:$0xff] }
0x2466   :  { %6242 = vrot.lane.b32.xlu1 %v11455_v14, %s9304_s4  ;;  %v11774_v14 = vld [vmem:[#allocation11 + $0xe0] sm:$0xff]  }
0x2467   :  { %7596 = vmatprep.subr.bf16.mxu0 %v11774_v14 }
0x2468   :  { %7597 = vmatpush3.bf16.msra.mxu0 %v11778_v54 }
0x2469   :  { %6210 = vadd.xlane.f32.xlu0 %v6209_v29  ;;  %7598 = vmatprep.subr.bf16.mxu0 %v11783_v8 }
0x246a   :  { %8261 = vrot.lane.b32.xlu1 %v8260_v1, %s9304_s4  ;;  %v12472_v1 = vld [vmem:[#allocation20_spill] sm:$0xff] }
0x246b   :  { %v12473_v29 = vpack.i.bf16 %v12471_v27, %v12472_v1 }
0x246c   :  { %7599 = vmatpush3.bf16.msra.mxu0 %v11785_v46 }
0x246d   :  { %7600 = vmatprep.subr.bf16.mxu0 %v11793_v38 }
0x246e   :  { %8266 = vrot.lane.b32.xlu1 %v8265_v42, %s9304_s4  ;;  %v12474_v42 = vld [vmem:[#allocation87_spill] sm:$0xff] }
0x2470   :  { %7601 = vmatpush3.bf16.msra.mxu0 %v11795_v15 }
0x2471   :  { %7602 = vmatprep.subr.bf16.mxu0 %v11803_v28 }
0x2472   :  { %8271 = vrot.lane.b32.xlu1 %v12449_v5, %s9304_s4  ;;  %v12475_v5 = vld [vmem:[#allocation89_spill] sm:$0xff] }
0x2474   :  { %7603 = vmatpush3.bf16.msra.mxu0 %v11805_v50 }
0x2475   :  { %7604 = vmatprep.subr.bf16.mxu0 %v11813_v7 }
0x2476   :  { %8276 = vrot.lane.b32.xlu1 %v12450_v61, %s9304_s4  ;;  %v12476_v61 = vpack.i.bf16 %v12474_v42, %v12475_v5 }
0x2478   :  { %7605 = vmatpush3.bf16.msra.mxu0 %v11817_v9 }
0x247a   :  { %8286 = vrot.lane.b32.xlu1 %v12451_v26, %s9304_s4  ;;  %v12477_v26 = vld [vmem:[#allocation68_spill] sm:$0xff] }
0x247e   :  { %8296 = vrot.lane.b32.xlu1 %v8295_v24, %s9304_s4  ;;  %v12478_v24 = vld [vmem:[#allocation74_spill] sm:$0xff] }
0x247f   :  { %6244 = vrot.lane.b32.xlu0 %v11449_v59, %s9304_s4  ;;  %v12464_v59 = vld [vmem:[#allocation21_spill] sm:$0xff] }
0x2480   :  { %v12465_v57 = vpack.i.bf16 %v12463_v37, %v12464_v59 }
0x2482   :  { %8306 = vrot.lane.b32.xlu1 %v12452_v18, %s9304_s4  ;;  %v12480_v18 = vld [vmem:[#allocation44_spill] sm:$0xff] }
0x2483   :  { %8281 = vrot.lane.b32.xlu0 %v8280_v25, %s9304_s4  ;;  %v12479_v25 = vpack.i.bf16 %v12477_v26, %v12478_v24 }
0x2486   :  { %8316 = vrot.lane.b32.xlu1 %v12453_v19, %s9304_s4 }
0x2487   :  { %8291 = vrot.lane.b32.xlu0 %v8290_v0, %s9304_s4  ;;  %v12481_v0 = vld [vmem:[#allocation32_spill] sm:$0xff] }
0x2488   :  { %v12482_v19 = vpack.i.bf16 %v12480_v18, %v12481_v0 }
0x248a   :  { %8326 = vrot.lane.b32.xlu1 %v12454_v45, %s9304_s4  ;;  %v12483_v45 = vld [vmem:[#allocation78_spill] sm:$0xff] }
0x248b   :  { %8301 = vrot.lane.b32.xlu0 %v12455_v33, %s9304_s4  ;;  %v12484_v33 = vld [vmem:[#allocation84_spill] sm:$0xff] }
0x248e   :  { %8336 = vrot.lane.b32.xlu1 %v12456_v53, %s9304_s4  ;;  %v12485_v53 = vpack.i.bf16 %v12483_v45, %v12484_v33  ;;  %v12490_v33 = vld [vmem:[#allocation56_spill] sm:$0xff] }
0x248f   :  { %8311 = vrot.lane.b32.xlu0 %v12459_v10, %s9304_s4  ;;  %v12488_v10 = vpack.i.bf16 %v12486_v22, %v12487_v63  ;;  %v8580_v22 = vld [vmem:[#allocation11 + $0x78] sm:$0xff]  }
0x2492   :  { %8346 = vrot.lane.b32.xlu1 %v12462_v47, %s9304_s4 }
0x2493   :  { %8321 = vrot.lane.b32.xlu0 %v12465_v57, %s9304_s4 }
0x2496   :  { %8356 = vrot.lane.b32.xlu1 %v12470_v13, %s9304_s4 }
0x2497   :  { %8331 = vrot.lane.b32.xlu0 %v8330_v62, %s9304_s4 }
0x249b   :  { %8341 = vrot.lane.b32.xlu0 %v12473_v29, %s9304_s4 }
0x249f   :  { %8351 = vrot.lane.b32.xlu0 %v12476_v61, %s9304_s4 }
0x24a3   :  { %8361 = vrot.lane.b32.xlu0 %v12479_v25, %s9304_s4 }
0x24a7   :  { %8366 = vrot.lane.b32.xlu0 %v12482_v19, %s9304_s4 }
0x24ab   :  { %8381 = vrot.lane.b32.xlu0 %v12485_v53, %s9304_s4 }
0x24af   :  { %8391 = vrot.lane.b32.xlu0 %v12488_v10, %s9304_s4 }
0x24da   :  { %v6202_v32 = vpop.xlane.xlu1 %6201 }
0x24de   :  { %v6196_v35 = vpop.xlane.xlu1 %6195  ;;  %v6205_v47 = vpop.xlane.xlu0 %6204 }
0x24df   :  { %9124 = vrcp.f32 %v6196_v35 }
0x24e2   :  { %v6243_v37 = vpop.permute.xlu1 %6242  ;;  %v6199_v59 = vpop.xlane.xlu0 %6198 }
0x24e3   :  { %9126 = vrcp.f32 %v6199_v59 }
0x24e4   :  { %9128 = vrcp.f32 %v6205_v47 }
0x24e5   :  { %9130 = vrcp.f32 %v6202_v32 }
0x24e6   :  { %v11893_v57 = vpop.permute.xlu1 %8261  ;;  %v6214_v36 = vpop.xlane.xlu0 %6213 }
0x24e7   :  { %9132 = vrcp.f32 %v6214_v36  ;;  %v8581_v36 = vld [vmem:[#allocation11 + $0x38] sm:$0xff]  }
0x24ea   :  { %v11895_v16 = vpop.permute.xlu1 %8266  ;;  %v6208_v62 = vpop.xlane.xlu0 %6207 }
0x24ec   :  { %v9125_v17 = vpop.eup %9124 }
0x24ed   :  { %v6226_v1 = vmul.f32 %v9125_v17, %v11723_v3  ;;  %v12491_v17 = vld [vmem:[#allocation92_spill] sm:$0xff] }
0x24ee   :  { %v11897_v6 = vpop.permute.xlu1 %8271  ;;  %v6217_v13 = vpop.xlane.xlu0 %6216 }
0x24ef   :  { %9134 = vrcp.f32 %v6217_v13 }
0x24f0   :  { %v9127_v27 = vpop.eup %9126  ;;  %9136 = vrcp.f32 %v6208_v62 }
0x24f1   :  { %v6227_v29 = vmul.f32 %v9127_v27, %v11731_v44  ;;  %v9129_v26 = vpop.eup %9128  ;;  %v12489_v44 = vld [vmem:[#allocation58_spill] sm:$0xff]  ;;  %v12492_v27 = vld [vmem:[#allocation25_spill] sm:$0xff] }
0x24f2   :  { %v11901_v42 = vpop.permute.xlu1 %8276  ;;  %v6211_v5 = vpop.xlane.xlu0 %6210  ;;  %v6229_v3 = vmul.f32 %v9129_v26, %v11725_v51 }
0x24f3   :  { %9138 = vrcp.f32 %v6211_v5  ;;  %v6234_v61 = vpack.c.bf16 %v6227_v29, %v6226_v1  ;;  %v9131_v19 = vpop.eup %9130  ;;  %v8582_v29 = vld [vmem:[#allocation11 + $0x70] sm:$0xff]  }
0x24f4   :  { %v6228_v35 = vmul.f32 %v9131_v19, %v11719_v43  ;;  %v9133_v51 = vpop.eup %9132 }
0x24f5   :  { %8158 = vmatprep.mubr.msk.bf16.mxu1 %vm1631_vm0, %v6234_v61  ;;  %v8263_v61 = vunpack.i.l.bf16 %v11893_v57 }
0x24f6   :  { %v8287_v24 = vpop.permute.xlu1 %8286  ;;  %v6245_v25 = vpop.permute.xlu0 %6244  ;;  %v6235_v62 = vpack.c.bf16 %v6229_v3, %v6228_v35  ;;  %v8583_v3 = vld [vmem:[#allocation11 + $0x30] sm:$0xff]  }
0x24f7   :  { %v8289_v18 = vunpack.i.h.bf16 %v8287_v24  ;;  %v8288_v0 = vunpack.i.l.bf16 %v8287_v24  ;;  %8154 = vmatprep.subr.bf16.mxu1 %v6245_v25 }
0x24f8   :  { %8155 = vmatpush3.bf16.msra.mxu1 %v6245_v25  ;;  %v8264_v25 = vunpack.i.h.bf16 %v11893_v57 }
0x24f9   :  { %8156 = vmatprep.subr.bf16.mxu1 %v6243_v37  ;;  %v4044_v45 = vsel %vm1631_vm0, %v12489_v44, %v8288_v0  ;;  %v4045_v53 = vsel %vm1631_vm0, %v12490_v33, %v8289_v18  ;;  %v12493_v44 = vld [vmem:[#allocation61_spill] sm:$0xff]  ;;  %v12494_v33 = vld [vmem:[#allocation59_spill] sm:$0xff] }
0x24fa   :  { %v8297_v63 = vpop.permute.xlu1 %8296  ;;  %v11909_v10 = vpop.permute.xlu0 %8281  ;;  %v6494_v32 = vpack.c.bf16 %v4045_v53, %v4044_v45 }
0x24fb   :  { %v8299_v47 = vunpack.i.h.bf16 %v8297_v63  ;;  %v8298_v59 = vunpack.i.l.bf16 %v8297_v63  ;;  %v8584_v63 = vld [vmem:[#allocation11 + $0x68] sm:$0xff]  }
0x24fc   :  { %8157 = vmatpush3.bf16.msra.mxu1 %v6243_v37  ;;  %6908 = vmatprep.mubr.bf16.mxu0 %v6494_v32  ;;  %v9135_v5 = vpop.eup %9134 }
0x24fd   :  { %v4037_v13 = vsel %vm1631_vm0, %v12491_v17, %v8299_v47  ;;  %v4036_v1 = vsel %vm1631_vm0, %v12492_v27, %v8298_v59  ;;  %7526 = vmatprep.subr.bf16.mxu1 %v8580_v22  ;;  %v9137_v37 = vpop.eup %9136  ;;  %v6233_v22 = vmul.f32 %v9135_v5, %v11747_v49  ;;  %v6232_v27 = vmul.f32 %v9133_v51, %v11735_v52  ;;  %v8585_v5 = vld [vmem:[#allocation11 + $0x28] sm:$0xff]  }
0x24fe   :  { %v6493_v26 = vpack.c.bf16 %v4037_v13, %v4036_v1  ;;  %v8307_v43 = vpop.permute.xlu1 %8306  ;;  %v11917_v24 = vpop.permute.xlu0 %8291  ;;  %v6230_v47 = vmul.f32 %v9137_v37, %v11739_v55  ;;  %v12496_v1 = vld [vmem:[#allocation130_spill] sm:$0xff] }
0x24ff   :  { %v8309_v18 = vunpack.i.h.bf16 %v8307_v43  ;;  %v8308_v0 = vunpack.i.l.bf16 %v8307_v43  ;;  %8159 = vmatmul.mubr.msk.bf16.vlgmr.msra.gmra.mxu1 %vm1631_vm0, %v6235_v62  ;;  %v12498_v55 = vld [vmem:[#allocation22_spill] sm:$0xff]  ;;  %v6237_v37 = vpack.c.bf16 %v6233_v22, %v6232_v27  ;;  %v12500_v22 = vld [vmem:[#allocation19_spill] sm:$0xff] }
0x2500   :  { %v9139_v19 = vpop.eup %9138  ;;  %7527 = vmatpush3.bf16.msra.mxu1 %v8581_v36  ;;  %6909 = vmatmul.mubr.bf16.vlgmr.msra.gmra.mxu0 %v6493_v26  ;;  %v12495_v36 = vld [vmem:[#allocation128_spill] sm:$0xff]  ;;  %v12502_v27 = vld [vmem:[#allocation90_spill] sm:$0xff] }
0x2501   :  { %7528 = vmatprep.subr.bf16.mxu1 %v8582_v29  ;;  %v4046_v45 = vsel %vm1631_vm0, %v12493_v44, %v8308_v0  ;;  %v4047_v53 = vsel %vm1631_vm0, %v12494_v33, %v8309_v18  ;;  %v6231_v59 = vmul.f32 %v9139_v19, %v11757_v21  ;;  %v4028_v62 = vsel %vm1631_vm0, %v12495_v36, %v8263_v61  ;;  %v12497_v26 = vld [vmem:[#allocation28_spill] sm:$0xff]  ;;  %v8586_v61 = vld [vmem:[#allocation11 + $0x60] sm:$0xff]   ;;  %v8588_v0 = vld [vmem:[#allocation11 + $0x58] sm:$0xff]  }
0x2502   :  { %v8317_v32 = vpop.permute.xlu1 %8316  ;;  %v11926_v57 = vpop.permute.xlu0 %8301  ;;  %v6498_v35 = vpack.c.bf16 %v4047_v53, %v4046_v45  ;;  %v4029_v29 = vsel %vm1631_vm0, %v12496_v1, %v8264_v25  ;;  %v8587_v25 = vld [vmem:[#allocation11 + $0x20] sm:$0xff]   ;;  %v8589_v45 = vld [vmem:[#allocation11 + $0x18] sm:$0xff]  }
0x2503   :  { %v8319_v17 = vunpack.i.h.bf16 %v8317_v32  ;;  %v8318_v13 = vunpack.i.l.bf16 %v8317_v32  ;;  %v6236_v49 = vpack.c.bf16 %v6231_v59, %v6230_v47  ;;  %v6492_v51 = vpack.c.bf16 %v4029_v29, %v4028_v62  ;;  %v12499_v33 = vld [vmem:[#allocation54_spill] sm:$0xff]  ;;  %v8590_v32 = vld [vmem:[#allocation11 + $0x50] sm:$0xff]   ;;  %v8592_v29 = vld [vmem:[#allocation11 + $0x48] sm:$0xff]  }
0x2504   :  { %7529 = vmatpush3.bf16.msra.mxu1 %v8583_v3  ;;  %6916 = vmatprep.mubr.bf16.mxu0 %v6498_v35  ;;  %v8591_v62 = vld [vmem:[#allocation11 + $0x10] sm:$0xff]  }
0x2505   :  { %v4039_v43 = vsel %vm1631_vm0, %v12497_v26, %v8319_v17  ;;  %v4038_v21 = vsel %vm1631_vm0, %v12498_v55, %v8318_v13  ;;  %7530 = vmatprep.subr.bf16.mxu1 %v8584_v63  ;;  %8162 = vmatprep.mubr.msk.bf16.mxu1 %vm1631_vm0, %v6236_v49  ;;  %v12501_v17 = vld [vmem:[#allocation88_spill] sm:$0xff] }
0x2506   :  { %v6497_v18 = vpack.c.bf16 %v4039_v43, %v4038_v21  ;;  %v11940_v52 = vpop.permute.xlu0 %8311  ;;  %v8593_v55 = vld [vmem:[#allocation11 + $0x8] sm:$0xff]   ;;  %v12503_v21 = vld [vmem:[#allocation57_spill] sm:$0xff] }
0x2507   :  { %8163 = vmatmul.mubr.msk.bf16.gmra.mxu1 %vm1631_vm0, %v6237_v37 }
0x2508   :  { %7531 = vmatpush3.bf16.msra.mxu1 %v8585_v5  ;;  %6811 = vmatprep.mubr.bf16.mxu1 %v6492_v51  ;;  %v8594_v51 = vld [vmem:[#allocation11 + $0x40] sm:$0xff]  }
0x2509   :  { %6917 = vmatmul.mubr.bf16.gmra.mxu0 %v6497_v18  ;;  %7532 = vmatprep.subr.bf16.mxu1 %v8586_v61  ;;  %v12504_v61 = vld [vmem:[#allocation55_spill] sm:$0xff] }
0x250a   :  { %v8322_v19 = vpop.permute.xlu0 %8321 }
0x250b   :  { %v8324_v3 = vunpack.i.h.bf16 %v8322_v19  ;;  %v8323_v44 = vunpack.i.l.bf16 %v8322_v19 }
0x250c   :  { %7533 = vmatpush3.bf16.msra.mxu1 %v8587_v25  ;;  %v8269_v25 = vunpack.i.h.bf16 %v11895_v16 }
0x250d   :  { %7534 = vmatprep.subr.bf16.mxu1 %v8588_v0  ;;  %v4048_v53 = vsel %vm1631_vm0, %v12499_v33, %v8323_v44  ;;  %v4049_v63 = vsel %vm1631_vm0, %v12500_v22, %v8324_v3  ;;  %v8268_v0 = vunpack.i.l.bf16 %v11895_v16  ;;  %v8274_v44 = vunpack.i.h.bf16 %v11897_v6  ;;  %v8595_v22 = vld [vmem:[#allocation11] sm:$0xff]  }
0x250e   :  { %v8332_v35 = vpop.permute.xlu0 %8331  ;;  %v6502_v47 = vpack.c.bf16 %v4049_v63, %v4048_v53  ;;  %v12505_v63 = vld [vmem:[#allocation91_spill] sm:$0xff] }
0x250f   :  { %v8334_v59 = vunpack.i.h.bf16 %v8332_v35  ;;  %v8333_v36 = vunpack.i.l.bf16 %v8332_v35  ;;  %v12506_v35 = vld [vmem:[#allocation93_spill] sm:$0xff] }
0x2510   :  { %7535 = vmatpush3.bf16.msra.mxu1 %v8589_v45  ;;  %6924 = vmatprep.mubr.bf16.mxu0 %v6502_v47  ;;  %v8273_v45 = vunpack.i.l.bf16 %v11897_v6  ;;  %v12509_v6 = vld [vmem:[#allocation127_spill] sm:$0xff] }
0x2511   :  { %v4041_v13 = vsel %vm1631_vm0, %v12501_v17, %v8334_v59  ;;  %v4040_v1 = vsel %vm1631_vm0, %v12502_v27, %v8333_v36  ;;  %7536 = vmatprep.subr.bf16.mxu1 %v8590_v32  ;;  %v12507_v59 = vld [vmem:[#allocation120_spill] sm:$0xff]  ;;  %v12508_v36 = vld [vmem:[#allocation118_spill] sm:$0xff]  ;;  %v12510_v27 = vld [vmem:[#allocation129_spill] sm:$0xff] }
0x2512   :  { %v6501_v49 = vpack.c.bf16 %v4041_v13, %v4040_v1  ;;  %v8342_v5 = vpop.permute.xlu0 %8341  ;;  %v4021_v16 = vsel %vm1631_vm0, %v12507_v59, %v8269_v25  ;;  %v4030_v13 = vsel %vm1631_vm0, %v12509_v6, %v8273_v45  ;;  %v4031_v1 = vsel %vm1631_vm0, %v12510_v27, %v8274_v44  ;;  %v8327_v44 = vpop.permute.xlu1 %8326 }
0x2513   :  { %v8344_v26 = vunpack.i.h.bf16 %v8342_v5  ;;  %v8343_v43 = vunpack.i.l.bf16 %v8342_v5  ;;  %v8278_v5 = vunpack.i.l.bf16 %v11901_v42  ;;  %v8328_v59 = vunpack.i.l.bf16 %v8327_v44 }
0x2514   :  { %7537 = vmatpush3.bf16.msra.mxu1 %v8591_v62  ;;  %6925 = vmatmul.mubr.bf16.gmra.mxu0 %v6501_v49  ;;  %v4020_v62 = vsel %vm1631_vm0, %v12508_v36, %v8268_v0  ;;  %v8279_v49 = vunpack.i.h.bf16 %v11901_v42  ;;  %v12520_v36 = vld [vmem:[#allocation121_spill] sm:$0xff] }
0x2515   :  { %7538 = vmatprep.subr.bf16.mxu1 %v8592_v29  ;;  %v4050_v37 = vsel %vm1631_vm0, %v12503_v21, %v8343_v43  ;;  %v4051_v18 = vsel %vm1631_vm0, %v12504_v61, %v8344_v26  ;;  %v6491_v29 = vpack.c.bf16 %v4021_v16, %v4020_v62  ;;  %v6496_v26 = vpack.c.bf16 %v4031_v1, %v4030_v13  ;;  %v12511_v21 = vld [vmem:[#allocation119_spill] sm:$0xff]  ;;  %v12512_v61 = vld [vmem:[#allocation117_spill] sm:$0xff]  ;;  %v12521_v62 = vld [vmem:[#allocation112_spill] sm:$0xff] }
0x2516   :  { %v8352_v19 = vpop.permute.xlu0 %8351  ;;  %v6506_v3 = vpack.c.bf16 %v4051_v18, %v4050_v37  ;;  %v8284_v43 = vunpack.i.h.bf16 %v11909_v10  ;;  %v4023_v37 = vsel %vm1631_vm0, %v12511_v21, %v8279_v49  ;;  %v12513_v18 = vld [vmem:[#allocation132_spill] sm:$0xff]  ;;  %v12519_v16 = vld [vmem:[#allocation123_spill] sm:$0xff] }
0x2517   :  { %v8354_v33 = vunpack.i.h.bf16 %v8352_v19  ;;  %v8353_v53 = vunpack.i.l.bf16 %v8352_v19  ;;  %v8304_v19 = vunpack.i.h.bf16 %v11926_v57 }
0x2518   :  { %7539 = vmatpush3.bf16.msra.mxu1 %v8593_v55  ;;  %6932 = vmatprep.mubr.bf16.mxu0 %v6506_v3  ;;  %v8283_v55 = vunpack.i.l.bf16 %v11909_v10  ;;  %v8303_v3 = vunpack.i.l.bf16 %v11926_v57 }
0x2519   :  { %v4043_v32 = vsel %vm1631_vm0, %v12505_v63, %v8354_v33  ;;  %v4042_v47 = vsel %vm1631_vm0, %v12506_v35, %v8353_v53  ;;  %7540 = vmatprep.subr.bf16.mxu1 %v8594_v51  ;;  %v12514_v51 = vld [vmem:[#allocation134_spill] sm:$0xff]  ;;  %v12517_v53 = vld [vmem:[#allocation131_spill] sm:$0xff] }
0x251a   :  { %v6505_v17 = vpack.c.bf16 %v4043_v32, %v4042_v47  ;;  %v4032_v42 = vsel %vm1631_vm0, %v12513_v18, %v8283_v55  ;;  %v4033_v25 = vsel %vm1631_vm0, %v12514_v51, %v8284_v43  ;;  %v8337_v32 = vpop.permute.xlu1 %8336  ;;  %v8329_v47 = vunpack.i.h.bf16 %v8327_v44  ;;  %v12524_v55 = vld [vmem:[#allocation27_spill] sm:$0xff] }
0x251b   :  { %v6500_v0 = vpack.c.bf16 %v4033_v25, %v4032_v42 }
0x251c   :  { %7541 = vmatpush3.bf16.msra.mxu1 %v8595_v22  ;;  %6933 = vmatmul.mubr.bf16.gmra.mxu0 %v6505_v17  ;;  %v12518_v22 = vld [vmem:[#allocation133_spill] sm:$0xff]  ;;  %v6467_v17 = vsel %vm1631_vm0, %v12521_v62, %v8328_v59 }
0x251d   :  { %8166 = vmatprep.subr.bf16.mxu1 %v11741_v58  ;;  %v4022_v58 = vsel %vm1631_vm0, %v12512_v61, %v8278_v5  ;;  %v4035_v63 = vsel %vm1631_vm0, %v12518_v22, %v8304_v19  ;;  %v8362_v5 = vpop.permute.xlu0 %8361  ;;  %v12526_v61 = vld [vmem:[#allocation116_spill] sm:$0xff] }
0x251e   :  { %v6495_v10 = vpack.c.bf16 %v4023_v37, %v4022_v58  ;;  %v8347_v13 = vpop.permute.xlu1 %8346  ;;  %v8364_v25 = vunpack.i.h.bf16 %v8362_v5 }
0x251f   :  { %6812 = vmatmul.mubr.bf16.vlgmr.msra.gmra.mxu1 %v6491_v29  ;;  %v8349_v29 = vunpack.i.h.bf16 %v8347_v13  ;;  %v8348_v49 = vunpack.i.l.bf16 %v8347_v13  ;;  %v12536_v13 = vld [vmem:[#allocation108_spill] sm:$0xff] }
0x2520   :  { %6819 = vmatprep.mubr.bf16.mxu1 %v6496_v26  ;;  %8174 = vmatpush3.bf16.msra.mxu1 %v11745_v56  ;;  %v8294_v56 = vunpack.i.h.bf16 %v11917_v24  ;;  %v12523_v26 = vld [vmem:[#allocation114_spill] sm:$0xff] }
0x2521   :  { %8167 = vmatprep.subr.bf16.mxu1 %v11751_v31  ;;  %v8293_v31 = vunpack.i.l.bf16 %v11917_v24  ;;  %v4034_v24 = vsel %vm1631_vm0, %v12517_v53, %v8303_v3  ;;  %v6470_v58 = vsel %vm1631_vm0, %v12526_v61, %v8349_v29  ;;  %v8367_v51 = vpop.permute.xlu0 %8366  ;;  %v12529_v3 = vld [vmem:[#allocation100_spill] sm:$0xff] }
0x2522   :  { %v6504_v35 = vpack.c.bf16 %v4035_v63, %v4034_v24  ;;  %v8357_v21 = vpop.permute.xlu1 %8356  ;;  %v8368_v53 = vunpack.i.l.bf16 %v8367_v51 }
0x2523   :  { %v8359_v42 = vunpack.i.h.bf16 %v8357_v21 }
0x2524   :  { %8175 = vmatpush3.bf16.msra.mxu1 %v11755_v20  ;;  %v12515_v20 = vld [vmem:[#allocation124_spill] sm:$0xff] }
0x2525   :  { %8168 = vmatprep.subr.bf16.mxu1 %v11763_v39  ;;  %v4025_v45 = vsel %vm1631_vm0, %v12515_v20, %v8294_v56  ;;  %v12516_v39 = vld [vmem:[#allocation122_spill] sm:$0xff]  ;;  %v12527_v56 = vld [vmem:[#allocation29_spill] sm:$0xff] }
0x2526   :  { %v4024_v33 = vsel %vm1631_vm0, %v12516_v39, %v8293_v31  ;;  %v6462_v31 = vsel %vm1631_vm0, %v12527_v56, %v8359_v42  ;;  %v12530_v20 = vld [vmem:[#allocation94_spill] sm:$0xff]  ;;  %v12542_v56 = vld [vmem:[#allocation115_spill] sm:$0xff] }
0x2527   :  { %6820 = vmatmul.mubr.bf16.gmra.mxu1 %v6495_v10  ;;  %v6499_v57 = vpack.c.bf16 %v4025_v45, %v4024_v33  ;;  %v8363_v10 = vunpack.i.l.bf16 %v8362_v5  ;;  %v8382_v45 = vpop.permute.xlu0 %8381  ;;  %v8369_v33 = vunpack.i.h.bf16 %v8367_v51  ;;  %v12538_v51 = vld [vmem:[#allocation48_spill] sm:$0xff] }
0x2528   :  { %6827 = vmatprep.mubr.bf16.mxu1 %v6500_v0  ;;  %8176 = vmatpush3.bf16.msra.mxu1 %v11769_v30  ;;  %v8314_v30 = vunpack.i.h.bf16 %v11940_v52  ;;  %v12528_v0 = vld [vmem:[#allocation26_spill] sm:$0xff]  ;;  %v8384_v22 = vunpack.i.h.bf16 %v8382_v45  ;;  %v8383_v63 = vunpack.i.l.bf16 %v8382_v45 }
0x2529   :  { %8169 = vmatprep.subr.bf16.mxu1 %v11774_v14  ;;  %v8313_v14 = vunpack.i.l.bf16 %v11940_v52  ;;  %v12522_v52 = vld [vmem:[#allocation106_spill] sm:$0xff]  ;;  %v6471_v44 = vsel %vm1631_vm0, %v12529_v3, %v8363_v10  ;;  %v12541_v10 = vld [vmem:[#allocation103_spill] sm:$0xff]  ;;  %v12545_v3 = vld [vmem:[#allocation52_spill] sm:$0xff] }
0x252a   :  { %v6468_v6 = vsel %vm1631_vm0, %v12522_v52, %v8329_v47  ;;  %v12533_v47 = vld [vmem:[#allocation110_spill] sm:$0xff]  ;;  %v12535_v52 = vld [vmem:[#allocation96_spill] sm:$0xff] }
0x252b   :  { %v6508_v1 = vpack.c.bf16 %v6468_v6, %v6467_v17  ;;  %v6473_v59 = vsel %vm1631_vm0, %v12533_v47, %v8383_v63 }
0x252c   :  { %8177 = vmatpush3.bf16.msra.mxu1 %v11778_v54  ;;  %v4027_v54 = vsel %vm1631_vm0, %v12519_v16, %v8314_v30  ;;  %v12534_v16 = vld [vmem:[#allocation104_spill] sm:$0xff] }
0x252d   :  { %8170 = vmatprep.subr.bf16.mxu1 %v11783_v8  ;;  %v4026_v8 = vsel %vm1631_vm0, %v12520_v36, %v8313_v14  ;;  %v12532_v14 = vld [vmem:[#allocation102_spill] sm:$0xff] }
0x252e   :  { %v6503_v27 = vpack.c.bf16 %v4027_v54, %v4026_v8  ;;  %v6474_v54 = vsel %vm1631_vm0, %v12534_v16, %v8384_v22 }
0x252f   :  { %6828 = vmatmul.mubr.bf16.gmra.mxu1 %v6499_v57  ;;  %v12531_v57 = vld [vmem:[#allocation82_spill] sm:$0xff]  ;;  %v6520_v17 = vpack.c.bf16 %v6474_v54, %v6473_v59 }
0x2530   :  { %6835 = vmatprep.mubr.bf16.mxu1 %v6504_v35  ;;  %8178 = vmatpush3.bf16.msra.mxu1 %v11785_v46  ;;  %v8339_v46 = vunpack.i.h.bf16 %v8337_v32  ;;  %v6464_v30 = vsel %vm1631_vm0, %v12531_v57, %v8369_v33  ;;  %v8392_v35 = vpop.permute.xlu0 %8391 }
0x2531   :  { %8171 = vmatprep.subr.bf16.mxu1 %v11793_v38  ;;  %v8338_v38 = vunpack.i.l.bf16 %v8337_v32  ;;  %v6463_v32 = vsel %vm1631_vm0, %v12532_v14, %v8368_v53  ;;  %v8394_v8 = vunpack.i.h.bf16 %v8392_v35  ;;  %v8393_v62 = vunpack.i.l.bf16 %v8392_v35 }
0x2532   :  { %v6460_v43 = vsel %vm1631_vm0, %v12523_v26, %v8339_v46  ;;  %v6515_v36 = vpack.c.bf16 %v6464_v30, %v6463_v32 }
0x2533   :  { %v6466_v6 = vsel %vm1631_vm0, %v12535_v52, %v8394_v8 }
0x2534   :  { %8179 = vmatpush3.bf16.msra.mxu1 %v11795_v15  ;;  %v6459_v15 = vsel %vm1631_vm0, %v12524_v55, %v8338_v38 }
0x2535   :  { %8172 = vmatprep.subr.bf16.mxu1 %v11803_v28  ;;  %v12525_v28 = vld [vmem:[#allocation50_spill] sm:$0xff]  ;;  %v6507_v18 = vpack.c.bf16 %v6460_v43, %v6459_v15 }
0x2536   :  { %v6469_v37 = vsel %vm1631_vm0, %v12525_v28, %v8348_v49 }
0x2537   :  { %6836 = vmatmul.mubr.bf16.gmra.mxu1 %v6503_v27  ;;  %v6465_v27 = vsel %vm1631_vm0, %v12536_v13, %v8393_v62 }
0x2538   :  { %6843 = vmatprep.mubr.bf16.mxu1 %v6508_v1  ;;  %8180 = vmatpush3.bf16.msra.mxu1 %v11805_v50  ;;  %v8358_v50 = vunpack.i.l.bf16 %v8357_v21  ;;  %v6519_v46 = vpack.c.bf16 %v6466_v6, %v6465_v27 }
0x2539   :  { %8173 = vmatprep.subr.bf16.mxu1 %v11813_v7  ;;  %v6512_v7 = vpack.c.bf16 %v6470_v58, %v6469_v37  ;;  %v12537_v37 = vpack.i.bf16 %v11601_v23, %v11595_v40 }
0x253a   :  { %v6461_v19 = vsel %vm1631_vm0, %v12528_v0, %v8358_v50 }
0x253b   :  { %v6511_v39 = vpack.c.bf16 %v6462_v31, %v6461_v19  ;;  %v12543_v31 = vpack.i.bf16 %v12541_v10, %v12542_v56  ;;  %v12544_v19 = vld [vmem:[#allocation109_spill] sm:$0xff] }
0x253c   :  { %8181 = vmatpush3.bf16.msra.mxu1 %v11817_v9  ;;  %v6472_v9 = vsel %vm1631_vm0, %v12530_v20, %v8364_v25 }
0x253d   :  { %v6516_v24 = vpack.c.bf16 %v6472_v9, %v6471_v44  ;;  %v12546_v44 = vpack.i.bf16 %v12544_v19, %v12545_v3 }
0x253f   :  { %6844 = vmatmul.mubr.bf16.gmra.mxu1 %v6507_v18 }
0x2540   :  { %6851 = vmatprep.mubr.bf16.mxu1 %v6512_v7  ;;  %v12539_v7 = vld [vmem:[#allocation46_spill] sm:$0xff] }
0x2541   :  { %v12540_v25 = vpack.i.bf16 %v12538_v51, %v12539_v7 }
0x2547   :  { %6852 = vmatmul.mubr.bf16.gmra.mxu1 %v6511_v39 }
0x2548   :  { %6859 = vmatprep.mubr.bf16.mxu1 %v6516_v24 }
0x254f   :  { %6860 = vmatmul.mubr.bf16.gmra.mxu1 %v6515_v36 }
0x2550   :  { %6867 = vmatprep.mubr.bf16.mxu1 %v6520_v17 }
0x2557   :  { %6868 = vmatmul.mubr.bf16.gmra.mxu1 %v6519_v46 }
0x25bf   :  { %v8160_v38 = vpop.f32.mrf.mxu1 }
0x25c0   :  { %v7606_v1 = vpop.f32.mrf.mxu0 }
0x25c1   :  { %v6300_v29 = vpop.f32.mrf.mxu1 }
0x25c2   :  { %v7607_v5 = vpop.f32.mrf.mxu0 }
0x25c3   :  { %v8161_v49 = vpop.f32.mrf.mxu1  ;;  %v7608_v33 = vadd.f32 %v7607_v5, %v7606_v1 }
0x25c4   :  { %v7609_v15 = vpop.f32.mrf.mxu0  ;;  %v8385_v18 = vpack.i.bf16 %v8161_v49, %v8160_v38 }
0x25c5   :  { %v6303_v26 = vpop.f32.mrf.mxu1 }
0x25c6   :  { %v8370_v43 = vpack.i.bf16 %v6303_v26, %v6300_v29  ;;  %v7610_v61 = vpop.f32.mrf.mxu0 }
0x25c7   :  { %v8164_v55 = vpop.f32.mrf.mxu1  ;;  %v7611_v30 = vadd.f32 %v7610_v61, %v7609_v15 }
0x25c8   :  { %8371 = vrot.lane.b32.xlu1 %v8370_v43, %s9304_s4 }
0x25c9   :  { %v6316_v21 = vpop.f32.mrf.mxu1  ;;  %v7612_v50 = vpop.f32.mrf.mxu0 }
0x25cb   :  { %v8165_v28 = vpop.f32.mrf.mxu1  ;;  %v7613_v40 = vpop.f32.mrf.mxu0 }
0x25cc   :  { %8376 = vrot.lane.b32.xlu1 %v12537_v37, %s9304_s4  ;;  %v8400_v23 = vpack.i.bf16 %v8165_v28, %v8164_v55  ;;  %v7614_v16 = vadd.f32 %v7613_v40, %v7612_v50 }
0x25cd   :  { %v6319_v58 = vpop.f32.mrf.mxu1  ;;  %v7615_v0 = vpop.f32.mrf.mxu0 }
0x25ce   :  { %v8405_v42 = vpack.i.bf16 %v6319_v58, %v6316_v21 }
0x25cf   :  { %v7616_v20 = vpop.f32.mrf.mxu0 }
0x25d0   :  { %8386 = vrot.lane.b32.xlu1 %v8385_v18, %s9304_s4  ;;  %8406 = vrot.lane.b32.xlu0 %v8405_v42, %s9304_s4  ;;  %v7617_v52 = vadd.f32 %v7616_v20, %v7615_v0 }
0x25d4   :  { %8396 = vrot.lane.b32.xlu1 %v12540_v25, %s9304_s4  ;;  %8411 = vrot.lane.b32.xlu0 %v12543_v31, %s9304_s4  ;;  %v7618_v9 = vpop.f32.mrf.mxu0 }
0x25d6   :  { %v7619_v24 = vpop.f32.mrf.mxu0 }
0x25d7   :  { %v7620_v1 = vadd.f32 %v7619_v24, %v7618_v9 }
0x25d8   :  { %8401 = vrot.lane.b32.xlu1 %v8400_v23, %s9304_s4  ;;  %v7621_v32 = vpop.f32.mrf.mxu0 }
0x25da   :  { %v7622_v36 = vpop.f32.mrf.mxu0 }
0x25db   :  { %v7623_v55 = vadd.f32 %v7622_v36, %v7621_v32 }
0x25dc   :  { %8416 = vrot.lane.b32.xlu1 %v12546_v44, %s9304_s4  ;;  %v7624_v13 = vpop.f32.mrf.mxu0 }
0x25de   :  { %v7625_v49 = vpop.f32.mrf.mxu0 }
0x25df   :  { %v7542_v45 = vpop.f32.mrf.mxu1  ;;  %v7626_v58 = vadd.f32 %v7625_v49, %v7624_v13 }
0x25e0   :  { %v7627_v21 = vpop.f32.mrf.mxu0 }
0x25e1   :  { %v7543_v39 = vpop.f32.mrf.mxu1 }
0x25e2   :  { %v7544_v53 = vadd.f32 %v7543_v39, %v7542_v45  ;;  %v7628_v42 = vpop.f32.mrf.mxu0  ;;  %v12547_v45 = vld [vmem:[#allocation30_spill] sm:$0xff] }
0x25e3   :  { %v7545_v22 = vpop.f32.mrf.mxu1  ;;  %v7629_v25 = vadd.f32 %v7628_v42, %v7627_v21 }
0x25e4   :  { %v6911_v63 = vadd.f32 %v7608_v33, %v7544_v53  ;;  %v12548_v33 = vld [vmem:[#allocation62_spill] sm:$0xff] }
0x25e5   :  { %v7546_v57 = vpop.f32.mrf.mxu1 }
0x25e6   :  { %6973 = vst [vmem:[#allocation13] sm:$0xff] %v6911_v63  ;;  %v7547_v14 = vadd.f32 %v7546_v57, %v7545_v22 }
0x25e7   :  { %v7548_v35 = vpop.f32.mrf.mxu1 }
0x25e8   :  { %v6914_v47 = vadd.f32 %v7611_v30, %v7547_v14 }
0x25e9   :  { %v7549_v59 = vpop.f32.mrf.mxu1 }
0x25ea   :  { %6974 = vst [vmem:[#allocation13 + $0x8] sm:$0xff] %v6914_v47  ;;  %v7550_v54 = vadd.f32 %v7549_v59, %v7548_v35 }
0x25eb   :  { %v7551_v8 = vpop.f32.mrf.mxu1 }
0x25ec   :  { %v6919_v62 = vadd.f32 %v7614_v16, %v7550_v54 }
0x25ed   :  { %v7552_v17 = vpop.f32.mrf.mxu1 }
0x25ee   :  { %6975 = vst [vmem:[#allocation13 + $0x10] sm:$0xff] %v6919_v62  ;;  %v7553_v6 = vadd.f32 %v7552_v17, %v7551_v8  ;;  %v12549_v62 = vld [vmem:[#allocation66_spill] sm:$0xff] }
0x25ef   :  { %v7554_v27 = vpop.f32.mrf.mxu1 }
0x25f0   :  { %v6922_v46 = vadd.f32 %v7617_v52, %v7553_v6  ;;  %v12550_v52 = vld [vmem:[#allocation72_spill] sm:$0xff] }
0x25f1   :  { %v7555_v38 = vpop.f32.mrf.mxu1 }
0x25f2   :  { %6976 = vst [vmem:[#allocation13 + $0x18] sm:$0xff] %v6922_v46  ;;  %v7556_v29 = vadd.f32 %v7555_v38, %v7554_v27 }
0x25f3   :  { %v7557_v5 = vpop.f32.mrf.mxu1 }
0x25f4   :  { %v6927_v26 = vadd.f32 %v7620_v1, %v7556_v29 }
0x25f5   :  { %v7558_v43 = vpop.f32.mrf.mxu1 }
0x25f6   :  { %6977 = vst [vmem:[#allocation13 + $0x20] sm:$0xff] %v6927_v26  ;;  %v7559_v15 = vadd.f32 %v7558_v43, %v7557_v5  ;;  %v12551_v5 = vld [vmem:[#allocation42_spill] sm:$0xff]  ;;  %v12552_v43 = vld [vmem:[#allocation36_spill] sm:$0xff] }
0x25f7   :  { %v7560_v28 = vpop.f32.mrf.mxu1 }
0x25f8   :  { %v6930_v37 = vadd.f32 %v7623_v55, %v7559_v15 }
0x25f9   :  { %v7561_v61 = vpop.f32.mrf.mxu1 }
0x25fa   :  { %6978 = vst [vmem:[#allocation13 + $0x28] sm:$0xff] %v6930_v37  ;;  %v7562_v18 = vadd.f32 %v7561_v61, %v7560_v28  ;;  %v12553_v28 = vld [vmem:[#allocation40_spill] sm:$0xff]  ;;  %v12554_v61 = vld [vmem:[#allocation34_spill] sm:$0xff] }
0x25fb   :  { %v7563_v50 = vpop.f32.mrf.mxu1 }
0x25fc   :  { %v6935_v51 = vadd.f32 %v7626_v58, %v7562_v18 }
0x25fd   :  { %v7564_v7 = vpop.f32.mrf.mxu1 }
0x25fe   :  { %6979 = vst [vmem:[#allocation13 + $0x30] sm:$0xff] %v6935_v51  ;;  %v7565_v10 = vadd.f32 %v7564_v7, %v7563_v50 }
0x2600   :  { %v6938_v56 = vadd.f32 %v7629_v25, %v7565_v10 }
0x2602   :  { %6980 = vst [vmem:[#allocation13 + $0x38] sm:$0xff] %v6938_v56 }
0x263a   :  { %v8372_v31 = vpop.permute.xlu1 %8371 }
0x263b   :  { %v8374_v40 = vunpack.i.h.bf16 %v8372_v31  ;;  %v8373_v23 = vunpack.i.l.bf16 %v8372_v31 }
0x263d   :  { %v6483_v0 = vsel %vm1631_vm0, %v11685_v48, %v8373_v23  ;;  %v6484_v19 = vsel %vm1631_vm0, %v11689_v2, %v8374_v40 }
0x263e   :  { %v8377_v3 = vpop.permute.xlu1 %8376  ;;  %v6510_v44 = vpack.c.bf16 %v6484_v19, %v6483_v0 }
0x263f   :  { %v8379_v20 = vunpack.i.h.bf16 %v8377_v3  ;;  %v8378_v9 = vunpack.i.l.bf16 %v8377_v3 }
0x2640   :  { %6940 = vmatprep.mubr.bf16.mxu0 %v6510_v44 }
0x2641   :  { %v6476_v39 = vsel %vm1631_vm0, %v12547_v45, %v8379_v20  ;;  %v6475_v53 = vsel %vm1631_vm0, %v12548_v33, %v8378_v9 }
0x2642   :  { %v6509_v24 = vpack.c.bf16 %v6476_v39, %v6475_v53  ;;  %v8387_v22 = vpop.permute.xlu1 %8386  ;;  %v8407_v63 = vpop.permute.xlu0 %8406 }
0x2643   :  { %v8389_v57 = vunpack.i.h.bf16 %v8387_v22  ;;  %v8388_v30 = vunpack.i.l.bf16 %v8387_v22  ;;  %v8409_v48 = vunpack.i.h.bf16 %v8407_v63  ;;  %v8408_v14 = vunpack.i.l.bf16 %v8407_v63 }
0x2644   :  { %6941 = vmatmul.mubr.bf16.gmra.mxu0 %v6509_v24 }
0x2645   :  { %v6485_v2 = vsel %vm1631_vm0, %v11683_v12, %v8388_v30  ;;  %v6486_v32 = vsel %vm1631_vm0, %v11687_v60, %v8389_v57  ;;  %v6487_v54 = vsel %vm1631_vm0, %v11693_v34, %v8408_v14  ;;  %v6488_v36 = vsel %vm1631_vm0, %v11697_v4, %v8409_v48 }
0x2646   :  { %v8397_v35 = vpop.permute.xlu1 %8396  ;;  %v6514_v47 = vpack.c.bf16 %v6486_v32, %v6485_v2  ;;  %v8412_v8 = vpop.permute.xlu0 %8411  ;;  %v6518_v13 = vpack.c.bf16 %v6488_v36, %v6487_v54 }
0x2647   :  { %v8399_v59 = vunpack.i.h.bf16 %v8397_v35  ;;  %v8398_v16 = vunpack.i.l.bf16 %v8397_v35  ;;  %v8414_v27 = vunpack.i.h.bf16 %v8412_v8  ;;  %v8413_v46 = vunpack.i.l.bf16 %v8412_v8 }
0x2648   :  { %6948 = vmatprep.mubr.bf16.mxu0 %v6514_v47 }
0x2649   :  { %v6478_v17 = vsel %vm1631_vm0, %v12549_v62, %v8399_v59  ;;  %v6477_v12 = vsel %vm1631_vm0, %v12550_v52, %v8398_v16  ;;  %v6480_v26 = vsel %vm1631_vm0, %v12551_v5, %v8414_v27  ;;  %v6479_v55 = vsel %vm1631_vm0, %v12552_v43, %v8413_v46 }
0x264a   :  { %v6513_v6 = vpack.c.bf16 %v6478_v17, %v6477_v12  ;;  %v8402_v60 = vpop.permute.xlu1 %8401  ;;  %v6517_v58 = vpack.c.bf16 %v6480_v26, %v6479_v55 }
0x264b   :  { %v8404_v38 = vunpack.i.h.bf16 %v8402_v60  ;;  %v8403_v1 = vunpack.i.l.bf16 %v8402_v60 }
0x264c   :  { %6949 = vmatmul.mubr.bf16.gmra.mxu0 %v6513_v6 }
0x264d   :  { %6956 = vmatprep.mubr.bf16.mxu0 %v6518_v13  ;;  %v6489_v34 = vsel %vm1631_vm0, %v11691_v41, %v8403_v1  ;;  %v6490_v4 = vsel %vm1631_vm0, %v11695_v11, %v8404_v38  ;;  %v7566_v11 = vpop.f32.mrf.mxu1 }
0x264e   :  { %v8417_v29 = vpop.permute.xlu1 %8416  ;;  %v6522_v49 = vpack.c.bf16 %v6490_v4, %v6489_v34 }
0x264f   :  { %v8419_v15 = vunpack.i.h.bf16 %v8417_v29  ;;  %v8418_v21 = vunpack.i.l.bf16 %v8417_v29  ;;  %v7567_v42 = vpop.f32.mrf.mxu1 }
0x2650   :  { %6964 = vmatprep.mubr.bf16.mxu1 %v6522_v49  ;;  %v7568_v20 = vadd.f32 %v7567_v42, %v7566_v11 }
0x2651   :  { %v6482_v37 = vsel %vm1631_vm0, %v12553_v28, %v8419_v15  ;;  %v6481_v41 = vsel %vm1631_vm0, %v12554_v61, %v8418_v21  ;;  %v7569_v50 = vpop.f32.mrf.mxu1 }
0x2652   :  { %v6521_v18 = vpack.c.bf16 %v6482_v37, %v6481_v41 }
0x2653   :  { %v7570_v51 = vpop.f32.mrf.mxu1 }
0x2654   :  { %6957 = vmatmul.mubr.bf16.gmra.mxu0 %v6517_v58  ;;  %6965 = vmatmul.mubr.bf16.vlgmr.msra.gmra.mxu1 %v6521_v18  ;;  %v7571_v24 = vadd.f32 %v7570_v51, %v7569_v50 }
0x2655   :  { %v7572_v7 = vpop.f32.mrf.mxu1 }
0x2657   :  { %v7573_v25 = vpop.f32.mrf.mxu1 }
0x2658   :  { %v7574_v14 = vadd.f32 %v7573_v25, %v7572_v7 }
0x2659   :  { %v7575_v10 = vpop.f32.mrf.mxu1 }
0x265b   :  { %v7576_v56 = vpop.f32.mrf.mxu1 }
0x265c   :  { %v7577_v16 = vadd.f32 %v7576_v56, %v7575_v10 }
0x265d   :  { %v7578_v31 = vpop.f32.mrf.mxu1 }
0x265f   :  { %v7579_v40 = vpop.f32.mrf.mxu1 }
0x2660   :  { %v7580_v12 = vadd.f32 %v7579_v40, %v7578_v31 }
0x2661   :  { %v7581_v23 = vpop.f32.mrf.mxu1 }
0x2663   :  { %v7582_v0 = vpop.f32.mrf.mxu1 }
0x2664   :  { %v7583_v29 = vadd.f32 %v7582_v0, %v7581_v23 }
0x2665   :  { %v7584_v3 = vpop.f32.mrf.mxu1 }
0x2667   :  { %v7585_v33 = vpop.f32.mrf.mxu1 }
0x2668   :  { %v7586_v6 = vadd.f32 %v7585_v33, %v7584_v3 }
0x2669   :  { %v7587_v30 = vpop.f32.mrf.mxu1 }
0x266b   :  { %v7588_v47 = vpop.f32.mrf.mxu1 }
0x266c   :  { %v7589_v49 = vadd.f32 %v7588_v47, %v7587_v30 }
0x2704   :  { %v7630_v19 = vpop.f32.mrf.mxu0 }
0x2706   :  { %v7631_v44 = vpop.f32.mrf.mxu0 }
0x2707   :  { %v7632_v9 = vadd.f32 %v7631_v44, %v7630_v19 }
0x2708   :  { %v7633_v45 = vpop.f32.mrf.mxu0 }
0x2709   :  { %v6943_v39 = vadd.f32 %v7632_v9, %v7568_v20 }
0x270a   :  { %v7634_v53 = vpop.f32.mrf.mxu0 }
0x270b   :  { %6981 = vst [vmem:[#allocation13 + $0x40] sm:$0xff] %v6943_v39  ;;  %v7635_v22 = vadd.f32 %v7634_v53, %v7633_v45 }
0x270c   :  { %v7636_v63 = vpop.f32.mrf.mxu0 }
0x270d   :  { %v6946_v57 = vadd.f32 %v7635_v22, %v7571_v24 }
0x270e   :  { %v7637_v48 = vpop.f32.mrf.mxu0 }
0x270f   :  { %6982 = vst [vmem:[#allocation13 + $0x48] sm:$0xff] %v6946_v57  ;;  %v7638_v2 = vadd.f32 %v7637_v48, %v7636_v63 }
0x2710   :  { %v7639_v32 = vpop.f32.mrf.mxu0 }
0x2711   :  { %v6951_v35 = vadd.f32 %v7638_v2, %v7574_v14 }
0x2712   :  { %v7640_v59 = vpop.f32.mrf.mxu0 }
0x2713   :  { %6983 = vst [vmem:[#allocation13 + $0x50] sm:$0xff] %v6951_v35  ;;  %v7641_v54 = vadd.f32 %v7640_v59, %v7639_v32 }
0x2714   :  { %v7642_v36 = vpop.f32.mrf.mxu0  ;;  %v7648_v8 = vpop.f32.mrf.mxu1 }
0x2715   :  { %v6954_v62 = vadd.f32 %v7641_v54, %v7577_v16 }
0x2716   :  { %v7643_v17 = vpop.f32.mrf.mxu0  ;;  %v7649_v52 = vpop.f32.mrf.mxu1 }
0x2717   :  { %6984 = vst [vmem:[#allocation13 + $0x58] sm:$0xff] %v6954_v62  ;;  %v7644_v60 = vadd.f32 %v7643_v17, %v7642_v36  ;;  %v7650_v13 = vadd.f32 %v7649_v52, %v7648_v8 }
0x2718   :  { %v7645_v27 = vpop.f32.mrf.mxu0  ;;  %v7651_v46 = vpop.f32.mrf.mxu1 }
0x2719   :  { %v6959_v38 = vadd.f32 %v7644_v60, %v7580_v12  ;;  %v6967_v1 = vadd.f32 %v7650_v13, %v7586_v6 }
0x271a   :  { %v7646_v34 = vpop.f32.mrf.mxu0  ;;  %v7652_v4 = vpop.f32.mrf.mxu1 }
0x271b   :  { %6985 = vst [vmem:[#allocation13 + $0x60] sm:$0xff] %v6959_v38  ;;  %6987 = vst [vmem:[#allocation13 + $0x70] sm:$0xff] %v6967_v1  ;;  %v7647_v5 = vadd.f32 %v7646_v34, %v7645_v27  ;;  %v7653_v26 = vadd.f32 %v7652_v4, %v7651_v46 }
0x271d   :  { %v6962_v43 = vadd.f32 %v7647_v5, %v7583_v29  ;;  %v6970_v55 = vadd.f32 %v7653_v26, %v7589_v49 }
0x271f   :  { %6986 = vst [vmem:[#allocation13 + $0x68] sm:$0xff] %v6962_v43  ;;  %6988 = vst [vmem:[#allocation13 + $0x78] sm:$0xff] %v6970_v55 }
0x2720   :  { %9275 = shalt.err (!%p9272_p6)
}
0x2721   :  { %7000 = dma.vmem_to_hbm [thread:$0]  %s6995_s3, 2048, %s12115_s8, [#allocation4], %s9299_s19, %s9299_s19, %s9300_s20  }
0x2722   :  { %9292 = dma.done.wait [#allocation4], 2048  }
0x2723   :  { %9293 = vsyncadd [#allocation4], 4294965248 }
0x2724   :  { %7004 = vsyncpa [#allocation3], 1 }
0x2725   :  { %7005 = vsyncpa [#allocation6], 1 }
0x2726   :  { %7006 = vsyncpa [#allocation9], 1 }
0x2727   :  { %7007 = vsyncpa [#allocation12], 1 }
0x2728   :  { %7008 = vsyncpa [#allocation4], 1 }

</bundles_post_ra>
